<compile_context>
chip_gen: v7x
topology: tpu7x:2x2x1
jax: 0.10.0
libtpu: 0.0.40
codegen_flags: <defaults>
</compile_context>

<pallas_src>
import numpy as np

import jax
import jax.numpy as jnp
from jax import lax
from jax.experimental import pallas as pl
from jax.experimental.pallas import tpu as pltpu


B_TILE = 8   # images per grid step


# ----------------------------------------------------------------------------
# Layer geometry.
#
# The activation feeding conv layer l is kept as TWO row-parity-split matrices
#   E[hh*B + b, w*cin + ci] = x_pad[b, 2*hh,   w, ci]
#   O[hh*B + b, w*cin + ci] = x_pad[b, 2*hh+1, w, ci]
# where x_pad is the activation zero-padded by 2 rows top/bottom (the width
# padding is folded into the Toeplitz M constants instead).
# hh runs over h/2 + 2 groups: group 0 and group h/2+1 are the zero halo.
# ----------------------------------------------------------------------------
def _layer_geoms(dim):
    chans = [2, dim, 2 * dim, 4 * dim, 8 * dim]
    geoms, h = [], 64
    for l in range(4):
        cin, cout = chans[l], chans[l + 1]
        ho = h // 2
        geoms.append(dict(cin=cin, cout=cout, h=h, ho=ho,
                          wc=h * cin,            # contraction width (K)
                          woc=ho * cout,         # output row width, (w, c) order
                          half_rows=h // 2 + 2)) # per-parity row groups (incl. halo)
        h = ho
    return geoms


# ----------------------------------------------------------------------------
# Synthetic parameters (deterministic):
#   conv weight: (5*5*Cin, Cout), flattened in (kh, kw, Cin) order
#   conv bias:   (Cout,)
#   fc weight:   (4*4*8*dim, 1) in PyTorch NCHW-flatten feature order
#   fc bias:     (1,)
# ----------------------------------------------------------------------------
def init_params(key, dim):
    channels = [2, dim, 2 * dim, 4 * dim, 8 * dim]
    params = {"convs": []}
    keys = jax.random.split(key, 10)
    for li in range(4):
        cin, cout = channels[li], channels[li + 1]
        kw = jax.random.normal(keys[2 * li], (5 * 5 * cin, cout),
                               dtype=jnp.float32) * 0.05
        kb = jax.random.normal(keys[2 * li + 1], (cout,),
                               dtype=jnp.float32) * 0.01
        params["convs"].append((kw, kb))
    feat = 4 * 4 * 8 * dim
    params["fc_w"] = jax.random.normal(keys[8], (feat, 1),
                                       dtype=jnp.float32) * 0.05
    params["fc_b"] = jax.random.normal(keys[9], (1,), dtype=jnp.float32) * 0.01
    return params


# ----------------------------------------------------------------------------
# One-time constant preparation (numpy, outside jit).
#   M[i]  : (wc, woc) Toeplitz matrix for height-tap i: width taps, width pad,
#           stride-2 width subsample and channel contraction folded in.
#   brow  : (1, woc) bias row (bias tiled over output width positions).
#   wfc   : (4*B_TILE, 4*cout4) fc weight, rows ordered (h, b), cols (w, c),
#           so it aligns elementwise with the batched layer-4 output tile.
# ----------------------------------------------------------------------------
def prepare_constants(params, dim, b_tile=B_TILE):
    geoms = _layer_geoms(dim)
    M_list, B_list = [], []
    for g, (w_flat, bias) in zip(geoms, params["convs"]):
        cin, cout, w, wo = g["cin"], g["cout"], g["h"], g["ho"]
        W = np.asarray(w_flat, np.float32).reshape(5, 5, cin, cout)
        M = np.zeros((5, g["wc"], g["woc"]), np.float32)
        for i in range(5):
            for j in range(5):
                for c in range(wo):
                    iw = 2 * c + j - 2               # width padding folded in
                    if 0 <= iw < w:
                        M[i, iw * cin:(iw + 1) * cin,
                          c * cout:(c + 1) * cout] = W[i, j]
        M_list.append(jnp.asarray(M, jnp.bfloat16))
        B_list.append(jnp.asarray(np.tile(np.asarray(bias, np.float32),
                                          wo)[None, :], jnp.float32))

    g4 = geoms[3]
    cout4 = g4["cout"]
    # PyTorch flatten order is (c, h, w); layer-4 output columns are (w, c).
    wfc = np.asarray(params["fc_w"], np.float32)[:, 0].reshape(cout4, 4, 4)
    wfc = wfc.transpose(1, 2, 0).reshape(4, 4 * cout4)      # [h, w*cout + c]
    wfc = np.repeat(wfc, b_tile, axis=0)                    # rows (h, b)
    fcb = np.asarray(params["fc_b"], np.float32).reshape(1, 1)
    return {"M": M_list, "brow": B_list,
            "wfc": jnp.asarray(wfc, jnp.float32),
            "fcb": jnp.asarray(fcb, jnp.float32)}


# ----------------------------------------------------------------------------
# Fused Pallas kernel: 4 convs + ReLUs + FC, B_TILE images per grid step.
# ----------------------------------------------------------------------------
def _make_fused_forward(geoms, n_steps, b_tile):
    B = b_tile
    g1, g2, g3, g4 = geoms
    assert g4["ho"] * B < 128, "final layer must fit a single output tile"

    def conv_block(src_e, src_o, m_ref, brow_ref, g, emit):
        """5x5 stride-2 conv + bias + ReLU over the whole B_TILE batch.

        src_e/src_o are parity-split refs with rows ordered (hh, b).
        emit(r_base, n0, tile) receives f32 tiles whose rows are output rows
        (r, b) with r in [r_base, r_base + rows/B) and cols [n0, n0+ncols).
        """
        mtot = g["ho"] * B
        m_chunk = min(128, mtot)                       # rows per MXU tile
        n_chunk = 128 if m_chunk >= 128 else g["woc"]  # cols per MXU tile
        for mi in range(mtot // m_chunk):
            for n0 in range(0, g["woc"], n_chunk):
                acc = jnp.zeros((m_chunk, n_chunk), jnp.float32)
                for i in range(5):                     # 5 height taps
                    src = src_e if i % 2 == 0 else src_o
                    r0 = mi * m_chunk + (i // 2) * B   # contiguous, 8-aligned
                    for k0 in range(0, g["wc"], 128):  # split K to cap vregs
                        ri = src[r0:r0 + m_chunk,
                                 k0:k0 + 128].astype(jnp.bfloat16)
                        acc = acc + jnp.dot(
                            ri, m_ref[i, k0:k0 + 128, n0:n0 + n_chunk],
                            preferred_element_type=jnp.float32)
                tile = jnp.maximum(acc + brow_ref[:, n0:n0 + n_chunk], 0.0)
                emit(mi * (m_chunk // B), n0, tile)

    def make_stash(dst_e, dst_o):
        """Write a conv-output tile into the next layer's parity-split scratch.
        Output row r goes to parity (r & 1), group r//2 + 1 (halo is group 0)."""
        def emit(r_base, n0, tile):
            rows, cols = tile.shape
            for s in range(rows // (2 * B)):
                grp = (r_base + 2 * s) // 2 + 1
                dst_e[grp * B:(grp + 1) * B, n0:n0 + cols] = \
                    tile[(2 * s) * B:(2 * s + 1) * B, :]
                dst_o[grp * B:(grp + 1) * B, n0:n0 + cols] = \
                    tile[(2 * s + 1) * B:(2 * s + 2) * B, :]
        return emit

    def kernel(xe_ref, xo_ref, m1, b1, m2, b2, m3, b3, m4, b4,
               wfc_ref, fcb_ref, o_ref, e2, o2, e3, o3, e4, o4):
        # Re-zero ONLY the top/bottom halo groups of the inter-layer scratch
        # (the interior is fully overwritten below).  Doing this every step is
        # tiny and stays correct under "parallel" megacore grid sharding.
        for ref, g in ((e2, g2), (o2, g2), (e3, g3), (o3, g3), (e4, g4), (o4, g4)):
            z = jnp.zeros((B, g["wc"]), jnp.float32)
            ref[0:B, :] = z
            last = (g["h"] // 2 + 1) * B
            ref[last:last + B, :] = z

        def emit_final(r_base, n0, tile):
            # Final Linear (out features = 1): VPU multiply + reductions.
            # tile: (4*B, 4*cout4) rows (h, b); wfc is laid out identically.
            prod = tile * wfc_ref[...]
            s = jnp.sum(prod, axis=1, keepdims=True)          # (4*B, 1)
            per_img = s[0:B] + s[B:2 * B] + s[2 * B:3 * B] + s[3 * B:4 * B]
            o_ref[...] = per_img + fcb_ref[...]               # (B, 1)

        conv_block(xe_ref.at[0], xo_ref.at[0], m1, b1, g1, make_stash(e2, o2))
        conv_block(e2, o2, m2, b2, g2, make_stash(e3, o3))
        conv_block(e3, o3, m3, b3, g3, make_stash(e4, o4))
        conv_block(e4, o4, m4, b4, g4, emit_final)

    c2 = lambda n: (0, 0)
    c3 = lambda n: (0, 0, 0)
    in_specs = [
        pl.BlockSpec((1, g1["half_rows"] * B, g1["wc"]), lambda n: (n, 0, 0)),
        pl.BlockSpec((1, g1["half_rows"] * B, g1["wc"]), lambda n: (n, 0, 0)),
    ]
    for g in geoms:
        in_specs += [pl.BlockSpec((5, g["wc"], g["woc"]), c3),
                     pl.BlockSpec((1, g["woc"]), c2)]
    in_specs += [pl.BlockSpec((4 * B, g4["woc"]), c2),
                 pl.BlockSpec((1, 1), c2)]

    scratch = []
    for g in geoms[1:]:
        rows = g["half_rows"] * B
        scratch += [pltpu.VMEM((rows, g["wc"]), jnp.float32),
                    pltpu.VMEM((rows, g["wc"]), jnp.float32)]

    # vmem budget computed from the actual footprint (double-buffered inputs
    # + single-buffered scratch) with headroom, instead of a hardcoded 32 MiB.
    footprint = 2 * 2 * g1["half_rows"] * B * g1["wc"] * 4
    for g in geoms:
        footprint += 2 * (5 * g["wc"] * g["woc"] * 2 + g["woc"] * 4)
    footprint += 2 * (4 * B * g4["woc"] * 4 + 4)
    for g in geoms[1:]:
        footprint += 2 * g["half_rows"] * B * g["wc"] * 4
    vmem_limit = min(int(footprint * 1.5) + (4 << 20), 96 << 20)

    return pl.pallas_call(
        kernel,
        out_shape=jax.ShapeDtypeStruct((n_steps * B, 1), jnp.float32),
        grid=(n_steps,),
        in_specs=in_specs,
        out_specs=pl.BlockSpec((B, 1), lambda n: (n, 0)),
        scratch_shapes=scratch,
        compiler_params=pltpu.CompilerParams(
            dimension_semantics=("parallel",),
            vmem_limit_bytes=vmem_limit),
    )


def _prep_input(x_nchw, n_steps, b_tile):
    """NCHW -> per-step parity-split, (hh, b)-interleaved 2D activation layout."""
    n = x_nchw.shape[0]
    x = jnp.transpose(x_nchw, (0, 2, 3, 1)).astype(jnp.float32)   # NHWC
    _, h, w, c = x.shape
    x = x.reshape(n, h, w * c)
    x = jnp.pad(x, ((0, n_steps * b_tile - n), (2, 2), (0, 0)))   # batch + height pad
    x = x.reshape(n_steps, b_tile, h + 4, w * c)
    xe = jnp.transpose(x[:, :, 0::2, :], (0, 2, 1, 3))            # (steps, hh, b, wc)
    xo = jnp.transpose(x[:, :, 1::2, :], (0, 2, 1, 3))
    xe = xe.reshape(n_steps, -1, w * c)                           # row = hh*B + b
    xo = xo.reshape(n_steps, -1, w * c)
    return xe, xo


def make_discriminator2_forward(dim, batch, b_tile=B_TILE):
    assert dim % 4 == 0, "DIM must be a multiple of 4 (128-lane alignment)"
    geoms = _layer_geoms(dim)
    n_steps = -(-batch // b_tile)
    fused = _make_fused_forward(geoms, n_steps, b_tile)

    def forward(consts, x_nchw):
        xe, xo = _prep_input(x_nchw, n_steps, b_tile)
        args = [xe, xo]
        for l in range(4):
            args += [consts["M"][l], consts["brow"][l]]
        args += [consts["wfc"], consts["fcb"]]
        out = fused(*args)                    # (n_steps*B, 1)
        return out.reshape(-1)[:batch]        # matches PyTorch .view(-1)

    return forward


# ----------------------------------------------------------------------------
# Pure-JAX f32 reference (for the tolerance check requested by the review).
# ----------------------------------------------------------------------------
def reference_forward(params, x_nchw):
    y = x_nchw.astype(jnp.float32)
    for w_flat, bias in params["convs"]:
        cin, cout = y.shape[1], w_flat.shape[1]
        w = w_flat.reshape(5, 5, cin, cout).transpose(3, 2, 0, 1)   # OIHW
        y = lax.conv_general_dilated(y, w, (2, 2), ((2, 2), (2, 2)),
                                     dimension_numbers=("NCHW", "OIHW", "NCHW"),
                                     precision=lax.Precision.HIGHEST)
        y = jnp.maximum(y + bias[None, :, None, None], 0.0)
    feat = y.reshape(y.shape[0], -1)
    out = jnp.dot(feat, params["fc_w"],
                  precision=lax.Precision.HIGHEST) + params["fc_b"]
    return out.reshape(-1)


# ----------------------------------------------------------------------------
# Main
# ----------------------------------------------------------------------------
if __name__ == "__main__":
    DIM = 8        # config.model_dim (small synthetic value, multiple of 4)
    BATCH = 16     # 2 grid steps of B_TILE=8 -> both v7x TensorCores get work
    H = W = 64     # required by the hardcoded 4*4*8*DIM Linear input

    key = jax.random.PRNGKey(0)
    k_param, k_input = jax.random.split(key)

    params = init_params(k_param, DIM)
    consts = prepare_constants(params, DIM)          # one-time, outside jit
    x = jax.random.normal(k_input, (BATCH, 2, H, W), dtype=jnp.float32)

    fwd = jax.jit(make_discriminator2_forward(DIM, BATCH))
    out = jax.block_until_ready(fwd(consts, x))

    assert out.shape == (BATCH,), out.shape
    assert bool(jnp.all(jnp.isfinite(out)))

    ref = jax.block_until_ready(jax.jit(reference_forward)(params, x))
    rel_err = float(jnp.max(jnp.abs(out - ref)) /
                    (jnp.max(jnp.abs(ref)) + 1e-6))
    assert rel_err < 6e-2, f"mismatch vs f32 reference: rel err {rel_err:.3e}"
    print("KERNEL_OK")
</pallas_src>

<mosaic_0001>
module attributes {stable_mosaic.version = 11 : i64} {
  func.func @kernel(%arg0: i32, %arg1: memref<1x272x128xf32, #tpu.memory_space<vmem>>, %arg2: memref<1x272x128xf32, #tpu.memory_space<vmem>>, %arg3: memref<5x128x256xbf16, #tpu.memory_space<vmem>>, %arg4: memref<1x256xf32, #tpu.memory_space<vmem>>, %arg5: memref<5x256x256xbf16, #tpu.memory_space<vmem>>, %arg6: memref<1x256xf32, #tpu.memory_space<vmem>>, %arg7: memref<5x256x256xbf16, #tpu.memory_space<vmem>>, %arg8: memref<1x256xf32, #tpu.memory_space<vmem>>, %arg9: memref<5x256x256xbf16, #tpu.memory_space<vmem>>, %arg10: memref<1x256xf32, #tpu.memory_space<vmem>>, %arg11: memref<32x256xf32, #tpu.memory_space<vmem>>, %arg12: memref<1x1xf32, #tpu.memory_space<vmem>>, %arg13: memref<8x1xf32, #tpu.memory_space<vmem>>, %arg14: memref<144x256xf32, #tpu.memory_space<vmem>>, %arg15: memref<144x256xf32, #tpu.memory_space<vmem>>, %arg16: memref<80x256xf32, #tpu.memory_space<vmem>>, %arg17: memref<80x256xf32, #tpu.memory_space<vmem>>, %arg18: memref<48x256xf32, #tpu.memory_space<vmem>>, %arg19: memref<48x256xf32, #tpu.memory_space<vmem>>) attributes {dimension_semantics = [#tpu.dimension_semantics<parallel>], iteration_bounds = array<i64: 2>, scalar_prefetch = 0 : i64, scratch_operands = 6 : i64, tpu.core_type = #tpu.core_type<tc>, window_params = [{transform_indices = @transform_0, window_bounds = array<i64: 1, 272, 128>}, {transform_indices = @transform_1, window_bounds = array<i64: 1, 272, 128>}, {pipeline_mode = #tpu.pipeline_mode<synchronous>, transform_indices = @transform_2, window_bounds = array<i64: 5, 128, 256>}, {pipeline_mode = #tpu.pipeline_mode<synchronous>, transform_indices = @transform_3, window_bounds = array<i64: 1, 256>}, {pipeline_mode = #tpu.pipeline_mode<synchronous>, transform_indices = @transform_4, window_bounds = array<i64: 5, 256, 256>}, {pipeline_mode = #tpu.pipeline_mode<synchronous>, transform_indices = @transform_5, window_bounds = array<i64: 1, 256>}, {pipeline_mode = #tpu.pipeline_mode<synchronous>, transform_indices = @transform_6, window_bounds = array<i64: 5, 256, 256>}, {pipeline_mode = #tpu.pipeline_mode<synchronous>, transform_indices = @transform_7, window_bounds = array<i64: 1, 256>}, {pipeline_mode = #tpu.pipeline_mode<synchronous>, transform_indices = @transform_8, window_bounds = array<i64: 5, 256, 256>}, {pipeline_mode = #tpu.pipeline_mode<synchronous>, transform_indices = @transform_9, window_bounds = array<i64: 1, 256>}, {pipeline_mode = #tpu.pipeline_mode<synchronous>, transform_indices = @transform_10, window_bounds = array<i64: 32, 256>}, {pipeline_mode = #tpu.pipeline_mode<synchronous>, transform_indices = @transform_11, window_bounds = array<i64: 1, 1>}, {transform_indices = @transform_12, window_bounds = array<i64: 8, 1>}]} {
    %cst = arith.constant 0.000000e+00 : f32
    %0 = vector.broadcast %cst : f32 to vector<8x256xf32>
    %c0 = arith.constant 0 : index
    %c0_0 = arith.constant 0 : index
    %1 = vector.load %arg14[%c0, %c0_0] : memref<144x256xf32, #tpu.memory_space<vmem>>, vector<8x256xf32>
    tpu.vector_store %arg14[%c0, %c0_0], %0 {strides = array<i32>} : memref<144x256xf32, #tpu.memory_space<vmem>>, vector<8x256xf32>,
    %c136 = arith.constant 136 : index
    %c0_1 = arith.constant 0 : index
    %2 = vector.load %arg14[%c136, %c0_1] : memref<144x256xf32, #tpu.memory_space<vmem>>, vector<8x256xf32>
    tpu.vector_store %arg14[%c136, %c0_1], %0 {strides = array<i32>} : memref<144x256xf32, #tpu.memory_space<vmem>>, vector<8x256xf32>,
    %cst_2 = arith.constant 0.000000e+00 : f32
    %3 = vector.broadcast %cst_2 : f32 to vector<8x256xf32>
    %c0_3 = arith.constant 0 : index
    %c0_4 = arith.constant 0 : index
    %4 = vector.load %arg15[%c0_3, %c0_4] : memref<144x256xf32, #tpu.memory_space<vmem>>, vector<8x256xf32>
    tpu.vector_store %arg15[%c0_3, %c0_4], %3 {strides = array<i32>} : memref<144x256xf32, #tpu.memory_space<vmem>>, vector<8x256xf32>,
    %c136_5 = arith.constant 136 : index
    %c0_6 = arith.constant 0 : index
    %5 = vector.load %arg15[%c136_5, %c0_6] : memref<144x256xf32, #tpu.memory_space<vmem>>, vector<8x256xf32>
    tpu.vector_store %arg15[%c136_5, %c0_6], %3 {strides = array<i32>} : memref<144x256xf32, #tpu.memory_space<vmem>>, vector<8x256xf32>,
    %cst_7 = arith.constant 0.000000e+00 : f32
    %6 = vector.broadcast %cst_7 : f32 to vector<8x256xf32>
    %c0_8 = arith.constant 0 : index
    %c0_9 = arith.constant 0 : index
    %7 = vector.load %arg16[%c0_8, %c0_9] : memref<80x256xf32, #tpu.memory_space<vmem>>, vector<8x256xf32>
    tpu.vector_store %arg16[%c0_8, %c0_9], %6 {strides = array<i32>} : memref<80x256xf32, #tpu.memory_space<vmem>>, vector<8x256xf32>,
    %c72 = arith.constant 72 : index
    %c0_10 = arith.constant 0 : index
    %8 = vector.load %arg16[%c72, %c0_10] : memref<80x256xf32, #tpu.memory_space<vmem>>, vector<8x256xf32>
    tpu.vector_store %arg16[%c72, %c0_10], %6 {strides = array<i32>} : memref<80x256xf32, #tpu.memory_space<vmem>>, vector<8x256xf32>,
    %cst_11 = arith.constant 0.000000e+00 : f32
    %9 = vector.broadcast %cst_11 : f32 to vector<8x256xf32>
    %c0_12 = arith.constant 0 : index
    %c0_13 = arith.constant 0 : index
    %10 = vector.load %arg17[%c0_12, %c0_13] : memref<80x256xf32, #tpu.memory_space<vmem>>, vector<8x256xf32>
    tpu.vector_store %arg17[%c0_12, %c0_13], %9 {strides = array<i32>} : memref<80x256xf32, #tpu.memory_space<vmem>>, vector<8x256xf32>,
    %c72_14 = arith.constant 72 : index
    %c0_15 = arith.constant 0 : index
    %11 = vector.load %arg17[%c72_14, %c0_15] : memref<80x256xf32, #tpu.memory_space<vmem>>, vector<8x256xf32>
    tpu.vector_store %arg17[%c72_14, %c0_15], %9 {strides = array<i32>} : memref<80x256xf32, #tpu.memory_space<vmem>>, vector<8x256xf32>,
    %cst_16 = arith.constant 0.000000e+00 : f32
    %12 = vector.broadcast %cst_16 : f32 to vector<8x256xf32>
    %c0_17 = arith.constant 0 : index
    %c0_18 = arith.constant 0 : index
    %13 = vector.load %arg18[%c0_17, %c0_18] : memref<48x256xf32, #tpu.memory_space<vmem>>, vector<8x256xf32>
    tpu.vector_store %arg18[%c0_17, %c0_18], %12 {strides = array<i32>} : memref<48x256xf32, #tpu.memory_space<vmem>>, vector<8x256xf32>,
    %c40 = arith.constant 40 : index
    %c0_19 = arith.constant 0 : index
    %14 = vector.load %arg18[%c40, %c0_19] : memref<48x256xf32, #tpu.memory_space<vmem>>, vector<8x256xf32>
    tpu.vector_store %arg18[%c40, %c0_19], %12 {strides = array<i32>} : memref<48x256xf32, #tpu.memory_space<vmem>>, vector<8x256xf32>,
    %cst_20 = arith.constant 0.000000e+00 : f32
    %15 = vector.broadcast %cst_20 : f32 to vector<8x256xf32>
    %c0_21 = arith.constant 0 : index
    %c0_22 = arith.constant 0 : index
    %16 = vector.load %arg19[%c0_21, %c0_22] : memref<48x256xf32, #tpu.memory_space<vmem>>, vector<8x256xf32>
    tpu.vector_store %arg19[%c0_21, %c0_22], %15 {strides = array<i32>} : memref<48x256xf32, #tpu.memory_space<vmem>>, vector<8x256xf32>,
    %c40_23 = arith.constant 40 : index
    %c0_24 = arith.constant 0 : index
    %17 = vector.load %arg19[%c40_23, %c0_24] : memref<48x256xf32, #tpu.memory_space<vmem>>, vector<8x256xf32>
    tpu.vector_store %arg19[%c40_23, %c0_24], %15 {strides = array<i32>} : memref<48x256xf32, #tpu.memory_space<vmem>>, vector<8x256xf32>,
    %cst_25 = arith.constant 0.000000e+00 : f32
    %18 = vector.broadcast %cst_25 : f32 to vector<128x128xf32>
    %c0_i32 = arith.constant 0 : i32
    %c0_i32_26 = arith.constant 0 : i32
    %c0_i32_27 = arith.constant 0 : i32
    %19 = tpu.memref_slice %arg1[%c0_i32, %c0_i32_26, %c0_i32_27] : memref<1x272x128xf32, #tpu.memory_space<vmem>> -> memref<1x272x128xf32, #tpu.memory_space<vmem>>
    %20 = tpu.memref_squeeze %19 : memref<1x272x128xf32, #tpu.memory_space<vmem>> -> memref<272x128xf32, #tpu.memory_space<vmem>>
    %c0_28 = arith.constant 0 : index
    %c0_29 = arith.constant 0 : index
    %21 = vector.load %20[%c0_28, %c0_29] : memref<272x128xf32, #tpu.memory_space<vmem>>, vector<128x128xf32>
    %22 = arith.truncf %21 : vector<128x128xf32> to vector<128x128xbf16>
    %c0_30 = arith.constant 0 : index
    %c0_31 = arith.constant 0 : index
    %c0_32 = arith.constant 0 : index
    %23 = vector.load %arg3[%c0_30, %c0_31, %c0_32] : memref<5x128x256xbf16, #tpu.memory_space<vmem>>, vector<1x128x128xbf16>
    %24 = vector.shape_cast %23 : vector<1x128x128xbf16> to vector<128x128xbf16>
    %cst_33 = arith.constant dense<0.000000e+00> : vector<128x128xf32>
    %25 = tpu.matmul %22, %24, %cst_33 {dimension_numbers = #tpu.dot_dimension_numbers<[1], [0], [0], [1], [0, 0, 1, 1], [], []>} : vector<128x128xbf16>, vector<128x128xbf16>, vector<128x128xf32> -> vector<128x128xf32>
    %26 = arith.addf %18, %25 : vector<128x128xf32>
    %c0_i32_34 = arith.constant 0 : i32
    %c0_i32_35 = arith.constant 0 : i32
    %c0_i32_36 = arith.constant 0 : i32
    %27 = tpu.memref_slice %arg2[%c0_i32_34, %c0_i32_35, %c0_i32_36] : memref<1x272x128xf32, #tpu.memory_space<vmem>> -> memref<1x272x128xf32, #tpu.memory_space<vmem>>
    %28 = tpu.memref_squeeze %27 : memref<1x272x128xf32, #tpu.memory_space<vmem>> -> memref<272x128xf32, #tpu.memory_space<vmem>>
    %c0_37 = arith.constant 0 : index
    %c0_38 = arith.constant 0 : index
    %29 = vector.load %28[%c0_37, %c0_38] : memref<272x128xf32, #tpu.memory_space<vmem>>, vector<128x128xf32>
    %30 = arith.truncf %29 : vector<128x128xf32> to vector<128x128xbf16>
    %c1 = arith.constant 1 : index
    %c0_39 = arith.constant 0 : index
    %c0_40 = arith.constant 0 : index
    %31 = vector.load %arg3[%c1, %c0_39, %c0_40] : memref<5x128x256xbf16, #tpu.memory_space<vmem>>, vector<1x128x128xbf16>
    %32 = vector.shape_cast %31 : vector<1x128x128xbf16> to vector<128x128xbf16>
    %cst_41 = arith.constant dense<0.000000e+00> : vector<128x128xf32>
    %33 = tpu.matmul %30, %32, %cst_41 {dimension_numbers = #tpu.dot_dimension_numbers<[1], [0], [0], [1], [0, 0, 1, 1], [], []>} : vector<128x128xbf16>, vector<128x128xbf16>, vector<128x128xf32> -> vector<128x128xf32>
    %34 = arith.addf %26, %33 : vector<128x128xf32>
    %c0_i32_42 = arith.constant 0 : i32
    %c0_i32_43 = arith.constant 0 : i32
    %c0_i32_44 = arith.constant 0 : i32
    %35 = tpu.memref_slice %arg1[%c0_i32_42, %c0_i32_43, %c0_i32_44] : memref<1x272x128xf32, #tpu.memory_space<vmem>> -> memref<1x272x128xf32, #tpu.memory_space<vmem>>
    %36 = tpu.memref_squeeze %35 : memref<1x272x128xf32, #tpu.memory_space<vmem>> -> memref<272x128xf32, #tpu.memory_space<vmem>>
    %c8 = arith.constant 8 : index
    %c0_45 = arith.constant 0 : index
    %37 = vector.load %36[%c8, %c0_45] : memref<272x128xf32, #tpu.memory_space<vmem>>, vector<128x128xf32>
    %38 = arith.truncf %37 : vector<128x128xf32> to vector<128x128xbf16>
    %c2 = arith.constant 2 : index
    %c0_46 = arith.constant 0 : index
    %c0_47 = arith.constant 0 : index
    %39 = vector.load %arg3[%c2, %c0_46, %c0_47] : memref<5x128x256xbf16, #tpu.memory_space<vmem>>, vector<1x128x128xbf16>
    %40 = vector.shape_cast %39 : vector<1x128x128xbf16> to vector<128x128xbf16>
    %cst_48 = arith.constant dense<0.000000e+00> : vector<128x128xf32>
    %41 = tpu.matmul %38, %40, %cst_48 {dimension_numbers = #tpu.dot_dimension_numbers<[1], [0], [0], [1], [0, 0, 1, 1], [], []>} : vector<128x128xbf16>, vector<128x128xbf16>, vector<128x128xf32> -> vector<128x128xf32>
    %42 = arith.addf %34, %41 : vector<128x128xf32>
    %c0_i32_49 = arith.constant 0 : i32
    %c0_i32_50 = arith.constant 0 : i32
    %c0_i32_51 = arith.constant 0 : i32
    %43 = tpu.memref_slice %arg2[%c0_i32_49, %c0_i32_50, %c0_i32_51] : memref<1x272x128xf32, #tpu.memory_space<vmem>> -> memref<1x272x128xf32, #tpu.memory_space<vmem>>
    %44 = tpu.memref_squeeze %43 : memref<1x272x128xf32, #tpu.memory_space<vmem>> -> memref<272x128xf32, #tpu.memory_space<vmem>>
    %c8_52 = arith.constant 8 : index
    %c0_53 = arith.constant 0 : index
    %45 = vector.load %44[%c8_52, %c0_53] : memref<272x128xf32, #tpu.memory_space<vmem>>, vector<128x128xf32>
    %46 = arith.truncf %45 : vector<128x128xf32> to vector<128x128xbf16>
    %c3 = arith.constant 3 : index
    %c0_54 = arith.constant 0 : index
    %c0_55 = arith.constant 0 : index
    %47 = vector.load %arg3[%c3, %c0_54, %c0_55] : memref<5x128x256xbf16, #tpu.memory_space<vmem>>, vector<1x128x128xbf16>
    %48 = vector.shape_cast %47 : vector<1x128x128xbf16> to vector<128x128xbf16>
    %cst_56 = arith.constant dense<0.000000e+00> : vector<128x128xf32>
    %49 = tpu.matmul %46, %48, %cst_56 {dimension_numbers = #tpu.dot_dimension_numbers<[1], [0], [0], [1], [0, 0, 1, 1], [], []>} : vector<128x128xbf16>, vector<128x128xbf16>, vector<128x128xf32> -> vector<128x128xf32>
    %50 = arith.addf %42, %49 : vector<128x128xf32>
    %c0_i32_57 = arith.constant 0 : i32
    %c0_i32_58 = arith.constant 0 : i32
    %c0_i32_59 = arith.constant 0 : i32
    %51 = tpu.memref_slice %arg1[%c0_i32_57, %c0_i32_58, %c0_i32_59] : memref<1x272x128xf32, #tpu.memory_space<vmem>> -> memref<1x272x128xf32, #tpu.memory_space<vmem>>
    %52 = tpu.memref_squeeze %51 : memref<1x272x128xf32, #tpu.memory_space<vmem>> -> memref<272x128xf32, #tpu.memory_space<vmem>>
    %c16 = arith.constant 16 : index
    %c0_60 = arith.constant 0 : index
    %53 = vector.load %52[%c16, %c0_60] : memref<272x128xf32, #tpu.memory_space<vmem>>, vector<128x128xf32>
    %54 = arith.truncf %53 : vector<128x128xf32> to vector<128x128xbf16>
    %c4 = arith.constant 4 : index
    %c0_61 = arith.constant 0 : index
    %c0_62 = arith.constant 0 : index
    %55 = vector.load %arg3[%c4, %c0_61, %c0_62] : memref<5x128x256xbf16, #tpu.memory_space<vmem>>, vector<1x128x128xbf16>
    %56 = vector.shape_cast %55 : vector<1x128x128xbf16> to vector<128x128xbf16>
    %cst_63 = arith.constant dense<0.000000e+00> : vector<128x128xf32>
    %57 = tpu.matmul %54, %56, %cst_63 {dimension_numbers = #tpu.dot_dimension_numbers<[1], [0], [0], [1], [0, 0, 1, 1], [], []>} : vector<128x128xbf16>, vector<128x128xbf16>, vector<128x128xf32> -> vector<128x128xf32>
    %58 = arith.addf %50, %57 : vector<128x128xf32>
    %c0_64 = arith.constant 0 : index
    %c0_65 = arith.constant 0 : index
    %59 = vector.load %arg4[%c0_64, %c0_65] : memref<1x256xf32, #tpu.memory_space<vmem>>, vector<1x128xf32>
    %60 = vector.broadcast %59 : vector<1x128xf32> to vector<128x128xf32>
    %61 = arith.addf %58, %60 : vector<128x128xf32>
    %cst_66 = arith.constant 0.000000e+00 : f32
    %62 = vector.broadcast %cst_66 : f32 to vector<128x128xf32>
    %63 = arith.maximumf %61, %62 : vector<128x128xf32>
    %64 = vector.extract_strided_slice %63 {offsets = [0, 0], sizes = [8, 128], strides = [1, 1]} : vector<128x128xf32> to vector<8x128xf32>
    %c8_67 = arith.constant 8 : index
    %c0_68 = arith.constant 0 : index
    %65 = vector.load %arg14[%c8_67, %c0_68] : memref<144x256xf32, #tpu.memory_space<vmem>>, vector<8x128xf32>
    tpu.vector_store %arg14[%c8_67, %c0_68], %64 {strides = array<i32>} : memref<144x256xf32, #tpu.memory_space<vmem>>, vector<8x128xf32>,
    %66 = vector.extract_strided_slice %63 {offsets = [8, 0], sizes = [8, 128], strides = [1, 1]} : vector<128x128xf32> to vector<8x128xf32>
    %c8_69 = arith.constant 8 : index
    %c0_70 = arith.constant 0 : index
    %67 = vector.load %arg15[%c8_69, %c0_70] : memref<144x256xf32, #tpu.memory_space<vmem>>, vector<8x128xf32>
    tpu.vector_store %arg15[%c8_69, %c0_70], %66 {strides = array<i32>} : memref<144x256xf32, #tpu.memory_space<vmem>>, vector<8x128xf32>,
    %68 = vector.extract_strided_slice %63 {offsets = [16, 0], sizes = [8, 128], strides = [1, 1]} : vector<128x128xf32> to vector<8x128xf32>
    %c16_71 = arith.constant 16 : index
    %c0_72 = arith.constant 0 : index
    %69 = vector.load %arg14[%c16_71, %c0_72] : memref<144x256xf32, #tpu.memory_space<vmem>>, vector<8x128xf32>
    tpu.vector_store %arg14[%c16_71, %c0_72], %68 {strides = array<i32>} : memref<144x256xf32, #tpu.memory_space<vmem>>, vector<8x128xf32>,
    %70 = vector.extract_strided_slice %63 {offsets = [24, 0], sizes = [8, 128], strides = [1, 1]} : vector<128x128xf32> to vector<8x128xf32>
    %c16_73 = arith.constant 16 : index
    %c0_74 = arith.constant 0 : index
    %71 = vector.load %arg15[%c16_73, %c0_74] : memref<144x256xf32, #tpu.memory_space<vmem>>, vector<8x128xf32>
    tpu.vector_store %arg15[%c16_73, %c0_74], %70 {strides = array<i32>} : memref<144x256xf32, #tpu.memory_space<vmem>>, vector<8x128xf32>,
    %72 = vector.extract_strided_slice %63 {offsets = [32, 0], sizes = [8, 128], strides = [1, 1]} : vector<128x128xf32> to vector<8x128xf32>
    %c24 = arith.constant 24 : index
    %c0_75 = arith.constant 0 : index
    %73 = vector.load %arg14[%c24, %c0_75] : memref<144x256xf32, #tpu.memory_space<vmem>>, vector<8x128xf32>
    tpu.vector_store %arg14[%c24, %c0_75], %72 {strides = array<i32>} : memref<144x256xf32, #tpu.memory_space<vmem>>, vector<8x128xf32>,
    %74 = vector.extract_strided_slice %63 {offsets = [40, 0], sizes = [8, 128], strides = [1, 1]} : vector<128x128xf32> to vector<8x128xf32>
    %c24_76 = arith.constant 24 : index
    %c0_77 = arith.constant 0 : index
    %75 = vector.load %arg15[%c24_76, %c0_77] : memref<144x256xf32, #tpu.memory_space<vmem>>, vector<8x128xf32>
    tpu.vector_store %arg15[%c24_76, %c0_77], %74 {strides = array<i32>} : memref<144x256xf32, #tpu.memory_space<vmem>>, vector<8x128xf32>,
    %76 = vector.extract_strided_slice %63 {offsets = [48, 0], sizes = [8, 128], strides = [1, 1]} : vector<128x128xf32> to vector<8x128xf32>
    %c32 = arith.constant 32 : index
    %c0_78 = arith.constant 0 : index
    %77 = vector.load %arg14[%c32, %c0_78] : memref<144x256xf32, #tpu.memory_space<vmem>>, vector<8x128xf32>
    tpu.vector_store %arg14[%c32, %c0_78], %76 {strides = array<i32>} : memref<144x256xf32, #tpu.memory_space<vmem>>, vector<8x128xf32>,
    %78 = vector.extract_strided_slice %63 {offsets = [56, 0], sizes = [8, 128], strides = [1, 1]} : vector<128x128xf32> to vector<8x128xf32>
    %c32_79 = arith.constant 32 : index
    %c0_80 = arith.constant 0 : index
    %79 = vector.load %arg15[%c32_79, %c0_80] : memref<144x256xf32, #tpu.memory_space<vmem>>, vector<8x128xf32>
    tpu.vector_store %arg15[%c32_79, %c0_80], %78 {strides = array<i32>} : memref<144x256xf32, #tpu.memory_space<vmem>>, vector<8x128xf32>,
    %80 = vector.extract_strided_slice %63 {offsets = [64, 0], sizes = [8, 128], strides = [1, 1]} : vector<128x128xf32> to vector<8x128xf32>
    %c40_81 = arith.constant 40 : index
    %c0_82 = arith.constant 0 : index
    %81 = vector.load %arg14[%c40_81, %c0_82] : memref<144x256xf32, #tpu.memory_space<vmem>>, vector<8x128xf32>
    tpu.vector_store %arg14[%c40_81, %c0_82], %80 {strides = array<i32>} : memref<144x256xf32, #tpu.memory_space<vmem>>, vector<8x128xf32>,
    %82 = vector.extract_strided_slice %63 {offsets = [72, 0], sizes = [8, 128], strides = [1, 1]} : vector<128x128xf32> to vector<8x128xf32>
    %c40_83 = arith.constant 40 : index
    %c0_84 = arith.constant 0 : index
    %83 = vector.load %arg15[%c40_83, %c0_84] : memref<144x256xf32, #tpu.memory_space<vmem>>, vector<8x128xf32>
    tpu.vector_store %arg15[%c40_83, %c0_84], %82 {strides = array<i32>} : memref<144x256xf32, #tpu.memory_space<vmem>>, vector<8x128xf32>,
    %84 = vector.extract_strided_slice %63 {offsets = [80, 0], sizes = [8, 128], strides = [1, 1]} : vector<128x128xf32> to vector<8x128xf32>
    %c48 = arith.constant 48 : index
    %c0_85 = arith.constant 0 : index
    %85 = vector.load %arg14[%c48, %c0_85] : memref<144x256xf32, #tpu.memory_space<vmem>>, vector<8x128xf32>
    tpu.vector_store %arg14[%c48, %c0_85], %84 {strides = array<i32>} : memref<144x256xf32, #tpu.memory_space<vmem>>, vector<8x128xf32>,
    %86 = vector.extract_strided_slice %63 {offsets = [88, 0], sizes = [8, 128], strides = [1, 1]} : vector<128x128xf32> to vector<8x128xf32>
    %c48_86 = arith.constant 48 : index
    %c0_87 = arith.constant 0 : index
    %87 = vector.load %arg15[%c48_86, %c0_87] : memref<144x256xf32, #tpu.memory_space<vmem>>, vector<8x128xf32>
    tpu.vector_store %arg15[%c48_86, %c0_87], %86 {strides = array<i32>} : memref<144x256xf32, #tpu.memory_space<vmem>>, vector<8x128xf32>,
    %88 = vector.extract_strided_slice %63 {offsets = [96, 0], sizes = [8, 128], strides = [1, 1]} : vector<128x128xf32> to vector<8x128xf32>
    %c56 = arith.constant 56 : index
    %c0_88 = arith.constant 0 : index
    %89 = vector.load %arg14[%c56, %c0_88] : memref<144x256xf32, #tpu.memory_space<vmem>>, vector<8x128xf32>
    tpu.vector_store %arg14[%c56, %c0_88], %88 {strides = array<i32>} : memref<144x256xf32, #tpu.memory_space<vmem>>, vector<8x128xf32>,
    %90 = vector.extract_strided_slice %63 {offsets = [104, 0], sizes = [8, 128], strides = [1, 1]} : vector<128x128xf32> to vector<8x128xf32>
    %c56_89 = arith.constant 56 : index
    %c0_90 = arith.constant 0 : index
    %91 = vector.load %arg15[%c56_89, %c0_90] : memref<144x256xf32, #tpu.memory_space<vmem>>, vector<8x128xf32>
    tpu.vector_store %arg15[%c56_89, %c0_90], %90 {strides = array<i32>} : memref<144x256xf32, #tpu.memory_space<vmem>>, vector<8x128xf32>,
    %92 = vector.extract_strided_slice %63 {offsets = [112, 0], sizes = [8, 128], strides = [1, 1]} : vector<128x128xf32> to vector<8x128xf32>
    %c64 = arith.constant 64 : index
    %c0_91 = arith.constant 0 : index
    %93 = vector.load %arg14[%c64, %c0_91] : memref<144x256xf32, #tpu.memory_space<vmem>>, vector<8x128xf32>
    tpu.vector_store %arg14[%c64, %c0_91], %92 {strides = array<i32>} : memref<144x256xf32, #tpu.memory_space<vmem>>, vector<8x128xf32>,
    %94 = vector.extract_strided_slice %63 {offsets = [120, 0], sizes = [8, 128], strides = [1, 1]} : vector<128x128xf32> to vector<8x128xf32>
    %c64_92 = arith.constant 64 : index
    %c0_93 = arith.constant 0 : index
    %95 = vector.load %arg15[%c64_92, %c0_93] : memref<144x256xf32, #tpu.memory_space<vmem>>, vector<8x128xf32>
    tpu.vector_store %arg15[%c64_92, %c0_93], %94 {strides = array<i32>} : memref<144x256xf32, #tpu.memory_space<vmem>>, vector<8x128xf32>,
    %cst_94 = arith.constant 0.000000e+00 : f32
    %96 = vector.broadcast %cst_94 : f32 to vector<128x128xf32>
    %c0_i32_95 = arith.constant 0 : i32
    %c0_i32_96 = arith.constant 0 : i32
    %c0_i32_97 = arith.constant 0 : i32
    %97 = tpu.memref_slice %arg1[%c0_i32_95, %c0_i32_96, %c0_i32_97] : memref<1x272x128xf32, #tpu.memory_space<vmem>> -> memref<1x272x128xf32, #tpu.memory_space<vmem>>
    %98 = tpu.memref_squeeze %97 : memref<1x272x128xf32, #tpu.memory_space<vmem>> -> memref<272x128xf32, #tpu.memory_space<vmem>>
    %c0_98 = arith.constant 0 : index
    %c0_99 = arith.constant 0 : index
    %99 = vector.load %98[%c0_98, %c0_99] : memref<272x128xf32, #tpu.memory_space<vmem>>, vector<128x128xf32>
    %100 = arith.truncf %99 : vector<128x128xf32> to vector<128x128xbf16>
    %c0_100 = arith.constant 0 : index
    %c0_101 = arith.constant 0 : index
    %c128 = arith.constant 128 : index
    %101 = vector.load %arg3[%c0_100, %c0_101, %c128] : memref<5x128x256xbf16, #tpu.memory_space<vmem>>, vector<1x128x128xbf16>
    %102 = vector.shape_cast %101 : vector<1x128x128xbf16> to vector<128x128xbf16>
    %cst_102 = arith.constant dense<0.000000e+00> : vector<128x128xf32>
    %103 = tpu.matmul %100, %102, %cst_102 {dimension_numbers = #tpu.dot_dimension_numbers<[1], [0], [0], [1], [0, 0, 1, 1], [], []>} : vector<128x128xbf16>, vector<128x128xbf16>, vector<128x128xf32> -> vector<128x128xf32>
    %104 = arith.addf %96, %103 : vector<128x128xf32>
    %c0_i32_103 = arith.constant 0 : i32
    %c0_i32_104 = arith.constant 0 : i32
    %c0_i32_105 = arith.constant 0 : i32
    %105 = tpu.memref_slice %arg2[%c0_i32_103, %c0_i32_104, %c0_i32_105] : memref<1x272x128xf32, #tpu.memory_space<vmem>> -> memref<1x272x128xf32, #tpu.memory_space<vmem>>
    %106 = tpu.memref_squeeze %105 : memref<1x272x128xf32, #tpu.memory_space<vmem>> -> memref<272x128xf32, #tpu.memory_space<vmem>>
    %c0_106 = arith.constant 0 : index
    %c0_107 = arith.constant 0 : index
    %107 = vector.load %106[%c0_106, %c0_107] : memref<272x128xf32, #tpu.memory_space<vmem>>, vector<128x128xf32>
    %108 = arith.truncf %107 : vector<128x128xf32> to vector<128x128xbf16>
    %c1_108 = arith.constant 1 : index
    %c0_109 = arith.constant 0 : index
    %c128_110 = arith.constant 128 : index
    %109 = vector.load %arg3[%c1_108, %c0_109, %c128_110] : memref<5x128x256xbf16, #tpu.memory_space<vmem>>, vector<1x128x128xbf16>
    %110 = vector.shape_cast %109 : vector<1x128x128xbf16> to vector<128x128xbf16>
    %cst_111 = arith.constant dense<0.000000e+00> : vector<128x128xf32>
    %111 = tpu.matmul %108, %110, %cst_111 {dimension_numbers = #tpu.dot_dimension_numbers<[1], [0], [0], [1], [0, 0, 1, 1], [], []>} : vector<128x128xbf16>, vector<128x128xbf16>, vector<128x128xf32> -> vector<128x128xf32>
    %112 = arith.addf %104, %111 : vector<128x128xf32>
    %c0_i32_112 = arith.constant 0 : i32
    %c0_i32_113 = arith.constant 0 : i32
    %c0_i32_114 = arith.constant 0 : i32
    %113 = tpu.memref_slice %arg1[%c0_i32_112, %c0_i32_113, %c0_i32_114] : memref<1x272x128xf32, #tpu.memory_space<vmem>> -> memref<1x272x128xf32, #tpu.memory_space<vmem>>
    %114 = tpu.memref_squeeze %113 : memref<1x272x128xf32, #tpu.memory_space<vmem>> -> memref<272x128xf32, #tpu.memory_space<vmem>>
    %c8_115 = arith.constant 8 : index
    %c0_116 = arith.constant 0 : index
    %115 = vector.load %114[%c8_115, %c0_116] : memref<272x128xf32, #tpu.memory_space<vmem>>, vector<128x128xf32>
    %116 = arith.truncf %115 : vector<128x128xf32> to vector<128x128xbf16>
    %c2_117 = arith.constant 2 : index
    %c0_118 = arith.constant 0 : index
    %c128_119 = arith.constant 128 : index
    %117 = vector.load %arg3[%c2_117, %c0_118, %c128_119] : memref<5x128x256xbf16, #tpu.memory_space<vmem>>, vector<1x128x128xbf16>
    %118 = vector.shape_cast %117 : vector<1x128x128xbf16> to vector<128x128xbf16>
    %cst_120 = arith.constant dense<0.000000e+00> : vector<128x128xf32>
    %119 = tpu.matmul %116, %118, %cst_120 {dimension_numbers = #tpu.dot_dimension_numbers<[1], [0], [0], [1], [0, 0, 1, 1], [], []>} : vector<128x128xbf16>, vector<128x128xbf16>, vector<128x128xf32> -> vector<128x128xf32>
    %120 = arith.addf %112, %119 : vector<128x128xf32>
    %c0_i32_121 = arith.constant 0 : i32
    %c0_i32_122 = arith.constant 0 : i32
    %c0_i32_123 = arith.constant 0 : i32
    %121 = tpu.memref_slice %arg2[%c0_i32_121, %c0_i32_122, %c0_i32_123] : memref<1x272x128xf32, #tpu.memory_space<vmem>> -> memref<1x272x128xf32, #tpu.memory_space<vmem>>
    %122 = tpu.memref_squeeze %121 : memref<1x272x128xf32, #tpu.memory_space<vmem>> -> memref<272x128xf32, #tpu.memory_space<vmem>>
    %c8_124 = arith.constant 8 : index
    %c0_125 = arith.constant 0 : index
    %123 = vector.load %122[%c8_124, %c0_125] : memref<272x128xf32, #tpu.memory_space<vmem>>, vector<128x128xf32>
    %124 = arith.truncf %123 : vector<128x128xf32> to vector<128x128xbf16>
    %c3_126 = arith.constant 3 : index
    %c0_127 = arith.constant 0 : index
    %c128_128 = arith.constant 128 : index
    %125 = vector.load %arg3[%c3_126, %c0_127, %c128_128] : memref<5x128x256xbf16, #tpu.memory_space<vmem>>, vector<1x128x128xbf16>
    %126 = vector.shape_cast %125 : vector<1x128x128xbf16> to vector<128x128xbf16>
    %cst_129 = arith.constant dense<0.000000e+00> : vector<128x128xf32>
    %127 = tpu.matmul %124, %126, %cst_129 {dimension_numbers = #tpu.dot_dimension_numbers<[1], [0], [0], [1], [0, 0, 1, 1], [], []>} : vector<128x128xbf16>, vector<128x128xbf16>, vector<128x128xf32> -> vector<128x128xf32>
    %128 = arith.addf %120, %127 : vector<128x128xf32>
    %c0_i32_130 = arith.constant 0 : i32
    %c0_i32_131 = arith.constant 0 : i32
    %c0_i32_132 = arith.constant 0 : i32
    %129 = tpu.memref_slice %arg1[%c0_i32_130, %c0_i32_131, %c0_i32_132] : memref<1x272x128xf32, #tpu.memory_space<vmem>> -> memref<1x272x128xf32, #tpu.memory_space<vmem>>
    %130 = tpu.memref_squeeze %129 : memref<1x272x128xf32, #tpu.memory_space<vmem>> -> memref<272x128xf32, #tpu.memory_space<vmem>>
    %c16_133 = arith.constant 16 : index
    %c0_134 = arith.constant 0 : index
    %131 = vector.load %130[%c16_133, %c0_134] : memref<272x128xf32, #tpu.memory_space<vmem>>, vector<128x128xf32>
    %132 = arith.truncf %131 : vector<128x128xf32> to vector<128x128xbf16>
    %c4_135 = arith.constant 4 : index
    %c0_136 = arith.constant 0 : index
    %c128_137 = arith.constant 128 : index
    %133 = vector.load %arg3[%c4_135, %c0_136, %c128_137] : memref<5x128x256xbf16, #tpu.memory_space<vmem>>, vector<1x128x128xbf16>
    %134 = vector.shape_cast %133 : vector<1x128x128xbf16> to vector<128x128xbf16>
    %cst_138 = arith.constant dense<0.000000e+00> : vector<128x128xf32>
    %135 = tpu.matmul %132, %134, %cst_138 {dimension_numbers = #tpu.dot_dimension_numbers<[1], [0], [0], [1], [0, 0, 1, 1], [], []>} : vector<128x128xbf16>, vector<128x128xbf16>, vector<128x128xf32> -> vector<128x128xf32>
    %136 = arith.addf %128, %135 : vector<128x128xf32>
    %c0_139 = arith.constant 0 : index
    %c128_140 = arith.constant 128 : index
    %137 = vector.load %arg4[%c0_139, %c128_140] : memref<1x256xf32, #tpu.memory_space<vmem>>, vector<1x128xf32>
    %138 = vector.broadcast %137 : vector<1x128xf32> to vector<128x128xf32>
    %139 = arith.addf %136, %138 : vector<128x128xf32>
    %cst_141 = arith.constant 0.000000e+00 : f32
    %140 = vector.broadcast %cst_141 : f32 to vector<128x128xf32>
    %141 = arith.maximumf %139, %140 : vector<128x128xf32>
    %142 = vector.extract_strided_slice %141 {offsets = [0, 0], sizes = [8, 128], strides = [1, 1]} : vector<128x128xf32> to vector<8x128xf32>
    %c8_142 = arith.constant 8 : index
    %c128_143 = arith.constant 128 : index
    %143 = vector.load %arg14[%c8_142, %c128_143] : memref<144x256xf32, #tpu.memory_space<vmem>>, vector<8x128xf32>
    tpu.vector_store %arg14[%c8_142, %c128_143], %142 {strides = array<i32>} : memref<144x256xf32, #tpu.memory_space<vmem>>, vector<8x128xf32>,
    %144 = vector.extract_strided_slice %141 {offsets = [8, 0], sizes = [8, 128], strides = [1, 1]} : vector<128x128xf32> to vector<8x128xf32>
    %c8_144 = arith.constant 8 : index
    %c128_145 = arith.constant 128 : index
    %145 = vector.load %arg15[%c8_144, %c128_145] : memref<144x256xf32, #tpu.memory_space<vmem>>, vector<8x128xf32>
    tpu.vector_store %arg15[%c8_144, %c128_145], %144 {strides = array<i32>} : memref<144x256xf32, #tpu.memory_space<vmem>>, vector<8x128xf32>,
    %146 = vector.extract_strided_slice %141 {offsets = [16, 0], sizes = [8, 128], strides = [1, 1]} : vector<128x128xf32> to vector<8x128xf32>
    %c16_146 = arith.constant 16 : index
    %c128_147 = arith.constant 128 : index
    %147 = vector.load %arg14[%c16_146, %c128_147] : memref<144x256xf32, #tpu.memory_space<vmem>>, vector<8x128xf32>
    tpu.vector_store %arg14[%c16_146, %c128_147], %146 {strides = array<i32>} : memref<144x256xf32, #tpu.memory_space<vmem>>, vector<8x128xf32>,
    %148 = vector.extract_strided_slice %141 {offsets = [24, 0], sizes = [8, 128], strides = [1, 1]} : vector<128x128xf32> to vector<8x128xf32>
    %c16_148 = arith.constant 16 : index
    %c128_149 = arith.constant 128 : index
    %149 = vector.load %arg15[%c16_148, %c128_149] : memref<144x256xf32, #tpu.memory_space<vmem>>, vector<8x128xf32>
    tpu.vector_store %arg15[%c16_148, %c128_149], %148 {strides = array<i32>} : memref<144x256xf32, #tpu.memory_space<vmem>>, vector<8x128xf32>,
    %150 = vector.extract_strided_slice %141 {offsets = [32, 0], sizes = [8, 128], strides = [1, 1]} : vector<128x128xf32> to vector<8x128xf32>
    %c24_150 = arith.constant 24 : index
    %c128_151 = arith.constant 128 : index
    %151 = vector.load %arg14[%c24_150, %c128_151] : memref<144x256xf32, #tpu.memory_space<vmem>>, vector<8x128xf32>
    tpu.vector_store %arg14[%c24_150, %c128_151], %150 {strides = array<i32>} : memref<144x256xf32, #tpu.memory_space<vmem>>, vector<8x128xf32>,
    %152 = vector.extract_strided_slice %141 {offsets = [40, 0], sizes = [8, 128], strides = [1, 1]} : vector<128x128xf32> to vector<8x128xf32>
    %c24_152 = arith.constant 24 : index
    %c128_153 = arith.constant 128 : index
    %153 = vector.load %arg15[%c24_152, %c128_153] : memref<144x256xf32, #tpu.memory_space<vmem>>, vector<8x128xf32>
    tpu.vector_store %arg15[%c24_152, %c128_153], %152 {strides = array<i32>} : memref<144x256xf32, #tpu.memory_space<vmem>>, vector<8x128xf32>,
    %154 = vector.extract_strided_slice %141 {offsets = [48, 0], sizes = [8, 128], strides = [1, 1]} : vector<128x128xf32> to vector<8x128xf32>
    %c32_154 = arith.constant 32 : index
    %c128_155 = arith.constant 128 : index
    %155 = vector.load %arg14[%c32_154, %c128_155] : memref<144x256xf32, #tpu.memory_space<vmem>>, vector<8x128xf32>
    tpu.vector_store %arg14[%c32_154, %c128_155], %154 {strides = array<i32>} : memref<144x256xf32, #tpu.memory_space<vmem>>, vector<8x128xf32>,
    %156 = vector.extract_strided_slice %141 {offsets = [56, 0], sizes = [8, 128], strides = [1, 1]} : vector<128x128xf32> to vector<8x128xf32>
    %c32_156 = arith.constant 32 : index
    %c128_157 = arith.constant 128 : index
    %157 = vector.load %arg15[%c32_156, %c128_157] : memref<144x256xf32, #tpu.memory_space<vmem>>, vector<8x128xf32>
    tpu.vector_store %arg15[%c32_156, %c128_157], %156 {strides = array<i32>} : memref<144x256xf32, #tpu.memory_space<vmem>>, vector<8x128xf32>,
    %158 = vector.extract_strided_slice %141 {offsets = [64, 0], sizes = [8, 128], strides = [1, 1]} : vector<128x128xf32> to vector<8x128xf32>
    %c40_158 = arith.constant 40 : index
    %c128_159 = arith.constant 128 : index
    %159 = vector.load %arg14[%c40_158, %c128_159] : memref<144x256xf32, #tpu.memory_space<vmem>>, vector<8x128xf32>
    tpu.vector_store %arg14[%c40_158, %c128_159], %158 {strides = array<i32>} : memref<144x256xf32, #tpu.memory_space<vmem>>, vector<8x128xf32>,
    %160 = vector.extract_strided_slice %141 {offsets = [72, 0], sizes = [8, 128], strides = [1, 1]} : vector<128x128xf32> to vector<8x128xf32>
    %c40_160 = arith.constant 40 : index
    %c128_161 = arith.constant 128 : index
    %161 = vector.load %arg15[%c40_160, %c128_161] : memref<144x256xf32, #tpu.memory_space<vmem>>, vector<8x128xf32>
    tpu.vector_store %arg15[%c40_160, %c128_161], %160 {strides = array<i32>} : memref<144x256xf32, #tpu.memory_space<vmem>>, vector<8x128xf32>,
    %162 = vector.extract_strided_slice %141 {offsets = [80, 0], sizes = [8, 128], strides = [1, 1]} : vector<128x128xf32> to vector<8x128xf32>
    %c48_162 = arith.constant 48 : index
    %c128_163 = arith.constant 128 : index
    %163 = vector.load %arg14[%c48_162, %c128_163] : memref<144x256xf32, #tpu.memory_space<vmem>>, vector<8x128xf32>
    tpu.vector_store %arg14[%c48_162, %c128_163], %162 {strides = array<i32>} : memref<144x256xf32, #tpu.memory_space<vmem>>, vector<8x128xf32>,
    %164 = vector.extract_strided_slice %141 {offsets = [88, 0], sizes = [8, 128], strides = [1, 1]} : vector<128x128xf32> to vector<8x128xf32>
    %c48_164 = arith.constant 48 : index
    %c128_165 = arith.constant 128 : index
    %165 = vector.load %arg15[%c48_164, %c128_165] : memref<144x256xf32, #tpu.memory_space<vmem>>, vector<8x128xf32>
    tpu.vector_store %arg15[%c48_164, %c128_165], %164 {strides = array<i32>} : memref<144x256xf32, #tpu.memory_space<vmem>>, vector<8x128xf32>,
    %166 = vector.extract_strided_slice %141 {offsets = [96, 0], sizes = [8, 128], strides = [1, 1]} : vector<128x128xf32> to vector<8x128xf32>
    %c56_166 = arith.constant 56 : index
    %c128_167 = arith.constant 128 : index
    %167 = vector.load %arg14[%c56_166, %c128_167] : memref<144x256xf32, #tpu.memory_space<vmem>>, vector<8x128xf32>
    tpu.vector_store %arg14[%c56_166, %c128_167], %166 {strides = array<i32>} : memref<144x256xf32, #tpu.memory_space<vmem>>, vector<8x128xf32>,
    %168 = vector.extract_strided_slice %141 {offsets = [104, 0], sizes = [8, 128], strides = [1, 1]} : vector<128x128xf32> to vector<8x128xf32>
    %c56_168 = arith.constant 56 : index
    %c128_169 = arith.constant 128 : index
    %169 = vector.load %arg15[%c56_168, %c128_169] : memref<144x256xf32, #tpu.memory_space<vmem>>, vector<8x128xf32>
    tpu.vector_store %arg15[%c56_168, %c128_169], %168 {strides = array<i32>} : memref<144x256xf32, #tpu.memory_space<vmem>>, vector<8x128xf32>,
    %170 = vector.extract_strided_slice %141 {offsets = [112, 0], sizes = [8, 128], strides = [1, 1]} : vector<128x128xf32> to vector<8x128xf32>
    %c64_170 = arith.constant 64 : index
    %c128_171 = arith.constant 128 : index
    %171 = vector.load %arg14[%c64_170, %c128_171] : memref<144x256xf32, #tpu.memory_space<vmem>>, vector<8x128xf32>
    tpu.vector_store %arg14[%c64_170, %c128_171], %170 {strides = array<i32>} : memref<144x256xf32, #tpu.memory_space<vmem>>, vector<8x128xf32>,
    %172 = vector.extract_strided_slice %141 {offsets = [120, 0], sizes = [8, 128], strides = [1, 1]} : vector<128x128xf32> to vector<8x128xf32>
    %c64_172 = arith.constant 64 : index
    %c128_173 = arith.constant 128 : index
    %173 = vector.load %arg15[%c64_172, %c128_173] : memref<144x256xf32, #tpu.memory_space<vmem>>, vector<8x128xf32>
    tpu.vector_store %arg15[%c64_172, %c128_173], %172 {strides = array<i32>} : memref<144x256xf32, #tpu.memory_space<vmem>>, vector<8x128xf32>,
    %cst_174 = arith.constant 0.000000e+00 : f32
    %174 = vector.broadcast %cst_174 : f32 to vector<128x128xf32>
    %c0_i32_175 = arith.constant 0 : i32
    %c0_i32_176 = arith.constant 0 : i32
    %c0_i32_177 = arith.constant 0 : i32
    %175 = tpu.memref_slice %arg1[%c0_i32_175, %c0_i32_176, %c0_i32_177] : memref<1x272x128xf32, #tpu.memory_space<vmem>> -> memref<1x272x128xf32, #tpu.memory_space<vmem>>
    %176 = tpu.memref_squeeze %175 : memref<1x272x128xf32, #tpu.memory_space<vmem>> -> memref<272x128xf32, #tpu.memory_space<vmem>>
    %c128_178 = arith.constant 128 : index
    %c0_179 = arith.constant 0 : index
    %177 = vector.load %176[%c128_178, %c0_179] : memref<272x128xf32, #tpu.memory_space<vmem>>, vector<128x128xf32>
    %178 = arith.truncf %177 : vector<128x128xf32> to vector<128x128xbf16>
    %c0_180 = arith.constant 0 : index
    %c0_181 = arith.constant 0 : index
    %c0_182 = arith.constant 0 : index
    %179 = vector.load %arg3[%c0_180, %c0_181, %c0_182] : memref<5x128x256xbf16, #tpu.memory_space<vmem>>, vector<1x128x128xbf16>
    %180 = vector.shape_cast %179 : vector<1x128x128xbf16> to vector<128x128xbf16>
    %cst_183 = arith.constant dense<0.000000e+00> : vector<128x128xf32>
    %181 = tpu.matmul %178, %180, %cst_183 {dimension_numbers = #tpu.dot_dimension_numbers<[1], [0], [0], [1], [0, 0, 1, 1], [], []>} : vector<128x128xbf16>, vector<128x128xbf16>, vector<128x128xf32> -> vector<128x128xf32>
    %182 = arith.addf %174, %181 : vector<128x128xf32>
    %c0_i32_184 = arith.constant 0 : i32
    %c0_i32_185 = arith.constant 0 : i32
    %c0_i32_186 = arith.constant 0 : i32
    %183 = tpu.memref_slice %arg2[%c0_i32_184, %c0_i32_185, %c0_i32_186] : memref<1x272x128xf32, #tpu.memory_space<vmem>> -> memref<1x272x128xf32, #tpu.memory_space<vmem>>
    %184 = tpu.memref_squeeze %183 : memref<1x272x128xf32, #tpu.memory_space<vmem>> -> memref<272x128xf32, #tpu.memory_space<vmem>>
    %c128_187 = arith.constant 128 : index
    %c0_188 = arith.constant 0 : index
    %185 = vector.load %184[%c128_187, %c0_188] : memref<272x128xf32, #tpu.memory_space<vmem>>, vector<128x128xf32>
    %186 = arith.truncf %185 : vector<128x128xf32> to vector<128x128xbf16>
    %c1_189 = arith.constant 1 : index
    %c0_190 = arith.constant 0 : index
    %c0_191 = arith.constant 0 : index
    %187 = vector.load %arg3[%c1_189, %c0_190, %c0_191] : memref<5x128x256xbf16, #tpu.memory_space<vmem>>, vector<1x128x128xbf16>
    %188 = vector.shape_cast %187 : vector<1x128x128xbf16> to vector<128x128xbf16>
    %cst_192 = arith.constant dense<0.000000e+00> : vector<128x128xf32>
    %189 = tpu.matmul %186, %188, %cst_192 {dimension_numbers = #tpu.dot_dimension_numbers<[1], [0], [0], [1], [0, 0, 1, 1], [], []>} : vector<128x128xbf16>, vector<128x128xbf16>, vector<128x128xf32> -> vector<128x128xf32>
    %190 = arith.addf %182, %189 : vector<128x128xf32>
    %c0_i32_193 = arith.constant 0 : i32
    %c0_i32_194 = arith.constant 0 : i32
    %c0_i32_195 = arith.constant 0 : i32
    %191 = tpu.memref_slice %arg1[%c0_i32_193, %c0_i32_194, %c0_i32_195] : memref<1x272x128xf32, #tpu.memory_space<vmem>> -> memref<1x272x128xf32, #tpu.memory_space<vmem>>
    %192 = tpu.memref_squeeze %191 : memref<1x272x128xf32, #tpu.memory_space<vmem>> -> memref<272x128xf32, #tpu.memory_space<vmem>>
    %c136_196 = arith.constant 136 : index
    %c0_197 = arith.constant 0 : index
    %193 = vector.load %192[%c136_196, %c0_197] : memref<272x128xf32, #tpu.memory_space<vmem>>, vector<128x128xf32>
    %194 = arith.truncf %193 : vector<128x128xf32> to vector<128x128xbf16>
    %c2_198 = arith.constant 2 : index
    %c0_199 = arith.constant 0 : index
    %c0_200 = arith.constant 0 : index
    %195 = vector.load %arg3[%c2_198, %c0_199, %c0_200] : memref<5x128x256xbf16, #tpu.memory_space<vmem>>, vector<1x128x128xbf16>
    %196 = vector.shape_cast %195 : vector<1x128x128xbf16> to vector<128x128xbf16>
    %cst_201 = arith.constant dense<0.000000e+00> : vector<128x128xf32>
    %197 = tpu.matmul %194, %196, %cst_201 {dimension_numbers = #tpu.dot_dimension_numbers<[1], [0], [0], [1], [0, 0, 1, 1], [], []>} : vector<128x128xbf16>, vector<128x128xbf16>, vector<128x128xf32> -> vector<128x128xf32>
    %198 = arith.addf %190, %197 : vector<128x128xf32>
    %c0_i32_202 = arith.constant 0 : i32
    %c0_i32_203 = arith.constant 0 : i32
    %c0_i32_204 = arith.constant 0 : i32
    %199 = tpu.memref_slice %arg2[%c0_i32_202, %c0_i32_203, %c0_i32_204] : memref<1x272x128xf32, #tpu.memory_space<vmem>> -> memref<1x272x128xf32, #tpu.memory_space<vmem>>
    %200 = tpu.memref_squeeze %199 : memref<1x272x128xf32, #tpu.memory_space<vmem>> -> memref<272x128xf32, #tpu.memory_space<vmem>>
    %c136_205 = arith.constant 136 : index
    %c0_206 = arith.constant 0 : index
    %201 = vector.load %200[%c136_205, %c0_206] : memref<272x128xf32, #tpu.memory_space<vmem>>, vector<128x128xf32>
    %202 = arith.truncf %201 : vector<128x128xf32> to vector<128x128xbf16>
    %c3_207 = arith.constant 3 : index
    %c0_208 = arith.constant 0 : index
    %c0_209 = arith.constant 0 : index
    %203 = vector.load %arg3[%c3_207, %c0_208, %c0_209] : memref<5x128x256xbf16, #tpu.memory_space<vmem>>, vector<1x128x128xbf16>
    %204 = vector.shape_cast %203 : vector<1x128x128xbf16> to vector<128x128xbf16>
    %cst_210 = arith.constant dense<0.000000e+00> : vector<128x128xf32>
    %205 = tpu.matmul %202, %204, %cst_210 {dimension_numbers = #tpu.dot_dimension_numbers<[1], [0], [0], [1], [0, 0, 1, 1], [], []>} : vector<128x128xbf16>, vector<128x128xbf16>, vector<128x128xf32> -> vector<128x128xf32>
    %206 = arith.addf %198, %205 : vector<128x128xf32>
    %c0_i32_211 = arith.constant 0 : i32
    %c0_i32_212 = arith.constant 0 : i32
    %c0_i32_213 = arith.constant 0 : i32
    %207 = tpu.memref_slice %arg1[%c0_i32_211, %c0_i32_212, %c0_i32_213] : memref<1x272x128xf32, #tpu.memory_space<vmem>> -> memref<1x272x128xf32, #tpu.memory_space<vmem>>
    %208 = tpu.memref_squeeze %207 : memref<1x272x128xf32, #tpu.memory_space<vmem>> -> memref<272x128xf32, #tpu.memory_space<vmem>>
    %c144 = arith.constant 144 : index
    %c0_214 = arith.constant 0 : index
    %209 = vector.load %208[%c144, %c0_214] : memref<272x128xf32, #tpu.memory_space<vmem>>, vector<128x128xf32>
    %210 = arith.truncf %209 : vector<128x128xf32> to vector<128x128xbf16>
    %c4_215 = arith.constant 4 : index
    %c0_216 = arith.constant 0 : index
    %c0_217 = arith.constant 0 : index
    %211 = vector.load %arg3[%c4_215, %c0_216, %c0_217] : memref<5x128x256xbf16, #tpu.memory_space<vmem>>, vector<1x128x128xbf16>
    %212 = vector.shape_cast %211 : vector<1x128x128xbf16> to vector<128x128xbf16>
    %cst_218 = arith.constant dense<0.000000e+00> : vector<128x128xf32>
    %213 = tpu.matmul %210, %212, %cst_218 {dimension_numbers = #tpu.dot_dimension_numbers<[1], [0], [0], [1], [0, 0, 1, 1], [], []>} : vector<128x128xbf16>, vector<128x128xbf16>, vector<128x128xf32> -> vector<128x128xf32>
    %214 = arith.addf %206, %213 : vector<128x128xf32>
    %c0_219 = arith.constant 0 : index
    %c0_220 = arith.constant 0 : index
    %215 = vector.load %arg4[%c0_219, %c0_220] : memref<1x256xf32, #tpu.memory_space<vmem>>, vector<1x128xf32>
    %216 = vector.broadcast %215 : vector<1x128xf32> to vector<128x128xf32>
    %217 = arith.addf %214, %216 : vector<128x128xf32>
    %cst_221 = arith.constant 0.000000e+00 : f32
    %218 = vector.broadcast %cst_221 : f32 to vector<128x128xf32>
    %219 = arith.maximumf %217, %218 : vector<128x128xf32>
    %220 = vector.extract_strided_slice %219 {offsets = [0, 0], sizes = [8, 128], strides = [1, 1]} : vector<128x128xf32> to vector<8x128xf32>
    %c72_222 = arith.constant 72 : index
    %c0_223 = arith.constant 0 : index
    %221 = vector.load %arg14[%c72_222, %c0_223] : memref<144x256xf32, #tpu.memory_space<vmem>>, vector<8x128xf32>
    tpu.vector_store %arg14[%c72_222, %c0_223], %220 {strides = array<i32>} : memref<144x256xf32, #tpu.memory_space<vmem>>, vector<8x128xf32>,
    %222 = vector.extract_strided_slice %219 {offsets = [8, 0], sizes = [8, 128], strides = [1, 1]} : vector<128x128xf32> to vector<8x128xf32>
    %c72_224 = arith.constant 72 : index
    %c0_225 = arith.constant 0 : index
    %223 = vector.load %arg15[%c72_224, %c0_225] : memref<144x256xf32, #tpu.memory_space<vmem>>, vector<8x128xf32>
    tpu.vector_store %arg15[%c72_224, %c0_225], %222 {strides = array<i32>} : memref<144x256xf32, #tpu.memory_space<vmem>>, vector<8x128xf32>,
    %224 = vector.extract_strided_slice %219 {offsets = [16, 0], sizes = [8, 128], strides = [1, 1]} : vector<128x128xf32> to vector<8x128xf32>
    %c80 = arith.constant 80 : index
    %c0_226 = arith.constant 0 : index
    %225 = vector.load %arg14[%c80, %c0_226] : memref<144x256xf32, #tpu.memory_space<vmem>>, vector<8x128xf32>
    tpu.vector_store %arg14[%c80, %c0_226], %224 {strides = array<i32>} : memref<144x256xf32, #tpu.memory_space<vmem>>, vector<8x128xf32>,
    %226 = vector.extract_strided_slice %219 {offsets = [24, 0], sizes = [8, 128], strides = [1, 1]} : vector<128x128xf32> to vector<8x128xf32>
    %c80_227 = arith.constant 80 : index
    %c0_228 = arith.constant 0 : index
    %227 = vector.load %arg15[%c80_227, %c0_228] : memref<144x256xf32, #tpu.memory_space<vmem>>, vector<8x128xf32>
    tpu.vector_store %arg15[%c80_227, %c0_228], %226 {strides = array<i32>} : memref<144x256xf32, #tpu.memory_space<vmem>>, vector<8x128xf32>,
    %228 = vector.extract_strided_slice %219 {offsets = [32, 0], sizes = [8, 128], strides = [1, 1]} : vector<128x128xf32> to vector<8x128xf32>
    %c88 = arith.constant 88 : index
    %c0_229 = arith.constant 0 : index
    %229 = vector.load %arg14[%c88, %c0_229] : memref<144x256xf32, #tpu.memory_space<vmem>>, vector<8x128xf32>
    tpu.vector_store %arg14[%c88, %c0_229], %228 {strides = array<i32>} : memref<144x256xf32, #tpu.memory_space<vmem>>, vector<8x128xf32>,
    %230 = vector.extract_strided_slice %219 {offsets = [40, 0], sizes = [8, 128], strides = [1, 1]} : vector<128x128xf32> to vector<8x128xf32>
    %c88_230 = arith.constant 88 : index
    %c0_231 = arith.constant 0 : index
    %231 = vector.load %arg15[%c88_230, %c0_231] : memref<144x256xf32, #tpu.memory_space<vmem>>, vector<8x128xf32>
    tpu.vector_store %arg15[%c88_230, %c0_231], %230 {strides = array<i32>} : memref<144x256xf32, #tpu.memory_space<vmem>>, vector<8x128xf32>,
    %232 = vector.extract_strided_slice %219 {offsets = [48, 0], sizes = [8, 128], strides = [1, 1]} : vector<128x128xf32> to vector<8x128xf32>
    %c96 = arith.constant 96 : index
    %c0_232 = arith.constant 0 : index
    %233 = vector.load %arg14[%c96, %c0_232] : memref<144x256xf32, #tpu.memory_space<vmem>>, vector<8x128xf32>
    tpu.vector_store %arg14[%c96, %c0_232], %232 {strides = array<i32>} : memref<144x256xf32, #tpu.memory_space<vmem>>, vector<8x128xf32>,
    %234 = vector.extract_strided_slice %219 {offsets = [56, 0], sizes = [8, 128], strides = [1, 1]} : vector<128x128xf32> to vector<8x128xf32>
    %c96_233 = arith.constant 96 : index
    %c0_234 = arith.constant 0 : index
    %235 = vector.load %arg15[%c96_233, %c0_234] : memref<144x256xf32, #tpu.memory_space<vmem>>, vector<8x128xf32>
    tpu.vector_store %arg15[%c96_233, %c0_234], %234 {strides = array<i32>} : memref<144x256xf32, #tpu.memory_space<vmem>>, vector<8x128xf32>,
    %236 = vector.extract_strided_slice %219 {offsets = [64, 0], sizes = [8, 128], strides = [1, 1]} : vector<128x128xf32> to vector<8x128xf32>
    %c104 = arith.constant 104 : index
    %c0_235 = arith.constant 0 : index
    %237 = vector.load %arg14[%c104, %c0_235] : memref<144x256xf32, #tpu.memory_space<vmem>>, vector<8x128xf32>
    tpu.vector_store %arg14[%c104, %c0_235], %236 {strides = array<i32>} : memref<144x256xf32, #tpu.memory_space<vmem>>, vector<8x128xf32>,
    %238 = vector.extract_strided_slice %219 {offsets = [72, 0], sizes = [8, 128], strides = [1, 1]} : vector<128x128xf32> to vector<8x128xf32>
    %c104_236 = arith.constant 104 : index
    %c0_237 = arith.constant 0 : index
    %239 = vector.load %arg15[%c104_236, %c0_237] : memref<144x256xf32, #tpu.memory_space<vmem>>, vector<8x128xf32>
    tpu.vector_store %arg15[%c104_236, %c0_237], %238 {strides = array<i32>} : memref<144x256xf32, #tpu.memory_space<vmem>>, vector<8x128xf32>,
    %240 = vector.extract_strided_slice %219 {offsets = [80, 0], sizes = [8, 128], strides = [1, 1]} : vector<128x128xf32> to vector<8x128xf32>
    %c112 = arith.constant 112 : index
    %c0_238 = arith.constant 0 : index
    %241 = vector.load %arg14[%c112, %c0_238] : memref<144x256xf32, #tpu.memory_space<vmem>>, vector<8x128xf32>
    tpu.vector_store %arg14[%c112, %c0_238], %240 {strides = array<i32>} : memref<144x256xf32, #tpu.memory_space<vmem>>, vector<8x128xf32>,
    %242 = vector.extract_strided_slice %219 {offsets = [88, 0], sizes = [8, 128], strides = [1, 1]} : vector<128x128xf32> to vector<8x128xf32>
    %c112_239 = arith.constant 112 : index
    %c0_240 = arith.constant 0 : index
    %243 = vector.load %arg15[%c112_239, %c0_240] : memref<144x256xf32, #tpu.memory_space<vmem>>, vector<8x128xf32>
    tpu.vector_store %arg15[%c112_239, %c0_240], %242 {strides = array<i32>} : memref<144x256xf32, #tpu.memory_space<vmem>>, vector<8x128xf32>,
    %244 = vector.extract_strided_slice %219 {offsets = [96, 0], sizes = [8, 128], strides = [1, 1]} : vector<128x128xf32> to vector<8x128xf32>
    %c120 = arith.constant 120 : index
    %c0_241 = arith.constant 0 : index
    %245 = vector.load %arg14[%c120, %c0_241] : memref<144x256xf32, #tpu.memory_space<vmem>>, vector<8x128xf32>
    tpu.vector_store %arg14[%c120, %c0_241], %244 {strides = array<i32>} : memref<144x256xf32, #tpu.memory_space<vmem>>, vector<8x128xf32>,
    %246 = vector.extract_strided_slice %219 {offsets = [104, 0], sizes = [8, 128], strides = [1, 1]} : vector<128x128xf32> to vector<8x128xf32>
    %c120_242 = arith.constant 120 : index
    %c0_243 = arith.constant 0 : index
    %247 = vector.load %arg15[%c120_242, %c0_243] : memref<144x256xf32, #tpu.memory_space<vmem>>, vector<8x128xf32>
    tpu.vector_store %arg15[%c120_242, %c0_243], %246 {strides = array<i32>} : memref<144x256xf32, #tpu.memory_space<vmem>>, vector<8x128xf32>,
    %248 = vector.extract_strided_slice %219 {offsets = [112, 0], sizes = [8, 128], strides = [1, 1]} : vector<128x128xf32> to vector<8x128xf32>
    %c128_244 = arith.constant 128 : index
    %c0_245 = arith.constant 0 : index
    %249 = vector.load %arg14[%c128_244, %c0_245] : memref<144x256xf32, #tpu.memory_space<vmem>>, vector<8x128xf32>
    tpu.vector_store %arg14[%c128_244, %c0_245], %248 {strides = array<i32>} : memref<144x256xf32, #tpu.memory_space<vmem>>, vector<8x128xf32>,
    %250 = vector.extract_strided_slice %219 {offsets = [120, 0], sizes = [8, 128], strides = [1, 1]} : vector<128x128xf32> to vector<8x128xf32>
    %c128_246 = arith.constant 128 : index
    %c0_247 = arith.constant 0 : index
    %251 = vector.load %arg15[%c128_246, %c0_247] : memref<144x256xf32, #tpu.memory_space<vmem>>, vector<8x128xf32>
    tpu.vector_store %arg15[%c128_246, %c0_247], %250 {strides = array<i32>} : memref<144x256xf32, #tpu.memory_space<vmem>>, vector<8x128xf32>,
    %cst_248 = arith.constant 0.000000e+00 : f32
    %252 = vector.broadcast %cst_248 : f32 to vector<128x128xf32>
    %c0_i32_249 = arith.constant 0 : i32
    %c0_i32_250 = arith.constant 0 : i32
    %c0_i32_251 = arith.constant 0 : i32
    %253 = tpu.memref_slice %arg1[%c0_i32_249, %c0_i32_250, %c0_i32_251] : memref<1x272x128xf32, #tpu.memory_space<vmem>> -> memref<1x272x128xf32, #tpu.memory_space<vmem>>
    %254 = tpu.memref_squeeze %253 : memref<1x272x128xf32, #tpu.memory_space<vmem>> -> memref<272x128xf32, #tpu.memory_space<vmem>>
    %c128_252 = arith.constant 128 : index
    %c0_253 = arith.constant 0 : index
    %255 = vector.load %254[%c128_252, %c0_253] : memref<272x128xf32, #tpu.memory_space<vmem>>, vector<128x128xf32>
    %256 = arith.truncf %255 : vector<128x128xf32> to vector<128x128xbf16>
    %c0_254 = arith.constant 0 : index
    %c0_255 = arith.constant 0 : index
    %c128_256 = arith.constant 128 : index
    %257 = vector.load %arg3[%c0_254, %c0_255, %c128_256] : memref<5x128x256xbf16, #tpu.memory_space<vmem>>, vector<1x128x128xbf16>
    %258 = vector.shape_cast %257 : vector<1x128x128xbf16> to vector<128x128xbf16>
    %cst_257 = arith.constant dense<0.000000e+00> : vector<128x128xf32>
    %259 = tpu.matmul %256, %258, %cst_257 {dimension_numbers = #tpu.dot_dimension_numbers<[1], [0], [0], [1], [0, 0, 1, 1], [], []>} : vector<128x128xbf16>, vector<128x128xbf16>, vector<128x128xf32> -> vector<128x128xf32>
    %260 = arith.addf %252, %259 : vector<128x128xf32>
    %c0_i32_258 = arith.constant 0 : i32
    %c0_i32_259 = arith.constant 0 : i32
    %c0_i32_260 = arith.constant 0 : i32
    %261 = tpu.memref_slice %arg2[%c0_i32_258, %c0_i32_259, %c0_i32_260] : memref<1x272x128xf32, #tpu.memory_space<vmem>> -> memref<1x272x128xf32, #tpu.memory_space<vmem>>
    %262 = tpu.memref_squeeze %261 : memref<1x272x128xf32, #tpu.memory_space<vmem>> -> memref<272x128xf32, #tpu.memory_space<vmem>>
    %c128_261 = arith.constant 128 : index
    %c0_262 = arith.constant 0 : index
    %263 = vector.load %262[%c128_261, %c0_262] : memref<272x128xf32, #tpu.memory_space<vmem>>, vector<128x128xf32>
    %264 = arith.truncf %263 : vector<128x128xf32> to vector<128x128xbf16>
    %c1_263 = arith.constant 1 : index
    %c0_264 = arith.constant 0 : index
    %c128_265 = arith.constant 128 : index
    %265 = vector.load %arg3[%c1_263, %c0_264, %c128_265] : memref<5x128x256xbf16, #tpu.memory_space<vmem>>, vector<1x128x128xbf16>
    %266 = vector.shape_cast %265 : vector<1x128x128xbf16> to vector<128x128xbf16>
    %cst_266 = arith.constant dense<0.000000e+00> : vector<128x128xf32>
    %267 = tpu.matmul %264, %266, %cst_266 {dimension_numbers = #tpu.dot_dimension_numbers<[1], [0], [0], [1], [0, 0, 1, 1], [], []>} : vector<128x128xbf16>, vector<128x128xbf16>, vector<128x128xf32> -> vector<128x128xf32>
    %268 = arith.addf %260, %267 : vector<128x128xf32>
    %c0_i32_267 = arith.constant 0 : i32
    %c0_i32_268 = arith.constant 0 : i32
    %c0_i32_269 = arith.constant 0 : i32
    %269 = tpu.memref_slice %arg1[%c0_i32_267, %c0_i32_268, %c0_i32_269] : memref<1x272x128xf32, #tpu.memory_space<vmem>> -> memref<1x272x128xf32, #tpu.memory_space<vmem>>
    %270 = tpu.memref_squeeze %269 : memref<1x272x128xf32, #tpu.memory_space<vmem>> -> memref<272x128xf32, #tpu.memory_space<vmem>>
    %c136_270 = arith.constant 136 : index
    %c0_271 = arith.constant 0 : index
    %271 = vector.load %270[%c136_270, %c0_271] : memref<272x128xf32, #tpu.memory_space<vmem>>, vector<128x128xf32>
    %272 = arith.truncf %271 : vector<128x128xf32> to vector<128x128xbf16>
    %c2_272 = arith.constant 2 : index
    %c0_273 = arith.constant 0 : index
    %c128_274 = arith.constant 128 : index
    %273 = vector.load %arg3[%c2_272, %c0_273, %c128_274] : memref<5x128x256xbf16, #tpu.memory_space<vmem>>, vector<1x128x128xbf16>
    %274 = vector.shape_cast %273 : vector<1x128x128xbf16> to vector<128x128xbf16>
    %cst_275 = arith.constant dense<0.000000e+00> : vector<128x128xf32>
    %275 = tpu.matmul %272, %274, %cst_275 {dimension_numbers = #tpu.dot_dimension_numbers<[1], [0], [0], [1], [0, 0, 1, 1], [], []>} : vector<128x128xbf16>, vector<128x128xbf16>, vector<128x128xf32> -> vector<128x128xf32>
    %276 = arith.addf %268, %275 : vector<128x128xf32>
    %c0_i32_276 = arith.constant 0 : i32
    %c0_i32_277 = arith.constant 0 : i32
    %c0_i32_278 = arith.constant 0 : i32
    %277 = tpu.memref_slice %arg2[%c0_i32_276, %c0_i32_277, %c0_i32_278] : memref<1x272x128xf32, #tpu.memory_space<vmem>> -> memref<1x272x128xf32, #tpu.memory_space<vmem>>
    %278 = tpu.memref_squeeze %277 : memref<1x272x128xf32, #tpu.memory_space<vmem>> -> memref<272x128xf32, #tpu.memory_space<vmem>>
    %c136_279 = arith.constant 136 : index
    %c0_280 = arith.constant 0 : index
    %279 = vector.load %278[%c136_279, %c0_280] : memref<272x128xf32, #tpu.memory_space<vmem>>, vector<128x128xf32>
    %280 = arith.truncf %279 : vector<128x128xf32> to vector<128x128xbf16>
    %c3_281 = arith.constant 3 : index
    %c0_282 = arith.constant 0 : index
    %c128_283 = arith.constant 128 : index
    %281 = vector.load %arg3[%c3_281, %c0_282, %c128_283] : memref<5x128x256xbf16, #tpu.memory_space<vmem>>, vector<1x128x128xbf16>
    %282 = vector.shape_cast %281 : vector<1x128x128xbf16> to vector<128x128xbf16>
    %cst_284 = arith.constant dense<0.000000e+00> : vector<128x128xf32>
    %283 = tpu.matmul %280, %282, %cst_284 {dimension_numbers = #tpu.dot_dimension_numbers<[1], [0], [0], [1], [0, 0, 1, 1], [], []>} : vector<128x128xbf16>, vector<128x128xbf16>, vector<128x128xf32> -> vector<128x128xf32>
    %284 = arith.addf %276, %283 : vector<128x128xf32>
    %c0_i32_285 = arith.constant 0 : i32
    %c0_i32_286 = arith.constant 0 : i32
    %c0_i32_287 = arith.constant 0 : i32
    %285 = tpu.memref_slice %arg1[%c0_i32_285, %c0_i32_286, %c0_i32_287] : memref<1x272x128xf32, #tpu.memory_space<vmem>> -> memref<1x272x128xf32, #tpu.memory_space<vmem>>
    %286 = tpu.memref_squeeze %285 : memref<1x272x128xf32, #tpu.memory_space<vmem>> -> memref<272x128xf32, #tpu.memory_space<vmem>>
    %c144_288 = arith.constant 144 : index
    %c0_289 = arith.constant 0 : index
    %287 = vector.load %286[%c144_288, %c0_289] : memref<272x128xf32, #tpu.memory_space<vmem>>, vector<128x128xf32>
    %288 = arith.truncf %287 : vector<128x128xf32> to vector<128x128xbf16>
    %c4_290 = arith.constant 4 : index
    %c0_291 = arith.constant 0 : index
    %c128_292 = arith.constant 128 : index
    %289 = vector.load %arg3[%c4_290, %c0_291, %c128_292] : memref<5x128x256xbf16, #tpu.memory_space<vmem>>, vector<1x128x128xbf16>
    %290 = vector.shape_cast %289 : vector<1x128x128xbf16> to vector<128x128xbf16>
    %cst_293 = arith.constant dense<0.000000e+00> : vector<128x128xf32>
    %291 = tpu.matmul %288, %290, %cst_293 {dimension_numbers = #tpu.dot_dimension_numbers<[1], [0], [0], [1], [0, 0, 1, 1], [], []>} : vector<128x128xbf16>, vector<128x128xbf16>, vector<128x128xf32> -> vector<128x128xf32>
    %292 = arith.addf %284, %291 : vector<128x128xf32>
    %c0_294 = arith.constant 0 : index
    %c128_295 = arith.constant 128 : index
    %293 = vector.load %arg4[%c0_294, %c128_295] : memref<1x256xf32, #tpu.memory_space<vmem>>, vector<1x128xf32>
    %294 = vector.broadcast %293 : vector<1x128xf32> to vector<128x128xf32>
    %295 = arith.addf %292, %294 : vector<128x128xf32>
    %cst_296 = arith.constant 0.000000e+00 : f32
    %296 = vector.broadcast %cst_296 : f32 to vector<128x128xf32>
    %297 = arith.maximumf %295, %296 : vector<128x128xf32>
    %298 = vector.extract_strided_slice %297 {offsets = [0, 0], sizes = [8, 128], strides = [1, 1]} : vector<128x128xf32> to vector<8x128xf32>
    %c72_297 = arith.constant 72 : index
    %c128_298 = arith.constant 128 : index
    %299 = vector.load %arg14[%c72_297, %c128_298] : memref<144x256xf32, #tpu.memory_space<vmem>>, vector<8x128xf32>
    tpu.vector_store %arg14[%c72_297, %c128_298], %298 {strides = array<i32>} : memref<144x256xf32, #tpu.memory_space<vmem>>, vector<8x128xf32>,
    %300 = vector.extract_strided_slice %297 {offsets = [8, 0], sizes = [8, 128], strides = [1, 1]} : vector<128x128xf32> to vector<8x128xf32>
    %c72_299 = arith.constant 72 : index
    %c128_300 = arith.constant 128 : index
    %301 = vector.load %arg15[%c72_299, %c128_300] : memref<144x256xf32, #tpu.memory_space<vmem>>, vector<8x128xf32>
    tpu.vector_store %arg15[%c72_299, %c128_300], %300 {strides = array<i32>} : memref<144x256xf32, #tpu.memory_space<vmem>>, vector<8x128xf32>,
    %302 = vector.extract_strided_slice %297 {offsets = [16, 0], sizes = [8, 128], strides = [1, 1]} : vector<128x128xf32> to vector<8x128xf32>
    %c80_301 = arith.constant 80 : index
    %c128_302 = arith.constant 128 : index
    %303 = vector.load %arg14[%c80_301, %c128_302] : memref<144x256xf32, #tpu.memory_space<vmem>>, vector<8x128xf32>
    tpu.vector_store %arg14[%c80_301, %c128_302], %302 {strides = array<i32>} : memref<144x256xf32, #tpu.memory_space<vmem>>, vector<8x128xf32>,
    %304 = vector.extract_strided_slice %297 {offsets = [24, 0], sizes = [8, 128], strides = [1, 1]} : vector<128x128xf32> to vector<8x128xf32>
    %c80_303 = arith.constant 80 : index
    %c128_304 = arith.constant 128 : index
    %305 = vector.load %arg15[%c80_303, %c128_304] : memref<144x256xf32, #tpu.memory_space<vmem>>, vector<8x128xf32>
    tpu.vector_store %arg15[%c80_303, %c128_304], %304 {strides = array<i32>} : memref<144x256xf32, #tpu.memory_space<vmem>>, vector<8x128xf32>,
    %306 = vector.extract_strided_slice %297 {offsets = [32, 0], sizes = [8, 128], strides = [1, 1]} : vector<128x128xf32> to vector<8x128xf32>
    %c88_305 = arith.constant 88 : index
    %c128_306 = arith.constant 128 : index
    %307 = vector.load %arg14[%c88_305, %c128_306] : memref<144x256xf32, #tpu.memory_space<vmem>>, vector<8x128xf32>
    tpu.vector_store %arg14[%c88_305, %c128_306], %306 {strides = array<i32>} : memref<144x256xf32, #tpu.memory_space<vmem>>, vector<8x128xf32>,
    %308 = vector.extract_strided_slice %297 {offsets = [40, 0], sizes = [8, 128], strides = [1, 1]} : vector<128x128xf32> to vector<8x128xf32>
    %c88_307 = arith.constant 88 : index
    %c128_308 = arith.constant 128 : index
    %309 = vector.load %arg15[%c88_307, %c128_308] : memref<144x256xf32, #tpu.memory_space<vmem>>, vector<8x128xf32>
    tpu.vector_store %arg15[%c88_307, %c128_308], %308 {strides = array<i32>} : memref<144x256xf32, #tpu.memory_space<vmem>>, vector<8x128xf32>,
    %310 = vector.extract_strided_slice %297 {offsets = [48, 0], sizes = [8, 128], strides = [1, 1]} : vector<128x128xf32> to vector<8x128xf32>
    %c96_309 = arith.constant 96 : index
    %c128_310 = arith.constant 128 : index
    %311 = vector.load %arg14[%c96_309, %c128_310] : memref<144x256xf32, #tpu.memory_space<vmem>>, vector<8x128xf32>
    tpu.vector_store %arg14[%c96_309, %c128_310], %310 {strides = array<i32>} : memref<144x256xf32, #tpu.memory_space<vmem>>, vector<8x128xf32>,
    %312 = vector.extract_strided_slice %297 {offsets = [56, 0], sizes = [8, 128], strides = [1, 1]} : vector<128x128xf32> to vector<8x128xf32>
    %c96_311 = arith.constant 96 : index
    %c128_312 = arith.constant 128 : index
    %313 = vector.load %arg15[%c96_311, %c128_312] : memref<144x256xf32, #tpu.memory_space<vmem>>, vector<8x128xf32>
    tpu.vector_store %arg15[%c96_311, %c128_312], %312 {strides = array<i32>} : memref<144x256xf32, #tpu.memory_space<vmem>>, vector<8x128xf32>,
    %314 = vector.extract_strided_slice %297 {offsets = [64, 0], sizes = [8, 128], strides = [1, 1]} : vector<128x128xf32> to vector<8x128xf32>
    %c104_313 = arith.constant 104 : index
    %c128_314 = arith.constant 128 : index
    %315 = vector.load %arg14[%c104_313, %c128_314] : memref<144x256xf32, #tpu.memory_space<vmem>>, vector<8x128xf32>
    tpu.vector_store %arg14[%c104_313, %c128_314], %314 {strides = array<i32>} : memref<144x256xf32, #tpu.memory_space<vmem>>, vector<8x128xf32>,
    %316 = vector.extract_strided_slice %297 {offsets = [72, 0], sizes = [8, 128], strides = [1, 1]} : vector<128x128xf32> to vector<8x128xf32>
    %c104_315 = arith.constant 104 : index
    %c128_316 = arith.constant 128 : index
    %317 = vector.load %arg15[%c104_315, %c128_316] : memref<144x256xf32, #tpu.memory_space<vmem>>, vector<8x128xf32>
    tpu.vector_store %arg15[%c104_315, %c128_316], %316 {strides = array<i32>} : memref<144x256xf32, #tpu.memory_space<vmem>>, vector<8x128xf32>,
    %318 = vector.extract_strided_slice %297 {offsets = [80, 0], sizes = [8, 128], strides = [1, 1]} : vector<128x128xf32> to vector<8x128xf32>
    %c112_317 = arith.constant 112 : index
    %c128_318 = arith.constant 128 : index
    %319 = vector.load %arg14[%c112_317, %c128_318] : memref<144x256xf32, #tpu.memory_space<vmem>>, vector<8x128xf32>
    tpu.vector_store %arg14[%c112_317, %c128_318], %318 {strides = array<i32>} : memref<144x256xf32, #tpu.memory_space<vmem>>, vector<8x128xf32>,
    %320 = vector.extract_strided_slice %297 {offsets = [88, 0], sizes = [8, 128], strides = [1, 1]} : vector<128x128xf32> to vector<8x128xf32>
    %c112_319 = arith.constant 112 : index
    %c128_320 = arith.constant 128 : index
    %321 = vector.load %arg15[%c112_319, %c128_320] : memref<144x256xf32, #tpu.memory_space<vmem>>, vector<8x128xf32>
    tpu.vector_store %arg15[%c112_319, %c128_320], %320 {strides = array<i32>} : memref<144x256xf32, #tpu.memory_space<vmem>>, vector<8x128xf32>,
    %322 = vector.extract_strided_slice %297 {offsets = [96, 0], sizes = [8, 128], strides = [1, 1]} : vector<128x128xf32> to vector<8x128xf32>
    %c120_321 = arith.constant 120 : index
    %c128_322 = arith.constant 128 : index
    %323 = vector.load %arg14[%c120_321, %c128_322] : memref<144x256xf32, #tpu.memory_space<vmem>>, vector<8x128xf32>
    tpu.vector_store %arg14[%c120_321, %c128_322], %322 {strides = array<i32>} : memref<144x256xf32, #tpu.memory_space<vmem>>, vector<8x128xf32>,
    %324 = vector.extract_strided_slice %297 {offsets = [104, 0], sizes = [8, 128], strides = [1, 1]} : vector<128x128xf32> to vector<8x128xf32>
    %c120_323 = arith.constant 120 : index
    %c128_324 = arith.constant 128 : index
    %325 = vector.load %arg15[%c120_323, %c128_324] : memref<144x256xf32, #tpu.memory_space<vmem>>, vector<8x128xf32>
    tpu.vector_store %arg15[%c120_323, %c128_324], %324 {strides = array<i32>} : memref<144x256xf32, #tpu.memory_space<vmem>>, vector<8x128xf32>,
    %326 = vector.extract_strided_slice %297 {offsets = [112, 0], sizes = [8, 128], strides = [1, 1]} : vector<128x128xf32> to vector<8x128xf32>
    %c128_325 = arith.constant 128 : index
    %c128_326 = arith.constant 128 : index
    %327 = vector.load %arg14[%c128_325, %c128_326] : memref<144x256xf32, #tpu.memory_space<vmem>>, vector<8x128xf32>
    tpu.vector_store %arg14[%c128_325, %c128_326], %326 {strides = array<i32>} : memref<144x256xf32, #tpu.memory_space<vmem>>, vector<8x128xf32>,
    %328 = vector.extract_strided_slice %297 {offsets = [120, 0], sizes = [8, 128], strides = [1, 1]} : vector<128x128xf32> to vector<8x128xf32>
    %c128_327 = arith.constant 128 : index
    %c128_328 = arith.constant 128 : index
    %329 = vector.load %arg15[%c128_327, %c128_328] : memref<144x256xf32, #tpu.memory_space<vmem>>, vector<8x128xf32>
    tpu.vector_store %arg15[%c128_327, %c128_328], %328 {strides = array<i32>} : memref<144x256xf32, #tpu.memory_space<vmem>>, vector<8x128xf32>,
    %cst_329 = arith.constant 0.000000e+00 : f32
    %330 = vector.broadcast %cst_329 : f32 to vector<128x128xf32>
    %c0_330 = arith.constant 0 : index
    %c0_331 = arith.constant 0 : index
    %331 = vector.load %arg14[%c0_330, %c0_331] : memref<144x256xf32, #tpu.memory_space<vmem>>, vector<128x128xf32>
    %332 = arith.truncf %331 : vector<128x128xf32> to vector<128x128xbf16>
    %c0_332 = arith.constant 0 : index
    %c0_333 = arith.constant 0 : index
    %c0_334 = arith.constant 0 : index
    %333 = vector.load %arg5[%c0_332, %c0_333, %c0_334] : memref<5x256x256xbf16, #tpu.memory_space<vmem>>, vector<1x128x128xbf16>
    %334 = vector.shape_cast %333 : vector<1x128x128xbf16> to vector<128x128xbf16>
    %cst_335 = arith.constant dense<0.000000e+00> : vector<128x128xf32>
    %335 = tpu.matmul %332, %334, %cst_335 {dimension_numbers = #tpu.dot_dimension_numbers<[1], [0], [0], [1], [0, 0, 1, 1], [], []>} : vector<128x128xbf16>, vector<128x128xbf16>, vector<128x128xf32> -> vector<128x128xf32>
    %336 = arith.addf %330, %335 : vector<128x128xf32>
    %c0_336 = arith.constant 0 : index
    %c128_337 = arith.constant 128 : index
    %337 = vector.load %arg14[%c0_336, %c128_337] : memref<144x256xf32, #tpu.memory_space<vmem>>, vector<128x128xf32>
    %338 = arith.truncf %337 : vector<128x128xf32> to vector<128x128xbf16>
    %c0_338 = arith.constant 0 : index
    %c128_339 = arith.constant 128 : index
    %c0_340 = arith.constant 0 : index
    %339 = vector.load %arg5[%c0_338, %c128_339, %c0_340] : memref<5x256x256xbf16, #tpu.memory_space<vmem>>, vector<1x128x128xbf16>
    %340 = vector.shape_cast %339 : vector<1x128x128xbf16> to vector<128x128xbf16>
    %cst_341 = arith.constant dense<0.000000e+00> : vector<128x128xf32>
    %341 = tpu.matmul %338, %340, %cst_341 {dimension_numbers = #tpu.dot_dimension_numbers<[1], [0], [0], [1], [0, 0, 1, 1], [], []>} : vector<128x128xbf16>, vector<128x128xbf16>, vector<128x128xf32> -> vector<128x128xf32>
    %342 = arith.addf %336, %341 : vector<128x128xf32>
    %c0_342 = arith.constant 0 : index
    %c0_343 = arith.constant 0 : index
    %343 = vector.load %arg15[%c0_342, %c0_343] : memref<144x256xf32, #tpu.memory_space<vmem>>, vector<128x128xf32>
    %344 = arith.truncf %343 : vector<128x128xf32> to vector<128x128xbf16>
    %c1_344 = arith.constant 1 : index
    %c0_345 = arith.constant 0 : index
    %c0_346 = arith.constant 0 : index
    %345 = vector.load %arg5[%c1_344, %c0_345, %c0_346] : memref<5x256x256xbf16, #tpu.memory_space<vmem>>, vector<1x128x128xbf16>
    %346 = vector.shape_cast %345 : vector<1x128x128xbf16> to vector<128x128xbf16>
    %cst_347 = arith.constant dense<0.000000e+00> : vector<128x128xf32>
    %347 = tpu.matmul %344, %346, %cst_347 {dimension_numbers = #tpu.dot_dimension_numbers<[1], [0], [0], [1], [0, 0, 1, 1], [], []>} : vector<128x128xbf16>, vector<128x128xbf16>, vector<128x128xf32> -> vector<128x128xf32>
    %348 = arith.addf %342, %347 : vector<128x128xf32>
    %c0_348 = arith.constant 0 : index
    %c128_349 = arith.constant 128 : index
    %349 = vector.load %arg15[%c0_348, %c128_349] : memref<144x256xf32, #tpu.memory_space<vmem>>, vector<128x128xf32>
    %350 = arith.truncf %349 : vector<128x128xf32> to vector<128x128xbf16>
    %c1_350 = arith.constant 1 : index
    %c128_351 = arith.constant 128 : index
    %c0_352 = arith.constant 0 : index
    %351 = vector.load %arg5[%c1_350, %c128_351, %c0_352] : memref<5x256x256xbf16, #tpu.memory_space<vmem>>, vector<1x128x128xbf16>
    %352 = vector.shape_cast %351 : vector<1x128x128xbf16> to vector<128x128xbf16>
    %cst_353 = arith.constant dense<0.000000e+00> : vector<128x128xf32>
    %353 = tpu.matmul %350, %352, %cst_353 {dimension_numbers = #tpu.dot_dimension_numbers<[1], [0], [0], [1], [0, 0, 1, 1], [], []>} : vector<128x128xbf16>, vector<128x128xbf16>, vector<128x128xf32> -> vector<128x128xf32>
    %354 = arith.addf %348, %353 : vector<128x128xf32>
    %c8_354 = arith.constant 8 : index
    %c0_355 = arith.constant 0 : index
    %355 = vector.load %arg14[%c8_354, %c0_355] : memref<144x256xf32, #tpu.memory_space<vmem>>, vector<128x128xf32>
    %356 = arith.truncf %355 : vector<128x128xf32> to vector<128x128xbf16>
    %c2_356 = arith.constant 2 : index
    %c0_357 = arith.constant 0 : index
    %c0_358 = arith.constant 0 : index
    %357 = vector.load %arg5[%c2_356, %c0_357, %c0_358] : memref<5x256x256xbf16, #tpu.memory_space<vmem>>, vector<1x128x128xbf16>
    %358 = vector.shape_cast %357 : vector<1x128x128xbf16> to vector<128x128xbf16>
    %cst_359 = arith.constant dense<0.000000e+00> : vector<128x128xf32>
    %359 = tpu.matmul %356, %358, %cst_359 {dimension_numbers = #tpu.dot_dimension_numbers<[1], [0], [0], [1], [0, 0, 1, 1], [], []>} : vector<128x128xbf16>, vector<128x128xbf16>, vector<128x128xf32> -> vector<128x128xf32>
    %360 = arith.addf %354, %359 : vector<128x128xf32>
    %c8_360 = arith.constant 8 : index
    %c128_361 = arith.constant 128 : index
    %361 = vector.load %arg14[%c8_360, %c128_361] : memref<144x256xf32, #tpu.memory_space<vmem>>, vector<128x128xf32>
    %362 = arith.truncf %361 : vector<128x128xf32> to vector<128x128xbf16>
    %c2_362 = arith.constant 2 : index
    %c128_363 = arith.constant 128 : index
    %c0_364 = arith.constant 0 : index
    %363 = vector.load %arg5[%c2_362, %c128_363, %c0_364] : memref<5x256x256xbf16, #tpu.memory_space<vmem>>, vector<1x128x128xbf16>
    %364 = vector.shape_cast %363 : vector<1x128x128xbf16> to vector<128x128xbf16>
    %cst_365 = arith.constant dense<0.000000e+00> : vector<128x128xf32>
    %365 = tpu.matmul %362, %364, %cst_365 {dimension_numbers = #tpu.dot_dimension_numbers<[1], [0], [0], [1], [0, 0, 1, 1], [], []>} : vector<128x128xbf16>, vector<128x128xbf16>, vector<128x128xf32> -> vector<128x128xf32>
    %366 = arith.addf %360, %365 : vector<128x128xf32>
    %c8_366 = arith.constant 8 : index
    %c0_367 = arith.constant 0 : index
    %367 = vector.load %arg15[%c8_366, %c0_367] : memref<144x256xf32, #tpu.memory_space<vmem>>, vector<128x128xf32>
    %368 = arith.truncf %367 : vector<128x128xf32> to vector<128x128xbf16>
    %c3_368 = arith.constant 3 : index
    %c0_369 = arith.constant 0 : index
    %c0_370 = arith.constant 0 : index
    %369 = vector.load %arg5[%c3_368, %c0_369, %c0_370] : memref<5x256x256xbf16, #tpu.memory_space<vmem>>, vector<1x128x128xbf16>
    %370 = vector.shape_cast %369 : vector<1x128x128xbf16> to vector<128x128xbf16>
    %cst_371 = arith.constant dense<0.000000e+00> : vector<128x128xf32>
    %371 = tpu.matmul %368, %370, %cst_371 {dimension_numbers = #tpu.dot_dimension_numbers<[1], [0], [0], [1], [0, 0, 1, 1], [], []>} : vector<128x128xbf16>, vector<128x128xbf16>, vector<128x128xf32> -> vector<128x128xf32>
    %372 = arith.addf %366, %371 : vector<128x128xf32>
    %c8_372 = arith.constant 8 : index
    %c128_373 = arith.constant 128 : index
    %373 = vector.load %arg15[%c8_372, %c128_373] : memref<144x256xf32, #tpu.memory_space<vmem>>, vector<128x128xf32>
    %374 = arith.truncf %373 : vector<128x128xf32> to vector<128x128xbf16>
    %c3_374 = arith.constant 3 : index
    %c128_375 = arith.constant 128 : index
    %c0_376 = arith.constant 0 : index
    %375 = vector.load %arg5[%c3_374, %c128_375, %c0_376] : memref<5x256x256xbf16, #tpu.memory_space<vmem>>, vector<1x128x128xbf16>
    %376 = vector.shape_cast %375 : vector<1x128x128xbf16> to vector<128x128xbf16>
    %cst_377 = arith.constant dense<0.000000e+00> : vector<128x128xf32>
    %377 = tpu.matmul %374, %376, %cst_377 {dimension_numbers = #tpu.dot_dimension_numbers<[1], [0], [0], [1], [0, 0, 1, 1], [], []>} : vector<128x128xbf16>, vector<128x128xbf16>, vector<128x128xf32> -> vector<128x128xf32>
    %378 = arith.addf %372, %377 : vector<128x128xf32>
    %c16_378 = arith.constant 16 : index
    %c0_379 = arith.constant 0 : index
    %379 = vector.load %arg14[%c16_378, %c0_379] : memref<144x256xf32, #tpu.memory_space<vmem>>, vector<128x128xf32>
    %380 = arith.truncf %379 : vector<128x128xf32> to vector<128x128xbf16>
    %c4_380 = arith.constant 4 : index
    %c0_381 = arith.constant 0 : index
    %c0_382 = arith.constant 0 : index
    %381 = vector.load %arg5[%c4_380, %c0_381, %c0_382] : memref<5x256x256xbf16, #tpu.memory_space<vmem>>, vector<1x128x128xbf16>
    %382 = vector.shape_cast %381 : vector<1x128x128xbf16> to vector<128x128xbf16>
    %cst_383 = arith.constant dense<0.000000e+00> : vector<128x128xf32>
    %383 = tpu.matmul %380, %382, %cst_383 {dimension_numbers = #tpu.dot_dimension_numbers<[1], [0], [0], [1], [0, 0, 1, 1], [], []>} : vector<128x128xbf16>, vector<128x128xbf16>, vector<128x128xf32> -> vector<128x128xf32>
    %384 = arith.addf %378, %383 : vector<128x128xf32>
    %c16_384 = arith.constant 16 : index
    %c128_385 = arith.constant 128 : index
    %385 = vector.load %arg14[%c16_384, %c128_385] : memref<144x256xf32, #tpu.memory_space<vmem>>, vector<128x128xf32>
    %386 = arith.truncf %385 : vector<128x128xf32> to vector<128x128xbf16>
    %c4_386 = arith.constant 4 : index
    %c128_387 = arith.constant 128 : index
    %c0_388 = arith.constant 0 : index
    %387 = vector.load %arg5[%c4_386, %c128_387, %c0_388] : memref<5x256x256xbf16, #tpu.memory_space<vmem>>, vector<1x128x128xbf16>
    %388 = vector.shape_cast %387 : vector<1x128x128xbf16> to vector<128x128xbf16>
    %cst_389 = arith.constant dense<0.000000e+00> : vector<128x128xf32>
    %389 = tpu.matmul %386, %388, %cst_389 {dimension_numbers = #tpu.dot_dimension_numbers<[1], [0], [0], [1], [0, 0, 1, 1], [], []>} : vector<128x128xbf16>, vector<128x128xbf16>, vector<128x128xf32> -> vector<128x128xf32>
    %390 = arith.addf %384, %389 : vector<128x128xf32>
    %c0_390 = arith.constant 0 : index
    %c0_391 = arith.constant 0 : index
    %391 = vector.load %arg6[%c0_390, %c0_391] : memref<1x256xf32, #tpu.memory_space<vmem>>, vector<1x128xf32>
    %392 = vector.broadcast %391 : vector<1x128xf32> to vector<128x128xf32>
    %393 = arith.addf %390, %392 : vector<128x128xf32>
    %cst_392 = arith.constant 0.000000e+00 : f32
    %394 = vector.broadcast %cst_392 : f32 to vector<128x128xf32>
    %395 = arith.maximumf %393, %394 : vector<128x128xf32>
    %396 = vector.extract_strided_slice %395 {offsets = [0, 0], sizes = [8, 128], strides = [1, 1]} : vector<128x128xf32> to vector<8x128xf32>
    %c8_393 = arith.constant 8 : index
    %c0_394 = arith.constant 0 : index
    %397 = vector.load %arg16[%c8_393, %c0_394] : memref<80x256xf32, #tpu.memory_space<vmem>>, vector<8x128xf32>
    tpu.vector_store %arg16[%c8_393, %c0_394], %396 {strides = array<i32>} : memref<80x256xf32, #tpu.memory_space<vmem>>, vector<8x128xf32>,
    %398 = vector.extract_strided_slice %395 {offsets = [8, 0], sizes = [8, 128], strides = [1, 1]} : vector<128x128xf32> to vector<8x128xf32>
    %c8_395 = arith.constant 8 : index
    %c0_396 = arith.constant 0 : index
    %399 = vector.load %arg17[%c8_395, %c0_396] : memref<80x256xf32, #tpu.memory_space<vmem>>, vector<8x128xf32>
    tpu.vector_store %arg17[%c8_395, %c0_396], %398 {strides = array<i32>} : memref<80x256xf32, #tpu.memory_space<vmem>>, vector<8x128xf32>,
    %400 = vector.extract_strided_slice %395 {offsets = [16, 0], sizes = [8, 128], strides = [1, 1]} : vector<128x128xf32> to vector<8x128xf32>
    %c16_397 = arith.constant 16 : index
    %c0_398 = arith.constant 0 : index
    %401 = vector.load %arg16[%c16_397, %c0_398] : memref<80x256xf32, #tpu.memory_space<vmem>>, vector<8x128xf32>
    tpu.vector_store %arg16[%c16_397, %c0_398], %400 {strides = array<i32>} : memref<80x256xf32, #tpu.memory_space<vmem>>, vector<8x128xf32>,
    %402 = vector.extract_strided_slice %395 {offsets = [24, 0], sizes = [8, 128], strides = [1, 1]} : vector<128x128xf32> to vector<8x128xf32>
    %c16_399 = arith.constant 16 : index
    %c0_400 = arith.constant 0 : index
    %403 = vector.load %arg17[%c16_399, %c0_400] : memref<80x256xf32, #tpu.memory_space<vmem>>, vector<8x128xf32>
    tpu.vector_store %arg17[%c16_399, %c0_400], %402 {strides = array<i32>} : memref<80x256xf32, #tpu.memory_space<vmem>>, vector<8x128xf32>,
    %404 = vector.extract_strided_slice %395 {offsets = [32, 0], sizes = [8, 128], strides = [1, 1]} : vector<128x128xf32> to vector<8x128xf32>
    %c24_401 = arith.constant 24 : index
    %c0_402 = arith.constant 0 : index
    %405 = vector.load %arg16[%c24_401, %c0_402] : memref<80x256xf32, #tpu.memory_space<vmem>>, vector<8x128xf32>
    tpu.vector_store %arg16[%c24_401, %c0_402], %404 {strides = array<i32>} : memref<80x256xf32, #tpu.memory_space<vmem>>, vector<8x128xf32>,
    %406 = vector.extract_strided_slice %395 {offsets = [40, 0], sizes = [8, 128], strides = [1, 1]} : vector<128x128xf32> to vector<8x128xf32>
    %c24_403 = arith.constant 24 : index
    %c0_404 = arith.constant 0 : index
    %407 = vector.load %arg17[%c24_403, %c0_404] : memref<80x256xf32, #tpu.memory_space<vmem>>, vector<8x128xf32>
    tpu.vector_store %arg17[%c24_403, %c0_404], %406 {strides = array<i32>} : memref<80x256xf32, #tpu.memory_space<vmem>>, vector<8x128xf32>,
    %408 = vector.extract_strided_slice %395 {offsets = [48, 0], sizes = [8, 128], strides = [1, 1]} : vector<128x128xf32> to vector<8x128xf32>
    %c32_405 = arith.constant 32 : index
    %c0_406 = arith.constant 0 : index
    %409 = vector.load %arg16[%c32_405, %c0_406] : memref<80x256xf32, #tpu.memory_space<vmem>>, vector<8x128xf32>
    tpu.vector_store %arg16[%c32_405, %c0_406], %408 {strides = array<i32>} : memref<80x256xf32, #tpu.memory_space<vmem>>, vector<8x128xf32>,
    %410 = vector.extract_strided_slice %395 {offsets = [56, 0], sizes = [8, 128], strides = [1, 1]} : vector<128x128xf32> to vector<8x128xf32>
    %c32_407 = arith.constant 32 : index
    %c0_408 = arith.constant 0 : index
    %411 = vector.load %arg17[%c32_407, %c0_408] : memref<80x256xf32, #tpu.memory_space<vmem>>, vector<8x128xf32>
    tpu.vector_store %arg17[%c32_407, %c0_408], %410 {strides = array<i32>} : memref<80x256xf32, #tpu.memory_space<vmem>>, vector<8x128xf32>,
    %412 = vector.extract_strided_slice %395 {offsets = [64, 0], sizes = [8, 128], strides = [1, 1]} : vector<128x128xf32> to vector<8x128xf32>
    %c40_409 = arith.constant 40 : index
    %c0_410 = arith.constant 0 : index
    %413 = vector.load %arg16[%c40_409, %c0_410] : memref<80x256xf32, #tpu.memory_space<vmem>>, vector<8x128xf32>
    tpu.vector_store %arg16[%c40_409, %c0_410], %412 {strides = array<i32>} : memref<80x256xf32, #tpu.memory_space<vmem>>, vector<8x128xf32>,
    %414 = vector.extract_strided_slice %395 {offsets = [72, 0], sizes = [8, 128], strides = [1, 1]} : vector<128x128xf32> to vector<8x128xf32>
    %c40_411 = arith.constant 40 : index
    %c0_412 = arith.constant 0 : index
    %415 = vector.load %arg17[%c40_411, %c0_412] : memref<80x256xf32, #tpu.memory_space<vmem>>, vector<8x128xf32>
    tpu.vector_store %arg17[%c40_411, %c0_412], %414 {strides = array<i32>} : memref<80x256xf32, #tpu.memory_space<vmem>>, vector<8x128xf32>,
    %416 = vector.extract_strided_slice %395 {offsets = [80, 0], sizes = [8, 128], strides = [1, 1]} : vector<128x128xf32> to vector<8x128xf32>
    %c48_413 = arith.constant 48 : index
    %c0_414 = arith.constant 0 : index
    %417 = vector.load %arg16[%c48_413, %c0_414] : memref<80x256xf32, #tpu.memory_space<vmem>>, vector<8x128xf32>
    tpu.vector_store %arg16[%c48_413, %c0_414], %416 {strides = array<i32>} : memref<80x256xf32, #tpu.memory_space<vmem>>, vector<8x128xf32>,
    %418 = vector.extract_strided_slice %395 {offsets = [88, 0], sizes = [8, 128], strides = [1, 1]} : vector<128x128xf32> to vector<8x128xf32>
    %c48_415 = arith.constant 48 : index
    %c0_416 = arith.constant 0 : index
    %419 = vector.load %arg17[%c48_415, %c0_416] : memref<80x256xf32, #tpu.memory_space<vmem>>, vector<8x128xf32>
    tpu.vector_store %arg17[%c48_415, %c0_416], %418 {strides = array<i32>} : memref<80x256xf32, #tpu.memory_space<vmem>>, vector<8x128xf32>,
    %420 = vector.extract_strided_slice %395 {offsets = [96, 0], sizes = [8, 128], strides = [1, 1]} : vector<128x128xf32> to vector<8x128xf32>
    %c56_417 = arith.constant 56 : index
    %c0_418 = arith.constant 0 : index
    %421 = vector.load %arg16[%c56_417, %c0_418] : memref<80x256xf32, #tpu.memory_space<vmem>>, vector<8x128xf32>
    tpu.vector_store %arg16[%c56_417, %c0_418], %420 {strides = array<i32>} : memref<80x256xf32, #tpu.memory_space<vmem>>, vector<8x128xf32>,
    %422 = vector.extract_strided_slice %395 {offsets = [104, 0], sizes = [8, 128], strides = [1, 1]} : vector<128x128xf32> to vector<8x128xf32>
    %c56_419 = arith.constant 56 : index
    %c0_420 = arith.constant 0 : index
    %423 = vector.load %arg17[%c56_419, %c0_420] : memref<80x256xf32, #tpu.memory_space<vmem>>, vector<8x128xf32>
    tpu.vector_store %arg17[%c56_419, %c0_420], %422 {strides = array<i32>} : memref<80x256xf32, #tpu.memory_space<vmem>>, vector<8x128xf32>,
    %424 = vector.extract_strided_slice %395 {offsets = [112, 0], sizes = [8, 128], strides = [1, 1]} : vector<128x128xf32> to vector<8x128xf32>
    %c64_421 = arith.constant 64 : index
    %c0_422 = arith.constant 0 : index
    %425 = vector.load %arg16[%c64_421, %c0_422] : memref<80x256xf32, #tpu.memory_space<vmem>>, vector<8x128xf32>
    tpu.vector_store %arg16[%c64_421, %c0_422], %424 {strides = array<i32>} : memref<80x256xf32, #tpu.memory_space<vmem>>, vector<8x128xf32>,
    %426 = vector.extract_strided_slice %395 {offsets = [120, 0], sizes = [8, 128], strides = [1, 1]} : vector<128x128xf32> to vector<8x128xf32>
    %c64_423 = arith.constant 64 : index
    %c0_424 = arith.constant 0 : index
    %427 = vector.load %arg17[%c64_423, %c0_424] : memref<80x256xf32, #tpu.memory_space<vmem>>, vector<8x128xf32>
    tpu.vector_store %arg17[%c64_423, %c0_424], %426 {strides = array<i32>} : memref<80x256xf32, #tpu.memory_space<vmem>>, vector<8x128xf32>,
    %cst_425 = arith.constant 0.000000e+00 : f32
    %428 = vector.broadcast %cst_425 : f32 to vector<128x128xf32>
    %c0_426 = arith.constant 0 : index
    %c0_427 = arith.constant 0 : index
    %429 = vector.load %arg14[%c0_426, %c0_427] : memref<144x256xf32, #tpu.memory_space<vmem>>, vector<128x128xf32>
    %430 = arith.truncf %429 : vector<128x128xf32> to vector<128x128xbf16>
    %c0_428 = arith.constant 0 : index
    %c0_429 = arith.constant 0 : index
    %c128_430 = arith.constant 128 : index
    %431 = vector.load %arg5[%c0_428, %c0_429, %c128_430] : memref<5x256x256xbf16, #tpu.memory_space<vmem>>, vector<1x128x128xbf16>
    %432 = vector.shape_cast %431 : vector<1x128x128xbf16> to vector<128x128xbf16>
    %cst_431 = arith.constant dense<0.000000e+00> : vector<128x128xf32>
    %433 = tpu.matmul %430, %432, %cst_431 {dimension_numbers = #tpu.dot_dimension_numbers<[1], [0], [0], [1], [0, 0, 1, 1], [], []>} : vector<128x128xbf16>, vector<128x128xbf16>, vector<128x128xf32> -> vector<128x128xf32>
    %434 = arith.addf %428, %433 : vector<128x128xf32>
    %c0_432 = arith.constant 0 : index
    %c128_433 = arith.constant 128 : index
    %435 = vector.load %arg14[%c0_432, %c128_433] : memref<144x256xf32, #tpu.memory_space<vmem>>, vector<128x128xf32>
    %436 = arith.truncf %435 : vector<128x128xf32> to vector<128x128xbf16>
    %c0_434 = arith.constant 0 : index
    %c128_435 = arith.constant 128 : index
    %c128_436 = arith.constant 128 : index
    %437 = vector.load %arg5[%c0_434, %c128_435, %c128_436] : memref<5x256x256xbf16, #tpu.memory_space<vmem>>, vector<1x128x128xbf16>
    %438 = vector.shape_cast %437 : vector<1x128x128xbf16> to vector<128x128xbf16>
    %cst_437 = arith.constant dense<0.000000e+00> : vector<128x128xf32>
    %439 = tpu.matmul %436, %438, %cst_437 {dimension_numbers = #tpu.dot_dimension_numbers<[1], [0], [0], [1], [0, 0, 1, 1], [], []>} : vector<128x128xbf16>, vector<128x128xbf16>, vector<128x128xf32> -> vector<128x128xf32>
    %440 = arith.addf %434, %439 : vector<128x128xf32>
    %c0_438 = arith.constant 0 : index
    %c0_439 = arith.constant 0 : index
    %441 = vector.load %arg15[%c0_438, %c0_439] : memref<144x256xf32, #tpu.memory_space<vmem>>, vector<128x128xf32>
    %442 = arith.truncf %441 : vector<128x128xf32> to vector<128x128xbf16>
    %c1_440 = arith.constant 1 : index
    %c0_441 = arith.constant 0 : index
    %c128_442 = arith.constant 128 : index
    %443 = vector.load %arg5[%c1_440, %c0_441, %c128_442] : memref<5x256x256xbf16, #tpu.memory_space<vmem>>, vector<1x128x128xbf16>
    %444 = vector.shape_cast %443 : vector<1x128x128xbf16> to vector<128x128xbf16>
    %cst_443 = arith.constant dense<0.000000e+00> : vector<128x128xf32>
    %445 = tpu.matmul %442, %444, %cst_443 {dimension_numbers = #tpu.dot_dimension_numbers<[1], [0], [0], [1], [0, 0, 1, 1], [], []>} : vector<128x128xbf16>, vector<128x128xbf16>, vector<128x128xf32> -> vector<128x128xf32>
    %446 = arith.addf %440, %445 : vector<128x128xf32>
    %c0_444 = arith.constant 0 : index
    %c128_445 = arith.constant 128 : index
    %447 = vector.load %arg15[%c0_444, %c128_445] : memref<144x256xf32, #tpu.memory_space<vmem>>, vector<128x128xf32>
    %448 = arith.truncf %447 : vector<128x128xf32> to vector<128x128xbf16>
    %c1_446 = arith.constant 1 : index
    %c128_447 = arith.constant 128 : index
    %c128_448 = arith.constant 128 : index
    %449 = vector.load %arg5[%c1_446, %c128_447, %c128_448] : memref<5x256x256xbf16, #tpu.memory_space<vmem>>, vector<1x128x128xbf16>
    %450 = vector.shape_cast %449 : vector<1x128x128xbf16> to vector<128x128xbf16>
    %cst_449 = arith.constant dense<0.000000e+00> : vector<128x128xf32>
    %451 = tpu.matmul %448, %450, %cst_449 {dimension_numbers = #tpu.dot_dimension_numbers<[1], [0], [0], [1], [0, 0, 1, 1], [], []>} : vector<128x128xbf16>, vector<128x128xbf16>, vector<128x128xf32> -> vector<128x128xf32>
    %452 = arith.addf %446, %451 : vector<128x128xf32>
    %c8_450 = arith.constant 8 : index
    %c0_451 = arith.constant 0 : index
    %453 = vector.load %arg14[%c8_450, %c0_451] : memref<144x256xf32, #tpu.memory_space<vmem>>, vector<128x128xf32>
    %454 = arith.truncf %453 : vector<128x128xf32> to vector<128x128xbf16>
    %c2_452 = arith.constant 2 : index
    %c0_453 = arith.constant 0 : index
    %c128_454 = arith.constant 128 : index
    %455 = vector.load %arg5[%c2_452, %c0_453, %c128_454] : memref<5x256x256xbf16, #tpu.memory_space<vmem>>, vector<1x128x128xbf16>
    %456 = vector.shape_cast %455 : vector<1x128x128xbf16> to vector<128x128xbf16>
    %cst_455 = arith.constant dense<0.000000e+00> : vector<128x128xf32>
    %457 = tpu.matmul %454, %456, %cst_455 {dimension_numbers = #tpu.dot_dimension_numbers<[1], [0], [0], [1], [0, 0, 1, 1], [], []>} : vector<128x128xbf16>, vector<128x128xbf16>, vector<128x128xf32> -> vector<128x128xf32>
    %458 = arith.addf %452, %457 : vector<128x128xf32>
    %c8_456 = arith.constant 8 : index
    %c128_457 = arith.constant 128 : index
    %459 = vector.load %arg14[%c8_456, %c128_457] : memref<144x256xf32, #tpu.memory_space<vmem>>, vector<128x128xf32>
    %460 = arith.truncf %459 : vector<128x128xf32> to vector<128x128xbf16>
    %c2_458 = arith.constant 2 : index
    %c128_459 = arith.constant 128 : index
    %c128_460 = arith.constant 128 : index
    %461 = vector.load %arg5[%c2_458, %c128_459, %c128_460] : memref<5x256x256xbf16, #tpu.memory_space<vmem>>, vector<1x128x128xbf16>
    %462 = vector.shape_cast %461 : vector<1x128x128xbf16> to vector<128x128xbf16>
    %cst_461 = arith.constant dense<0.000000e+00> : vector<128x128xf32>
    %463 = tpu.matmul %460, %462, %cst_461 {dimension_numbers = #tpu.dot_dimension_numbers<[1], [0], [0], [1], [0, 0, 1, 1], [], []>} : vector<128x128xbf16>, vector<128x128xbf16>, vector<128x128xf32> -> vector<128x128xf32>
    %464 = arith.addf %458, %463 : vector<128x128xf32>
    %c8_462 = arith.constant 8 : index
    %c0_463 = arith.constant 0 : index
    %465 = vector.load %arg15[%c8_462, %c0_463] : memref<144x256xf32, #tpu.memory_space<vmem>>, vector<128x128xf32>
    %466 = arith.truncf %465 : vector<128x128xf32> to vector<128x128xbf16>
    %c3_464 = arith.constant 3 : index
    %c0_465 = arith.constant 0 : index
    %c128_466 = arith.constant 128 : index
    %467 = vector.load %arg5[%c3_464, %c0_465, %c128_466] : memref<5x256x256xbf16, #tpu.memory_space<vmem>>, vector<1x128x128xbf16>
    %468 = vector.shape_cast %467 : vector<1x128x128xbf16> to vector<128x128xbf16>
    %cst_467 = arith.constant dense<0.000000e+00> : vector<128x128xf32>
    %469 = tpu.matmul %466, %468, %cst_467 {dimension_numbers = #tpu.dot_dimension_numbers<[1], [0], [0], [1], [0, 0, 1, 1], [], []>} : vector<128x128xbf16>, vector<128x128xbf16>, vector<128x128xf32> -> vector<128x128xf32>
    %470 = arith.addf %464, %469 : vector<128x128xf32>
    %c8_468 = arith.constant 8 : index
    %c128_469 = arith.constant 128 : index
    %471 = vector.load %arg15[%c8_468, %c128_469] : memref<144x256xf32, #tpu.memory_space<vmem>>, vector<128x128xf32>
    %472 = arith.truncf %471 : vector<128x128xf32> to vector<128x128xbf16>
    %c3_470 = arith.constant 3 : index
    %c128_471 = arith.constant 128 : index
    %c128_472 = arith.constant 128 : index
    %473 = vector.load %arg5[%c3_470, %c128_471, %c128_472] : memref<5x256x256xbf16, #tpu.memory_space<vmem>>, vector<1x128x128xbf16>
    %474 = vector.shape_cast %473 : vector<1x128x128xbf16> to vector<128x128xbf16>
    %cst_473 = arith.constant dense<0.000000e+00> : vector<128x128xf32>
    %475 = tpu.matmul %472, %474, %cst_473 {dimension_numbers = #tpu.dot_dimension_numbers<[1], [0], [0], [1], [0, 0, 1, 1], [], []>} : vector<128x128xbf16>, vector<128x128xbf16>, vector<128x128xf32> -> vector<128x128xf32>
    %476 = arith.addf %470, %475 : vector<128x128xf32>
    %c16_474 = arith.constant 16 : index
    %c0_475 = arith.constant 0 : index
    %477 = vector.load %arg14[%c16_474, %c0_475] : memref<144x256xf32, #tpu.memory_space<vmem>>, vector<128x128xf32>
    %478 = arith.truncf %477 : vector<128x128xf32> to vector<128x128xbf16>
    %c4_476 = arith.constant 4 : index
    %c0_477 = arith.constant 0 : index
    %c128_478 = arith.constant 128 : index
    %479 = vector.load %arg5[%c4_476, %c0_477, %c128_478] : memref<5x256x256xbf16, #tpu.memory_space<vmem>>, vector<1x128x128xbf16>
    %480 = vector.shape_cast %479 : vector<1x128x128xbf16> to vector<128x128xbf16>
    %cst_479 = arith.constant dense<0.000000e+00> : vector<128x128xf32>
    %481 = tpu.matmul %478, %480, %cst_479 {dimension_numbers = #tpu.dot_dimension_numbers<[1], [0], [0], [1], [0, 0, 1, 1], [], []>} : vector<128x128xbf16>, vector<128x128xbf16>, vector<128x128xf32> -> vector<128x128xf32>
    %482 = arith.addf %476, %481 : vector<128x128xf32>
    %c16_480 = arith.constant 16 : index
    %c128_481 = arith.constant 128 : index
    %483 = vector.load %arg14[%c16_480, %c128_481] : memref<144x256xf32, #tpu.memory_space<vmem>>, vector<128x128xf32>
    %484 = arith.truncf %483 : vector<128x128xf32> to vector<128x128xbf16>
    %c4_482 = arith.constant 4 : index
    %c128_483 = arith.constant 128 : index
    %c128_484 = arith.constant 128 : index
    %485 = vector.load %arg5[%c4_482, %c128_483, %c128_484] : memref<5x256x256xbf16, #tpu.memory_space<vmem>>, vector<1x128x128xbf16>
    %486 = vector.shape_cast %485 : vector<1x128x128xbf16> to vector<128x128xbf16>
    %cst_485 = arith.constant dense<0.000000e+00> : vector<128x128xf32>
    %487 = tpu.matmul %484, %486, %cst_485 {dimension_numbers = #tpu.dot_dimension_numbers<[1], [0], [0], [1], [0, 0, 1, 1], [], []>} : vector<128x128xbf16>, vector<128x128xbf16>, vector<128x128xf32> -> vector<128x128xf32>
    %488 = arith.addf %482, %487 : vector<128x128xf32>
    %c0_486 = arith.constant 0 : index
    %c128_487 = arith.constant 128 : index
    %489 = vector.load %arg6[%c0_486, %c128_487] : memref<1x256xf32, #tpu.memory_space<vmem>>, vector<1x128xf32>
    %490 = vector.broadcast %489 : vector<1x128xf32> to vector<128x128xf32>
    %491 = arith.addf %488, %490 : vector<128x128xf32>
    %cst_488 = arith.constant 0.000000e+00 : f32
    %492 = vector.broadcast %cst_488 : f32 to vector<128x128xf32>
    %493 = arith.maximumf %491, %492 : vector<128x128xf32>
    %494 = vector.extract_strided_slice %493 {offsets = [0, 0], sizes = [8, 128], strides = [1, 1]} : vector<128x128xf32> to vector<8x128xf32>
    %c8_489 = arith.constant 8 : index
    %c128_490 = arith.constant 128 : index
    %495 = vector.load %arg16[%c8_489, %c128_490] : memref<80x256xf32, #tpu.memory_space<vmem>>, vector<8x128xf32>
    tpu.vector_store %arg16[%c8_489, %c128_490], %494 {strides = array<i32>} : memref<80x256xf32, #tpu.memory_space<vmem>>, vector<8x128xf32>,
    %496 = vector.extract_strided_slice %493 {offsets = [8, 0], sizes = [8, 128], strides = [1, 1]} : vector<128x128xf32> to vector<8x128xf32>
    %c8_491 = arith.constant 8 : index
    %c128_492 = arith.constant 128 : index
    %497 = vector.load %arg17[%c8_491, %c128_492] : memref<80x256xf32, #tpu.memory_space<vmem>>, vector<8x128xf32>
    tpu.vector_store %arg17[%c8_491, %c128_492], %496 {strides = array<i32>} : memref<80x256xf32, #tpu.memory_space<vmem>>, vector<8x128xf32>,
    %498 = vector.extract_strided_slice %493 {offsets = [16, 0], sizes = [8, 128], strides = [1, 1]} : vector<128x128xf32> to vector<8x128xf32>
    %c16_493 = arith.constant 16 : index
    %c128_494 = arith.constant 128 : index
    %499 = vector.load %arg16[%c16_493, %c128_494] : memref<80x256xf32, #tpu.memory_space<vmem>>, vector<8x128xf32>
    tpu.vector_store %arg16[%c16_493, %c128_494], %498 {strides = array<i32>} : memref<80x256xf32, #tpu.memory_space<vmem>>, vector<8x128xf32>,
    %500 = vector.extract_strided_slice %493 {offsets = [24, 0], sizes = [8, 128], strides = [1, 1]} : vector<128x128xf32> to vector<8x128xf32>
    %c16_495 = arith.constant 16 : index
    %c128_496 = arith.constant 128 : index
    %501 = vector.load %arg17[%c16_495, %c128_496] : memref<80x256xf32, #tpu.memory_space<vmem>>, vector<8x128xf32>
    tpu.vector_store %arg17[%c16_495, %c128_496], %500 {strides = array<i32>} : memref<80x256xf32, #tpu.memory_space<vmem>>, vector<8x128xf32>,
    %502 = vector.extract_strided_slice %493 {offsets = [32, 0], sizes = [8, 128], strides = [1, 1]} : vector<128x128xf32> to vector<8x128xf32>
    %c24_497 = arith.constant 24 : index
    %c128_498 = arith.constant 128 : index
    %503 = vector.load %arg16[%c24_497, %c128_498] : memref<80x256xf32, #tpu.memory_space<vmem>>, vector<8x128xf32>
    tpu.vector_store %arg16[%c24_497, %c128_498], %502 {strides = array<i32>} : memref<80x256xf32, #tpu.memory_space<vmem>>, vector<8x128xf32>,
    %504 = vector.extract_strided_slice %493 {offsets = [40, 0], sizes = [8, 128], strides = [1, 1]} : vector<128x128xf32> to vector<8x128xf32>
    %c24_499 = arith.constant 24 : index
    %c128_500 = arith.constant 128 : index
    %505 = vector.load %arg17[%c24_499, %c128_500] : memref<80x256xf32, #tpu.memory_space<vmem>>, vector<8x128xf32>
    tpu.vector_store %arg17[%c24_499, %c128_500], %504 {strides = array<i32>} : memref<80x256xf32, #tpu.memory_space<vmem>>, vector<8x128xf32>,
    %506 = vector.extract_strided_slice %493 {offsets = [48, 0], sizes = [8, 128], strides = [1, 1]} : vector<128x128xf32> to vector<8x128xf32>
    %c32_501 = arith.constant 32 : index
    %c128_502 = arith.constant 128 : index
    %507 = vector.load %arg16[%c32_501, %c128_502] : memref<80x256xf32, #tpu.memory_space<vmem>>, vector<8x128xf32>
    tpu.vector_store %arg16[%c32_501, %c128_502], %506 {strides = array<i32>} : memref<80x256xf32, #tpu.memory_space<vmem>>, vector<8x128xf32>,
    %508 = vector.extract_strided_slice %493 {offsets = [56, 0], sizes = [8, 128], strides = [1, 1]} : vector<128x128xf32> to vector<8x128xf32>
    %c32_503 = arith.constant 32 : index
    %c128_504 = arith.constant 128 : index
    %509 = vector.load %arg17[%c32_503, %c128_504] : memref<80x256xf32, #tpu.memory_space<vmem>>, vector<8x128xf32>
    tpu.vector_store %arg17[%c32_503, %c128_504], %508 {strides = array<i32>} : memref<80x256xf32, #tpu.memory_space<vmem>>, vector<8x128xf32>,
    %510 = vector.extract_strided_slice %493 {offsets = [64, 0], sizes = [8, 128], strides = [1, 1]} : vector<128x128xf32> to vector<8x128xf32>
    %c40_505 = arith.constant 40 : index
    %c128_506 = arith.constant 128 : index
    %511 = vector.load %arg16[%c40_505, %c128_506] : memref<80x256xf32, #tpu.memory_space<vmem>>, vector<8x128xf32>
    tpu.vector_store %arg16[%c40_505, %c128_506], %510 {strides = array<i32>} : memref<80x256xf32, #tpu.memory_space<vmem>>, vector<8x128xf32>,
    %512 = vector.extract_strided_slice %493 {offsets = [72, 0], sizes = [8, 128], strides = [1, 1]} : vector<128x128xf32> to vector<8x128xf32>
    %c40_507 = arith.constant 40 : index
    %c128_508 = arith.constant 128 : index
    %513 = vector.load %arg17[%c40_507, %c128_508] : memref<80x256xf32, #tpu.memory_space<vmem>>, vector<8x128xf32>
    tpu.vector_store %arg17[%c40_507, %c128_508], %512 {strides = array<i32>} : memref<80x256xf32, #tpu.memory_space<vmem>>, vector<8x128xf32>,
    %514 = vector.extract_strided_slice %493 {offsets = [80, 0], sizes = [8, 128], strides = [1, 1]} : vector<128x128xf32> to vector<8x128xf32>
    %c48_509 = arith.constant 48 : index
    %c128_510 = arith.constant 128 : index
    %515 = vector.load %arg16[%c48_509, %c128_510] : memref<80x256xf32, #tpu.memory_space<vmem>>, vector<8x128xf32>
    tpu.vector_store %arg16[%c48_509, %c128_510], %514 {strides = array<i32>} : memref<80x256xf32, #tpu.memory_space<vmem>>, vector<8x128xf32>,
    %516 = vector.extract_strided_slice %493 {offsets = [88, 0], sizes = [8, 128], strides = [1, 1]} : vector<128x128xf32> to vector<8x128xf32>
    %c48_511 = arith.constant 48 : index
    %c128_512 = arith.constant 128 : index
    %517 = vector.load %arg17[%c48_511, %c128_512] : memref<80x256xf32, #tpu.memory_space<vmem>>, vector<8x128xf32>
    tpu.vector_store %arg17[%c48_511, %c128_512], %516 {strides = array<i32>} : memref<80x256xf32, #tpu.memory_space<vmem>>, vector<8x128xf32>,
    %518 = vector.extract_strided_slice %493 {offsets = [96, 0], sizes = [8, 128], strides = [1, 1]} : vector<128x128xf32> to vector<8x128xf32>
    %c56_513 = arith.constant 56 : index
    %c128_514 = arith.constant 128 : index
    %519 = vector.load %arg16[%c56_513, %c128_514] : memref<80x256xf32, #tpu.memory_space<vmem>>, vector<8x128xf32>
    tpu.vector_store %arg16[%c56_513, %c128_514], %518 {strides = array<i32>} : memref<80x256xf32, #tpu.memory_space<vmem>>, vector<8x128xf32>,
    %520 = vector.extract_strided_slice %493 {offsets = [104, 0], sizes = [8, 128], strides = [1, 1]} : vector<128x128xf32> to vector<8x128xf32>
    %c56_515 = arith.constant 56 : index
    %c128_516 = arith.constant 128 : index
    %521 = vector.load %arg17[%c56_515, %c128_516] : memref<80x256xf32, #tpu.memory_space<vmem>>, vector<8x128xf32>
    tpu.vector_store %arg17[%c56_515, %c128_516], %520 {strides = array<i32>} : memref<80x256xf32, #tpu.memory_space<vmem>>, vector<8x128xf32>,
    %522 = vector.extract_strided_slice %493 {offsets = [112, 0], sizes = [8, 128], strides = [1, 1]} : vector<128x128xf32> to vector<8x128xf32>
    %c64_517 = arith.constant 64 : index
    %c128_518 = arith.constant 128 : index
    %523 = vector.load %arg16[%c64_517, %c128_518] : memref<80x256xf32, #tpu.memory_space<vmem>>, vector<8x128xf32>
    tpu.vector_store %arg16[%c64_517, %c128_518], %522 {strides = array<i32>} : memref<80x256xf32, #tpu.memory_space<vmem>>, vector<8x128xf32>,
    %524 = vector.extract_strided_slice %493 {offsets = [120, 0], sizes = [8, 128], strides = [1, 1]} : vector<128x128xf32> to vector<8x128xf32>
    %c64_519 = arith.constant 64 : index
    %c128_520 = arith.constant 128 : index
    %525 = vector.load %arg17[%c64_519, %c128_520] : memref<80x256xf32, #tpu.memory_space<vmem>>, vector<8x128xf32>
    tpu.vector_store %arg17[%c64_519, %c128_520], %524 {strides = array<i32>} : memref<80x256xf32, #tpu.memory_space<vmem>>, vector<8x128xf32>,
    %cst_521 = arith.constant 0.000000e+00 : f32
    %526 = vector.broadcast %cst_521 : f32 to vector<64x256xf32>
    %c0_522 = arith.constant 0 : index
    %c0_523 = arith.constant 0 : index
    %527 = vector.load %arg16[%c0_522, %c0_523] : memref<80x256xf32, #tpu.memory_space<vmem>>, vector<64x128xf32>
    %528 = arith.truncf %527 : vector<64x128xf32> to vector<64x128xbf16>
    %c0_524 = arith.constant 0 : index
    %c0_525 = arith.constant 0 : index
    %c0_526 = arith.constant 0 : index
    %529 = vector.load %arg7[%c0_524, %c0_525, %c0_526] : memref<5x256x256xbf16, #tpu.memory_space<vmem>>, vector<1x128x256xbf16>
    %530 = vector.shape_cast %529 : vector<1x128x256xbf16> to vector<128x256xbf16>
    %cst_527 = arith.constant dense<0.000000e+00> : vector<64x256xf32>
    %531 = tpu.matmul %528, %530, %cst_527 {dimension_numbers = #tpu.dot_dimension_numbers<[1], [0], [0], [1], [0, 0, 1, 1], [], []>} : vector<64x128xbf16>, vector<128x256xbf16>, vector<64x256xf32> -> vector<64x256xf32>
    %532 = arith.addf %526, %531 : vector<64x256xf32>
    %c0_528 = arith.constant 0 : index
    %c128_529 = arith.constant 128 : index
    %533 = vector.load %arg16[%c0_528, %c128_529] : memref<80x256xf32, #tpu.memory_space<vmem>>, vector<64x128xf32>
    %534 = arith.truncf %533 : vector<64x128xf32> to vector<64x128xbf16>
    %c0_530 = arith.constant 0 : index
    %c128_531 = arith.constant 128 : index
    %c0_532 = arith.constant 0 : index
    %535 = vector.load %arg7[%c0_530, %c128_531, %c0_532] : memref<5x256x256xbf16, #tpu.memory_space<vmem>>, vector<1x128x256xbf16>
    %536 = vector.shape_cast %535 : vector<1x128x256xbf16> to vector<128x256xbf16>
    %cst_533 = arith.constant dense<0.000000e+00> : vector<64x256xf32>
    %537 = tpu.matmul %534, %536, %cst_533 {dimension_numbers = #tpu.dot_dimension_numbers<[1], [0], [0], [1], [0, 0, 1, 1], [], []>} : vector<64x128xbf16>, vector<128x256xbf16>, vector<64x256xf32> -> vector<64x256xf32>
    %538 = arith.addf %532, %537 : vector<64x256xf32>
    %c0_534 = arith.constant 0 : index
    %c0_535 = arith.constant 0 : index
    %539 = vector.load %arg17[%c0_534, %c0_535] : memref<80x256xf32, #tpu.memory_space<vmem>>, vector<64x128xf32>
    %540 = arith.truncf %539 : vector<64x128xf32> to vector<64x128xbf16>
    %c1_536 = arith.constant 1 : index
    %c0_537 = arith.constant 0 : index
    %c0_538 = arith.constant 0 : index
    %541 = vector.load %arg7[%c1_536, %c0_537, %c0_538] : memref<5x256x256xbf16, #tpu.memory_space<vmem>>, vector<1x128x256xbf16>
    %542 = vector.shape_cast %541 : vector<1x128x256xbf16> to vector<128x256xbf16>
    %cst_539 = arith.constant dense<0.000000e+00> : vector<64x256xf32>
    %543 = tpu.matmul %540, %542, %cst_539 {dimension_numbers = #tpu.dot_dimension_numbers<[1], [0], [0], [1], [0, 0, 1, 1], [], []>} : vector<64x128xbf16>, vector<128x256xbf16>, vector<64x256xf32> -> vector<64x256xf32>
    %544 = arith.addf %538, %543 : vector<64x256xf32>
    %c0_540 = arith.constant 0 : index
    %c128_541 = arith.constant 128 : index
    %545 = vector.load %arg17[%c0_540, %c128_541] : memref<80x256xf32, #tpu.memory_space<vmem>>, vector<64x128xf32>
    %546 = arith.truncf %545 : vector<64x128xf32> to vector<64x128xbf16>
    %c1_542 = arith.constant 1 : index
    %c128_543 = arith.constant 128 : index
    %c0_544 = arith.constant 0 : index
    %547 = vector.load %arg7[%c1_542, %c128_543, %c0_544] : memref<5x256x256xbf16, #tpu.memory_space<vmem>>, vector<1x128x256xbf16>
    %548 = vector.shape_cast %547 : vector<1x128x256xbf16> to vector<128x256xbf16>
    %cst_545 = arith.constant dense<0.000000e+00> : vector<64x256xf32>
    %549 = tpu.matmul %546, %548, %cst_545 {dimension_numbers = #tpu.dot_dimension_numbers<[1], [0], [0], [1], [0, 0, 1, 1], [], []>} : vector<64x128xbf16>, vector<128x256xbf16>, vector<64x256xf32> -> vector<64x256xf32>
    %550 = arith.addf %544, %549 : vector<64x256xf32>
    %c8_546 = arith.constant 8 : index
    %c0_547 = arith.constant 0 : index
    %551 = vector.load %arg16[%c8_546, %c0_547] : memref<80x256xf32, #tpu.memory_space<vmem>>, vector<64x128xf32>
    %552 = arith.truncf %551 : vector<64x128xf32> to vector<64x128xbf16>
    %c2_548 = arith.constant 2 : index
    %c0_549 = arith.constant 0 : index
    %c0_550 = arith.constant 0 : index
    %553 = vector.load %arg7[%c2_548, %c0_549, %c0_550] : memref<5x256x256xbf16, #tpu.memory_space<vmem>>, vector<1x128x256xbf16>
    %554 = vector.shape_cast %553 : vector<1x128x256xbf16> to vector<128x256xbf16>
    %cst_551 = arith.constant dense<0.000000e+00> : vector<64x256xf32>
    %555 = tpu.matmul %552, %554, %cst_551 {dimension_numbers = #tpu.dot_dimension_numbers<[1], [0], [0], [1], [0, 0, 1, 1], [], []>} : vector<64x128xbf16>, vector<128x256xbf16>, vector<64x256xf32> -> vector<64x256xf32>
    %556 = arith.addf %550, %555 : vector<64x256xf32>
    %c8_552 = arith.constant 8 : index
    %c128_553 = arith.constant 128 : index
    %557 = vector.load %arg16[%c8_552, %c128_553] : memref<80x256xf32, #tpu.memory_space<vmem>>, vector<64x128xf32>
    %558 = arith.truncf %557 : vector<64x128xf32> to vector<64x128xbf16>
    %c2_554 = arith.constant 2 : index
    %c128_555 = arith.constant 128 : index
    %c0_556 = arith.constant 0 : index
    %559 = vector.load %arg7[%c2_554, %c128_555, %c0_556] : memref<5x256x256xbf16, #tpu.memory_space<vmem>>, vector<1x128x256xbf16>
    %560 = vector.shape_cast %559 : vector<1x128x256xbf16> to vector<128x256xbf16>
    %cst_557 = arith.constant dense<0.000000e+00> : vector<64x256xf32>
    %561 = tpu.matmul %558, %560, %cst_557 {dimension_numbers = #tpu.dot_dimension_numbers<[1], [0], [0], [1], [0, 0, 1, 1], [], []>} : vector<64x128xbf16>, vector<128x256xbf16>, vector<64x256xf32> -> vector<64x256xf32>
    %562 = arith.addf %556, %561 : vector<64x256xf32>
    %c8_558 = arith.constant 8 : index
    %c0_559 = arith.constant 0 : index
    %563 = vector.load %arg17[%c8_558, %c0_559] : memref<80x256xf32, #tpu.memory_space<vmem>>, vector<64x128xf32>
    %564 = arith.truncf %563 : vector<64x128xf32> to vector<64x128xbf16>
    %c3_560 = arith.constant 3 : index
    %c0_561 = arith.constant 0 : index
    %c0_562 = arith.constant 0 : index
    %565 = vector.load %arg7[%c3_560, %c0_561, %c0_562] : memref<5x256x256xbf16, #tpu.memory_space<vmem>>, vector<1x128x256xbf16>
    %566 = vector.shape_cast %565 : vector<1x128x256xbf16> to vector<128x256xbf16>
    %cst_563 = arith.constant dense<0.000000e+00> : vector<64x256xf32>
    %567 = tpu.matmul %564, %566, %cst_563 {dimension_numbers = #tpu.dot_dimension_numbers<[1], [0], [0], [1], [0, 0, 1, 1], [], []>} : vector<64x128xbf16>, vector<128x256xbf16>, vector<64x256xf32> -> vector<64x256xf32>
    %568 = arith.addf %562, %567 : vector<64x256xf32>
    %c8_564 = arith.constant 8 : index
    %c128_565 = arith.constant 128 : index
    %569 = vector.load %arg17[%c8_564, %c128_565] : memref<80x256xf32, #tpu.memory_space<vmem>>, vector<64x128xf32>
    %570 = arith.truncf %569 : vector<64x128xf32> to vector<64x128xbf16>
    %c3_566 = arith.constant 3 : index
    %c128_567 = arith.constant 128 : index
    %c0_568 = arith.constant 0 : index
    %571 = vector.load %arg7[%c3_566, %c128_567, %c0_568] : memref<5x256x256xbf16, #tpu.memory_space<vmem>>, vector<1x128x256xbf16>
    %572 = vector.shape_cast %571 : vector<1x128x256xbf16> to vector<128x256xbf16>
    %cst_569 = arith.constant dense<0.000000e+00> : vector<64x256xf32>
    %573 = tpu.matmul %570, %572, %cst_569 {dimension_numbers = #tpu.dot_dimension_numbers<[1], [0], [0], [1], [0, 0, 1, 1], [], []>} : vector<64x128xbf16>, vector<128x256xbf16>, vector<64x256xf32> -> vector<64x256xf32>
    %574 = arith.addf %568, %573 : vector<64x256xf32>
    %c16_570 = arith.constant 16 : index
    %c0_571 = arith.constant 0 : index
    %575 = vector.load %arg16[%c16_570, %c0_571] : memref<80x256xf32, #tpu.memory_space<vmem>>, vector<64x128xf32>
    %576 = arith.truncf %575 : vector<64x128xf32> to vector<64x128xbf16>
    %c4_572 = arith.constant 4 : index
    %c0_573 = arith.constant 0 : index
    %c0_574 = arith.constant 0 : index
    %577 = vector.load %arg7[%c4_572, %c0_573, %c0_574] : memref<5x256x256xbf16, #tpu.memory_space<vmem>>, vector<1x128x256xbf16>
    %578 = vector.shape_cast %577 : vector<1x128x256xbf16> to vector<128x256xbf16>
    %cst_575 = arith.constant dense<0.000000e+00> : vector<64x256xf32>
    %579 = tpu.matmul %576, %578, %cst_575 {dimension_numbers = #tpu.dot_dimension_numbers<[1], [0], [0], [1], [0, 0, 1, 1], [], []>} : vector<64x128xbf16>, vector<128x256xbf16>, vector<64x256xf32> -> vector<64x256xf32>
    %580 = arith.addf %574, %579 : vector<64x256xf32>
    %c16_576 = arith.constant 16 : index
    %c128_577 = arith.constant 128 : index
    %581 = vector.load %arg16[%c16_576, %c128_577] : memref<80x256xf32, #tpu.memory_space<vmem>>, vector<64x128xf32>
    %582 = arith.truncf %581 : vector<64x128xf32> to vector<64x128xbf16>
    %c4_578 = arith.constant 4 : index
    %c128_579 = arith.constant 128 : index
    %c0_580 = arith.constant 0 : index
    %583 = vector.load %arg7[%c4_578, %c128_579, %c0_580] : memref<5x256x256xbf16, #tpu.memory_space<vmem>>, vector<1x128x256xbf16>
    %584 = vector.shape_cast %583 : vector<1x128x256xbf16> to vector<128x256xbf16>
    %cst_581 = arith.constant dense<0.000000e+00> : vector<64x256xf32>
    %585 = tpu.matmul %582, %584, %cst_581 {dimension_numbers = #tpu.dot_dimension_numbers<[1], [0], [0], [1], [0, 0, 1, 1], [], []>} : vector<64x128xbf16>, vector<128x256xbf16>, vector<64x256xf32> -> vector<64x256xf32>
    %586 = arith.addf %580, %585 : vector<64x256xf32>
    %c0_582 = arith.constant 0 : index
    %c0_583 = arith.constant 0 : index
    %587 = vector.load %arg8[%c0_582, %c0_583] : memref<1x256xf32, #tpu.memory_space<vmem>>, vector<1x256xf32>
    %588 = vector.broadcast %587 : vector<1x256xf32> to vector<64x256xf32>
    %589 = arith.addf %586, %588 : vector<64x256xf32>
    %cst_584 = arith.constant 0.000000e+00 : f32
    %590 = vector.broadcast %cst_584 : f32 to vector<64x256xf32>
    %591 = arith.maximumf %589, %590 : vector<64x256xf32>
    %592 = vector.extract_strided_slice %591 {offsets = [0, 0], sizes = [8, 256], strides = [1, 1]} : vector<64x256xf32> to vector<8x256xf32>
    %c8_585 = arith.constant 8 : index
    %c0_586 = arith.constant 0 : index
    %593 = vector.load %arg18[%c8_585, %c0_586] : memref<48x256xf32, #tpu.memory_space<vmem>>, vector<8x256xf32>
    tpu.vector_store %arg18[%c8_585, %c0_586], %592 {strides = array<i32>} : memref<48x256xf32, #tpu.memory_space<vmem>>, vector<8x256xf32>,
    %594 = vector.extract_strided_slice %591 {offsets = [8, 0], sizes = [8, 256], strides = [1, 1]} : vector<64x256xf32> to vector<8x256xf32>
    %c8_587 = arith.constant 8 : index
    %c0_588 = arith.constant 0 : index
    %595 = vector.load %arg19[%c8_587, %c0_588] : memref<48x256xf32, #tpu.memory_space<vmem>>, vector<8x256xf32>
    tpu.vector_store %arg19[%c8_587, %c0_588], %594 {strides = array<i32>} : memref<48x256xf32, #tpu.memory_space<vmem>>, vector<8x256xf32>,
    %596 = vector.extract_strided_slice %591 {offsets = [16, 0], sizes = [8, 256], strides = [1, 1]} : vector<64x256xf32> to vector<8x256xf32>
    %c16_589 = arith.constant 16 : index
    %c0_590 = arith.constant 0 : index
    %597 = vector.load %arg18[%c16_589, %c0_590] : memref<48x256xf32, #tpu.memory_space<vmem>>, vector<8x256xf32>
    tpu.vector_store %arg18[%c16_589, %c0_590], %596 {strides = array<i32>} : memref<48x256xf32, #tpu.memory_space<vmem>>, vector<8x256xf32>,
    %598 = vector.extract_strided_slice %591 {offsets = [24, 0], sizes = [8, 256], strides = [1, 1]} : vector<64x256xf32> to vector<8x256xf32>
    %c16_591 = arith.constant 16 : index
    %c0_592 = arith.constant 0 : index
    %599 = vector.load %arg19[%c16_591, %c0_592] : memref<48x256xf32, #tpu.memory_space<vmem>>, vector<8x256xf32>
    tpu.vector_store %arg19[%c16_591, %c0_592], %598 {strides = array<i32>} : memref<48x256xf32, #tpu.memory_space<vmem>>, vector<8x256xf32>,
    %600 = vector.extract_strided_slice %591 {offsets = [32, 0], sizes = [8, 256], strides = [1, 1]} : vector<64x256xf32> to vector<8x256xf32>
    %c24_593 = arith.constant 24 : index
    %c0_594 = arith.constant 0 : index
    %601 = vector.load %arg18[%c24_593, %c0_594] : memref<48x256xf32, #tpu.memory_space<vmem>>, vector<8x256xf32>
    tpu.vector_store %arg18[%c24_593, %c0_594], %600 {strides = array<i32>} : memref<48x256xf32, #tpu.memory_space<vmem>>, vector<8x256xf32>,
    %602 = vector.extract_strided_slice %591 {offsets = [40, 0], sizes = [8, 256], strides = [1, 1]} : vector<64x256xf32> to vector<8x256xf32>
    %c24_595 = arith.constant 24 : index
    %c0_596 = arith.constant 0 : index
    %603 = vector.load %arg19[%c24_595, %c0_596] : memref<48x256xf32, #tpu.memory_space<vmem>>, vector<8x256xf32>
    tpu.vector_store %arg19[%c24_595, %c0_596], %602 {strides = array<i32>} : memref<48x256xf32, #tpu.memory_space<vmem>>, vector<8x256xf32>,
    %604 = vector.extract_strided_slice %591 {offsets = [48, 0], sizes = [8, 256], strides = [1, 1]} : vector<64x256xf32> to vector<8x256xf32>
    %c32_597 = arith.constant 32 : index
    %c0_598 = arith.constant 0 : index
    %605 = vector.load %arg18[%c32_597, %c0_598] : memref<48x256xf32, #tpu.memory_space<vmem>>, vector<8x256xf32>
    tpu.vector_store %arg18[%c32_597, %c0_598], %604 {strides = array<i32>} : memref<48x256xf32, #tpu.memory_space<vmem>>, vector<8x256xf32>,
    %606 = vector.extract_strided_slice %591 {offsets = [56, 0], sizes = [8, 256], strides = [1, 1]} : vector<64x256xf32> to vector<8x256xf32>
    %c32_599 = arith.constant 32 : index
    %c0_600 = arith.constant 0 : index
    %607 = vector.load %arg19[%c32_599, %c0_600] : memref<48x256xf32, #tpu.memory_space<vmem>>, vector<8x256xf32>
    tpu.vector_store %arg19[%c32_599, %c0_600], %606 {strides = array<i32>} : memref<48x256xf32, #tpu.memory_space<vmem>>, vector<8x256xf32>,
    %cst_601 = arith.constant 0.000000e+00 : f32
    %608 = vector.broadcast %cst_601 : f32 to vector<32x256xf32>
    %c0_602 = arith.constant 0 : index
    %c0_603 = arith.constant 0 : index
    %609 = vector.load %arg18[%c0_602, %c0_603] : memref<48x256xf32, #tpu.memory_space<vmem>>, vector<32x128xf32>
    %610 = arith.truncf %609 : vector<32x128xf32> to vector<32x128xbf16>
    %c0_604 = arith.constant 0 : index
    %c0_605 = arith.constant 0 : index
    %c0_606 = arith.constant 0 : index
    %611 = vector.load %arg9[%c0_604, %c0_605, %c0_606] : memref<5x256x256xbf16, #tpu.memory_space<vmem>>, vector<1x128x256xbf16>
    %612 = vector.shape_cast %611 : vector<1x128x256xbf16> to vector<128x256xbf16>
    %cst_607 = arith.constant dense<0.000000e+00> : vector<32x256xf32>
    %613 = tpu.matmul %610, %612, %cst_607 {dimension_numbers = #tpu.dot_dimension_numbers<[1], [0], [0], [1], [0, 0, 1, 1], [], []>} : vector<32x128xbf16>, vector<128x256xbf16>, vector<32x256xf32> -> vector<32x256xf32>
    %614 = arith.addf %608, %613 : vector<32x256xf32>
    %c0_608 = arith.constant 0 : index
    %c128_609 = arith.constant 128 : index
    %615 = vector.load %arg18[%c0_608, %c128_609] : memref<48x256xf32, #tpu.memory_space<vmem>>, vector<32x128xf32>
    %616 = arith.truncf %615 : vector<32x128xf32> to vector<32x128xbf16>
    %c0_610 = arith.constant 0 : index
    %c128_611 = arith.constant 128 : index
    %c0_612 = arith.constant 0 : index
    %617 = vector.load %arg9[%c0_610, %c128_611, %c0_612] : memref<5x256x256xbf16, #tpu.memory_space<vmem>>, vector<1x128x256xbf16>
    %618 = vector.shape_cast %617 : vector<1x128x256xbf16> to vector<128x256xbf16>
    %cst_613 = arith.constant dense<0.000000e+00> : vector<32x256xf32>
    %619 = tpu.matmul %616, %618, %cst_613 {dimension_numbers = #tpu.dot_dimension_numbers<[1], [0], [0], [1], [0, 0, 1, 1], [], []>} : vector<32x128xbf16>, vector<128x256xbf16>, vector<32x256xf32> -> vector<32x256xf32>
    %620 = arith.addf %614, %619 : vector<32x256xf32>
    %c0_614 = arith.constant 0 : index
    %c0_615 = arith.constant 0 : index
    %621 = vector.load %arg19[%c0_614, %c0_615] : memref<48x256xf32, #tpu.memory_space<vmem>>, vector<32x128xf32>
    %622 = arith.truncf %621 : vector<32x128xf32> to vector<32x128xbf16>
    %c1_616 = arith.constant 1 : index
    %c0_617 = arith.constant 0 : index
    %c0_618 = arith.constant 0 : index
    %623 = vector.load %arg9[%c1_616, %c0_617, %c0_618] : memref<5x256x256xbf16, #tpu.memory_space<vmem>>, vector<1x128x256xbf16>
    %624 = vector.shape_cast %623 : vector<1x128x256xbf16> to vector<128x256xbf16>
    %cst_619 = arith.constant dense<0.000000e+00> : vector<32x256xf32>
    %625 = tpu.matmul %622, %624, %cst_619 {dimension_numbers = #tpu.dot_dimension_numbers<[1], [0], [0], [1], [0, 0, 1, 1], [], []>} : vector<32x128xbf16>, vector<128x256xbf16>, vector<32x256xf32> -> vector<32x256xf32>
    %626 = arith.addf %620, %625 : vector<32x256xf32>
    %c0_620 = arith.constant 0 : index
    %c128_621 = arith.constant 128 : index
    %627 = vector.load %arg19[%c0_620, %c128_621] : memref<48x256xf32, #tpu.memory_space<vmem>>, vector<32x128xf32>
    %628 = arith.truncf %627 : vector<32x128xf32> to vector<32x128xbf16>
    %c1_622 = arith.constant 1 : index
    %c128_623 = arith.constant 128 : index
    %c0_624 = arith.constant 0 : index
    %629 = vector.load %arg9[%c1_622, %c128_623, %c0_624] : memref<5x256x256xbf16, #tpu.memory_space<vmem>>, vector<1x128x256xbf16>
    %630 = vector.shape_cast %629 : vector<1x128x256xbf16> to vector<128x256xbf16>
    %cst_625 = arith.constant dense<0.000000e+00> : vector<32x256xf32>
    %631 = tpu.matmul %628, %630, %cst_625 {dimension_numbers = #tpu.dot_dimension_numbers<[1], [0], [0], [1], [0, 0, 1, 1], [], []>} : vector<32x128xbf16>, vector<128x256xbf16>, vector<32x256xf32> -> vector<32x256xf32>
    %632 = arith.addf %626, %631 : vector<32x256xf32>
    %c8_626 = arith.constant 8 : index
    %c0_627 = arith.constant 0 : index
    %633 = vector.load %arg18[%c8_626, %c0_627] : memref<48x256xf32, #tpu.memory_space<vmem>>, vector<32x128xf32>
    %634 = arith.truncf %633 : vector<32x128xf32> to vector<32x128xbf16>
    %c2_628 = arith.constant 2 : index
    %c0_629 = arith.constant 0 : index
    %c0_630 = arith.constant 0 : index
    %635 = vector.load %arg9[%c2_628, %c0_629, %c0_630] : memref<5x256x256xbf16, #tpu.memory_space<vmem>>, vector<1x128x256xbf16>
    %636 = vector.shape_cast %635 : vector<1x128x256xbf16> to vector<128x256xbf16>
    %cst_631 = arith.constant dense<0.000000e+00> : vector<32x256xf32>
    %637 = tpu.matmul %634, %636, %cst_631 {dimension_numbers = #tpu.dot_dimension_numbers<[1], [0], [0], [1], [0, 0, 1, 1], [], []>} : vector<32x128xbf16>, vector<128x256xbf16>, vector<32x256xf32> -> vector<32x256xf32>
    %638 = arith.addf %632, %637 : vector<32x256xf32>
    %c8_632 = arith.constant 8 : index
    %c128_633 = arith.constant 128 : index
    %639 = vector.load %arg18[%c8_632, %c128_633] : memref<48x256xf32, #tpu.memory_space<vmem>>, vector<32x128xf32>
    %640 = arith.truncf %639 : vector<32x128xf32> to vector<32x128xbf16>
    %c2_634 = arith.constant 2 : index
    %c128_635 = arith.constant 128 : index
    %c0_636 = arith.constant 0 : index
    %641 = vector.load %arg9[%c2_634, %c128_635, %c0_636] : memref<5x256x256xbf16, #tpu.memory_space<vmem>>, vector<1x128x256xbf16>
    %642 = vector.shape_cast %641 : vector<1x128x256xbf16> to vector<128x256xbf16>
    %cst_637 = arith.constant dense<0.000000e+00> : vector<32x256xf32>
    %643 = tpu.matmul %640, %642, %cst_637 {dimension_numbers = #tpu.dot_dimension_numbers<[1], [0], [0], [1], [0, 0, 1, 1], [], []>} : vector<32x128xbf16>, vector<128x256xbf16>, vector<32x256xf32> -> vector<32x256xf32>
    %644 = arith.addf %638, %643 : vector<32x256xf32>
    %c8_638 = arith.constant 8 : index
    %c0_639 = arith.constant 0 : index
    %645 = vector.load %arg19[%c8_638, %c0_639] : memref<48x256xf32, #tpu.memory_space<vmem>>, vector<32x128xf32>
    %646 = arith.truncf %645 : vector<32x128xf32> to vector<32x128xbf16>
    %c3_640 = arith.constant 3 : index
    %c0_641 = arith.constant 0 : index
    %c0_642 = arith.constant 0 : index
    %647 = vector.load %arg9[%c3_640, %c0_641, %c0_642] : memref<5x256x256xbf16, #tpu.memory_space<vmem>>, vector<1x128x256xbf16>
    %648 = vector.shape_cast %647 : vector<1x128x256xbf16> to vector<128x256xbf16>
    %cst_643 = arith.constant dense<0.000000e+00> : vector<32x256xf32>
    %649 = tpu.matmul %646, %648, %cst_643 {dimension_numbers = #tpu.dot_dimension_numbers<[1], [0], [0], [1], [0, 0, 1, 1], [], []>} : vector<32x128xbf16>, vector<128x256xbf16>, vector<32x256xf32> -> vector<32x256xf32>
    %650 = arith.addf %644, %649 : vector<32x256xf32>
    %c8_644 = arith.constant 8 : index
    %c128_645 = arith.constant 128 : index
    %651 = vector.load %arg19[%c8_644, %c128_645] : memref<48x256xf32, #tpu.memory_space<vmem>>, vector<32x128xf32>
    %652 = arith.truncf %651 : vector<32x128xf32> to vector<32x128xbf16>
    %c3_646 = arith.constant 3 : index
    %c128_647 = arith.constant 128 : index
    %c0_648 = arith.constant 0 : index
    %653 = vector.load %arg9[%c3_646, %c128_647, %c0_648] : memref<5x256x256xbf16, #tpu.memory_space<vmem>>, vector<1x128x256xbf16>
    %654 = vector.shape_cast %653 : vector<1x128x256xbf16> to vector<128x256xbf16>
    %cst_649 = arith.constant dense<0.000000e+00> : vector<32x256xf32>
    %655 = tpu.matmul %652, %654, %cst_649 {dimension_numbers = #tpu.dot_dimension_numbers<[1], [0], [0], [1], [0, 0, 1, 1], [], []>} : vector<32x128xbf16>, vector<128x256xbf16>, vector<32x256xf32> -> vector<32x256xf32>
    %656 = arith.addf %650, %655 : vector<32x256xf32>
    %c16_650 = arith.constant 16 : index
    %c0_651 = arith.constant 0 : index
    %657 = vector.load %arg18[%c16_650, %c0_651] : memref<48x256xf32, #tpu.memory_space<vmem>>, vector<32x128xf32>
    %658 = arith.truncf %657 : vector<32x128xf32> to vector<32x128xbf16>
    %c4_652 = arith.constant 4 : index
    %c0_653 = arith.constant 0 : index
    %c0_654 = arith.constant 0 : index
    %659 = vector.load %arg9[%c4_652, %c0_653, %c0_654] : memref<5x256x256xbf16, #tpu.memory_space<vmem>>, vector<1x128x256xbf16>
    %660 = vector.shape_cast %659 : vector<1x128x256xbf16> to vector<128x256xbf16>
    %cst_655 = arith.constant dense<0.000000e+00> : vector<32x256xf32>
    %661 = tpu.matmul %658, %660, %cst_655 {dimension_numbers = #tpu.dot_dimension_numbers<[1], [0], [0], [1], [0, 0, 1, 1], [], []>} : vector<32x128xbf16>, vector<128x256xbf16>, vector<32x256xf32> -> vector<32x256xf32>
    %662 = arith.addf %656, %661 : vector<32x256xf32>
    %c16_656 = arith.constant 16 : index
    %c128_657 = arith.constant 128 : index
    %663 = vector.load %arg18[%c16_656, %c128_657] : memref<48x256xf32, #tpu.memory_space<vmem>>, vector<32x128xf32>
    %664 = arith.truncf %663 : vector<32x128xf32> to vector<32x128xbf16>
    %c4_658 = arith.constant 4 : index
    %c128_659 = arith.constant 128 : index
    %c0_660 = arith.constant 0 : index
    %665 = vector.load %arg9[%c4_658, %c128_659, %c0_660] : memref<5x256x256xbf16, #tpu.memory_space<vmem>>, vector<1x128x256xbf16>
    %666 = vector.shape_cast %665 : vector<1x128x256xbf16> to vector<128x256xbf16>
    %cst_661 = arith.constant dense<0.000000e+00> : vector<32x256xf32>
    %667 = tpu.matmul %664, %666, %cst_661 {dimension_numbers = #tpu.dot_dimension_numbers<[1], [0], [0], [1], [0, 0, 1, 1], [], []>} : vector<32x128xbf16>, vector<128x256xbf16>, vector<32x256xf32> -> vector<32x256xf32>
    %668 = arith.addf %662, %667 : vector<32x256xf32>
    %c0_662 = arith.constant 0 : index
    %c0_663 = arith.constant 0 : index
    %669 = vector.load %arg10[%c0_662, %c0_663] : memref<1x256xf32, #tpu.memory_space<vmem>>, vector<1x256xf32>
    %670 = vector.broadcast %669 : vector<1x256xf32> to vector<32x256xf32>
    %671 = arith.addf %668, %670 : vector<32x256xf32>
    %cst_664 = arith.constant 0.000000e+00 : f32
    %672 = vector.broadcast %cst_664 : f32 to vector<32x256xf32>
    %673 = arith.maximumf %671, %672 : vector<32x256xf32>
    %c0_665 = arith.constant 0 : index
    %c0_666 = arith.constant 0 : index
    %674 = vector.load %arg11[%c0_665, %c0_666] : memref<32x256xf32, #tpu.memory_space<vmem>>, vector<32x256xf32>
    %675 = arith.mulf %673, %674 : vector<32x256xf32>
    %cst_667 = arith.constant dense<0.000000e+00> : vector<32xf32>
    %676 = vector.multi_reduction <add>, %675, %cst_667 [1] : vector<32x256xf32> to vector<32xf32>
    %677 = vector.shape_cast %676 : vector<32xf32> to vector<32x1xf32>
    %678 = vector.extract_strided_slice %677 {offsets = [0, 0], sizes = [8, 1], strides = [1, 1]} : vector<32x1xf32> to vector<8x1xf32>
    %679 = vector.extract_strided_slice %677 {offsets = [8, 0], sizes = [8, 1], strides = [1, 1]} : vector<32x1xf32> to vector<8x1xf32>
    %680 = arith.addf %678, %679 : vector<8x1xf32>
    %681 = vector.extract_strided_slice %677 {offsets = [16, 0], sizes = [8, 1], strides = [1, 1]} : vector<32x1xf32> to vector<8x1xf32>
    %682 = arith.addf %680, %681 : vector<8x1xf32>
    %683 = vector.extract_strided_slice %677 {offsets = [24, 0], sizes = [8, 1], strides = [1, 1]} : vector<32x1xf32> to vector<8x1xf32>
    %684 = arith.addf %682, %683 : vector<8x1xf32>
    %c0_668 = arith.constant 0 : index
    %c0_669 = arith.constant 0 : index
    %685 = vector.load %arg12[%c0_668, %c0_669] : memref<1x1xf32, #tpu.memory_space<vmem>>, vector<1x1xf32>
    %686 = vector.broadcast %685 : vector<1x1xf32> to vector<8x1xf32>
    %687 = arith.addf %684, %686 : vector<8x1xf32>
    %c0_670 = arith.constant 0 : index
    %c0_671 = arith.constant 0 : index
    %688 = vector.load %arg13[%c0_670, %c0_671] : memref<8x1xf32, #tpu.memory_space<vmem>>, vector<8x1xf32>
    tpu.vector_store %arg13[%c0_670, %c0_671], %687 {strides = array<i32>} : memref<8x1xf32, #tpu.memory_space<vmem>>, vector<8x1xf32>,
    return
  }
  func.func @transform_0(%arg0: i32) -> (i32, i32, i32) {
    %c0_i32 = arith.constant 0 : i32
    %c0_i32_0 = arith.constant 0 : i32
    %c0_i32_1 = arith.constant 0 : i32
    return %arg0, %c0_i32, %c0_i32_0 : i32, i32, i32
  }
  func.func @transform_1(%arg0: i32) -> (i32, i32, i32) {
    %c0_i32 = arith.constant 0 : i32
    %c0_i32_0 = arith.constant 0 : i32
    %c0_i32_1 = arith.constant 0 : i32
    return %arg0, %c0_i32, %c0_i32_0 : i32, i32, i32
  }
  func.func @transform_2(%arg0: i32) -> (i32, i32, i32) {
    %c0_i32 = arith.constant 0 : i32
    %c0_i32_0 = arith.constant 0 : i32
    %c0_i32_1 = arith.constant 0 : i32
    %c0_i32_2 = arith.constant 0 : i32
    return %c0_i32, %c0_i32_0, %c0_i32_1 : i32, i32, i32
  }
  func.func @transform_3(%arg0: i32) -> (i32, i32) {
    %c0_i32 = arith.constant 0 : i32
    %c0_i32_0 = arith.constant 0 : i32
    %c0_i32_1 = arith.constant 0 : i32
    return %c0_i32, %c0_i32_0 : i32, i32
  }
  func.func @transform_4(%arg0: i32) -> (i32, i32, i32) {
    %c0_i32 = arith.constant 0 : i32
    %c0_i32_0 = arith.constant 0 : i32
    %c0_i32_1 = arith.constant 0 : i32
    %c0_i32_2 = arith.constant 0 : i32
    return %c0_i32, %c0_i32_0, %c0_i32_1 : i32, i32, i32
  }
  func.func @transform_5(%arg0: i32) -> (i32, i32) {
    %c0_i32 = arith.constant 0 : i32
    %c0_i32_0 = arith.constant 0 : i32
    %c0_i32_1 = arith.constant 0 : i32
    return %c0_i32, %c0_i32_0 : i32, i32
  }
  func.func @transform_6(%arg0: i32) -> (i32, i32, i32) {
    %c0_i32 = arith.constant 0 : i32
    %c0_i32_0 = arith.constant 0 : i32
    %c0_i32_1 = arith.constant 0 : i32
    %c0_i32_2 = arith.constant 0 : i32
    return %c0_i32, %c0_i32_0, %c0_i32_1 : i32, i32, i32
  }
  func.func @transform_7(%arg0: i32) -> (i32, i32) {
    %c0_i32 = arith.constant 0 : i32
    %c0_i32_0 = arith.constant 0 : i32
    %c0_i32_1 = arith.constant 0 : i32
    return %c0_i32, %c0_i32_0 : i32, i32
  }
  func.func @transform_8(%arg0: i32) -> (i32, i32, i32) {
    %c0_i32 = arith.constant 0 : i32
    %c0_i32_0 = arith.constant 0 : i32
    %c0_i32_1 = arith.constant 0 : i32
    %c0_i32_2 = arith.constant 0 : i32
    return %c0_i32, %c0_i32_0, %c0_i32_1 : i32, i32, i32
  }
  func.func @transform_9(%arg0: i32) -> (i32, i32) {
    %c0_i32 = arith.constant 0 : i32
    %c0_i32_0 = arith.constant 0 : i32
    %c0_i32_1 = arith.constant 0 : i32
    return %c0_i32, %c0_i32_0 : i32, i32
  }
  func.func @transform_10(%arg0: i32) -> (i32, i32) {
    %c0_i32 = arith.constant 0 : i32
    %c0_i32_0 = arith.constant 0 : i32
    %c0_i32_1 = arith.constant 0 : i32
    return %c0_i32, %c0_i32_0 : i32, i32
  }
  func.func @transform_11(%arg0: i32) -> (i32, i32) {
    %c0_i32 = arith.constant 0 : i32
    %c0_i32_0 = arith.constant 0 : i32
    %c0_i32_1 = arith.constant 0 : i32
    return %c0_i32, %c0_i32_0 : i32, i32
  }
  func.func @transform_12(%arg0: i32) -> (i32, i32) {
    %c0_i32 = arith.constant 0 : i32
    %c0_i32_0 = arith.constant 0 : i32
    return %arg0, %c0_i32 : i32, i32
  }
}

</mosaic_0001>

<bundles_post_ra>
// kernel: forward.1
= control target key start
LH: loop header
LB: loop body
LE: loop exit
PB: predicated region body
PF: predicated region fallthrough
CT: control target
= control target key end

     0   :  { %s17395_s23 = smov 0   ;;  %s20610_s0 = inlined_call_operand.vmem [shape: f32[2,272,128], index: 0, kind: input, shape index: {}]   ;;  %s20611_s1 = inlined_call_operand.vmem [shape: f32[2,272,128], index: 1, kind: input, shape index: {}]   ;;  %s20612_s2 = inlined_call_operand.vmem [shape: bf16[5,128,256], index: 2, kind: input, shape index: {}]   ;;  %s20613_s3 = inlined_call_operand.vmem [shape: f32[1,256], index: 3, kind: input, shape index: {}]   ;;  %s20614_s4 = inlined_call_operand.vmem [shape: bf16[5,256,256], index: 4, kind: input, shape index: {}]   ;;  %s20615_s5 = inlined_call_operand.vmem [shape: f32[1,256], index: 5, kind: input, shape index: {}]   ;;  %s20616_s6 = inlined_call_operand.vmem [shape: bf16[5,256,256], index: 6, kind: input, shape index: {}]   ;;  %s20617_s7 = inlined_call_operand.vmem [shape: f32[1,256], index: 7, kind: input, shape index: {}]   ;;  %s20618_s8 = inlined_call_operand.vmem [shape: bf16[5,256,256], index: 8, kind: input, shape index: {}]   ;;  %s20619_s9 = inlined_call_operand.vmem [shape: f32[1,256], index: 9, kind: input, shape index: {}]   ;;  %s20620_s10 = inlined_call_operand.vmem [shape: f32[32,256], index: 10, kind: input, shape index: {}]   ;;  %s20621_s11 = inlined_call_operand.<no memory space> [shape: f32[1,1], index: 11, kind: input, shape index: {}]   ;;  %s20622_s12 = inlined_call_operand.vmem [shape: f32[16,1], index: 12, kind: output, shape index: {}]  }
   0x1   :  { %v17_v0 = vstv %s20621_s11 }
   0x2   :  { %18 = vst [vmem:[#allocation8] sm:$0x1] %v17_v0 }
   0x3 LB: > { %s12399_s24 = sadd.s32 4294967295, %s17323_s23   ;;  %p12403_p0 = scmp.ge.s32.totalorder %s17323_s23, 1  ;;  %s17323_s23 = sphi %s17395_s23, %s24_s23  }
   0x4   : > { %p374_p1 = scmp.lt.s32.totalorder %s17323_s23, 3 }
   0x6   : > { %p375_p2 = pnand %p12403_p0, %p374_p1 }
   0x8   : > { %378 = sbr.rel (%p375_p2) target bundleno = 2245 (0x8c5), region = 68 }
   0xf   : > { %v16515_v1 = vld [vmem:[%s20612_s2 + $0x80] ss:$8 sps:$4 sm:$0xff]   ;;  %v16516_v2 = vld [vmem:[%s20612_s2 + $0x84] ss:$8 sps:$4 sm:$0xff]   ;;  %v16517_v3 = vld [vmem:[%s20612_s2 + $0x90] ss:$8 sps:$4 sm:$0xff]  }
  0x10   : > { %14464 = vmatprep.subr.bf16.mxu0 %v16515_v1  ;;  %14624 = vmatprep.subr.bf16.mxu1 %v16516_v2  ;;  %v16518_v4 = vld [vmem:[%s20612_s2 + $0x94] ss:$8 sps:$4 sm:$0xff]   ;;  %v16519_v5 = vld [vmem:[%s20612_s2 + $0xa0] ss:$8 sps:$4 sm:$0xff]   ;;  %v16520_v6 = vld [vmem:[%s20612_s2 + $0xa4] ss:$8 sps:$4 sm:$0xff]  }
  0x11   : > { %14465 = vmatpush3.bf16.msra.mxu0 %v16515_v1  ;;  %14625 = vmatpush3.bf16.msra.mxu1 %v16516_v2  ;;  %v16521_v7 = vld [vmem:[%s20612_s2 + $0xb0] ss:$8 sps:$4 sm:$0xff]   ;;  %v16522_v8 = vld [vmem:[%s20612_s2 + $0xb4] ss:$8 sps:$4 sm:$0xff]   ;;  %v16523_v9 = vld [vmem:[%s20612_s2 + $0xc0] ss:$8 sps:$4 sm:$0xff]  }
  0x12   : > { %14466 = vmatprep.subr.bf16.mxu0 %v16517_v3  ;;  %14626 = vmatprep.subr.bf16.mxu1 %v16518_v4  ;;  %v16524_v10 = vld [vmem:[%s20612_s2 + $0xc4] ss:$8 sps:$4 sm:$0xff]   ;;  %v16525_v11 = vld [vmem:[%s20612_s2 + $0xd0] ss:$8 sps:$4 sm:$0xff]   ;;  %p420_p3 = scmp.lt.s32.totalorder %s12399_s24, 1  ;;  %vm12332_vm0 = vcmask 7168  }
  0x13   : > { %v16526_v12 = vld [vmem:[%s20612_s2 + $0xd4] ss:$8 sps:$4 sm:$0xff]   ;;  %v16527_v13 = vld [vmem:[%s20612_s2 + $0xe0] ss:$8 sps:$4 sm:$0xff]   ;;  %v16528_v14 = vld [vmem:[%s20612_s2 + $0xe4] ss:$8 sps:$4 sm:$0xff]  }
  0x14   : > { %s20727_s24 = smov (!%p420_p3, %s12399_s24), 1  ;;  %v16529_v15 = vld [vmem:[%s20612_s2 + $0xf0] ss:$8 sps:$4 sm:$0xff]   ;;  %v16530_v19 = vld [vmem:[%s20612_s2 + $0xf4] ss:$8 sps:$4 sm:$0xff]  }
  0x15   : > { %14467 = vmatpush3.bf16.msra.mxu0 %v16517_v3  ;;  %14627 = vmatpush3.bf16.msra.mxu1 %v16518_v4  ;;  %s16504_s15 = smul.u32 272, %s20727_s24  ;;  %v16531_v30 = vld [vmem:[%s20612_s2] ss:$8 sps:$4 sm:$0xff]   ;;  %v16532_v34 = vld [vmem:[%s20612_s2 + $0x4] ss:$8 sps:$4 sm:$0xff]   ;;  %s12406_s18 = sshll.u32 %s20727_s24, 3 }
  0x16   : > { %14468 = vmatprep.subr.bf16.mxu0 %v16519_v5  ;;  %14628 = vmatprep.subr.bf16.mxu1 %v16520_v6  ;;  %v16533_v37 = vld [vmem:[%s20612_s2 + $0x10] ss:$8 sps:$4 sm:$0xff]   ;;  %v16534_v38 = vld [vmem:[%s20612_s2 + $0x14] ss:$8 sps:$4 sm:$0xff]   ;;  %v16535_v46 = vld [vmem:[%s20612_s2 + $0x20] ss:$8 sps:$4 sm:$0xff]   ;;  %s433_s25 = scalar_lea.vmem %s20622_s12, %s12406_s18 }
  0x17   : > { %s17460_s22 = scalar_lea.vmem %s20611_s1, %s16504_s15  ;;  %v16536_v47 = vld [vmem:[%s20612_s2 + $0x24] ss:$8 sps:$4 sm:$0xff]   ;;  %v16537_v49 = vld [vmem:[%s20612_s2 + $0x30] ss:$8 sps:$4 sm:$0xff]   ;;  %v16538_v50 = vld [vmem:[%s20612_s2 + $0x34] ss:$8 sps:$4 sm:$0xff]   ;;  %s17535_s20 = scalar_lea.vmem %s20610_s0, %s16504_s15 }
  0x18   : > { %v499_v16 = vld [vmem:[%s17460_s22] sm:$0xff]  ;;  %v500_v17 = vld [vmem:[%s17460_s22 + $0x8] sm:$0xff]  ;;  %v501_v18 = vld [vmem:[%s17460_s22 + $0x10] sm:$0xff] }
  0x19   : > { %14469 = vmatpush3.bf16.msra.mxu0 %v16519_v5  ;;  %14629 = vmatpush3.bf16.msra.mxu1 %v16520_v6  ;;  %v515_v20 = vpack.c.bf16 %v500_v17, %v499_v16  ;;  %v502_v21 = vld [vmem:[%s17460_s22 + $0x18] sm:$0xff]  ;;  %v503_v22 = vld [vmem:[%s17460_s22 + $0x20] sm:$0xff]  ;;  %v17470_v23 = vpack.c.bf16 %v501_v18, %v500_v17  ;;  %v504_v24 = vld [vmem:[%s17460_s22 + $0x28] sm:$0xff] }
  0x1a   : > { %14470 = vmatprep.subr.bf16.mxu0 %v16521_v7  ;;  %14630 = vmatprep.subr.bf16.mxu1 %v16522_v8  ;;  %v505_v25 = vld [vmem:[%s17460_s22 + $0x30] sm:$0xff]  ;;  %v17474_v26 = vpack.c.bf16 %v503_v22, %v502_v21  ;;  %v506_v28 = vld [vmem:[%s17460_s22 + $0x38] sm:$0xff]  ;;  %v507_v29 = vld [vmem:[%s17460_s22 + $0x40] sm:$0xff]  ;;  %v516_v36 = vpack.c.bf16 %v502_v21, %v501_v18  ;;  %v517_v40 = vpack.c.bf16 %v504_v24, %v503_v22 }
  0x1b   : > { %14480 = vmatprep.mubr.bf16.mxu0 %v515_v20  ;;  %14640 = vmatprep.mubr.bf16.mxu1 %v515_v20  ;;  %v17476_v27 = vpack.c.bf16 %v505_v25, %v504_v24  ;;  %v508_v31 = vld [vmem:[%s17460_s22 + $0x48] sm:$0xff]  ;;  %v509_v32 = vld [vmem:[%s17460_s22 + $0x50] sm:$0xff]  ;;  %v17485_v33 = vpack.c.bf16 %v507_v29, %v506_v28  ;;  %v510_v39 = vld [vmem:[%s17460_s22 + $0x58] sm:$0xff]  ;;  %v518_v48 = vpack.c.bf16 %v506_v28, %v505_v25 }
  0x1c   : > { %v17490_v35 = vpack.c.bf16 %v509_v32, %v508_v31  ;;  %v511_v41 = vld [vmem:[%s17460_s22 + $0x60] sm:$0xff]  ;;  %v512_v42 = vld [vmem:[%s17460_s22 + $0x68] sm:$0xff]  ;;  %v513_v43 = vld [vmem:[%s17460_s22 + $0x70] sm:$0xff]  ;;  %v519_v51 = vpack.c.bf16 %v508_v31, %v507_v29  ;;  %v520_v54 = vpack.c.bf16 %v510_v39, %v509_v32 }
  0x1d   : > { %14471 = vmatpush3.bf16.msra.mxu0 %v16521_v7  ;;  %14631 = vmatpush3.bf16.msra.mxu1 %v16522_v8  ;;  %v17502_v44 = vpack.c.bf16 %v511_v41, %v510_v39  ;;  %v17504_v45 = vpack.c.bf16 %v513_v43, %v512_v42  ;;  %v16539_v52 = vld [vmem:[%s20612_s2 + $0x40] ss:$8 sps:$4 sm:$0xff]   ;;  %v16540_v53 = vld [vmem:[%s20612_s2 + $0x44] ss:$8 sps:$4 sm:$0xff]   ;;  %v16541_v55 = vld [vmem:[%s20612_s2 + $0x50] ss:$8 sps:$4 sm:$0xff]   ;;  %v521_v57 = vpack.c.bf16 %v512_v42, %v511_v41 }
  0x1e   : > { %14472 = vmatprep.subr.bf16.mxu0 %v16523_v9  ;;  %14632 = vmatprep.subr.bf16.mxu1 %v16524_v10  ;;  %v16542_v56 = vld [vmem:[%s20612_s2 + $0x54] ss:$8 sps:$4 sm:$0xff]   ;;  %v16543_v59 = vld [vmem:[%s20612_s2 + $0x60] ss:$8 sps:$4 sm:$0xff]   ;;  %v16544_v60 = vld [vmem:[%s20612_s2 + $0x64] ss:$8 sps:$4 sm:$0xff]  }
  0x1f   : > { %v17538_v58 = vld [vmem:[%s17460_s22 + $0x78] sm:$0xff]  ;;  %v459_v62 = vld [vmem:[%s17535_s20] sm:$0xff]  ;;  %v17549_v63 = vld [vmem:[%s17535_s20 + $0x8] sm:$0xff] }
  0x20   : > { %v522_v61 = vpack.c.bf16 %v17538_v58, %v513_v43  ;;  %v16545_v0 = vld [vmem:[%s20612_s2 + $0x70] ss:$8 sps:$4 sm:$0xff]   ;;  %v16546_v1 = vld [vmem:[%s20612_s2 + $0x74] ss:$8 sps:$4 sm:$0xff]   ;;  %v475_v2 = vpack.c.bf16 %v17549_v63, %v459_v62  ;;  %v16547_v5 = vld [vmem:[%s20612_s2 + $0x100] ss:$8 sps:$4 sm:$0xff]  }
  0x21   : > { %14473 = vmatpush3.bf16.msra.mxu0 %v16523_v9  ;;  %14633 = vmatpush3.bf16.msra.mxu1 %v16524_v10  ;;  %v17559_v3 = vld [vmem:[%s17535_s20 + $0x10] sm:$0xff]  ;;  %v17562_v4 = vld [vmem:[%s17535_s20 + $0x18] sm:$0xff]  ;;  %v16548_v6 = vld [vmem:[%s20612_s2 + $0x104] ss:$8 sps:$4 sm:$0xff]  }
  0x22   : > { %14474 = vmatprep.subr.bf16.mxu0 %v16525_v11  ;;  %14634 = vmatprep.subr.bf16.mxu1 %v16526_v12  ;;  %v17571_v7 = vld [vmem:[%s17535_s20 + $0x20] sm:$0xff]  ;;  %v17575_v8 = vpack.c.bf16 %v17562_v4, %v17559_v3  ;;  %v17578_v9 = vld [vmem:[%s17535_s20 + $0x28] sm:$0xff]  ;;  %v16549_v10 = vld [vmem:[%s20612_s2 + $0x110] ss:$8 sps:$4 sm:$0xff]  }
  0x23   : > { %v16552_v16 = vld [vmem:[%s20612_s2 + $0x124] ss:$8 sps:$4 sm:$0xff]   ;;  %v16553_v20 = vld [vmem:[%s20612_s2 + $0x130] ss:$8 sps:$4 sm:$0xff]   ;;  %v16554_v21 = vld [vmem:[%s20612_s2 + $0x134] ss:$8 sps:$4 sm:$0xff]  }
  0x24   : > { %v17606_v17 = vld [vmem:[%s17535_s20 + $0x40] sm:$0xff]  ;;  %v17627_v24 = vld [vmem:[%s17535_s20 + $0x50] sm:$0xff]  ;;  %v17631_v25 = vld [vmem:[%s17535_s20 + $0x58] sm:$0xff] }
  0x25   : > { %14475 = vmatpush3.bf16.msra.mxu0 %v16525_v11  ;;  %14635 = vmatpush3.bf16.msra.mxu1 %v16526_v12  ;;  %v16550_v11 = vld [vmem:[%s20612_s2 + $0x114] ss:$8 sps:$4 sm:$0xff]   ;;  %v17588_v12 = vpack.c.bf16 %v17578_v9, %v17571_v7  ;;  %v16555_v28 = vld [vmem:[%s20612_s2 + $0x140] ss:$8 sps:$4 sm:$0xff]   ;;  %v16556_v29 = vld [vmem:[%s20612_s2 + $0x144] ss:$8 sps:$4 sm:$0xff]   ;;  %v17647_v31 = vpack.c.bf16 %v17631_v25, %v17627_v24 }
  0x26   : > { %14476 = vmatprep.subr.bf16.mxu0 %v16527_v13  ;;  %14636 = vmatprep.subr.bf16.mxu1 %v16528_v14  ;;  %v17650_v32 = vld [vmem:[%s17535_s20 + $0x68] sm:$0xff]  ;;  %v17668_v39 = vld [vmem:[%s17535_s20 + $0x78] sm:$0xff] }
  0x27   : > { %v16560_v41 = vld [vmem:[%s20612_s2 + $0x164] ss:$8 sps:$4 sm:$0xff]   ;;  %v16561_v43 = vld [vmem:[%s20612_s2 + $0x170] ss:$8 sps:$4 sm:$0xff]  }
  0x28   : > { %v16572_v62 = vld [vmem:[%s20612_s2 + $0x1c4] ss:$8 sps:$4 sm:$0xff]  }
  0x29   : > { %14477 = vmatpush3.bf16.msra.mxu0 %v16527_v13  ;;  %14637 = vmatpush3.bf16.msra.mxu1 %v16528_v14  ;;  %v17591_v13 = vld [vmem:[%s17535_s20 + $0x30] sm:$0xff]  ;;  %v17595_v14 = vld [vmem:[%s17535_s20 + $0x38] sm:$0xff] }
  0x2a   : > { %14478 = vmatprep.subr.bf16.mxu0 %v16529_v15  ;;  %14638 = vmatprep.subr.bf16.mxu1 %v16530_v19  ;;  %v17611_v18 = vpack.c.bf16 %v17595_v14, %v17591_v13 }
  0x2d   : > { %14479 = vmatpush3.bf16.msra.mxu0 %v16529_v15  ;;  %14639 = vmatpush3.bf16.msra.mxu1 %v16530_v19  ;;  %v16551_v15 = vld [vmem:[%s20612_s2 + $0x120] ss:$8 sps:$4 sm:$0xff]  }
  0x2e   : > { %14496 = vmatprep.subr.bf16.mxu0 %v16531_v30  ;;  %14656 = vmatprep.subr.bf16.mxu1 %v16532_v34  ;;  %v17614_v19 = vld [vmem:[%s17535_s20 + $0x48] sm:$0xff] }
  0x2f   : > { %v17624_v22 = vpack.c.bf16 %v17614_v19, %v17606_v17 }
  0x30   : > { %14481 = vmatmul.mubr.bf16.vlgmr.msra.gmra.mrb[0].mxu0 %v516_v36  ;;  %14641 = vmatmul.mubr.bf16.vlgmr.msra.gmra.mrb[0].mxu1 %v516_v36  ;;  %v16558_v36 = vld [vmem:[%s20612_s2 + $0x154] ss:$8 sps:$4 sm:$0xff]  }
  0x31   : > { %14497 = vmatpush3.bf16.msra.mxu0 %v16531_v30  ;;  %14657 = vmatpush3.bf16.msra.mxu1 %v16532_v34  ;;  %v17642_v30 = vld [vmem:[%s17535_s20 + $0x60] sm:$0xff]  ;;  %v16557_v34 = vld [vmem:[%s20612_s2 + $0x150] ss:$8 sps:$4 sm:$0xff]  }
  0x32   : > { %14498 = vmatprep.subr.bf16.mxu0 %v16533_v37  ;;  %14658 = vmatprep.subr.bf16.mxu1 %v16534_v38 }
  0x33   : > { %14484 = vmatprep.mubr.bf16.mxu0 %v517_v40  ;;  %14644 = vmatprep.mubr.bf16.mxu1 %v517_v40  ;;  %v16559_v40 = vld [vmem:[%s20612_s2 + $0x160] ss:$8 sps:$4 sm:$0xff]  }
  0x35   : > { %14499 = vmatpush3.bf16.msra.mxu0 %v16533_v37  ;;  %14659 = vmatpush3.bf16.msra.mxu1 %v16534_v38  ;;  %v17660_v37 = vpack.c.bf16 %v17650_v32, %v17642_v30  ;;  %v17664_v38 = vld [vmem:[%s17535_s20 + $0x70] sm:$0xff] }
  0x36   : > { %14500 = vmatprep.subr.bf16.mxu0 %v16535_v46  ;;  %14660 = vmatprep.subr.bf16.mxu1 %v16536_v47  ;;  %v17680_v42 = vpack.c.bf16 %v17668_v39, %v17664_v38 }
  0x38   : > { %14485 = vmatmul.mubr.bf16.gmra.mrb[4].mxu0 %v518_v48  ;;  %14645 = vmatmul.mubr.bf16.gmra.mrb[4].mxu1 %v518_v48  ;;  %v16563_v48 = vld [vmem:[%s20612_s2 + $0x180] ss:$8 sps:$4 sm:$0xff]  }
  0x39   : > { %14501 = vmatpush3.bf16.msra.mxu0 %v16535_v46  ;;  %14661 = vmatpush3.bf16.msra.mxu1 %v16536_v47  ;;  %v16562_v46 = vld [vmem:[%s20612_s2 + $0x174] ss:$8 sps:$4 sm:$0xff]   ;;  %v846_v47 = vpack.c.bf16 %v17559_v3, %v17549_v63  ;;  %v851_v63 = vpack.c.bf16 %v17642_v30, %v17631_v25  ;;  %v17741_v3 = vld [vmem:[%s17535_s20 + $0x80] sm:$0xff] }
  0x3a   : > { %14502 = vmatprep.subr.bf16.mxu0 %v16537_v49  ;;  %14662 = vmatprep.subr.bf16.mxu1 %v16538_v50  ;;  %v16594_v25 = vld [vmem:[%s20612_s2 + $0x274] ss:$8 sps:$4 sm:$0xff]  }
  0x3b   : > { %14488 = vmatprep.mubr.bf16.mxu0 %v519_v51  ;;  %14648 = vmatprep.mubr.bf16.mxu1 %v519_v51  ;;  %v16565_v51 = vld [vmem:[%s20612_s2 + $0x190] ss:$8 sps:$4 sm:$0xff]  }
  0x3c   : > { %v17839_v30 = vld [vmem:[%s17460_s22 + $0x98] sm:$0xff] }
  0x3d   : > { %14503 = vmatpush3.bf16.msra.mxu0 %v16537_v49  ;;  %14663 = vmatpush3.bf16.msra.mxu1 %v16538_v50  ;;  %v16564_v49 = vld [vmem:[%s20612_s2 + $0x184] ss:$8 sps:$4 sm:$0xff]   ;;  %v847_v50 = vpack.c.bf16 %v17571_v7, %v17562_v4  ;;  %v16575_v4 = vld [vmem:[%s20612_s2 + $0x1e0] ss:$8 sps:$4 sm:$0xff]   ;;  %v16577_v7 = vld [vmem:[%s20612_s2 + $0x1f0] ss:$8 sps:$4 sm:$0xff]  }
  0x3e   : > { %14504 = vmatprep.subr.bf16.mxu0 %v16539_v52  ;;  %14664 = vmatprep.subr.bf16.mxu1 %v16540_v53 }
  0x40   : > { %14489 = vmatmul.mubr.bf16.gmra.mrb[8].mxu0 %v520_v54  ;;  %14649 = vmatmul.mubr.bf16.gmra.mrb[8].mxu1 %v520_v54  ;;  %v16567_v54 = vld [vmem:[%s20612_s2 + $0x1a0] ss:$8 sps:$4 sm:$0xff]  }
  0x41   : > { %14505 = vmatpush3.bf16.msra.mxu0 %v16539_v52  ;;  %14665 = vmatpush3.bf16.msra.mxu1 %v16540_v53  ;;  %v16566_v52 = vld [vmem:[%s20612_s2 + $0x194] ss:$8 sps:$4 sm:$0xff]   ;;  %v848_v53 = vpack.c.bf16 %v17591_v13, %v17578_v9  ;;  %v16581_v13 = vld [vmem:[%s20612_s2 + $0x210] ss:$8 sps:$4 sm:$0xff]  }
  0x42   : > { %14506 = vmatprep.subr.bf16.mxu0 %v16541_v55  ;;  %14666 = vmatprep.subr.bf16.mxu1 %v16542_v56  ;;  %v16578_v9 = vld [vmem:[%s20612_s2 + $0x1f4] ss:$8 sps:$4 sm:$0xff]  }
  0x43   : > { %14492 = vmatprep.mubr.bf16.mxu0 %v521_v57  ;;  %14652 = vmatprep.mubr.bf16.mxu1 %v521_v57  ;;  %v16569_v57 = vld [vmem:[%s20612_s2 + $0x1b0] ss:$8 sps:$4 sm:$0xff]  }
  0x45   : > { %14507 = vmatpush3.bf16.msra.mxu0 %v16541_v55  ;;  %14667 = vmatpush3.bf16.msra.mxu1 %v16542_v56  ;;  %v16568_v55 = vld [vmem:[%s20612_s2 + $0x1a4] ss:$8 sps:$4 sm:$0xff]   ;;  %v849_v56 = vpack.c.bf16 %v17606_v17, %v17595_v14  ;;  %v16582_v14 = vld [vmem:[%s20612_s2 + $0x214] ss:$8 sps:$4 sm:$0xff]  }
  0x46   : > { %14508 = vmatprep.subr.bf16.mxu0 %v16543_v59  ;;  %14668 = vmatprep.subr.bf16.mxu1 %v16544_v60  ;;  %v16588_v17 = vld [vmem:[%s20612_s2 + $0x244] ss:$8 sps:$4 sm:$0xff]  }
  0x48   : > { %14493 = vmatmul.mubr.bf16.gmra.mrb[12].mxu0 %v522_v61  ;;  %14653 = vmatmul.mubr.bf16.gmra.mrb[12].mxu1 %v522_v61  ;;  %v16571_v61 = vld [vmem:[%s20612_s2 + $0x1c0] ss:$8 sps:$4 sm:$0xff]  }
  0x49   : > { %14509 = vmatpush3.bf16.msra.mxu0 %v16543_v59  ;;  %14669 = vmatpush3.bf16.msra.mxu1 %v16544_v60  ;;  %v16570_v59 = vld [vmem:[%s20612_s2 + $0x1b4] ss:$8 sps:$4 sm:$0xff]   ;;  %v850_v60 = vpack.c.bf16 %v17627_v24, %v17614_v19  ;;  %v16593_v24 = vld [vmem:[%s20612_s2 + $0x270] ss:$8 sps:$4 sm:$0xff]  }
  0x4a   : > { %14510 = vmatprep.subr.bf16.mxu0 %v16545_v0  ;;  %14670 = vmatprep.subr.bf16.mxu1 %v16546_v1  ;;  %v16590_v19 = vld [vmem:[%s20612_s2 + $0x254] ss:$8 sps:$4 sm:$0xff]  }
  0x4b   : > { %14512 = vmatprep.mubr.bf16.mxu0 %v475_v2  ;;  %14672 = vmatprep.mubr.bf16.mxu1 %v475_v2  ;;  %v852_v2 = vpack.c.bf16 %v17664_v38, %v17650_v32  ;;  %v17842_v32 = vld [vmem:[%s17460_s22 + $0xa0] sm:$0xff]  ;;  %v16598_v38 = vld [vmem:[%s20612_s2 + $0x94] ss:$8 sps:$4 sm:$0xff]  }
  0x4d   : > { %14511 = vmatpush3.bf16.msra.mxu0 %v16545_v0  ;;  %14671 = vmatpush3.bf16.msra.mxu1 %v16546_v1  ;;  %v16573_v0 = vld [vmem:[%s20612_s2 + $0x1d0] ss:$8 sps:$4 sm:$0xff]   ;;  %v16574_v1 = vld [vmem:[%s20612_s2 + $0x1d4] ss:$8 sps:$4 sm:$0xff]  }
  0x4e   : > { %14528 = vmatprep.subr.bf16.mxu0 %v16547_v5  ;;  %14688 = vmatprep.subr.bf16.mxu1 %v16548_v6 }
  0x50   : > { %14513 = vmatmul.mubr.bf16.vlgmr.msra.gmra.mrb[0].mxu0 %v17575_v8  ;;  %14673 = vmatmul.mubr.bf16.vlgmr.msra.gmra.mrb[0].mxu1 %v17575_v8 }
  0x51   : > { %14529 = vmatpush3.bf16.msra.mxu0 %v16547_v5  ;;  %14689 = vmatpush3.bf16.msra.mxu1 %v16548_v6  ;;  %v16576_v5 = vld [vmem:[%s20612_s2 + $0x1e4] ss:$8 sps:$4 sm:$0xff]   ;;  %v853_v6 = vpack.c.bf16 %v17741_v3, %v17668_v39  ;;  %v16599_v39 = vld [vmem:[%s20612_s2 + $0xa0] ss:$8 sps:$4 sm:$0xff]  }
  0x52   : > { %14530 = vmatprep.subr.bf16.mxu0 %v16549_v10  ;;  %14690 = vmatprep.subr.bf16.mxu1 %v16550_v11 }
  0x53   : > { %14516 = vmatprep.mubr.bf16.mxu0 %v17588_v12  ;;  %14676 = vmatprep.mubr.bf16.mxu1 %v17588_v12 }
  0x55   : > { %14531 = vmatpush3.bf16.msra.mxu0 %v16549_v10  ;;  %14691 = vmatpush3.bf16.msra.mxu1 %v16550_v11  ;;  %v16579_v10 = vld [vmem:[%s20612_s2 + $0x200] ss:$8 sps:$4 sm:$0xff]   ;;  %v16580_v11 = vld [vmem:[%s20612_s2 + $0x204] ss:$8 sps:$4 sm:$0xff]  }
  0x56   : > { %14532 = vmatprep.subr.bf16.mxu0 %v16551_v15  ;;  %14692 = vmatprep.subr.bf16.mxu1 %v16552_v16 }
  0x58   : > { %14517 = vmatmul.mubr.bf16.gmra.mrb[4].mxu0 %v17611_v18  ;;  %14677 = vmatmul.mubr.bf16.gmra.mrb[4].mxu1 %v17611_v18 }
  0x59   : > { %14533 = vmatpush3.bf16.msra.mxu0 %v16551_v15  ;;  %14693 = vmatpush3.bf16.msra.mxu1 %v16552_v16  ;;  %v16584_v15 = vld [vmem:[%s20612_s2 + $0x224] ss:$8 sps:$4 sm:$0xff]   ;;  %v16586_v16 = vld [vmem:[%s20612_s2 + $0x234] ss:$8 sps:$4 sm:$0xff]  }
  0x5a   : > { %14534 = vmatprep.subr.bf16.mxu0 %v16553_v20  ;;  %14694 = vmatprep.subr.bf16.mxu1 %v16554_v21 }
  0x5b   : > { %14520 = vmatprep.mubr.bf16.mxu0 %v17624_v22  ;;  %14680 = vmatprep.mubr.bf16.mxu1 %v17624_v22 }
  0x5d   : > { %14535 = vmatpush3.bf16.msra.mxu0 %v16553_v20  ;;  %14695 = vmatpush3.bf16.msra.mxu1 %v16554_v21  ;;  %v17806_v20 = vld [vmem:[%s17460_s22 + $0x80] sm:$0xff] }
  0x5e   : > { %14536 = vmatprep.subr.bf16.mxu0 %v16555_v28  ;;  %14696 = vmatprep.subr.bf16.mxu1 %v16556_v29  ;;  %v16592_v21 = vld [vmem:[%s20612_s2 + $0x264] ss:$8 sps:$4 sm:$0xff]  }
  0x60   : > { %14521 = vmatmul.mubr.bf16.gmra.mrb[8].mxu0 %v17647_v31  ;;  %14681 = vmatmul.mubr.bf16.gmra.mrb[8].mxu1 %v17647_v31 }
  0x61   : > { %14537 = vmatpush3.bf16.msra.mxu0 %v16555_v28  ;;  %14697 = vmatpush3.bf16.msra.mxu1 %v16556_v29  ;;  %v17832_v28 = vld [vmem:[%s17460_s22 + $0x88] sm:$0xff]  ;;  %v17835_v29 = vld [vmem:[%s17460_s22 + $0x90] sm:$0xff] }
  0x62   : > { %14538 = vmatprep.subr.bf16.mxu0 %v16557_v34  ;;  %14698 = vmatprep.subr.bf16.mxu1 %v16558_v36 }
  0x63   : > { %14524 = vmatprep.mubr.bf16.mxu0 %v17660_v37  ;;  %14684 = vmatprep.mubr.bf16.mxu1 %v17660_v37 }
  0x65   : > { %14539 = vmatpush3.bf16.msra.mxu0 %v16557_v34  ;;  %14699 = vmatpush3.bf16.msra.mxu1 %v16558_v36  ;;  %v16597_v34 = vld [vmem:[%s20612_s2 + $0x90] ss:$8 sps:$4 sm:$0xff]   ;;  %v17849_v36 = vpack.c.bf16 %v17835_v29, %v17832_v28 }
  0x66   : > { %14540 = vmatprep.subr.bf16.mxu0 %v16559_v40  ;;  %14700 = vmatprep.subr.bf16.mxu1 %v16560_v41 }
  0x68   : > { %14525 = vmatmul.mubr.bf16.gmra.mrb[12].mxu0 %v17680_v42  ;;  %14685 = vmatmul.mubr.bf16.gmra.mrb[12].mxu1 %v17680_v42 }
  0x69   : > { %14541 = vmatpush3.bf16.msra.mxu0 %v16559_v40  ;;  %14701 = vmatpush3.bf16.msra.mxu1 %v16560_v41  ;;  %v16600_v40 = vld [vmem:[%s20612_s2 + $0xa4] ss:$8 sps:$4 sm:$0xff]  }
  0x6a   : > { %14542 = vmatprep.subr.bf16.mxu0 %v16561_v43  ;;  %14702 = vmatprep.subr.bf16.mxu1 %v16562_v46  ;;  %v17868_v41 = vld [vmem:[%s17460_s22 + $0xa8] sm:$0xff] }
  0x6b   : > { %14544 = vmatprep.mubr.bf16.mxu0 %v846_v47  ;;  %14704 = vmatprep.mubr.bf16.mxu1 %v846_v47  ;;  %v16601_v47 = vld [vmem:[%s20612_s2 + $0xb0] ss:$8 sps:$4 sm:$0xff]  }
  0x6d   : > { %14543 = vmatpush3.bf16.msra.mxu0 %v16561_v43  ;;  %14703 = vmatpush3.bf16.msra.mxu1 %v16562_v46  ;;  %v17871_v43 = vld [vmem:[%s17460_s22 + $0xb0] sm:$0xff]  ;;  %v17878_v46 = vld [vmem:[%s17460_s22 + $0xc0] sm:$0xff] }
  0x6e   : > { %14560 = vmatprep.subr.bf16.mxu0 %v16563_v48  ;;  %14720 = vmatprep.subr.bf16.mxu1 %v16564_v49 }
  0x70   : > { %14545 = vmatmul.mubr.bf16.vlgmr.msra.gmra.mrb[0].mxu0 %v847_v50  ;;  %14705 = vmatmul.mubr.bf16.vlgmr.msra.gmra.mrb[0].mxu1 %v847_v50  ;;  %v16603_v50 = vld [vmem:[%s20612_s2 + $0xc0] ss:$8 sps:$4 sm:$0xff]  }
  0x71   : > { %14561 = vmatpush3.bf16.msra.mxu0 %v16563_v48  ;;  %14721 = vmatpush3.bf16.msra.mxu1 %v16564_v49  ;;  %v17885_v48 = vpack.c.bf16 %v17871_v43, %v17868_v41  ;;  %v16602_v49 = vld [vmem:[%s20612_s2 + $0xb4] ss:$8 sps:$4 sm:$0xff]  }
  0x72   : > { %14562 = vmatprep.subr.bf16.mxu0 %v16565_v51  ;;  %14722 = vmatprep.subr.bf16.mxu1 %v16566_v52 }
  0x73   : > { %14548 = vmatprep.mubr.bf16.mxu0 %v848_v53  ;;  %14708 = vmatprep.mubr.bf16.mxu1 %v848_v53  ;;  %v17907_v53 = vld [vmem:[%s17460_s22 + $0xd0] sm:$0xff] }
  0x75   : > { %14563 = vmatpush3.bf16.msra.mxu0 %v16565_v51  ;;  %14723 = vmatpush3.bf16.msra.mxu1 %v16566_v52  ;;  %v16604_v51 = vld [vmem:[%s20612_s2 + $0xc4] ss:$8 sps:$4 sm:$0xff]  }
  0x76   : > { %14564 = vmatprep.subr.bf16.mxu0 %v16567_v54  ;;  %14724 = vmatprep.subr.bf16.mxu1 %v16568_v55  ;;  %v17904_v52 = vld [vmem:[%s17460_s22 + $0xc8] sm:$0xff] }
  0x78   : > { %14549 = vmatmul.mubr.bf16.gmra.mrb[4].mxu0 %v849_v56  ;;  %14709 = vmatmul.mubr.bf16.gmra.mrb[4].mxu1 %v849_v56  ;;  %v17921_v56 = vpack.c.bf16 %v17907_v53, %v17904_v52 }
  0x79   : > { %14565 = vmatpush3.bf16.msra.mxu0 %v16567_v54  ;;  %14725 = vmatpush3.bf16.msra.mxu1 %v16568_v55  ;;  %v16605_v54 = vld [vmem:[%s20612_s2 + $0xd0] ss:$8 sps:$4 sm:$0xff]   ;;  %v17917_v55 = vld [vmem:[%s17460_s22 + $0xe0] sm:$0xff] }
  0x7a   : > { %14566 = vmatprep.subr.bf16.mxu0 %v16569_v57  ;;  %14726 = vmatprep.subr.bf16.mxu1 %v16570_v59 }
  0x7b   : > { %14552 = vmatprep.mubr.bf16.mxu0 %v850_v60  ;;  %14712 = vmatprep.mubr.bf16.mxu1 %v850_v60  ;;  %v16607_v60 = vld [vmem:[%s20612_s2 + $0xe0] ss:$8 sps:$4 sm:$0xff]  }
  0x7d   : > { %14567 = vmatpush3.bf16.msra.mxu0 %v16569_v57  ;;  %14727 = vmatpush3.bf16.msra.mxu1 %v16570_v59  ;;  %v17931_v59 = vld [vmem:[%s17535_s20 + $0x88] sm:$0xff] }
  0x7e   : > { %14568 = vmatprep.subr.bf16.mxu0 %v16571_v61  ;;  %14728 = vmatprep.subr.bf16.mxu1 %v16572_v62 }
  0x80   : > { %14553 = vmatmul.mubr.bf16.gmra.mrb[8].mxu0 %v851_v63  ;;  %14713 = vmatmul.mubr.bf16.gmra.mrb[8].mxu1 %v851_v63  ;;  %v17946_v63 = vld [vmem:[%s17460_s22 + $0xf0] sm:$0xff] }
  0x81   : > { %14569 = vmatpush3.bf16.msra.mxu0 %v16571_v61  ;;  %14729 = vmatpush3.bf16.msra.mxu1 %v16572_v62  ;;  %v16608_v61 = vld [vmem:[%s20612_s2 + $0xe4] ss:$8 sps:$4 sm:$0xff]  }
  0x82   : > { %14570 = vmatprep.subr.bf16.mxu0 %v16573_v0  ;;  %14730 = vmatprep.subr.bf16.mxu1 %v16574_v1  ;;  %v17943_v62 = vld [vmem:[%s17460_s22 + $0xe8] sm:$0xff] }
  0x83   : > { %14556 = vmatprep.mubr.bf16.mxu0 %v852_v2  ;;  %14716 = vmatprep.mubr.bf16.mxu1 %v852_v2  ;;  %v2575_v2 = vpack.c.bf16 %v17832_v28, %v17806_v20  ;;  %v16627_v28 = vld [vmem:[%s20612_s2 + $0x100] ss:$8 sps:$4 sm:$0xff]  }
  0x85   : > { %14571 = vmatpush3.bf16.msra.mxu0 %v16573_v0  ;;  %14731 = vmatpush3.bf16.msra.mxu1 %v16574_v1  ;;  %v16609_v0 = vld [vmem:[%s20612_s2 + $0xf0] ss:$8 sps:$4 sm:$0xff]   ;;  %v17958_v1 = vpack.c.bf16 %v17946_v63, %v17943_v62 }
  0x86   : > { %14572 = vmatprep.subr.bf16.mxu0 %v16575_v4  ;;  %14732 = vmatprep.subr.bf16.mxu1 %v16576_v5 }
  0x88   : > { %14557 = vmatmul.mubr.bf16.gmra.mrb[12].mxu0 %v853_v6  ;;  %14717 = vmatmul.mubr.bf16.gmra.mrb[12].mxu1 %v853_v6  ;;  %v16613_v6 = vld [vmem:[%s20612_s2 + $0x10] ss:$8 sps:$4 sm:$0xff]  }
  0x89   : > { %14573 = vmatpush3.bf16.msra.mxu0 %v16575_v4  ;;  %14733 = vmatpush3.bf16.msra.mxu1 %v16576_v5  ;;  %v16612_v4 = vld [vmem:[%s20612_s2 + $0x4] ss:$8 sps:$4 sm:$0xff]   ;;  %v2576_v5 = vpack.c.bf16 %v17839_v30, %v17835_v29 }
  0x8a   : > { %14574 = vmatprep.subr.bf16.mxu0 %v16577_v7  ;;  %14734 = vmatprep.subr.bf16.mxu1 %v16578_v9  ;;  %v16628_v29 = vld [vmem:[%s20612_s2 + $0x104] ss:$8 sps:$4 sm:$0xff]  }
  0x8b   : > { %14576 = vmatprep.mubr.bf16.mxu0 %v17470_v23  ;;  %14736 = vmatprep.mubr.bf16.mxu1 %v17470_v23  ;;  %v16583_v23 = vld [vmem:[%s20612_s2 + $0x220] ss:$8 sps:$4 sm:$0xff]  }
  0x8d   : > { %14575 = vmatpush3.bf16.msra.mxu0 %v16577_v7  ;;  %14735 = vmatpush3.bf16.msra.mxu1 %v16578_v9  ;;  %v16614_v7 = vld [vmem:[%s20612_s2 + $0x14] ss:$8 sps:$4 sm:$0xff]   ;;  %v2577_v9 = vpack.c.bf16 %v17868_v41, %v17842_v32 }
  0x8e   : > { %14592 = vmatprep.subr.bf16.mxu0 %v16579_v10  ;;  %14752 = vmatprep.subr.bf16.mxu1 %v16580_v11  ;;  %v18064_v41 = vld [vmem:[%s17535_s20 + $0xb0] sm:$0xff] }
  0x90   : > { %14577 = vmatmul.mubr.bf16.vlgmr.msra.gmra.mrb[0].mxu0 %v17474_v26  ;;  %14737 = vmatmul.mubr.bf16.vlgmr.msra.gmra.mrb[0].mxu1 %v17474_v26  ;;  %v16585_v26 = vld [vmem:[%s20612_s2 + $0x230] ss:$8 sps:$4 sm:$0xff]  }
  0x91   : > { %14593 = vmatpush3.bf16.msra.mxu0 %v16579_v10  ;;  %14753 = vmatpush3.bf16.msra.mxu1 %v16580_v11  ;;  %v16615_v10 = vld [vmem:[%s20612_s2 + $0x20] ss:$8 sps:$4 sm:$0xff]   ;;  %v16616_v11 = vld [vmem:[%s20612_s2 + $0x24] ss:$8 sps:$4 sm:$0xff]  }
  0x92   : > { %14594 = vmatprep.subr.bf16.mxu0 %v16581_v13  ;;  %14754 = vmatprep.subr.bf16.mxu1 %v16582_v14 }
  0x93   : > { %14580 = vmatprep.mubr.bf16.mxu0 %v17476_v27  ;;  %14740 = vmatprep.mubr.bf16.mxu1 %v17476_v27  ;;  %v16587_v27 = vld [vmem:[%s20612_s2 + $0x240] ss:$8 sps:$4 sm:$0xff]  }
  0x95   : > { %14595 = vmatpush3.bf16.msra.mxu0 %v16581_v13  ;;  %14755 = vmatpush3.bf16.msra.mxu1 %v16582_v14  ;;  %v16617_v14 = vld [vmem:[%s20612_s2 + $0x30] ss:$8 sps:$4 sm:$0xff]  }
  0x96   : > { %14596 = vmatprep.subr.bf16.mxu0 %v16583_v23  ;;  %14756 = vmatprep.subr.bf16.mxu1 %v16584_v15 }
  0x98   : > { %14581 = vmatmul.mubr.bf16.gmra.mrb[4].mxu0 %v17485_v33  ;;  %14741 = vmatmul.mubr.bf16.gmra.mrb[4].mxu1 %v17485_v33  ;;  %v16589_v33 = vld [vmem:[%s20612_s2 + $0x250] ss:$8 sps:$4 sm:$0xff]  }
  0x99   : > { %14597 = vmatpush3.bf16.msra.mxu0 %v16583_v23  ;;  %14757 = vmatpush3.bf16.msra.mxu1 %v16584_v15  ;;  %v16618_v23 = vld [vmem:[%s20612_s2 + $0x34] ss:$8 sps:$4 sm:$0xff]   ;;  %v2579_v15 = vpack.c.bf16 %v17904_v52, %v17878_v46 }
  0x9a   : > { %14598 = vmatprep.subr.bf16.mxu0 %v16585_v26  ;;  %14758 = vmatprep.subr.bf16.mxu1 %v16586_v16  ;;  %v16634_v52 = vld [vmem:[%s20612_s2 + $0x134] ss:$8 sps:$4 sm:$0xff]  }
  0x9b   : > { %14584 = vmatprep.mubr.bf16.mxu0 %v17490_v35  ;;  %14744 = vmatprep.mubr.bf16.mxu1 %v17490_v35  ;;  %v16591_v35 = vld [vmem:[%s20612_s2 + $0x260] ss:$8 sps:$4 sm:$0xff]  }
  0x9d   : > { %14599 = vmatpush3.bf16.msra.mxu0 %v16585_v26  ;;  %14759 = vmatpush3.bf16.msra.mxu1 %v16586_v16  ;;  %v16619_v26 = vld [vmem:[%s20612_s2 + $0x40] ss:$8 sps:$4 sm:$0xff]   ;;  %v16620_v16 = vld [vmem:[%s20612_s2 + $0x44] ss:$8 sps:$4 sm:$0xff]  }
  0x9e   : > { %14600 = vmatprep.subr.bf16.mxu0 %v16587_v27  ;;  %14760 = vmatprep.subr.bf16.mxu1 %v16588_v17 }
  0xa0   : > { %14585 = vmatmul.mubr.bf16.gmra.mrb[8].mxu0 %v17502_v44  ;;  %14745 = vmatmul.mubr.bf16.gmra.mrb[8].mxu1 %v17502_v44  ;;  %v1055_v44 = vpack.c.bf16 %v17806_v20, %v17538_v58  ;;  %v16596_v58 = vld [vmem:[%s20612_s2 + $0x84] ss:$8 sps:$4 sm:$0xff]   ;;  %v2574_v20 = vld [vmem:[%s17460_s22 + $0xf8] sm:$0xff] }
  0xa1   : > { %14601 = vmatpush3.bf16.msra.mxu0 %v16587_v27  ;;  %14761 = vmatpush3.bf16.msra.mxu1 %v16588_v17  ;;  %v16621_v17 = vld [vmem:[%s20612_s2 + $0x50] ss:$8 sps:$4 sm:$0xff]  }
  0xa2   : > { %14602 = vmatprep.subr.bf16.mxu0 %v16589_v33  ;;  %14762 = vmatprep.subr.bf16.mxu1 %v16590_v19 }
  0xa3   : > { %14588 = vmatprep.mubr.bf16.mxu0 %v17504_v45  ;;  %14748 = vmatprep.mubr.bf16.mxu1 %v17504_v45  ;;  %v16595_v45 = vld [vmem:[%s20612_s2 + $0x80] ss:$8 sps:$4 sm:$0xff]  }
  0xa5   : > { %14603 = vmatpush3.bf16.msra.mxu0 %v16589_v33  ;;  %14763 = vmatpush3.bf16.msra.mxu1 %v16590_v19  ;;  %v16622_v33 = vld [vmem:[%s20612_s2 + $0x54] ss:$8 sps:$4 sm:$0xff]   ;;  %v2581_v19 = vpack.c.bf16 %v17943_v62, %v17917_v55 }
  0xa6   : > { %14604 = vmatprep.subr.bf16.mxu0 %v16591_v35  ;;  %14764 = vmatprep.subr.bf16.mxu1 %v16592_v21 }
  0xa8   : > { %14589 = vmatmul.mubr.bf16.gmra.mrb[12].mxu0 %v1055_v44  ;;  %14749 = vmatmul.mubr.bf16.gmra.mrb[12].mxu1 %v1055_v44  ;;  %v2582_v44 = vpack.c.bf16 %v2574_v20, %v17946_v63  ;;  %v16637_v63 = vld [vmem:[%s20612_s2 + $0x150] ss:$8 sps:$4 sm:$0xff]   ;;  %v16652_v20 = vld [vmem:[%s20612_s2 + $0x1c4] ss:$8 sps:$4 sm:$0xff]  }
  0xa9   : > { %14605 = vmatpush3.bf16.msra.mxu0 %v16591_v35  ;;  %14765 = vmatpush3.bf16.msra.mxu1 %v16592_v21  ;;  %v16623_v35 = vld [vmem:[%s20612_s2 + $0x60] ss:$8 sps:$4 sm:$0xff]   ;;  %v16624_v21 = vld [vmem:[%s20612_s2 + $0x64] ss:$8 sps:$4 sm:$0xff]  }
  0xaa   : > { %14606 = vmatprep.subr.bf16.mxu0 %v16593_v24  ;;  %14766 = vmatprep.subr.bf16.mxu1 %v16594_v25 }
  0xab   : > { %14608 = vmatprep.mubr.bf16.mxu0 %v17575_v8  ;;  %14768 = vmatprep.mubr.bf16.mxu1 %v17575_v8  ;;  %v17853_v8 = vpack.c.bf16 %v17842_v32, %v17839_v30  ;;  %v18043_v30 = vld [vmem:[%s17535_s20 + $0xa0] sm:$0xff]  ;;  %v18046_v32 = vld [vmem:[%s17535_s20 + $0xa8] sm:$0xff] }
  0xad   : > { %14607 = vmatpush3.bf16.msra.mxu0 %v16593_v24  ;;  %14767 = vmatpush3.bf16.msra.mxu1 %v16594_v25  ;;  %v16625_v24 = vld [vmem:[%s20612_s2 + $0x70] ss:$8 sps:$4 sm:$0xff]   ;;  %v16626_v25 = vld [vmem:[%s20612_s2 + $0x74] ss:$8 sps:$4 sm:$0xff]  }
  0xae   : > { %14784 = vmatprep.subr.bf16.mxu0 %v16595_v45  ;;  %14944 = vmatprep.subr.bf16.mxu1 %v16596_v58 }
  0xb0   : > { %14609 = vmatmul.mubr.bf16.vlgmr.msra.gmra.mrb[0].mxu0 %v17588_v12  ;;  %14769 = vmatmul.mubr.bf16.vlgmr.msra.gmra.mrb[0].mxu1 %v17588_v12  ;;  %v17875_v12 = vld [vmem:[%s17460_s22 + $0xb8] sm:$0xff] }
  0xb1   : > { %14785 = vmatpush3.bf16.msra.mxu0 %v16595_v45  ;;  %14945 = vmatpush3.bf16.msra.mxu1 %v16596_v58  ;;  %v2578_v13 = vpack.c.bf16 %v17875_v12, %v17871_v43  ;;  %v18030_v45 = vld [vmem:[%s17535_s20 + $0x90] sm:$0xff]  ;;  %v18033_v58 = vld [vmem:[%s17535_s20 + $0x98] sm:$0xff] }
  0xb2   : > { %14786 = vmatprep.subr.bf16.mxu0 %v16597_v34  ;;  %14946 = vmatprep.subr.bf16.mxu1 %v16598_v38  ;;  %v18067_v43 = vld [vmem:[%s17535_s20 + $0xb8] sm:$0xff] }
  0xb3   : > { %14612 = vmatprep.mubr.bf16.mxu0 %v17611_v18  ;;  %14772 = vmatprep.mubr.bf16.mxu1 %v17611_v18  ;;  %v17889_v18 = vpack.c.bf16 %v17878_v46, %v17875_v12  ;;  %v16631_v12 = vld [vmem:[%s20612_s2 + $0x120] ss:$8 sps:$4 sm:$0xff]   ;;  %v16632_v46 = vld [vmem:[%s20612_s2 + $0x124] ss:$8 sps:$4 sm:$0xff]  }
  0xb5   : > { %14787 = vmatpush3.bf16.msra.mxu0 %v16597_v34  ;;  %14947 = vmatpush3.bf16.msra.mxu1 %v16598_v38  ;;  %v18051_v34 = vpack.c.bf16 %v18033_v58, %v18030_v45  ;;  %v16629_v38 = vld [vmem:[%s20612_s2 + $0x110] ss:$8 sps:$4 sm:$0xff]  }
  0xb6   : > { %14788 = vmatprep.subr.bf16.mxu0 %v16599_v39  ;;  %14948 = vmatprep.subr.bf16.mxu1 %v16600_v40 }
  0xb8   : > { %14613 = vmatmul.mubr.bf16.gmra.mrb[4].mxu0 %v17624_v22  ;;  %14773 = vmatmul.mubr.bf16.gmra.mrb[4].mxu1 %v17624_v22  ;;  %v17910_v22 = vld [vmem:[%s17460_s22 + $0xd8] sm:$0xff] }
  0xb9   : > { %14789 = vmatpush3.bf16.msra.mxu0 %v16599_v39  ;;  %14949 = vmatpush3.bf16.msra.mxu1 %v16600_v40  ;;  %v17925_v57 = vpack.c.bf16 %v17917_v55, %v17910_v22  ;;  %v2580_v27 = vpack.c.bf16 %v17910_v22, %v17907_v53  ;;  %v16630_v39 = vld [vmem:[%s20612_s2 + $0x114] ss:$8 sps:$4 sm:$0xff]   ;;  %v18061_v40 = vpack.c.bf16 %v18046_v32, %v18043_v30  ;;  %v16635_v55 = vld [vmem:[%s20612_s2 + $0x140] ss:$8 sps:$4 sm:$0xff]  }
  0xba   : > { %14790 = vmatprep.subr.bf16.mxu0 %v16601_v47  ;;  %14950 = vmatprep.subr.bf16.mxu1 %v16602_v49  ;;  %v18100_v22 = vld [vmem:[%s17535_s20 + $0xd0] sm:$0xff] }
  0xbb   : > { %14616 = vmatprep.mubr.bf16.mxu0 %v17647_v31  ;;  %14776 = vmatprep.mubr.bf16.mxu1 %v17647_v31  ;;  %v16606_v31 = vld [vmem:[%s20612_s2 + $0xd4] ss:$8 sps:$4 sm:$0xff]  }
  0xbd   : > { %14791 = vmatpush3.bf16.msra.mxu0 %v16601_v47  ;;  %14951 = vmatpush3.bf16.msra.mxu1 %v16602_v49  ;;  %v18078_v47 = vld [vmem:[%s17535_s20 + $0xc0] sm:$0xff]  ;;  %v18081_v49 = vld [vmem:[%s17535_s20 + $0xc8] sm:$0xff] }
  0xbe   : > { %14792 = vmatprep.subr.bf16.mxu0 %v16603_v50  ;;  %14952 = vmatprep.subr.bf16.mxu1 %v16604_v51  ;;  %v18097_v53 = vpack.c.bf16 %v18081_v49, %v18078_v47 }
  0xc0   : > { %14617 = vmatmul.mubr.bf16.gmra.mrb[8].mxu0 %v17660_v37  ;;  %14777 = vmatmul.mubr.bf16.gmra.mrb[8].mxu1 %v17660_v37  ;;  %v17951_v37 = vpack.c.bf16 %v17931_v59, %v17741_v3  ;;  %v16611_v3 = vld [vmem:[%s20612_s2] ss:$8 sps:$4 sm:$0xff]  }
  0xc1   : > { %14793 = vmatpush3.bf16.msra.mxu0 %v16603_v50  ;;  %14953 = vmatpush3.bf16.msra.mxu1 %v16604_v51  ;;  %v18087_v50 = vpack.c.bf16 %v18067_v43, %v18064_v41  ;;  %v16633_v51 = vld [vmem:[%s20612_s2 + $0x130] ss:$8 sps:$4 sm:$0xff]  }
  0xc2   : > { %14794 = vmatprep.subr.bf16.mxu0 %v16605_v54  ;;  %14954 = vmatprep.subr.bf16.mxu1 %v16606_v31 }
  0xc3   : > { %14620 = vmatprep.mubr.bf16.mxu0 %v17680_v42  ;;  %14780 = vmatprep.mubr.bf16.mxu1 %v17680_v42  ;;  %v16610_v42 = vld [vmem:[%s20612_s2 + $0xf4] ss:$8 sps:$4 sm:$0xff]  }
  0xc5   : > { %14795 = vmatpush3.bf16.msra.mxu0 %v16605_v54  ;;  %14955 = vmatpush3.bf16.msra.mxu1 %v16606_v31  ;;  %v18103_v54 = vld [vmem:[%s17535_s20 + $0xd8] sm:$0xff]  ;;  %v16636_v31 = vld [vmem:[%s20612_s2 + $0x144] ss:$8 sps:$4 sm:$0xff]  }
  0xc6   : > { %14796 = vmatprep.subr.bf16.mxu0 %v16607_v60  ;;  %14956 = vmatprep.subr.bf16.mxu1 %v16608_v61  ;;  %v18123_v62 = vpack.c.bf16 %v18103_v54, %v18100_v22 }
  0xc8   : > { %14621 = vmatmul.mubr.bf16.gmra.mrb[12].mxu0 %v17951_v37  ;;  %14781 = vmatmul.mubr.bf16.gmra.mrb[12].mxu1 %v17951_v37 }
  0xc9   : > { %14797 = vmatpush3.bf16.msra.mxu0 %v16607_v60  ;;  %14957 = vmatpush3.bf16.msra.mxu1 %v16608_v61  ;;  %v18114_v60 = vld [vmem:[%s17535_s20 + $0xe0] sm:$0xff]  ;;  %v18117_v61 = vld [vmem:[%s17535_s20 + $0xe8] sm:$0xff] }
  0xca   : > { %14798 = vmatprep.subr.bf16.mxu0 %v16609_v0  ;;  %14958 = vmatprep.subr.bf16.mxu1 %v16610_v42 }
  0xcb   : > { %14800 = vmatprep.mubr.bf16.mxu0 %v2575_v2  ;;  %14960 = vmatprep.mubr.bf16.mxu1 %v2575_v2  ;;  %v18139_v2 = vld [vmem:[%s17535_s20 + $0xf8] sm:$0xff] }
  0xcd   : > { %14799 = vmatpush3.bf16.msra.mxu0 %v16609_v0  ;;  %14959 = vmatpush3.bf16.msra.mxu1 %v16610_v42  ;;  %v18133_v0 = vpack.c.bf16 %v18117_v61, %v18114_v60  ;;  %v18136_v42 = vld [vmem:[%s17535_s20 + $0xf0] sm:$0xff] }
  0xce   : > { %14816 = vmatprep.subr.bf16.mxu0 %v16611_v3  ;;  %14976 = vmatprep.subr.bf16.mxu1 %v16612_v4 }
  0xd0   : > { %14801 = vmatmul.mubr.bf16.vlgmr.msra.gmra.mrb[16].mxu0 %v2576_v5  ;;  %14961 = vmatmul.mubr.bf16.vlgmr.msra.gmra.mrb[16].mxu1 %v2576_v5  ;;  %v18153_v5 = vpack.c.bf16 %v18139_v2, %v18136_v42 }
  0xd1   : > { %14817 = vmatpush3.bf16.msra.mxu0 %v16611_v3  ;;  %14977 = vmatpush3.bf16.msra.mxu1 %v16612_v4  ;;  %v16639_v3 = vld [vmem:[%s20612_s2 + $0x160] ss:$8 sps:$4 sm:$0xff]   ;;  %v16640_v4 = vld [vmem:[%s20612_s2 + $0x164] ss:$8 sps:$4 sm:$0xff]  }
  0xd2   : > { %14818 = vmatprep.subr.bf16.mxu0 %v16613_v6  ;;  %14978 = vmatprep.subr.bf16.mxu1 %v16614_v7 }
  0xd3   : > { %14804 = vmatprep.mubr.bf16.mxu0 %v2577_v9  ;;  %14964 = vmatprep.mubr.bf16.mxu1 %v2577_v9  ;;  %v2905_v9 = vpack.c.bf16 %v18030_v45, %v17931_v59  ;;  %v2906_v59 = vpack.c.bf16 %v18043_v30, %v18033_v58  ;;  %v16655_v45 = vld [vmem:[%s20612_s2 + $0x1e0] ss:$8 sps:$4 sm:$0xff]   ;;  %v16656_v58 = vld [vmem:[%s20612_s2 + $0x1e4] ss:$8 sps:$4 sm:$0xff]   ;;  %v16658_v30 = vld [vmem:[%s20612_s2 + $0x1f4] ss:$8 sps:$4 sm:$0xff]  }
  0xd5   : > { %14819 = vmatpush3.bf16.msra.mxu0 %v16613_v6  ;;  %14979 = vmatpush3.bf16.msra.mxu1 %v16614_v7  ;;  %v16641_v6 = vld [vmem:[%s20612_s2 + $0x170] ss:$8 sps:$4 sm:$0xff]   ;;  %v16642_v7 = vld [vmem:[%s20612_s2 + $0x174] ss:$8 sps:$4 sm:$0xff]  }
  0xd6   : > { %14820 = vmatprep.subr.bf16.mxu0 %v16615_v10  ;;  %14980 = vmatprep.subr.bf16.mxu1 %v16616_v11 }
  0xd8   : > { %14805 = vmatmul.mubr.bf16.gmra.mrb[20].mxu0 %v2578_v13  ;;  %14965 = vmatmul.mubr.bf16.gmra.mrb[20].mxu1 %v2578_v13  ;;  %v16645_v13 = vld [vmem:[%s20612_s2 + $0x190] ss:$8 sps:$4 sm:$0xff]  }
  0xd9   : > { %14821 = vmatpush3.bf16.msra.mxu0 %v16615_v10  ;;  %14981 = vmatpush3.bf16.msra.mxu1 %v16616_v11  ;;  %v16643_v10 = vld [vmem:[%s20612_s2 + $0x180] ss:$8 sps:$4 sm:$0xff]   ;;  %v16644_v11 = vld [vmem:[%s20612_s2 + $0x184] ss:$8 sps:$4 sm:$0xff]  }
  0xda   : > { %14822 = vmatprep.subr.bf16.mxu0 %v16617_v14  ;;  %14982 = vmatprep.subr.bf16.mxu1 %v16618_v23 }
  0xdb   : > { %14808 = vmatprep.mubr.bf16.mxu0 %v2579_v15  ;;  %14968 = vmatprep.mubr.bf16.mxu1 %v2579_v15  ;;  %v16647_v15 = vld [vmem:[%s20612_s2 + $0x1a0] ss:$8 sps:$4 sm:$0xff]  }
  0xdd   : > { %14823 = vmatpush3.bf16.msra.mxu0 %v16617_v14  ;;  %14983 = vmatpush3.bf16.msra.mxu1 %v16618_v23  ;;  %v16646_v14 = vld [vmem:[%s20612_s2 + $0x194] ss:$8 sps:$4 sm:$0xff]   ;;  %v2907_v23 = vpack.c.bf16 %v18064_v41, %v18046_v32  ;;  %v16659_v32 = vld [vmem:[%s20612_s2 + $0x200] ss:$8 sps:$4 sm:$0xff]  }
  0xde   : > { %14824 = vmatprep.subr.bf16.mxu0 %v16619_v26  ;;  %14984 = vmatprep.subr.bf16.mxu1 %v16620_v16  ;;  %v16662_v41 = vld [vmem:[%s20612_s2 + $0x214] ss:$8 sps:$4 sm:$0xff]  }
  0xe0   : > { %14809 = vmatmul.mubr.bf16.gmra.mrb[24].mxu0 %v2580_v27  ;;  %14969 = vmatmul.mubr.bf16.gmra.mrb[24].mxu1 %v2580_v27  ;;  %v16649_v27 = vld [vmem:[%s20612_s2 + $0x1b0] ss:$8 sps:$4 sm:$0xff]  }
  0xe1   : > { %14825 = vmatpush3.bf16.msra.mxu0 %v16619_v26  ;;  %14985 = vmatpush3.bf16.msra.mxu1 %v16620_v16  ;;  %v16648_v26 = vld [vmem:[%s20612_s2 + $0x1a4] ss:$8 sps:$4 sm:$0xff]   ;;  %v2908_v16 = vpack.c.bf16 %v18078_v47, %v18067_v43  ;;  %v16663_v43 = vld [vmem:[%s20612_s2 + $0x220] ss:$8 sps:$4 sm:$0xff]   ;;  %v16669_v47 = vld [vmem:[%s20612_s2 + $0x250] ss:$8 sps:$4 sm:$0xff]  }
  0xe2   : > { %14826 = vmatprep.subr.bf16.mxu0 %v16621_v17  ;;  %14986 = vmatprep.subr.bf16.mxu1 %v16622_v33 }
  0xe3   : > { %14812 = vmatprep.mubr.bf16.mxu0 %v2581_v19  ;;  %14972 = vmatprep.mubr.bf16.mxu1 %v2581_v19  ;;  %v16651_v19 = vld [vmem:[%s20612_s2 + $0x1c0] ss:$8 sps:$4 sm:$0xff]  }
  0xe5   : > { %14827 = vmatpush3.bf16.msra.mxu0 %v16621_v17  ;;  %14987 = vmatpush3.bf16.msra.mxu1 %v16622_v33  ;;  %v16650_v17 = vld [vmem:[%s20612_s2 + $0x1b4] ss:$8 sps:$4 sm:$0xff]   ;;  %v2909_v33 = vpack.c.bf16 %v18100_v22, %v18081_v49  ;;  %v3105_v49 = vld [vmem:[%s17460_s22 + $0x100] sm:$0xff] }
  0xe6   : > { %14828 = vmatprep.subr.bf16.mxu0 %v16623_v35  ;;  %14988 = vmatprep.subr.bf16.mxu1 %v16624_v21 }
  0xe8   : > { %14813 = vmatmul.mubr.bf16.gmra.mrb[28].mxu0 %v2582_v44  ;;  %14973 = vmatmul.mubr.bf16.gmra.mrb[28].mxu1 %v2582_v44  ;;  %v16654_v44 = vld [vmem:[%s20612_s2 + $0x1d4] ss:$8 sps:$4 sm:$0xff]  }
  0xe9   : > { %14829 = vmatpush3.bf16.msra.mxu0 %v16623_v35  ;;  %14989 = vmatpush3.bf16.msra.mxu1 %v16624_v21  ;;  %v2910_v35 = vpack.c.bf16 %v18114_v60, %v18103_v54  ;;  %v16653_v21 = vld [vmem:[%s20612_s2 + $0x1d0] ss:$8 sps:$4 sm:$0xff]   ;;  %v16678_v60 = vld [vmem:[%s20614_s4 + $0x94] ss:$8 sps:$4 sm:$0xff]  }
  0xea   : > { %14830 = vmatprep.subr.bf16.mxu0 %v16625_v24  ;;  %14990 = vmatprep.subr.bf16.mxu1 %v16626_v25  ;;  %v16673_v54 = vld [vmem:[%s20612_s2 + $0x270] ss:$8 sps:$4 sm:$0xff]  }
  0xeb   : > { %14832 = vmatprep.mubr.bf16.mxu0 %v17951_v37  ;;  %14992 = vmatprep.mubr.bf16.mxu1 %v17951_v37  ;;  %v16638_v37 = vld [vmem:[%s20612_s2 + $0x154] ss:$8 sps:$4 sm:$0xff]  }
  0xed   : > { %14831 = vmatpush3.bf16.msra.mxu0 %v16625_v24  ;;  %14991 = vmatpush3.bf16.msra.mxu1 %v16626_v25  ;;  %v2911_v24 = vpack.c.bf16 %v18136_v42, %v18117_v61  ;;  %v18214_v25 = vld [vmem:[%s17535_s20 + $0x100] sm:$0xff]  ;;  %v16686_v42 = vld [vmem:[%s20614_s4 + $0xd4] ss:$8 sps:$4 sm:$0xff]  }
  0xee   : > { %14848 = vmatprep.subr.bf16.mxu0 %v16627_v28  ;;  %15008 = vmatprep.subr.bf16.mxu1 %v16628_v29  ;;  %v16680_v61 = vld [vmem:[%s20614_s4 + $0xa4] ss:$8 sps:$4 sm:$0xff]  }
  0xf0   : > { %14833 = vmatmul.mubr.bf16.vlgmr.msra.gmra.mrb[16].mxu0 %v18051_v34  ;;  %14993 = vmatmul.mubr.bf16.vlgmr.msra.gmra.mrb[16].mxu1 %v18051_v34 }
  0xf1   : > { %14849 = vmatpush3.bf16.msra.mxu0 %v16627_v28  ;;  %15009 = vmatpush3.bf16.msra.mxu1 %v16628_v29  ;;  %v2912_v28 = vpack.c.bf16 %v18214_v25, %v18139_v2  ;;  %v16657_v29 = vld [vmem:[%s20612_s2 + $0x1f0] ss:$8 sps:$4 sm:$0xff]   ;;  %v3306_v2 = vld [vmem:[%s17535_s20 + $0x108] sm:$0xff] }
  0xf2   : > { %14850 = vmatprep.subr.bf16.mxu0 %v16629_v38  ;;  %15010 = vmatprep.subr.bf16.mxu1 %v16630_v39 }
  0xf3   : > { %14836 = vmatprep.mubr.bf16.mxu0 %v18061_v40  ;;  %14996 = vmatprep.mubr.bf16.mxu1 %v18061_v40 }
  0xf5   : > { %14851 = vmatpush3.bf16.msra.mxu0 %v16629_v38  ;;  %15011 = vmatpush3.bf16.msra.mxu1 %v16630_v39  ;;  %v16660_v38 = vld [vmem:[%s20612_s2 + $0x204] ss:$8 sps:$4 sm:$0xff]   ;;  %v16661_v39 = vld [vmem:[%s20612_s2 + $0x210] ss:$8 sps:$4 sm:$0xff]  }
  0xf6   : > { %14852 = vmatprep.subr.bf16.mxu0 %v16631_v12  ;;  %15012 = vmatprep.subr.bf16.mxu1 %v16632_v46 }
  0xf8   : > { %14837 = vmatmul.mubr.bf16.gmra.mrb[20].mxu0 %v18087_v50  ;;  %14997 = vmatmul.mubr.bf16.gmra.mrb[20].mxu1 %v18087_v50 }
  0xf9   : > { %14853 = vmatpush3.bf16.msra.mxu0 %v16631_v12  ;;  %15013 = vmatpush3.bf16.msra.mxu1 %v16632_v46  ;;  %v16665_v12 = vld [vmem:[%s20612_s2 + $0x230] ss:$8 sps:$4 sm:$0xff]   ;;  %v16667_v46 = vld [vmem:[%s20612_s2 + $0x240] ss:$8 sps:$4 sm:$0xff]  }
  0xfa   : > { %14854 = vmatprep.subr.bf16.mxu0 %v16633_v51  ;;  %15014 = vmatprep.subr.bf16.mxu1 %v16634_v52 }
  0xfb   : > { %14840 = vmatprep.mubr.bf16.mxu0 %v18097_v53  ;;  %15000 = vmatprep.mubr.bf16.mxu1 %v18097_v53 }
  0xfd   : > { %14855 = vmatpush3.bf16.msra.mxu0 %v16633_v51  ;;  %15015 = vmatpush3.bf16.msra.mxu1 %v16634_v52  ;;  %v16672_v51 = vld [vmem:[%s20612_s2 + $0x264] ss:$8 sps:$4 sm:$0xff]   ;;  %v17315_v52 = vld [vmem:[%s17460_s22 + $0xf8] sm:$0xff] }
  0xfe   : > { %14856 = vmatprep.subr.bf16.mxu0 %v16635_v55  ;;  %15016 = vmatprep.subr.bf16.mxu1 %v16636_v31  ;;  %v3113_v22 = vpack.c.bf16 %v3105_v49, %v17315_v52 }
 0x100   : > { %14841 = vmatmul.mubr.bf16.gmra.mrb[24].mxu0 %v18123_v62  ;;  %15001 = vmatmul.mubr.bf16.gmra.mrb[24].mxu1 %v18123_v62 }
 0x101   : > { %14857 = vmatpush3.bf16.msra.mxu0 %v16635_v55  ;;  %15017 = vmatpush3.bf16.msra.mxu1 %v16636_v31  ;;  %v16675_v55 = vld [vmem:[%s20614_s4 + $0x80] ss:$8 sps:$4 sm:$0xff]   ;;  %v16677_v31 = vld [vmem:[%s20614_s4 + $0x90] ss:$8 sps:$4 sm:$0xff]  }
 0x102   : > { %14858 = vmatprep.subr.bf16.mxu0 %v16637_v63  ;;  %15018 = vmatprep.subr.bf16.mxu1 %v16638_v37 }
 0x103   : > { %14844 = vmatprep.mubr.bf16.mxu0 %v18133_v0  ;;  %15004 = vmatprep.mubr.bf16.mxu1 %v18133_v0 }
 0x105   : > { %14859 = vmatpush3.bf16.msra.mxu0 %v16637_v63  ;;  %15019 = vmatpush3.bf16.msra.mxu1 %v16638_v37  ;;  %v16682_v63 = vld [vmem:[%s20614_s4 + $0xb4] ss:$8 sps:$4 sm:$0xff]   ;;  %v16684_v37 = vld [vmem:[%s20614_s4 + $0xc4] ss:$8 sps:$4 sm:$0xff]  }
 0x106   : > { %14860 = vmatprep.subr.bf16.mxu0 %v16639_v3  ;;  %15020 = vmatprep.subr.bf16.mxu1 %v16640_v4 }
 0x108   : > { %14845 = vmatmul.mubr.bf16.gmra.mrb[28].mxu0 %v18153_v5  ;;  %15005 = vmatmul.mubr.bf16.gmra.mrb[28].mxu1 %v18153_v5 }
 0x109   : > { %14861 = vmatpush3.bf16.msra.mxu0 %v16639_v3  ;;  %15021 = vmatpush3.bf16.msra.mxu1 %v16640_v4  ;;  %v16688_v3 = vld [vmem:[%s20614_s4 + $0xe4] ss:$8 sps:$4 sm:$0xff]   ;;  %v3314_v4 = vpack.c.bf16 %v3306_v2, %v18214_v25 }
 0x10a   : > { %14862 = vmatprep.subr.bf16.mxu0 %v16641_v6  ;;  %15022 = vmatprep.subr.bf16.mxu1 %v16642_v7 }
 0x10b   : > { %14864 = vmatprep.mubr.bf16.mxu0 %v2905_v9  ;;  %15024 = vmatprep.mubr.bf16.mxu1 %v2905_v9 }
 0x10d   : > { %14863 = vmatpush3.bf16.msra.mxu0 %v16641_v6  ;;  %15023 = vmatpush3.bf16.msra.mxu1 %v16642_v7  ;;  %v16690_v6 = vld [vmem:[%s20614_s4 + $0xf4] ss:$8 sps:$4 sm:$0xff]   ;;  %v18366_v7 = vld [vmem:[%s20613_s3 + $0x1] ss:$0 sm:$0xff] }
 0x10e   : > { %14880 = vmatprep.subr.bf16.mxu0 %v16643_v10  ;;  %15040 = vmatprep.subr.bf16.mxu1 %v16644_v11 }
 0x110   : > { %14865 = vmatmul.mubr.bf16.vlgmr.msra.gmra.mrb[16].mxu0 %v2906_v59  ;;  %15025 = vmatmul.mubr.bf16.vlgmr.msra.gmra.mrb[16].mxu1 %v2906_v59 }
 0x111   : > { %14881 = vmatpush3.bf16.msra.mxu0 %v16643_v10  ;;  %15041 = vmatpush3.bf16.msra.mxu1 %v16644_v11 }
 0x112   : > { %14882 = vmatprep.subr.bf16.mxu0 %v16645_v13  ;;  %15042 = vmatprep.subr.bf16.mxu1 %v16646_v14 }
 0x113   : > { %14868 = vmatprep.mubr.bf16.mxu0 %v2907_v23  ;;  %15028 = vmatprep.mubr.bf16.mxu1 %v2907_v23 }
 0x115   : > { %14883 = vmatpush3.bf16.msra.mxu0 %v16645_v13  ;;  %15043 = vmatpush3.bf16.msra.mxu1 %v16646_v14 }
 0x116   : > { %14884 = vmatprep.subr.bf16.mxu0 %v16647_v15  ;;  %15044 = vmatprep.subr.bf16.mxu1 %v16648_v26 }
 0x118   : > { %14869 = vmatmul.mubr.bf16.gmra.mrb[20].mxu0 %v2908_v16  ;;  %15029 = vmatmul.mubr.bf16.gmra.mrb[20].mxu1 %v2908_v16 }
 0x119   : > { %14885 = vmatpush3.bf16.msra.mxu0 %v16647_v15  ;;  %15045 = vmatpush3.bf16.msra.mxu1 %v16648_v26 }
 0x11a   : > { %14886 = vmatprep.subr.bf16.mxu0 %v16649_v27  ;;  %15046 = vmatprep.subr.bf16.mxu1 %v16650_v17 }
 0x11b   : > { %14872 = vmatprep.mubr.bf16.mxu0 %v2909_v33  ;;  %15032 = vmatprep.mubr.bf16.mxu1 %v2909_v33 }
 0x11d   : > { %14887 = vmatpush3.bf16.msra.mxu0 %v16649_v27  ;;  %15047 = vmatpush3.bf16.msra.mxu1 %v16650_v17 }
 0x11e   : > { %14888 = vmatprep.subr.bf16.mxu0 %v16651_v19  ;;  %15048 = vmatprep.subr.bf16.mxu1 %v16652_v20 }
 0x120   : > { %14873 = vmatmul.mubr.bf16.gmra.mrb[24].mxu0 %v2910_v35  ;;  %15033 = vmatmul.mubr.bf16.gmra.mrb[24].mxu1 %v2910_v35 }
 0x121   : > { %14889 = vmatpush3.bf16.msra.mxu0 %v16651_v19  ;;  %15049 = vmatpush3.bf16.msra.mxu1 %v16652_v20 }
 0x122   : > { %14890 = vmatprep.subr.bf16.mxu0 %v16653_v21  ;;  %15050 = vmatprep.subr.bf16.mxu1 %v16654_v44 }
 0x123   : > { %14876 = vmatprep.mubr.bf16.mxu0 %v2911_v24  ;;  %15036 = vmatprep.mubr.bf16.mxu1 %v2911_v24 }
 0x125   : > { %14891 = vmatpush3.bf16.msra.mxu0 %v16653_v21  ;;  %15051 = vmatpush3.bf16.msra.mxu1 %v16654_v44 }
 0x126   : > { %14892 = vmatprep.subr.bf16.mxu0 %v16655_v45  ;;  %15052 = vmatprep.subr.bf16.mxu1 %v16656_v58 }
 0x128   : > { %14877 = vmatmul.mubr.bf16.gmra.mrb[28].mxu0 %v2912_v28  ;;  %15037 = vmatmul.mubr.bf16.gmra.mrb[28].mxu1 %v2912_v28 }
 0x129   : > { %14893 = vmatpush3.bf16.msra.mxu0 %v16655_v45  ;;  %15053 = vmatpush3.bf16.msra.mxu1 %v16656_v58 }
 0x12a   : > { %14894 = vmatprep.subr.bf16.mxu0 %v16657_v29  ;;  %15054 = vmatprep.subr.bf16.mxu1 %v16658_v30 }
 0x12b   : > { %14896 = vmatprep.mubr.bf16.mxu0 %v17849_v36  ;;  %15056 = vmatprep.mubr.bf16.mxu1 %v17849_v36  ;;  %v16664_v36 = vld [vmem:[%s20612_s2 + $0x224] ss:$8 sps:$4 sm:$0xff]  }
 0x12d   : > { %14895 = vmatpush3.bf16.msra.mxu0 %v16657_v29  ;;  %15055 = vmatpush3.bf16.msra.mxu1 %v16658_v30  ;;  %v20634_v30 = vmov 0.0  }
 0x12e   : > { %14912 = vmatprep.subr.bf16.mxu0 %v16659_v32  ;;  %15072 = vmatprep.subr.bf16.mxu1 %v16660_v38 }
 0x130   : > { %14897 = vmatmul.mubr.bf16.vlgmr.msra.gmra.mrb[16].mxu0 %v17853_v8  ;;  %15057 = vmatmul.mubr.bf16.vlgmr.msra.gmra.mrb[16].mxu1 %v17853_v8  ;;  %v16666_v8 = vld [vmem:[%s20612_s2 + $0x234] ss:$8 sps:$4 sm:$0xff]  }
 0x131   : > { %14913 = vmatpush3.bf16.msra.mxu0 %v16659_v32  ;;  %15073 = vmatpush3.bf16.msra.mxu1 %v16660_v38 }
 0x132   : > { %14914 = vmatprep.subr.bf16.mxu0 %v16661_v39  ;;  %15074 = vmatprep.subr.bf16.mxu1 %v16662_v41 }
 0x133   : > { %14900 = vmatprep.mubr.bf16.mxu0 %v17885_v48  ;;  %15060 = vmatprep.mubr.bf16.mxu1 %v17885_v48  ;;  %v16668_v48 = vld [vmem:[%s20612_s2 + $0x244] ss:$8 sps:$4 sm:$0xff]  }
 0x135   : > { %14915 = vmatpush3.bf16.msra.mxu0 %v16661_v39  ;;  %15075 = vmatpush3.bf16.msra.mxu1 %v16662_v41 }
 0x136   : > { %14916 = vmatprep.subr.bf16.mxu0 %v16663_v43  ;;  %15076 = vmatprep.subr.bf16.mxu1 %v16664_v36 }
 0x138   : > { %14901 = vmatmul.mubr.bf16.gmra.mrb[20].mxu0 %v17889_v18  ;;  %15061 = vmatmul.mubr.bf16.gmra.mrb[20].mxu1 %v17889_v18  ;;  %v16670_v18 = vld [vmem:[%s20612_s2 + $0x254] ss:$8 sps:$4 sm:$0xff]  }
 0x139   : > { %14917 = vmatpush3.bf16.msra.mxu0 %v16663_v43  ;;  %15077 = vmatpush3.bf16.msra.mxu1 %v16664_v36 }
 0x13a   : > { %14918 = vmatprep.subr.bf16.mxu0 %v16665_v12  ;;  %15078 = vmatprep.subr.bf16.mxu1 %v16666_v8 }
 0x13b   : > { %14904 = vmatprep.mubr.bf16.mxu0 %v17921_v56  ;;  %15064 = vmatprep.mubr.bf16.mxu1 %v17921_v56  ;;  %v16671_v56 = vld [vmem:[%s20612_s2 + $0x260] ss:$8 sps:$4 sm:$0xff]  }
 0x13d   : > { %14919 = vmatpush3.bf16.msra.mxu0 %v16665_v12  ;;  %15079 = vmatpush3.bf16.msra.mxu1 %v16666_v8 }
 0x13e   : > { %14920 = vmatprep.subr.bf16.mxu0 %v16667_v46  ;;  %15080 = vmatprep.subr.bf16.mxu1 %v16668_v48 }
 0x140   : > { %14905 = vmatmul.mubr.bf16.gmra.mrb[24].mxu0 %v17925_v57  ;;  %15065 = vmatmul.mubr.bf16.gmra.mrb[24].mxu1 %v17925_v57  ;;  %v16674_v57 = vld [vmem:[%s20612_s2 + $0x274] ss:$8 sps:$4 sm:$0xff]  }
 0x141   : > { %14921 = vmatpush3.bf16.msra.mxu0 %v16667_v46  ;;  %15081 = vmatpush3.bf16.msra.mxu1 %v16668_v48 }
 0x142   : > { %14922 = vmatprep.subr.bf16.mxu0 %v16669_v47  ;;  %15082 = vmatprep.subr.bf16.mxu1 %v16670_v18 }
 0x143   : > { %14908 = vmatprep.mubr.bf16.mxu0 %v17958_v1  ;;  %15068 = vmatprep.mubr.bf16.mxu1 %v17958_v1  ;;  %v16676_v1 = vld [vmem:[%s20614_s4 + $0x84] ss:$8 sps:$4 sm:$0xff]  }
 0x145   : > { %14923 = vmatpush3.bf16.msra.mxu0 %v16669_v47  ;;  %15083 = vmatpush3.bf16.msra.mxu1 %v16670_v18 }
 0x146   : > { %14924 = vmatprep.subr.bf16.mxu0 %v16671_v56  ;;  %15084 = vmatprep.subr.bf16.mxu1 %v16672_v51 }
 0x148   : > { %14909 = vmatmul.mubr.bf16.gmra.mrb[28].mxu0 %v3113_v22  ;;  %15069 = vmatmul.mubr.bf16.gmra.mrb[28].mxu1 %v3113_v22 }
 0x149   : > { %14925 = vmatpush3.bf16.msra.mxu0 %v16671_v56  ;;  %15085 = vmatpush3.bf16.msra.mxu1 %v16672_v51 }
 0x14a   : > { %14926 = vmatprep.subr.bf16.mxu0 %v16673_v54  ;;  %15086 = vmatprep.subr.bf16.mxu1 %v16674_v57 }
 0x14b   : > { %14928 = vmatprep.mubr.bf16.mxu0 %v18051_v34  ;;  %15088 = vmatprep.mubr.bf16.mxu1 %v18051_v34  ;;  %v16679_v34 = vld [vmem:[%s20614_s4 + $0xa0] ss:$8 sps:$4 sm:$0xff]  }
 0x14d   : > { %14927 = vmatpush3.bf16.msra.mxu0 %v16673_v54  ;;  %15087 = vmatpush3.bf16.msra.mxu1 %v16674_v57 }
 0x14e   : > { %15104 = vmatprep.subr.bf16.mxu0 %v16675_v55  ;;  %15424 = vmatprep.subr.bf16.mxu1 %v16676_v1 }
 0x150   : > { %14929 = vmatmul.mubr.bf16.vlgmr.msra.gmra.mrb[16].mxu0 %v18061_v40  ;;  %15089 = vmatmul.mubr.bf16.vlgmr.msra.gmra.mrb[16].mxu1 %v18061_v40  ;;  %v16681_v40 = vld [vmem:[%s20614_s4 + $0xb0] ss:$8 sps:$4 sm:$0xff]  }
 0x151   : > { %14932 = vmatprep.mubr.bf16.mxu0 %v18087_v50  ;;  %15092 = vmatprep.mubr.bf16.mxu1 %v18087_v50  ;;  %v16683_v50 = vld [vmem:[%s20614_s4 + $0xc0] ss:$8 sps:$4 sm:$0xff]  }
 0x152   : > { %15105 = vmatpush3.bf16.msra.mxu0 %v16675_v55  ;;  %15425 = vmatpush3.bf16.msra.mxu1 %v16676_v1 }
 0x153   : > { %15106 = vmatprep.subr.bf16.mxu0 %v16677_v31  ;;  %15426 = vmatprep.subr.bf16.mxu1 %v16678_v60 }
 0x156   : > { %15107 = vmatpush3.bf16.msra.mxu0 %v16677_v31  ;;  %15427 = vmatpush3.bf16.msra.mxu1 %v16678_v60 }
 0x157   : > { %15108 = vmatprep.subr.bf16.mxu0 %v16679_v34  ;;  %15428 = vmatprep.subr.bf16.mxu1 %v16680_v61 }
 0x158   : > { %14933 = vmatmul.mubr.bf16.gmra.mrb[20].mxu0 %v18097_v53  ;;  %15093 = vmatmul.mubr.bf16.gmra.mrb[20].mxu1 %v18097_v53  ;;  %v16685_v53 = vld [vmem:[%s20614_s4 + $0xd0] ss:$8 sps:$4 sm:$0xff]  }
 0x159   : > { %14936 = vmatprep.mubr.bf16.mxu0 %v18123_v62  ;;  %15096 = vmatprep.mubr.bf16.mxu1 %v18123_v62  ;;  %v16687_v62 = vld [vmem:[%s20614_s4 + $0xe0] ss:$8 sps:$4 sm:$0xff]  }
 0x15a   : > { %15109 = vmatpush3.bf16.msra.mxu0 %v16679_v34  ;;  %15429 = vmatpush3.bf16.msra.mxu1 %v16680_v61 }
 0x15b   : > { %15110 = vmatprep.subr.bf16.mxu0 %v16681_v40  ;;  %15430 = vmatprep.subr.bf16.mxu1 %v16682_v63 }
 0x15e   : > { %15111 = vmatpush3.bf16.msra.mxu0 %v16681_v40  ;;  %15431 = vmatpush3.bf16.msra.mxu1 %v16682_v63 }
 0x15f   : > { %15112 = vmatprep.subr.bf16.mxu0 %v16683_v50  ;;  %15432 = vmatprep.subr.bf16.mxu1 %v16684_v37 }
 0x160   : > { %14937 = vmatmul.mubr.bf16.gmra.mrb[24].mxu0 %v18133_v0  ;;  %15097 = vmatmul.mubr.bf16.gmra.mrb[24].mxu1 %v18133_v0  ;;  %v16689_v0 = vld [vmem:[%s20614_s4 + $0xf0] ss:$8 sps:$4 sm:$0xff]  }
 0x161   : > { %14940 = vmatprep.mubr.bf16.mxu0 %v18153_v5  ;;  %15100 = vmatprep.mubr.bf16.mxu1 %v18153_v5  ;;  %v18361_v5 = vld [vmem:[%s20613_s3] ss:$0 sm:$0xff] }
 0x162   : > { %15113 = vmatpush3.bf16.msra.mxu0 %v16683_v50  ;;  %15433 = vmatpush3.bf16.msra.mxu1 %v16684_v37 }
 0x163   : > { %15114 = vmatprep.subr.bf16.mxu0 %v16685_v53  ;;  %15434 = vmatprep.subr.bf16.mxu1 %v16686_v42 }
 0x166   : > { %15115 = vmatpush3.bf16.msra.mxu0 %v16685_v53  ;;  %15435 = vmatpush3.bf16.msra.mxu1 %v16686_v42 }
 0x167   : > { %15116 = vmatprep.subr.bf16.mxu0 %v16687_v62  ;;  %15436 = vmatprep.subr.bf16.mxu1 %v16688_v3 }
 0x168   : > { %14941 = vmatmul.mubr.bf16.gmra.mrb[28].mxu0 %v3314_v4  ;;  %15101 = vmatmul.mubr.bf16.gmra.mrb[28].mxu1 %v3314_v4 }
 0x16a   : > { %15117 = vmatpush3.bf16.msra.mxu0 %v16687_v62  ;;  %15437 = vmatpush3.bf16.msra.mxu1 %v16688_v3 }
 0x16b   : > { %15118 = vmatprep.subr.bf16.mxu0 %v16689_v0  ;;  %15438 = vmatprep.subr.bf16.mxu1 %v16690_v6 }
 0x16e   : > { %15119 = vmatpush3.bf16.msra.mxu0 %v16689_v0  ;;  %15439 = vmatpush3.bf16.msra.mxu1 %v16690_v6 }
 0x183   : > { %v14610_v9 = vpop.f32.mrb[0].mxu0  ;;  %v14770_v11 = vpop.f32.mrb[0].mxu1 }
 0x184   : > { %v1445_v10 = vadd.f32 %v14610_v9, %v18361_v5  ;;  %v1357_v59 = vpop.f32.mrb[1].mxu0  ;;  %v2473_v13 = vadd.f32 %v14770_v11, %v18366_v7  ;;  %v2385_v23 = vpop.f32.mrb[1].mxu1 }
 0x185   : > { %v18371_v14 = vadd.f32 %v18361_v5, %v1357_v59  ;;  %v14611_v15 = vpop.f32.mrb[2].mxu0  ;;  %v2471_v16 = vadd.f32 %v18366_v7, %v2385_v23  ;;  %v14771_v17 = vpop.f32.mrb[2].mxu1 }
 0x186   : > { %v1461_v26 = vmax.f32 %v1445_v10, 0.0  ;;  %v1446_v27 = vadd.f32 %v14611_v15, %v18361_v5  ;;  %v1360_v33 = vpop.f32.mrb[3].mxu0  ;;  %v2489_v19 = vmax.f32 %v2473_v13, 0.0  ;;  %v2474_v35 = vadd.f32 %v14771_v17, %v18366_v7  ;;  %v2388_v44 = vpop.f32.mrb[3].mxu1 }
 0x187   : > { %v20633_v20 = vmax.f32 %v18371_v14, 0.0  ;;  %v18378_v21 = vadd.f32 %v18361_v5, %v1360_v33  ;;  %v2487_v24 = vmax.f32 %v2471_v16, 0.0  ;;  %v18381_v45 = vadd.f32 %v18366_v7, %v2388_v44 }
 0x188   : > { %v1462_v25 = vmax.f32 %v1446_v27, 0.0  ;;  %v2490_v28 = vmax.f32 %v2474_v35, 0.0 }
 0x189   : > { %v18385_v58 = vpack.c.bf16 %v1461_v26, %v20633_v20  ;;  %v20630_v29 = vmax.f32 %v18378_v21, 0.0  ;;  %v4631_v32 = vpack.c.bf16 %v2487_v24, %v20634_v30  ;;  %v18389_v38 = vpack.c.bf16 %v2489_v19, %v2487_v24 }
 0x18a   : > { %v20628_v39 = vmax.f32 %v18381_v45, 0.0 }
 0x18b   : > { %v18394_v41 = vpack.c.bf16 %v1462_v25, %v20630_v29  ;;  %v14614_v43 = vpop.f32.mrb[4].mxu0  ;;  %v14774_v8 = vpop.f32.mrb[4].mxu1  ;;  %15120 = vmatprep.mubr.bf16.mxu0 %v4631_v32  ;;  %15440 = vmatprep.mubr.bf16.mxu1 %v4631_v32 }
 0x18c   : > { %v18398_v36 = vpack.c.bf16 %v2490_v28, %v20628_v39  ;;  %v1449_v12 = vadd.f32 %v14614_v43, %v18361_v5  ;;  %v1373_v46 = vpop.f32.mrb[5].mxu0  ;;  %v2477_v48 = vadd.f32 %v14774_v8, %v18366_v7  ;;  %v2401_v18 = vpop.f32.mrb[5].mxu1 }
 0x18d   : > { %20666 = vst [vmem:[#allocation9_spill] sm:$0xff] %v18394_v41  ;;  %v1447_v47 = vadd.f32 %v18361_v5, %v1373_v46  ;;  %v14615_v49 = vpop.f32.mrb[6].mxu0  ;;  %v2475_v51 = vadd.f32 %v18366_v7, %v2401_v18  ;;  %v14775_v22 = vpop.f32.mrb[6].mxu1 }
 0x18e   : > { %20667 = vst [vmem:[#allocation10_spill] sm:$0xff] %v18398_v36  ;;  %v1465_v56 = vmax.f32 %v1449_v12, 0.0  ;;  %v1450_v52 = vadd.f32 %v14615_v49, %v18361_v5  ;;  %v1376_v54 = vpop.f32.mrb[7].mxu0  ;;  %v2493_v57 = vmax.f32 %v2477_v48, 0.0  ;;  %v2478_v1 = vadd.f32 %v14775_v22, %v18366_v7  ;;  %v2404_v60 = vpop.f32.mrb[7].mxu1 }
 0x18f   : > { %v1463_v55 = vmax.f32 %v1447_v47, 0.0  ;;  %v1448_v31 = vadd.f32 %v18361_v5, %v1376_v54  ;;  %v2491_v34 = vmax.f32 %v2475_v51, 0.0  ;;  %v2476_v40 = vadd.f32 %v18366_v7, %v2404_v60 }
 0x190   : > { %v1466_v61 = vmax.f32 %v1450_v52, 0.0  ;;  %v2494_v37 = vmax.f32 %v2478_v1, 0.0 }
 0x191   : > { %v18408_v63 = vpack.c.bf16 %v1463_v55, %v1461_v26  ;;  %v18410_v50 = vpack.c.bf16 %v1465_v56, %v1463_v55  ;;  %v1464_v53 = vmax.f32 %v1448_v31, 0.0  ;;  %v18412_v42 = vpack.c.bf16 %v2491_v34, %v2489_v19 }
 0x192   : > { %v18414_v2 = vpack.c.bf16 %v2493_v57, %v2491_v34  ;;  %v2492_v62 = vmax.f32 %v2476_v40, 0.0 }
 0x193   : > { %20668 = vst [vmem:[#allocation11_spill] sm:$0xff] %v18412_v42  ;;  %v18416_v3 = vpack.c.bf16 %v1464_v53, %v1462_v25  ;;  %v18418_v4 = vpack.c.bf16 %v1466_v61, %v1464_v53  ;;  %v14618_v0 = vpop.f32.mrb[8].mxu0  ;;  %v14778_v11 = vpop.f32.mrb[8].mxu1  ;;  %15121 = vmatmul.mubr.bf16.vlgmr.msra.gmra.mrb[32].mxu0 %v18412_v42  ;;  %15441 = vmatmul.mubr.bf16.vlgmr.msra.gmra.mrb[32].mxu1 %v18412_v42 }
 0x194   : > { %v18420_v6 = vpack.c.bf16 %v2492_v62, %v2490_v28  ;;  %v18422_v9 = vpack.c.bf16 %v2494_v37, %v2492_v62  ;;  %v1453_v10 = vadd.f32 %v14618_v0, %v18361_v5  ;;  %v1389_v59 = vpop.f32.mrb[9].mxu0  ;;  %v2481_v13 = vadd.f32 %v14778_v11, %v18366_v7  ;;  %v2417_v15 = vpop.f32.mrb[9].mxu1 }
 0x195   : > { %20669 = vst [vmem:[#allocation12_spill] sm:$0xff] %v18418_v4  ;;  %v1451_v23 = vadd.f32 %v18361_v5, %v1389_v59  ;;  %v14619_v26 = vpop.f32.mrb[10].mxu0  ;;  %v2479_v27 = vadd.f32 %v18366_v7, %v2417_v15  ;;  %v14779_v33 = vpop.f32.mrb[10].mxu1 }
 0x196   : > { %20670 = vst [vmem:[#allocation13_spill] sm:$0xff] %v18422_v9  ;;  %v1469_v16 = vmax.f32 %v1453_v10, 0.0  ;;  %v1454_v17 = vadd.f32 %v14619_v26, %v18361_v5  ;;  %v1392_v19 = vpop.f32.mrb[11].mxu0  ;;  %v2497_v35 = vmax.f32 %v2481_v13, 0.0  ;;  %v2482_v24 = vadd.f32 %v14779_v33, %v18366_v7  ;;  %v2420_v28 = vpop.f32.mrb[11].mxu1 }
 0x197   : > { %v1467_v44 = vmax.f32 %v1451_v23, 0.0  ;;  %v1452_v25 = vadd.f32 %v18361_v5, %v1392_v19  ;;  %v2495_v32 = vmax.f32 %v2479_v27, 0.0  ;;  %v2480_v12 = vadd.f32 %v18366_v7, %v2420_v28  ;;  %v16693_v33 = vld [vmem:[%s20614_s4 + $0x10] ss:$8 sps:$4 sm:$0xff]   ;;  %v16694_v19 = vld [vmem:[%s20614_s4 + $0x14] ss:$8 sps:$4 sm:$0xff]  }
 0x198   : > { %v1470_v43 = vmax.f32 %v1454_v17, 0.0  ;;  %v2498_v48 = vmax.f32 %v2482_v24, 0.0  ;;  %v16692_v17 = vld [vmem:[%s20614_s4 + $0x4] ss:$8 sps:$4 sm:$0xff]   ;;  %v16697_v24 = vld [vmem:[%s20614_s4 + $0x30] ss:$8 sps:$4 sm:$0xff]  }
 0x199   : > { %v18434_v8 = vpack.c.bf16 %v1467_v44, %v1465_v56  ;;  %v18436_v46 = vpack.c.bf16 %v1469_v16, %v1467_v44  ;;  %v1468_v47 = vmax.f32 %v1452_v25, 0.0  ;;  %v18438_v18 = vpack.c.bf16 %v2495_v32, %v2493_v57  ;;  %15456 = vmatprep.subr.bf16.mxu1 %v16692_v17  ;;  %v16696_v44 = vld [vmem:[%s20614_s4 + $0x24] ss:$8 sps:$4 sm:$0xff]   ;;  %v16698_v25 = vld [vmem:[%s20614_s4 + $0x34] ss:$8 sps:$4 sm:$0xff]  }
 0x19a   : > { %v18440_v49 = vpack.c.bf16 %v2497_v35, %v2495_v32  ;;  %v2496_v51 = vmax.f32 %v2480_v12, 0.0  ;;  %15457 = vmatpush3.bf16.msra.mxu1 %v16692_v17  ;;  %v16699_v28 = vld [vmem:[%s20614_s4 + $0x40] ss:$8 sps:$4 sm:$0xff]   ;;  %v16700_v32 = vld [vmem:[%s20614_s4 + $0x44] ss:$8 sps:$4 sm:$0xff]  }
 0x19b   : > { %20671 = vst [vmem:[#allocation14_spill] sm:$0xff] %v18438_v18  ;;  %v18442_v52 = vpack.c.bf16 %v1468_v47, %v1466_v61  ;;  %v18444_v22 = vpack.c.bf16 %v1470_v43, %v1468_v47  ;;  %v18446_v54 = vpop.f32.mrb[12].mxu0  ;;  %v18452_v56 = vpop.f32.mrb[12].mxu1  ;;  %15124 = vmatprep.mubr.bf16.mxu0 %v18438_v18  ;;  %15444 = vmatprep.mubr.bf16.mxu1 %v18438_v18  ;;  %v16702_v12 = vld [vmem:[%s20614_s4 + $0x54] ss:$8 sps:$4 sm:$0xff]  }
 0x19c   : > { %v18448_v55 = vpack.c.bf16 %v2496_v51, %v2494_v37  ;;  %v18450_v1 = vpack.c.bf16 %v2498_v48, %v2496_v51  ;;  %v1405_v57 = vpop.f32.mrb[13].mxu0  ;;  %v2433_v60 = vpop.f32.mrb[13].mxu1  ;;  %15458 = vmatprep.subr.bf16.mxu1 %v16694_v19  ;;  %v16704_v47 = vld [vmem:[%s20614_s4 + $0x64] ss:$8 sps:$4 sm:$0xff]   ;;  %v16705_v51 = vld [vmem:[%s20614_s4 + $0x70] ss:$8 sps:$4 sm:$0xff]  }
 0x19d   : > { %20672 = vst [vmem:[#allocation15_spill] sm:$0xff] %v18444_v22  ;;  %v18457_v31 = vadd.f32 %v18361_v5, %v1405_v57  ;;  %v18459_v34 = vpop.f32.mrb[14].mxu0  ;;  %v18462_v61 = vadd.f32 %v18366_v7, %v2433_v60  ;;  %v18464_v40 = vpop.f32.mrb[14].mxu1  ;;  %v16706_v57 = vld [vmem:[%s20614_s4 + $0x74] ss:$8 sps:$4 sm:$0xff]  }
 0x19e   : > { %20673 = vst [vmem:[#allocation16_spill] sm:$0xff] %v18450_v1  ;;  %v1408_v37 = vpop.f32.mrb[15].mxu0  ;;  %v2436_v0 = vpop.f32.mrb[15].mxu1  ;;  %15459 = vmatpush3.bf16.msra.mxu1 %v16694_v19  ;;  %v18545_v60 = vld [vmem:[%s20614_s4 + $0x100] ss:$8 sps:$4 sm:$0xff]  }
 0x19f   : > { %v20627_v53 = vmax.f32 %v18457_v31, 0.0  ;;  %v18468_v62 = vadd.f32 %v18361_v5, %v1408_v37  ;;  %v20625_v10 = vmax.f32 %v18462_v61, 0.0  ;;  %v18472_v11 = vadd.f32 %v18366_v7, %v2436_v0  ;;  %15460 = vmatprep.subr.bf16.mxu1 %v16696_v44  ;;  %v18550_v37 = vld [vmem:[%s20614_s4 + $0x104] ss:$8 sps:$4 sm:$0xff]  }
 0x1a1   : > { %20674 = vst [vmem:[#allocation17_spill] sm:$0xff] %v18468_v62  ;;  %20675 = vst [vmem:[#allocation18_spill] sm:$0xff] %v18472_v11  ;;  %v18476_v59 = vpack.c.bf16 %v20627_v53, %v1469_v16  ;;  %v20624_v13 = vmax.f32 %v18468_v62, 0.0  ;;  %v18481_v23 = vpack.c.bf16 %v20625_v10, %v2497_v35  ;;  %v20623_v15 = vmax.f32 %v18472_v11, 0.0  ;;  %v16691_v16 = vld [vmem:[%s20614_s4] ss:$8 sps:$4 sm:$0xff]  }
 0x1a2   : > { %15136 = vmatprep.subr.bf16.mxu0 %v16691_v16  ;;  %v16695_v35 = vld [vmem:[%s20614_s4 + $0x20] ss:$8 sps:$4 sm:$0xff]   ;;  %15461 = vmatpush3.bf16.msra.mxu1 %v16696_v44 }
 0x1a3   : > { %20676 = vst [vmem:[#allocation19_spill] sm:$0xff] %v18481_v23  ;;  %v18486_v26 = vpack.c.bf16 %v20624_v13, %v1470_v43  ;;  %v18490_v27 = vpack.c.bf16 %v20623_v15, %v2498_v48  ;;  %15125 = vmatmul.mubr.bf16.gmra.mrb[36].mxu0 %v18481_v23  ;;  %15445 = vmatmul.mubr.bf16.gmra.mrb[36].mxu1 %v18481_v23  ;;  %v16701_v43 = vld [vmem:[%s20614_s4 + $0x50] ss:$8 sps:$4 sm:$0xff]   ;;  %v16703_v48 = vld [vmem:[%s20614_s4 + $0x60] ss:$8 sps:$4 sm:$0xff]  }
 0x1a4   : > { %15137 = vmatpush3.bf16.msra.mxu0 %v16691_v16  ;;  %15462 = vmatprep.subr.bf16.mxu1 %v16698_v25  ;;  %v18556_v16 = vadd.f32 %v18452_v56, %v18366_v7 }
 0x1a5   : > { %15138 = vmatprep.subr.bf16.mxu0 %v16693_v33 }
 0x1a6   : > { %15463 = vmatpush3.bf16.msra.mxu1 %v16698_v25  ;;  %20677 = vst [vmem:[#allocation20_spill] sm:$0xff] %v18556_v16 }
 0x1a7   : > { %15464 = vmatprep.subr.bf16.mxu1 %v16700_v32 }
 0x1a8   : > { %15139 = vmatpush3.bf16.msra.mxu0 %v16693_v33 }
 0x1a9   : > { %15140 = vmatprep.subr.bf16.mxu0 %v16695_v35 }
 0x1aa   : > { %15465 = vmatpush3.bf16.msra.mxu1 %v16700_v32 }
 0x1ab   : > { %15466 = vmatprep.subr.bf16.mxu1 %v16702_v12 }
 0x1ac   : > { %15141 = vmatpush3.bf16.msra.mxu0 %v16695_v35 }
 0x1ad   : > { %15142 = vmatprep.subr.bf16.mxu0 %v16697_v24 }
 0x1ae   : > { %15467 = vmatpush3.bf16.msra.mxu1 %v16702_v12 }
 0x1af   : > { %15468 = vmatprep.subr.bf16.mxu1 %v16704_v47 }
 0x1b0   : > { %15143 = vmatpush3.bf16.msra.mxu0 %v16697_v24 }
 0x1b1   : > { %15144 = vmatprep.subr.bf16.mxu0 %v16699_v28 }
 0x1b2   : > { %15469 = vmatpush3.bf16.msra.mxu1 %v16704_v47 }
 0x1b3   : > { %15470 = vmatprep.subr.bf16.mxu1 %v16706_v57 }
 0x1b4   : > { %15145 = vmatpush3.bf16.msra.mxu0 %v16699_v28 }
 0x1b5   : > { %15146 = vmatprep.subr.bf16.mxu0 %v16701_v43 }
 0x1b6   : > { %15471 = vmatpush3.bf16.msra.mxu1 %v16706_v57 }
 0x1b7   : > { %15488 = vmatprep.subr.bf16.mxu1 %v18550_v37 }
 0x1b8   : > { %15147 = vmatpush3.bf16.msra.mxu0 %v16701_v43 }
 0x1b9   : > { %15148 = vmatprep.subr.bf16.mxu0 %v16703_v48 }
 0x1bc   : > { %15149 = vmatpush3.bf16.msra.mxu0 %v16703_v48 }
 0x1bd   : > { %15150 = vmatprep.subr.bf16.mxu0 %v16705_v51 }
 0x1c0   : > { %15151 = vmatpush3.bf16.msra.mxu0 %v16705_v51 }
 0x1c1   : > { %15168 = vmatprep.subr.bf16.mxu0 %v18545_v60 }
 0x223   : > { %v14930_v0 = vpop.f32.mrb[16].mxu0  ;;  %v15090_v33 = vpop.f32.mrb[16].mxu1 }
 0x224   : > { %v3501_v17 = vadd.f32 %v14930_v0, %v18361_v5  ;;  %v3413_v19 = vpop.f32.mrb[17].mxu0  ;;  %v4529_v35 = vadd.f32 %v15090_v33, %v18366_v7  ;;  %v4441_v24 = vpop.f32.mrb[17].mxu1  ;;  %v20626_v33 = vmax.f32 %v18556_v16, 0.0  ;;  %v20690_v16 = vmov 0.0  }
 0x225   : > { %v18561_v44 = vadd.f32 %v18361_v5, %v3413_v19  ;;  %v14931_v25 = vpop.f32.mrb[18].mxu0  ;;  %v4527_v32 = vadd.f32 %v18366_v7, %v4441_v24  ;;  %v15091_v12 = vpop.f32.mrb[18].mxu1 }
 0x226   : > { %v3517_v28 = vmax.f32 %v3501_v17, 0.0  ;;  %v3502_v43 = vadd.f32 %v14931_v25, %v18361_v5  ;;  %v3416_v48 = vpop.f32.mrb[19].mxu0  ;;  %v4545_v56 = vmax.f32 %v4529_v35, 0.0  ;;  %v4530_v51 = vadd.f32 %v15091_v12, %v18366_v7  ;;  %v4444_v0 = vpop.f32.mrb[19].mxu1 }
 0x227   : > { %v20631_v47 = vmax.f32 %v18561_v44, 0.0  ;;  %v18568_v57 = vadd.f32 %v18361_v5, %v3416_v48  ;;  %v4543_v19 = vmax.f32 %v4527_v32, 0.0  ;;  %v18572_v17 = vadd.f32 %v18366_v7, %v4444_v0 }
 0x228   : > { %v3518_v15 = vmax.f32 %v3502_v43, 0.0  ;;  %v4546_v35 = vmax.f32 %v4530_v51, 0.0 }
 0x229   : > { %v18576_v24 = vpack.c.bf16 %v3517_v28, %v20631_v47  ;;  %v20629_v25 = vmax.f32 %v18568_v57, 0.0  ;;  %v18581_v12 = vpack.c.bf16 %v4543_v19, %v20626_v33  ;;  %v18583_v48 = vpack.c.bf16 %v4545_v56, %v4543_v19 }
 0x22a   : > { %v20632_v13 = vmax.f32 %v18572_v17, 0.0 }
 0x22b   : > { %20678 = vst [vmem:[#allocation21_spill] sm:$0xff] %v18581_v12  ;;  %20679 = vst [vmem:[#allocation22_spill] sm:$0xff] %v18583_v48  ;;  %v18588_v32 = vpack.c.bf16 %v3518_v15, %v20629_v25  ;;  %v14934_v43 = vpop.f32.mrb[20].mxu0  ;;  %v15094_v10 = vpop.f32.mrb[20].mxu1  ;;  %15128 = vmatprep.mubr.bf16.mxu0 %v18581_v12  ;;  %15448 = vmatprep.mubr.bf16.mxu1 %v18581_v12 }
 0x22c   : > { %v18592_v0 = vpack.c.bf16 %v4546_v35, %v20632_v13  ;;  %v3505_v51 = vadd.f32 %v14934_v43, %v18361_v5  ;;  %v3429_v19 = vpop.f32.mrb[21].mxu0  ;;  %v4533_v33 = vadd.f32 %v15094_v10, %v18366_v7  ;;  %v4457_v39 = vpop.f32.mrb[21].mxu1 }
 0x22d   : > { %20680 = vst [vmem:[#allocation23_spill] sm:$0xff] %v18588_v32  ;;  %v3503_v53 = vadd.f32 %v18361_v5, %v3429_v19  ;;  %v14935_v25 = vpop.f32.mrb[22].mxu0  ;;  %v4531_v47 = vadd.f32 %v18366_v7, %v4457_v39  ;;  %v15095_v20 = vpop.f32.mrb[22].mxu1 }
 0x22e   : > { %20681 = vst [vmem:[#allocation24_spill] sm:$0xff] %v18592_v0  ;;  %v3521_v29 = vmax.f32 %v3505_v51, 0.0  ;;  %v3506_v13 = vadd.f32 %v14935_v25, %v18361_v5  ;;  %v3432_v30 = vpop.f32.mrb[23].mxu0  ;;  %v4549_v43 = vmax.f32 %v4533_v33, 0.0  ;;  %v4534_v18 = vadd.f32 %v15095_v20, %v18366_v7  ;;  %v4460_v42 = vpop.f32.mrb[23].mxu1 }
 0x22f   : > { %v3519_v23 = vmax.f32 %v3503_v53, 0.0  ;;  %v3504_v12 = vadd.f32 %v18361_v5, %v3432_v30  ;;  %v4547_v0 = vmax.f32 %v4531_v47, 0.0  ;;  %v4532_v19 = vadd.f32 %v18366_v7, %v4460_v42 }
 0x230   : > { %v3522_v10 = vmax.f32 %v3506_v13, 0.0  ;;  %v4550_v39 = vmax.f32 %v4534_v18, 0.0 }
 0x231   : > { %v18604_v11 = vpack.c.bf16 %v3519_v23, %v3517_v28  ;;  %v18606_v51 = vpack.c.bf16 %v3521_v29, %v3519_v23  ;;  %v3520_v1 = vmax.f32 %v3504_v12, 0.0  ;;  %v18608_v25 = vpack.c.bf16 %v4547_v0, %v4545_v56 }
 0x232   : > { %v18610_v9 = vpack.c.bf16 %v4549_v43, %v4547_v0  ;;  %v4548_v53 = vmax.f32 %v4532_v19, 0.0 }
 0x233   : > { %20682 = vst [vmem:[#allocation25_spill] sm:$0xff] %v18608_v25  ;;  %v18612_v33 = vpack.c.bf16 %v3520_v1, %v3518_v15  ;;  %v18614_v20 = vpack.c.bf16 %v3522_v10, %v3520_v1  ;;  %v14938_v30 = vpop.f32.mrb[24].mxu0  ;;  %v15098_v23 = vpop.f32.mrb[24].mxu1  ;;  %15129 = vmatmul.mubr.bf16.gmra.mrb[40].mxu0 %v18608_v25  ;;  %15449 = vmatmul.mubr.bf16.gmra.mrb[40].mxu1 %v18608_v25 }
 0x234   : > { %20683 = vst [vmem:[#allocation26_spill] sm:$0xff] %v18610_v9  ;;  %v18616_v47 = vpack.c.bf16 %v4548_v53, %v4546_v35  ;;  %v18618_v13 = vpack.c.bf16 %v4550_v39, %v4548_v53  ;;  %v3509_v42 = vadd.f32 %v14938_v30, %v18361_v5  ;;  %v3445_v18 = vpop.f32.mrb[25].mxu0  ;;  %v4537_v28 = vadd.f32 %v15098_v23, %v18366_v7  ;;  %v4473_v56 = vpop.f32.mrb[25].mxu1 }
 0x235   : > { %20684 = vst [vmem:[#allocation27_spill] sm:$0xff] %v18614_v20  ;;  %v3507_v15 = vadd.f32 %v18361_v5, %v3445_v18  ;;  %v14939_v1 = vpop.f32.mrb[26].mxu0  ;;  %v4535_v35 = vadd.f32 %v18366_v7, %v4473_v56  ;;  %v15099_v19 = vpop.f32.mrb[26].mxu1 }
 0x236   : > { %20685 = vst [vmem:[#allocation28_spill] sm:$0xff] %v18618_v13  ;;  %v3525_v12 = vmax.f32 %v3509_v42, 0.0  ;;  %v3510_v0 = vadd.f32 %v14939_v1, %v18361_v5  ;;  %v3448_v53 = vpop.f32.mrb[27].mxu0  ;;  %v4553_v30 = vmax.f32 %v4537_v28, 0.0  ;;  %v4538_v36 = vadd.f32 %v15099_v19, %v18366_v7  ;;  %v4476_v20 = vpop.f32.mrb[27].mxu1 }
 0x237   : > { %v3523_v13 = vmax.f32 %v3507_v15, 0.0  ;;  %v3508_v25 = vadd.f32 %v18361_v5, %v3448_v53  ;;  %v4551_v32 = vmax.f32 %v4535_v35, 0.0  ;;  %v4536_v18 = vadd.f32 %v18366_v7, %v4476_v20 }
 0x238   : > { %v3526_v23 = vmax.f32 %v3510_v0, 0.0  ;;  %v4554_v56 = vmax.f32 %v4538_v36, 0.0 }
 0x239   : > { %v18630_v62 = vpack.c.bf16 %v3523_v13, %v3521_v29  ;;  %v18632_v42 = vpack.c.bf16 %v3525_v12, %v3523_v13  ;;  %v3524_v22 = vmax.f32 %v3508_v25, 0.0  ;;  %v18634_v1 = vpack.c.bf16 %v4551_v32, %v4549_v43 }
 0x23a   : > { %v18636_v4 = vpack.c.bf16 %v4553_v30, %v4551_v32  ;;  %v4552_v28 = vmax.f32 %v4536_v18, 0.0 }
 0x23b   : > { %20686 = vst [vmem:[#allocation29_spill] sm:$0xff] %v18634_v1  ;;  %v18638_v15 = vpack.c.bf16 %v3524_v22, %v3522_v10  ;;  %v18640_v19 = vpack.c.bf16 %v3526_v23, %v3524_v22  ;;  %v14942_v53 = vpop.f32.mrb[28].mxu0  ;;  %v15102_v20 = vpop.f32.mrb[28].mxu1  ;;  %15132 = vmatprep.mubr.bf16.mxu0 %v18634_v1  ;;  %15452 = vmatprep.mubr.bf16.mxu1 %v18634_v1 }
 0x23c   : > { %20687 = vst [vmem:[#allocation30_spill] sm:$0xff] %v18636_v4  ;;  %v18642_v35 = vpack.c.bf16 %v4552_v28, %v4550_v39  ;;  %v18644_v0 = vpack.c.bf16 %v4554_v56, %v4552_v28  ;;  %v18647_v29 = vadd.f32 %v14942_v53, %v18361_v5  ;;  %v3461_v36 = vpop.f32.mrb[29].mxu0  ;;  %v18652_v32 = vadd.f32 %v15102_v20, %v18366_v7  ;;  %v4489_v43 = vpop.f32.mrb[29].mxu1 }
 0x23d   : > { %20688 = vst [vmem:[#allocation31_spill] sm:$0xff] %v18640_v19  ;;  %v3511_v22 = vadd.f32 %v18361_v5, %v3461_v36  ;;  %v14943_v10 = vpop.f32.mrb[30].mxu0  ;;  %v4539_v25 = vadd.f32 %v18366_v7, %v4489_v43  ;;  %v15103_v18 = vpop.f32.mrb[30].mxu1 }
 0x23e   : > { %20689 = vst [vmem:[#allocation32_spill] sm:$0xff] %v18644_v0  ;;  %v3529_v39 = vmax.f32 %v18647_v29, 0.0  ;;  %v3514_v13 = vadd.f32 %v14943_v10, %v18361_v5  ;;  %v3464_v28 = vpop.f32.mrb[31].mxu0  ;;  %v4557_v53 = vmax.f32 %v18652_v32, 0.0  ;;  %v4542_v1 = vadd.f32 %v15103_v18, %v18366_v7  ;;  %v4492_v19 = vpop.f32.mrb[31].mxu1 }
 0x23f   : > { %v3527_v0 = vmax.f32 %v3511_v22, 0.0  ;;  %v3512_v20 = vadd.f32 %v18361_v5, %v3464_v28  ;;  %v4555_v41 = vmax.f32 %v4539_v25, 0.0  ;;  %v4540_v4 = vadd.f32 %v18366_v7, %v4492_v19  ;;  %v16837_v29 = vld [vmem:[%s20616_s6 + $0x84] ss:$8 sps:$4 sm:$0xff]   ;;  %v16856_v32 = vld [vmem:[%s20616_s6 + $0xf0] ss:$8 sps:$4 sm:$0xff]  }
 0x240   : > { %v3530_v36 = vmax.f32 %v3514_v13, 0.0  ;;  %v4558_v10 = vmax.f32 %v4542_v1, 0.0  ;;  %v20691_v25 = vmax.f32 %v18371_v14, 0.0  ;;  %v16710_v14 = vld [vmem:[%s20614_s4 + $0x114] ss:$8 sps:$4 sm:$0xff]  }
 0x241   : > { %v18662_v9 = vpack.c.bf16 %v3527_v0, %v3525_v12  ;;  %v18666_v43 = vpack.c.bf16 %v3529_v39, %v3527_v0  ;;  %v18668_v48 = vpack.c.bf16 %v4555_v41, %v4553_v30  ;;  %v18672_v22 = vpack.c.bf16 %v4557_v53, %v4555_v41  ;;  %v16709_v41 = vld [vmem:[%s20614_s4 + $0x110] ss:$8 sps:$4 sm:$0xff]   ;;  %v16711_v30 = vld [vmem:[%s20614_s4 + $0x120] ss:$8 sps:$4 sm:$0xff]   ;;  %v16714_v1 = vld [vmem:[%s20614_s4 + $0x134] ss:$8 sps:$4 sm:$0xff]  }
 0x242   : > { %v3528_v18 = vmax.f32 %v3512_v20, 0.0  ;;  %v4556_v28 = vmax.f32 %v4540_v4, 0.0  ;;  %v4591_v13 = vpack.c.bf16 %v20691_v25, %v20690_v16  ;;  %v18696_v4 = vadd.f32 %v18446_v54, %v18361_v5  ;;  %v16712_v54 = vld [vmem:[%s20614_s4 + $0x124] ss:$8 sps:$4 sm:$0xff]  }
 0x243   : > { %15133 = vmatmul.mubr.bf16.gmra.mrb[44].mxu0 %v18668_v48  ;;  %15453 = vmatmul.mubr.bf16.gmra.mrb[44].mxu1 %v18668_v48  ;;  %v16716_v20 = vld [vmem:[%s20614_s4 + $0x144] ss:$8 sps:$4 sm:$0xff]   ;;  %v20693_v25 = vmax.f32 %v18378_v21, 0.0  ;;  %v16723_v21 = vld [vmem:[%s20614_s4 + $0x180] ss:$8 sps:$4 sm:$0xff]  }
 0x244   : > { %v18677_v7 = vpack.c.bf16 %v3528_v18, %v3526_v23  ;;  %v18679_v12 = vpack.c.bf16 %v3530_v36, %v3528_v18  ;;  %v18681_v19 = vpack.c.bf16 %v4556_v28, %v4554_v56  ;;  %v18683_v0 = vpack.c.bf16 %v4558_v10, %v4556_v28  ;;  %15152 = vmatprep.mubr.bf16.mxu0 %v4591_v13  ;;  %v16717_v36 = vld [vmem:[%s20614_s4 + $0x150] ss:$8 sps:$4 sm:$0xff]   ;;  %v16718_v10 = vld [vmem:[%s20614_s4 + $0x154] ss:$8 sps:$4 sm:$0xff]   ;;  %v16719_v18 = vld [vmem:[%s20614_s4 + $0x160] ss:$8 sps:$4 sm:$0xff]  }
 0x245   : > { %15472 = vmatprep.mubr.bf16.mxu1 %v4591_v13  ;;  %v1473_v23 = vmax.f32 %v18696_v4, 0.0  ;;  %v16720_v28 = vld [vmem:[%s20614_s4 + $0x164] ss:$8 sps:$4 sm:$0xff]   ;;  %v4961_v13 = vpack.c.bf16 %v20693_v25, %v20690_v16 }
 0x246   : > { %v16764_v4 = vld [vmem:[%s20614_s4 + $0x2c4] ss:$8 sps:$4 sm:$0xff]  }
 0x24b   : > { %15153 = vmatmul.mubr.bf16.vlgmr.msra.gmra.mrb[32].mxu0 %v18408_v63  ;;  %15473 = vmatmul.mubr.bf16.vlgmr.msra.gmra.mrb[32].mxu1 %v18408_v63 }
 0x24c   : > { %15156 = vmatprep.mubr.bf16.mxu0 %v18434_v8  ;;  %15169 = vmatpush3.bf16.msra.mxu0 %v18545_v60  ;;  %v20692_v60 = vmax.f32 %v18561_v44, 0.0  ;;  %v16715_v44 = vld [vmem:[%s20614_s4 + $0x140] ss:$8 sps:$4 sm:$0xff]  }
 0x24d   : > { %15476 = vmatprep.mubr.bf16.mxu1 %v18434_v8  ;;  %15489 = vmatpush3.bf16.msra.mxu1 %v18550_v37  ;;  %v16713_v37 = vld [vmem:[%s20614_s4 + $0x130] ss:$8 sps:$4 sm:$0xff]  }
 0x24e   : > { %15170 = vmatprep.subr.bf16.mxu0 %v16709_v41  ;;  %15490 = vmatprep.subr.bf16.mxu1 %v16710_v14  ;;  %v18714_v56 = vpack.c.bf16 %v20692_v60, %v1473_v23  ;;  %v16726_v60 = vld [vmem:[%s20614_s4 + $0x194] ss:$8 sps:$4 sm:$0xff]  }
 0x250   : > { %15171 = vmatpush3.bf16.msra.mxu0 %v16709_v41  ;;  %v16721_v41 = vld [vmem:[%s20614_s4 + $0x170] ss:$8 sps:$4 sm:$0xff]  }
 0x251   : > { %15491 = vmatpush3.bf16.msra.mxu1 %v16710_v14  ;;  %15172 = vmatprep.subr.bf16.mxu0 %v16711_v30  ;;  %v16722_v14 = vld [vmem:[%s20614_s4 + $0x174] ss:$8 sps:$4 sm:$0xff]  }
 0x252   : > { %15492 = vmatprep.subr.bf16.mxu1 %v16712_v54 }
 0x253   : > { %15157 = vmatmul.mubr.bf16.gmra.mrb[36].mxu0 %v18476_v59  ;;  %15477 = vmatmul.mubr.bf16.gmra.mrb[36].mxu1 %v18476_v59 }
 0x254   : > { %15160 = vmatprep.mubr.bf16.mxu0 %v18714_v56  ;;  %15173 = vmatpush3.bf16.msra.mxu0 %v16711_v30  ;;  %v16724_v30 = vld [vmem:[%s20614_s4 + $0x184] ss:$8 sps:$4 sm:$0xff]  }
 0x255   : > { %15480 = vmatprep.mubr.bf16.mxu1 %v18714_v56  ;;  %15493 = vmatpush3.bf16.msra.mxu1 %v16712_v54  ;;  %v16725_v54 = vld [vmem:[%s20614_s4 + $0x190] ss:$8 sps:$4 sm:$0xff]  }
 0x256   : > { %15174 = vmatprep.subr.bf16.mxu0 %v16713_v37  ;;  %15494 = vmatprep.subr.bf16.mxu1 %v16714_v1 }
 0x258   : > { %15175 = vmatpush3.bf16.msra.mxu0 %v16713_v37  ;;  %v18774_v37 = vadd.f32 %v18459_v34, %v18361_v5 }
 0x259   : > { %15495 = vmatpush3.bf16.msra.mxu1 %v16714_v1  ;;  %15176 = vmatprep.subr.bf16.mxu0 %v16715_v44  ;;  %v16727_v1 = vld [vmem:[%s20614_s4 + $0x1a0] ss:$8 sps:$4 sm:$0xff]  }
 0x25a   : > { %15496 = vmatprep.subr.bf16.mxu1 %v16716_v20  ;;  %v1474_v5 = vmax.f32 %v18774_v37, 0.0  ;;  %v16795_v37 = vld [vmem:[%s20614_s4 + $0x3c0] ss:$8 sps:$4 sm:$0xff]  }
 0x25b   : > { %15161 = vmatmul.mubr.bf16.gmra.mrb[40].mxu0 %v18604_v11  ;;  %15481 = vmatmul.mubr.bf16.gmra.mrb[40].mxu1 %v18604_v11 }
 0x25c   : > { %15164 = vmatprep.mubr.bf16.mxu0 %v18630_v62  ;;  %15177 = vmatpush3.bf16.msra.mxu0 %v16715_v44  ;;  %v16728_v44 = vld [vmem:[%s20614_s4 + $0x1a4] ss:$8 sps:$4 sm:$0xff]  }
 0x25d   : > { %15484 = vmatprep.mubr.bf16.mxu1 %v18630_v62  ;;  %15497 = vmatpush3.bf16.msra.mxu1 %v16716_v20  ;;  %v16730_v20 = vld [vmem:[%s20614_s4 + $0x1b4] ss:$8 sps:$4 sm:$0xff]  }
 0x25e   : > { %15178 = vmatprep.subr.bf16.mxu0 %v16717_v36  ;;  %15498 = vmatprep.subr.bf16.mxu1 %v16718_v10 }
 0x260   : > { %15179 = vmatpush3.bf16.msra.mxu0 %v16717_v36  ;;  %v16732_v36 = vld [vmem:[%s20614_s4 + $0x1c4] ss:$8 sps:$4 sm:$0xff]  }
 0x261   : > { %15499 = vmatpush3.bf16.msra.mxu1 %v16718_v10  ;;  %15180 = vmatprep.subr.bf16.mxu0 %v16719_v18  ;;  %v16734_v10 = vld [vmem:[%s20614_s4 + $0x1d4] ss:$8 sps:$4 sm:$0xff]  }
 0x262   : > { %15500 = vmatprep.subr.bf16.mxu1 %v16720_v28 }
 0x263   : > { %15165 = vmatmul.mubr.bf16.gmra.mrb[44].mxu0 %v18662_v9  ;;  %15485 = vmatmul.mubr.bf16.gmra.mrb[44].mxu1 %v18662_v9 }
 0x264   : > { %15184 = vmatprep.mubr.bf16.mxu0 %v4961_v13  ;;  %15181 = vmatpush3.bf16.msra.mxu0 %v16719_v18  ;;  %v16735_v18 = vld [vmem:[%s20614_s4 + $0x1e0] ss:$8 sps:$4 sm:$0xff]  }
 0x265   : > { %15504 = vmatprep.mubr.bf16.mxu1 %v4961_v13  ;;  %15501 = vmatpush3.bf16.msra.mxu1 %v16720_v28  ;;  %v16736_v28 = vld [vmem:[%s20614_s4 + $0x1e4] ss:$8 sps:$4 sm:$0xff]   ;;  %v16738_v13 = vld [vmem:[%s20614_s4 + $0x1f4] ss:$8 sps:$4 sm:$0xff]  }
 0x266   : > { %15182 = vmatprep.subr.bf16.mxu0 %v16721_v41  ;;  %15502 = vmatprep.subr.bf16.mxu1 %v16722_v14 }
 0x268   : > { %15183 = vmatpush3.bf16.msra.mxu0 %v16721_v41  ;;  %v16740_v41 = vld [vmem:[%s20614_s4 + $0x204] ss:$8 sps:$4 sm:$0xff]  }
 0x269   : > { %15503 = vmatpush3.bf16.msra.mxu1 %v16722_v14  ;;  %15200 = vmatprep.subr.bf16.mxu0 %v16723_v21  ;;  %v16742_v14 = vld [vmem:[%s20614_s4 + $0x214] ss:$8 sps:$4 sm:$0xff]  }
 0x26a   : > { %15520 = vmatprep.subr.bf16.mxu1 %v16724_v30 }
 0x26b   : > { %15185 = vmatmul.mubr.bf16.vlgmr.msra.gmra.mrb[32].mxu0 %v18416_v3 }
 0x26c   : > { %15505 = vmatmul.mubr.bf16.vlgmr.msra.gmra.mrb[32].mxu1 %v18416_v3  ;;  %15188 = vmatprep.mubr.bf16.mxu0 %v18442_v52  ;;  %v20694_v3 = vmax.f32 %v18568_v57, 0.0  ;;  %v16731_v57 = vld [vmem:[%s20614_s4 + $0x1c0] ss:$8 sps:$4 sm:$0xff]  }
 0x26d   : > { %15201 = vmatpush3.bf16.msra.mxu0 %v16723_v21  ;;  %15508 = vmatprep.mubr.bf16.mxu1 %v18442_v52  ;;  %v16729_v52 = vld [vmem:[%s20614_s4 + $0x1b0] ss:$8 sps:$4 sm:$0xff]   ;;  %v17316_v21 = vld [vmem:[%s20613_s3 + $0x1] ss:$0 sm:$0xff] }
 0x26e   : > { %15521 = vmatpush3.bf16.msra.mxu1 %v16724_v30  ;;  %15202 = vmatprep.subr.bf16.mxu0 %v16725_v54  ;;  %v4965_v34 = vpack.c.bf16 %v20694_v3, %v1474_v5  ;;  %v18848_v30 = vadd.f32 %v17316_v21, %v18464_v40  ;;  %v16748_v3 = vld [vmem:[%s20614_s4 + $0x244] ss:$8 sps:$4 sm:$0xff]  }
 0x26f   : > { %15522 = vmatprep.subr.bf16.mxu1 %v16726_v60 }
 0x270   : > { %v2502_v40 = vmax.f32 %v18848_v30, 0.0  ;;  %v16811_v30 = vld [vmem:[%s20614_s4 + $0x440] ss:$8 sps:$4 sm:$0xff]  }
 0x271   : > { %15203 = vmatpush3.bf16.msra.mxu0 %v16725_v54  ;;  %v16743_v54 = vld [vmem:[%s20614_s4 + $0x220] ss:$8 sps:$4 sm:$0xff]  }
 0x272   : > { %15523 = vmatpush3.bf16.msra.mxu1 %v16726_v60  ;;  %15204 = vmatprep.subr.bf16.mxu0 %v16727_v1  ;;  %v16744_v60 = vld [vmem:[%s20614_s4 + $0x224] ss:$8 sps:$4 sm:$0xff]  }
 0x273   : > { %15189 = vmatmul.mubr.bf16.gmra.mrb[36].mxu0 %v18486_v26  ;;  %15524 = vmatprep.subr.bf16.mxu1 %v16728_v44 }
 0x274   : > { %15509 = vmatmul.mubr.bf16.gmra.mrb[36].mxu1 %v18486_v26  ;;  %15192 = vmatprep.mubr.bf16.mxu0 %v4965_v34  ;;  %v16733_v26 = vld [vmem:[%s20614_s4 + $0x1d0] ss:$8 sps:$4 sm:$0xff]  }
 0x275   : > { %15205 = vmatpush3.bf16.msra.mxu0 %v16727_v1  ;;  %15512 = vmatprep.mubr.bf16.mxu1 %v4965_v34  ;;  %v16750_v34 = vld [vmem:[%s20614_s4 + $0x254] ss:$8 sps:$4 sm:$0xff]  }
 0x276   : > { %15525 = vmatpush3.bf16.msra.mxu1 %v16728_v44  ;;  %15206 = vmatprep.subr.bf16.mxu0 %v16729_v52  ;;  %v16746_v44 = vld [vmem:[%s20614_s4 + $0x234] ss:$8 sps:$4 sm:$0xff]  }
 0x277   : > { %15526 = vmatprep.subr.bf16.mxu1 %v16730_v20 }
 0x279   : > { %15207 = vmatpush3.bf16.msra.mxu0 %v16729_v52  ;;  %v16751_v52 = vld [vmem:[%s20614_s4 + $0x260] ss:$8 sps:$4 sm:$0xff]  }
 0x27a   : > { %15527 = vmatpush3.bf16.msra.mxu1 %v16730_v20  ;;  %15208 = vmatprep.subr.bf16.mxu0 %v16731_v57  ;;  %v16752_v20 = vld [vmem:[%s20614_s4 + $0x264] ss:$8 sps:$4 sm:$0xff]  }
 0x27b   : > { %15193 = vmatmul.mubr.bf16.gmra.mrb[40].mxu0 %v18612_v33  ;;  %15528 = vmatprep.subr.bf16.mxu1 %v16732_v36 }
 0x27c   : > { %15513 = vmatmul.mubr.bf16.gmra.mrb[40].mxu1 %v18612_v33  ;;  %15196 = vmatprep.mubr.bf16.mxu0 %v18638_v15  ;;  %v20695_v33 = vmax.f32 %v18381_v45, 0.0  ;;  %v16739_v45 = vld [vmem:[%s20614_s4 + $0x200] ss:$8 sps:$4 sm:$0xff]  }
 0x27d   : > { %15209 = vmatpush3.bf16.msra.mxu0 %v16731_v57  ;;  %15516 = vmatprep.mubr.bf16.mxu1 %v18638_v15  ;;  %v16737_v15 = vld [vmem:[%s20614_s4 + $0x1f0] ss:$8 sps:$4 sm:$0xff]   ;;  %v16755_v57 = vld [vmem:[%s20614_s4 + $0x280] ss:$8 sps:$4 sm:$0xff]  }
 0x27e   : > { %15529 = vmatpush3.bf16.msra.mxu1 %v16732_v36  ;;  %15210 = vmatprep.subr.bf16.mxu0 %v16733_v26  ;;  %v5163_v25 = vpack.c.bf16 %v20695_v33, %v20690_v16  ;;  %v16756_v36 = vld [vmem:[%s20614_s4 + $0x284] ss:$8 sps:$4 sm:$0xff]   ;;  %v16767_v33 = vld [vmem:[%s20614_s4 + $0x2e0] ss:$8 sps:$4 sm:$0xff]  }
 0x27f   : > { %15530 = vmatprep.subr.bf16.mxu1 %v16734_v10 }
 0x281   : > { %15211 = vmatpush3.bf16.msra.mxu0 %v16733_v26  ;;  %v16759_v26 = vld [vmem:[%s20614_s4 + $0x2a0] ss:$8 sps:$4 sm:$0xff]  }
 0x282   : > { %15531 = vmatpush3.bf16.msra.mxu1 %v16734_v10  ;;  %15212 = vmatprep.subr.bf16.mxu0 %v16735_v18  ;;  %v16760_v10 = vld [vmem:[%s20614_s4 + $0x2a4] ss:$8 sps:$4 sm:$0xff]  }
 0x283   : > { %15197 = vmatmul.mubr.bf16.gmra.mrb[44].mxu0 %v18677_v7  ;;  %15532 = vmatprep.subr.bf16.mxu1 %v16736_v28 }
 0x284   : > { %15517 = vmatmul.mubr.bf16.gmra.mrb[44].mxu1 %v18677_v7  ;;  %15216 = vmatprep.mubr.bf16.mxu0 %v5163_v25  ;;  %v16741_v7 = vld [vmem:[%s20614_s4 + $0x210] ss:$8 sps:$4 sm:$0xff]  }
 0x285   : > { %15213 = vmatpush3.bf16.msra.mxu0 %v16735_v18  ;;  %15536 = vmatprep.mubr.bf16.mxu1 %v5163_v25  ;;  %v20697_v18 = vmax.f32 %v18457_v31, 0.0  ;;  %v16763_v31 = vld [vmem:[%s20614_s4 + $0x2c0] ss:$8 sps:$4 sm:$0xff]   ;;  %v16768_v25 = vld [vmem:[%s20614_s4 + $0x2e4] ss:$8 sps:$4 sm:$0xff]  }
 0x286   : > { %15533 = vmatpush3.bf16.msra.mxu1 %v16736_v28  ;;  %15214 = vmatprep.subr.bf16.mxu0 %v16737_v15  ;;  %v16762_v28 = vld [vmem:[%s20614_s4 + $0x2b4] ss:$8 sps:$4 sm:$0xff]  }
 0x287   : > { %15534 = vmatprep.subr.bf16.mxu1 %v16738_v13 }
 0x289   : > { %15215 = vmatpush3.bf16.msra.mxu0 %v16737_v15  ;;  %v16771_v15 = vld [vmem:[%s20614_s4 + $0x300] ss:$8 sps:$4 sm:$0xff]  }
 0x28a   : > { %15535 = vmatpush3.bf16.msra.mxu1 %v16738_v13  ;;  %15232 = vmatprep.subr.bf16.mxu0 %v16739_v45  ;;  %v16772_v13 = vld [vmem:[%s20614_s4 + $0x304] ss:$8 sps:$4 sm:$0xff]  }
 0x28b   : > { %15552 = vmatprep.subr.bf16.mxu1 %v16740_v41 }
 0x28c   : > { %15217 = vmatmul.mubr.bf16.vlgmr.msra.gmra.mrb[32].mxu0 %v18420_v6 }
 0x28d   : > { %15537 = vmatmul.mubr.bf16.vlgmr.msra.gmra.mrb[32].mxu1 %v18420_v6  ;;  %15220 = vmatprep.mubr.bf16.mxu0 %v18448_v55  ;;  %v20696_v6 = vmax.f32 %v18572_v17, 0.0  ;;  %v16747_v17 = vld [vmem:[%s20614_s4 + $0x240] ss:$8 sps:$4 sm:$0xff]  }
 0x28e   : > { %15233 = vmatpush3.bf16.msra.mxu0 %v16739_v45  ;;  %15540 = vmatprep.mubr.bf16.mxu1 %v18448_v55  ;;  %v16745_v55 = vld [vmem:[%s20614_s4 + $0x230] ss:$8 sps:$4 sm:$0xff]   ;;  %v16775_v45 = vld [vmem:[%s20614_s4 + $0x320] ss:$8 sps:$4 sm:$0xff]  }
 0x28f   : > { %15553 = vmatpush3.bf16.msra.mxu1 %v16740_v41  ;;  %15234 = vmatprep.subr.bf16.mxu0 %v16741_v7  ;;  %v5167_v1 = vpack.c.bf16 %v20696_v6, %v2502_v40  ;;  %v16776_v41 = vld [vmem:[%s20614_s4 + $0x324] ss:$8 sps:$4 sm:$0xff]  }
 0x290   : > { %15554 = vmatprep.subr.bf16.mxu1 %v16742_v14  ;;  %v16780_v6 = vld [vmem:[%s20614_s4 + $0x344] ss:$8 sps:$4 sm:$0xff]  }
 0x292   : > { %15235 = vmatpush3.bf16.msra.mxu0 %v16741_v7  ;;  %v20698_v7 = vmax.f32 %v18462_v61, 0.0  ;;  %v16779_v61 = vld [vmem:[%s20614_s4 + $0x340] ss:$8 sps:$4 sm:$0xff]  }
 0x293   : > { %15555 = vmatpush3.bf16.msra.mxu1 %v16742_v14  ;;  %15236 = vmatprep.subr.bf16.mxu0 %v16743_v54  ;;  %v20699_v14 = vld [vmem:[#allocation20_spill] sm:$0xff] }
 0x294   : > { %15221 = vmatmul.mubr.bf16.gmra.mrb[36].mxu0 %v18490_v27  ;;  %15556 = vmatprep.subr.bf16.mxu1 %v16744_v60 }
 0x295   : > { %15541 = vmatmul.mubr.bf16.gmra.mrb[36].mxu1 %v18490_v27  ;;  %15224 = vmatprep.mubr.bf16.mxu0 %v5167_v1  ;;  %v16749_v27 = vld [vmem:[%s20614_s4 + $0x250] ss:$8 sps:$4 sm:$0xff]  }
 0x296   : > { %15237 = vmatpush3.bf16.msra.mxu0 %v16743_v54  ;;  %15544 = vmatprep.mubr.bf16.mxu1 %v5167_v1  ;;  %v16778_v54 = vld [vmem:[%s20614_s4 + $0x334] ss:$8 sps:$4 sm:$0xff]   ;;  %v16781_v1 = vld [vmem:[%s20614_s4 + $0x350] ss:$8 sps:$4 sm:$0xff]  }
 0x297   : > { %15557 = vmatpush3.bf16.msra.mxu1 %v16744_v60  ;;  %15238 = vmatprep.subr.bf16.mxu0 %v16745_v55  ;;  %v20701_v60 = vld [vmem:[#allocation22_spill] sm:$0xff] }
 0x298   : > { %15558 = vmatprep.subr.bf16.mxu1 %v16746_v44 }
 0x29a   : > { %15239 = vmatpush3.bf16.msra.mxu0 %v16745_v55  ;;  %v20702_v55 = vld [vmem:[#allocation26_spill] sm:$0xff] }
 0x29b   : > { %15559 = vmatpush3.bf16.msra.mxu1 %v16746_v44  ;;  %15240 = vmatprep.subr.bf16.mxu0 %v16747_v17  ;;  %v16782_v44 = vld [vmem:[%s20614_s4 + $0x354] ss:$8 sps:$4 sm:$0xff]  }
 0x29c   : > { %15225 = vmatmul.mubr.bf16.gmra.mrb[40].mxu0 %v18616_v47  ;;  %15560 = vmatprep.subr.bf16.mxu1 %v16748_v3 }
 0x29d   : > { %15545 = vmatmul.mubr.bf16.gmra.mrb[40].mxu1 %v18616_v47  ;;  %15228 = vmatprep.mubr.bf16.mxu0 %v18642_v35  ;;  %v16753_v47 = vld [vmem:[%s20614_s4 + $0x270] ss:$8 sps:$4 sm:$0xff]  }
 0x29e   : > { %15241 = vmatpush3.bf16.msra.mxu0 %v16747_v17  ;;  %15548 = vmatprep.mubr.bf16.mxu1 %v18642_v35  ;;  %v16754_v35 = vld [vmem:[%s20614_s4 + $0x274] ss:$8 sps:$4 sm:$0xff]   ;;  %v20703_v17 = vld [vmem:[#allocation30_spill] sm:$0xff] }
 0x29f   : > { %15561 = vmatpush3.bf16.msra.mxu1 %v16748_v3  ;;  %15242 = vmatprep.subr.bf16.mxu0 %v16749_v27  ;;  %v16783_v3 = vld [vmem:[%s20614_s4 + $0x360] ss:$8 sps:$4 sm:$0xff]  }
 0x2a0   : > { %15562 = vmatprep.subr.bf16.mxu1 %v16750_v34 }
 0x2a2   : > { %15243 = vmatpush3.bf16.msra.mxu0 %v16749_v27  ;;  %v16784_v27 = vld [vmem:[%s20614_s4 + $0x364] ss:$8 sps:$4 sm:$0xff]  }
 0x2a3   : > { %15563 = vmatpush3.bf16.msra.mxu1 %v16750_v34  ;;  %15244 = vmatprep.subr.bf16.mxu0 %v16751_v52  ;;  %v16785_v34 = vld [vmem:[%s20614_s4 + $0x370] ss:$8 sps:$4 sm:$0xff]  }
 0x2a4   : > { %15229 = vmatmul.mubr.bf16.gmra.mrb[44].mxu0 %v18681_v19  ;;  %15564 = vmatprep.subr.bf16.mxu1 %v16752_v20 }
 0x2a5   : > { %15549 = vmatmul.mubr.bf16.gmra.mrb[44].mxu1 %v18681_v19  ;;  %15248 = vmatprep.mubr.bf16.mxu0 %v18385_v58  ;;  %v16757_v19 = vld [vmem:[%s20614_s4 + $0x290] ss:$8 sps:$4 sm:$0xff]  }
 0x2a6   : > { %15245 = vmatpush3.bf16.msra.mxu0 %v16751_v52  ;;  %15568 = vmatprep.mubr.bf16.mxu1 %v18385_v58  ;;  %v16758_v58 = vld [vmem:[%s20614_s4 + $0x294] ss:$8 sps:$4 sm:$0xff]  }
 0x2a7   : > { %15565 = vmatpush3.bf16.msra.mxu1 %v16752_v20  ;;  %15246 = vmatprep.subr.bf16.mxu0 %v16753_v47  ;;  %v16786_v52 = vld [vmem:[%s20614_s4 + $0x374] ss:$8 sps:$4 sm:$0xff]   ;;  %v20704_v20 = vld [vmem:[#allocation9_spill] sm:$0xff] }
 0x2a8   : > { %15566 = vmatprep.subr.bf16.mxu1 %v16754_v35 }
 0x2aa   : > { %15247 = vmatpush3.bf16.msra.mxu0 %v16753_v47  ;;  %v16787_v47 = vld [vmem:[%s20614_s4 + $0x380] ss:$8 sps:$4 sm:$0xff]  }
 0x2ab   : > { %15567 = vmatpush3.bf16.msra.mxu1 %v16754_v35  ;;  %15264 = vmatprep.subr.bf16.mxu0 %v16755_v57  ;;  %v16788_v35 = vld [vmem:[%s20614_s4 + $0x384] ss:$8 sps:$4 sm:$0xff]  }
 0x2ac   : > { %15584 = vmatprep.subr.bf16.mxu1 %v16756_v36 }
 0x2ad   : > { %15249 = vmatmul.mubr.bf16.vlgmr.msra.gmra.mrb[32].mxu0 %v18410_v50 }
 0x2ae   : > { %15569 = vmatmul.mubr.bf16.vlgmr.msra.gmra.mrb[32].mxu1 %v18410_v50  ;;  %15252 = vmatprep.mubr.bf16.mxu0 %v18436_v46  ;;  %v5367_v50 = vpack.c.bf16 %v1473_v23, %v20697_v18  ;;  %v16765_v23 = vld [vmem:[%s20614_s4 + $0x2d0] ss:$8 sps:$4 sm:$0xff]  }
 0x2af   : > { %15265 = vmatpush3.bf16.msra.mxu0 %v16755_v57  ;;  %15572 = vmatprep.mubr.bf16.mxu1 %v18436_v46  ;;  %v16761_v46 = vld [vmem:[%s20614_s4 + $0x2b0] ss:$8 sps:$4 sm:$0xff]  }
 0x2b0   : > { %15585 = vmatpush3.bf16.msra.mxu1 %v16756_v36  ;;  %15266 = vmatprep.subr.bf16.mxu0 %v16757_v19  ;;  %v20705_v57 = vld [vmem:[#allocation12_spill] sm:$0xff] }
 0x2b1   : > { %15586 = vmatprep.subr.bf16.mxu1 %v16758_v58  ;;  %v16790_v36 = vld [vmem:[%s20614_s4 + $0x394] ss:$8 sps:$4 sm:$0xff]  }
 0x2b3   : > { %15267 = vmatpush3.bf16.msra.mxu0 %v16757_v19  ;;  %v20706_v19 = vld [vmem:[#allocation15_spill] sm:$0xff] }
 0x2b4   : > { %15587 = vmatpush3.bf16.msra.mxu1 %v16758_v58  ;;  %15268 = vmatprep.subr.bf16.mxu0 %v16759_v26  ;;  %v16791_v58 = vld [vmem:[%s20614_s4 + $0x3a0] ss:$8 sps:$4 sm:$0xff]  }
 0x2b5   : > { %15253 = vmatmul.mubr.bf16.gmra.mrb[36].mxu0 %v5367_v50  ;;  %15588 = vmatprep.subr.bf16.mxu1 %v16760_v10 }
 0x2b6   : > { %15573 = vmatmul.mubr.bf16.gmra.mrb[36].mxu1 %v5367_v50  ;;  %15256 = vmatprep.mubr.bf16.mxu0 %v18576_v24 }
 0x2b7   : > { %15269 = vmatpush3.bf16.msra.mxu0 %v16759_v26  ;;  %15576 = vmatprep.mubr.bf16.mxu1 %v18576_v24  ;;  %v16766_v24 = vld [vmem:[%s20614_s4 + $0x2d4] ss:$8 sps:$4 sm:$0xff]   ;;  %v16792_v26 = vld [vmem:[%s20614_s4 + $0x3a4] ss:$8 sps:$4 sm:$0xff]  }
 0x2b8   : > { %15589 = vmatpush3.bf16.msra.mxu1 %v16760_v10  ;;  %15270 = vmatprep.subr.bf16.mxu0 %v16761_v46  ;;  %v20707_v10 = vld [vmem:[#allocation17_spill] sm:$0xff] }
 0x2b9   : > { %15590 = vmatprep.subr.bf16.mxu1 %v16762_v28  ;;  %v20708_v18 = vmax.f32 %v20707_v10, 0.0  ;;  %v20720_v10 = vld [vmem:[#allocation11_spill] sm:$0xff] }
 0x2bb   : > { %15271 = vmatpush3.bf16.msra.mxu0 %v16761_v46  ;;  %v5770_v50 = vpack.c.bf16 %v1474_v5, %v20708_v18  ;;  %v16793_v46 = vld [vmem:[%s20614_s4 + $0x3b0] ss:$8 sps:$4 sm:$0xff]   ;;  %v16796_v5 = vld [vmem:[%s20614_s4 + $0x3c4] ss:$8 sps:$4 sm:$0xff]   ;;  %v16840_v18 = vld [vmem:[%s20616_s6 + $0x94] ss:$8 sps:$4 sm:$0xff]  }
 0x2bc   : > { %15591 = vmatpush3.bf16.msra.mxu1 %v16762_v28  ;;  %15272 = vmatprep.subr.bf16.mxu0 %v16763_v31  ;;  %v16794_v28 = vld [vmem:[%s20614_s4 + $0x3b4] ss:$8 sps:$4 sm:$0xff]  }
 0x2bd   : > { %15257 = vmatmul.mubr.bf16.gmra.mrb[40].mxu0 %v18606_v51  ;;  %15592 = vmatprep.subr.bf16.mxu1 %v16764_v4 }
 0x2be   : > { %15577 = vmatmul.mubr.bf16.gmra.mrb[40].mxu1 %v18606_v51  ;;  %15260 = vmatprep.mubr.bf16.mxu0 %v18632_v42  ;;  %v16769_v51 = vld [vmem:[%s20614_s4 + $0x2f0] ss:$8 sps:$4 sm:$0xff]  }
 0x2bf   : > { %15273 = vmatpush3.bf16.msra.mxu0 %v16763_v31  ;;  %15580 = vmatprep.mubr.bf16.mxu1 %v18632_v42  ;;  %v16770_v42 = vld [vmem:[%s20614_s4 + $0x2f4] ss:$8 sps:$4 sm:$0xff]  }
 0x2c0   : > { %15593 = vmatpush3.bf16.msra.mxu1 %v16764_v4  ;;  %15274 = vmatprep.subr.bf16.mxu0 %v16765_v23  ;;  %v20709_v31 = vld [vmem:[#allocation23_spill] sm:$0xff] }
 0x2c1   : > { %15594 = vmatprep.subr.bf16.mxu1 %v16766_v24  ;;  %v16797_v4 = vld [vmem:[%s20614_s4 + $0x3d0] ss:$8 sps:$4 sm:$0xff]  }
 0x2c3   : > { %15275 = vmatpush3.bf16.msra.mxu0 %v16765_v23  ;;  %v20710_v23 = vld [vmem:[#allocation27_spill] sm:$0xff] }
 0x2c4   : > { %15595 = vmatpush3.bf16.msra.mxu1 %v16766_v24  ;;  %15276 = vmatprep.subr.bf16.mxu0 %v16767_v33  ;;  %v16798_v24 = vld [vmem:[%s20614_s4 + $0x3d4] ss:$8 sps:$4 sm:$0xff]  }
 0x2c5   : > { %15261 = vmatmul.mubr.bf16.gmra.mrb[44].mxu0 %v18666_v43  ;;  %15596 = vmatprep.subr.bf16.mxu1 %v16768_v25 }
 0x2c6   : > { %15581 = vmatmul.mubr.bf16.gmra.mrb[44].mxu1 %v18666_v43  ;;  %15280 = vmatprep.mubr.bf16.mxu0 %v18389_v38  ;;  %v16773_v43 = vld [vmem:[%s20614_s4 + $0x310] ss:$8 sps:$4 sm:$0xff]  }
 0x2c7   : > { %15277 = vmatpush3.bf16.msra.mxu0 %v16767_v33  ;;  %15600 = vmatprep.mubr.bf16.mxu1 %v18389_v38  ;;  %v16774_v38 = vld [vmem:[%s20614_s4 + $0x314] ss:$8 sps:$4 sm:$0xff]  }
 0x2c8   : > { %15597 = vmatpush3.bf16.msra.mxu1 %v16768_v25  ;;  %15278 = vmatprep.subr.bf16.mxu0 %v16769_v51  ;;  %v20711_v33 = vld [vmem:[#allocation31_spill] sm:$0xff]  ;;  %v16799_v25 = vld [vmem:[%s20614_s4 + $0x3e0] ss:$8 sps:$4 sm:$0xff]  }
 0x2c9   : > { %15598 = vmatprep.subr.bf16.mxu1 %v16770_v42 }
 0x2cb   : > { %15279 = vmatpush3.bf16.msra.mxu0 %v16769_v51  ;;  %v16800_v51 = vld [vmem:[%s20614_s4 + $0x3e4] ss:$8 sps:$4 sm:$0xff]  }
 0x2cc   : > { %15599 = vmatpush3.bf16.msra.mxu1 %v16770_v42  ;;  %15296 = vmatprep.subr.bf16.mxu0 %v16771_v15  ;;  %v16801_v42 = vld [vmem:[%s20614_s4 + $0x3f0] ss:$8 sps:$4 sm:$0xff]  }
 0x2cd   : > { %15616 = vmatprep.subr.bf16.mxu1 %v16772_v13 }
 0x2ce   : > { %15281 = vmatmul.mubr.bf16.vlgmr.msra.gmra.mrb[32].mxu0 %v18414_v2 }
 0x2cf   : > { %15601 = vmatmul.mubr.bf16.vlgmr.msra.gmra.mrb[32].mxu1 %v18414_v2  ;;  %15284 = vmatprep.mubr.bf16.mxu0 %v18440_v49  ;;  %v20700_v2 = vmax.f32 %v20699_v14, 0.0  ;;  %v16807_v14 = vld [vmem:[%s20614_s4 + $0x420] ss:$8 sps:$4 sm:$0xff]  }
 0x2d0   : > { %15297 = vmatpush3.bf16.msra.mxu0 %v16771_v15  ;;  %15604 = vmatprep.mubr.bf16.mxu1 %v18440_v49  ;;  %v16777_v49 = vld [vmem:[%s20614_s4 + $0x330] ss:$8 sps:$4 sm:$0xff]   ;;  %v16802_v15 = vld [vmem:[%s20614_s4 + $0x3f4] ss:$8 sps:$4 sm:$0xff]  }
 0x2d1   : > { %15617 = vmatpush3.bf16.msra.mxu1 %v16772_v13  ;;  %15298 = vmatprep.subr.bf16.mxu0 %v16773_v43  ;;  %v5569_v21 = vpack.c.bf16 %v20700_v2, %v20698_v7  ;;  %v20712_v13 = vld [vmem:[#allocation10_spill] sm:$0xff]  ;;  %v20714_v7 = vld [vmem:[#allocation16_spill] sm:$0xff] }
 0x2d2   : > { %15618 = vmatprep.subr.bf16.mxu1 %v16774_v38  ;;  %v16808_v2 = vld [vmem:[%s20614_s4 + $0x424] ss:$8 sps:$4 sm:$0xff]  }
 0x2d4   : > { %15299 = vmatpush3.bf16.msra.mxu0 %v16773_v43  ;;  %v16803_v43 = vld [vmem:[%s20614_s4 + $0x400] ss:$8 sps:$4 sm:$0xff]  }
 0x2d5   : > { %15619 = vmatpush3.bf16.msra.mxu1 %v16774_v38  ;;  %15300 = vmatprep.subr.bf16.mxu0 %v16775_v45  ;;  %v16804_v38 = vld [vmem:[%s20614_s4 + $0x404] ss:$8 sps:$4 sm:$0xff]  }
 0x2d6   : > { %15285 = vmatmul.mubr.bf16.gmra.mrb[36].mxu0 %v5569_v21  ;;  %15620 = vmatprep.subr.bf16.mxu1 %v16776_v41 }
 0x2d7   : > { %15605 = vmatmul.mubr.bf16.gmra.mrb[36].mxu1 %v5569_v21  ;;  %15288 = vmatprep.mubr.bf16.mxu0 %v20701_v60  ;;  %v20715_v21 = vld [vmem:[#allocation18_spill] sm:$0xff] }
 0x2d8   : > { %15301 = vmatpush3.bf16.msra.mxu0 %v16775_v45  ;;  %15608 = vmatprep.mubr.bf16.mxu1 %v20701_v60  ;;  %v20713_v45 = vld [vmem:[#allocation13_spill] sm:$0xff]  ;;  %v16809_v60 = vld [vmem:[%s20614_s4 + $0x430] ss:$8 sps:$4 sm:$0xff]  }
 0x2d9   : > { %15621 = vmatpush3.bf16.msra.mxu1 %v16776_v41  ;;  %15302 = vmatprep.subr.bf16.mxu0 %v16777_v49  ;;  %v16806_v41 = vld [vmem:[%s20614_s4 + $0x414] ss:$8 sps:$4 sm:$0xff]  }
 0x2da   : > { %15622 = vmatprep.subr.bf16.mxu1 %v16778_v54 }
 0x2dc   : > { %15303 = vmatpush3.bf16.msra.mxu0 %v16777_v49  ;;  %v20716_v49 = vmax.f32 %v20715_v21, 0.0 }
 0x2dd   : > { %15623 = vmatpush3.bf16.msra.mxu1 %v16778_v54  ;;  %15304 = vmatprep.subr.bf16.mxu0 %v16779_v61 }
 0x2de   : > { %15289 = vmatmul.mubr.bf16.gmra.mrb[40].mxu0 %v20702_v55  ;;  %15624 = vmatprep.subr.bf16.mxu1 %v16780_v6  ;;  %v5972_v54 = vpack.c.bf16 %v2502_v40, %v20716_v49  ;;  %v16812_v40 = vld [vmem:[%s20614_s4 + $0x444] ss:$8 sps:$4 sm:$0xff]  }
 0x2df   : > { %15609 = vmatmul.mubr.bf16.gmra.mrb[40].mxu1 %v20702_v55  ;;  %15292 = vmatprep.mubr.bf16.mxu0 %v20703_v17  ;;  %v20718_v55 = vld [vmem:[#allocation28_spill] sm:$0xff] }
 0x2e0   : > { %15305 = vmatpush3.bf16.msra.mxu0 %v16779_v61  ;;  %15612 = vmatprep.mubr.bf16.mxu1 %v20703_v17  ;;  %v16810_v61 = vld [vmem:[%s20614_s4 + $0x434] ss:$8 sps:$4 sm:$0xff]  }
 0x2e1   : > { %15625 = vmatpush3.bf16.msra.mxu1 %v16780_v6  ;;  %15306 = vmatprep.subr.bf16.mxu0 %v16781_v1  ;;  %v20717_v6 = vld [vmem:[#allocation24_spill] sm:$0xff] }
 0x2e2   : > { %15626 = vmatprep.subr.bf16.mxu1 %v16782_v44  ;;  %v20719_v17 = vld [vmem:[#allocation32_spill] sm:$0xff] }
 0x2e4   : > { %15307 = vmatpush3.bf16.msra.mxu0 %v16781_v1  ;;  %v16813_v1 = vld [vmem:[%s20614_s4 + $0x450] ss:$8 sps:$4 sm:$0xff]  }
 0x2e5   : > { %15627 = vmatpush3.bf16.msra.mxu1 %v16782_v44  ;;  %15308 = vmatprep.subr.bf16.mxu0 %v16783_v3  ;;  %v16814_v44 = vld [vmem:[%s20614_s4 + $0x454] ss:$8 sps:$4 sm:$0xff]  }
 0x2e6   : > { %15293 = vmatmul.mubr.bf16.gmra.mrb[44].mxu0 %v18672_v22  ;;  %15628 = vmatprep.subr.bf16.mxu1 %v16784_v27 }
 0x2e7   : > { %15613 = vmatmul.mubr.bf16.gmra.mrb[44].mxu1 %v18672_v22  ;;  %15312 = vmatprep.mubr.bf16.mxu0 %v20704_v20  ;;  %v16789_v22 = vld [vmem:[%s20614_s4 + $0x390] ss:$8 sps:$4 sm:$0xff]  }
 0x2e8   : > { %15309 = vmatpush3.bf16.msra.mxu0 %v16783_v3  ;;  %15632 = vmatprep.mubr.bf16.mxu1 %v20704_v20  ;;  %v16815_v3 = vld [vmem:[%s20614_s4 + $0x460] ss:$8 sps:$4 sm:$0xff]  }
 0x2e9   : > { %15629 = vmatpush3.bf16.msra.mxu1 %v16784_v27  ;;  %15310 = vmatprep.subr.bf16.mxu0 %v16785_v34  ;;  %v16816_v27 = vld [vmem:[%s20614_s4 + $0x464] ss:$8 sps:$4 sm:$0xff]   ;;  %v16819_v20 = vld [vmem:[%s20614_s4 + $0x480] ss:$8 sps:$4 sm:$0xff]  }
 0x2ea   : > { %15630 = vmatprep.subr.bf16.mxu1 %v16786_v52 }
 0x2ec   : > { %15311 = vmatpush3.bf16.msra.mxu0 %v16785_v34  ;;  %v16817_v34 = vld [vmem:[%s20614_s4 + $0x470] ss:$8 sps:$4 sm:$0xff]  }
 0x2ed   : > { %15631 = vmatpush3.bf16.msra.mxu1 %v16786_v52  ;;  %15328 = vmatprep.subr.bf16.mxu0 %v16787_v47  ;;  %v16818_v52 = vld [vmem:[%s20614_s4 + $0x474] ss:$8 sps:$4 sm:$0xff]  }
 0x2ee   : > { %15648 = vmatprep.subr.bf16.mxu1 %v16788_v35 }
 0x2ef   : > { %15313 = vmatmul.mubr.bf16.vlgmr.msra.gmra.mrb[32].mxu0 %v20705_v57 }
 0x2f0   : > { %15633 = vmatmul.mubr.bf16.vlgmr.msra.gmra.mrb[32].mxu1 %v20705_v57  ;;  %15316 = vmatprep.mubr.bf16.mxu0 %v20706_v19  ;;  %v16827_v57 = vld [vmem:[%s20614_s4 + $0x4c0] ss:$8 sps:$4 sm:$0xff]  }
 0x2f1   : > { %15329 = vmatpush3.bf16.msra.mxu0 %v16787_v47  ;;  %15636 = vmatprep.mubr.bf16.mxu1 %v20706_v19  ;;  %v16820_v47 = vld [vmem:[%s20614_s4 + $0x484] ss:$8 sps:$4 sm:$0xff]   ;;  %v16831_v19 = vld [vmem:[%s20614_s4 + $0x4e0] ss:$8 sps:$4 sm:$0xff]  }
 0x2f2   : > { %15649 = vmatpush3.bf16.msra.mxu1 %v16788_v35  ;;  %15330 = vmatprep.subr.bf16.mxu0 %v16789_v22  ;;  %v16823_v35 = vld [vmem:[%s20614_s4 + $0x4a0] ss:$8 sps:$4 sm:$0xff]  }
 0x2f3   : > { %15650 = vmatprep.subr.bf16.mxu1 %v16790_v36 }
 0x2f5   : > { %15331 = vmatpush3.bf16.msra.mxu0 %v16789_v22  ;;  %v16824_v22 = vld [vmem:[%s20614_s4 + $0x4a4] ss:$8 sps:$4 sm:$0xff]  }
 0x2f6   : > { %15651 = vmatpush3.bf16.msra.mxu1 %v16790_v36  ;;  %15332 = vmatprep.subr.bf16.mxu0 %v16791_v58  ;;  %v16828_v36 = vld [vmem:[%s20614_s4 + $0x4c4] ss:$8 sps:$4 sm:$0xff]  }
 0x2f7   : > { %15317 = vmatmul.mubr.bf16.gmra.mrb[36].mxu0 %v5770_v50  ;;  %15652 = vmatprep.subr.bf16.mxu1 %v16792_v26 }
 0x2f8   : > { %15637 = vmatmul.mubr.bf16.gmra.mrb[36].mxu1 %v5770_v50  ;;  %15320 = vmatprep.mubr.bf16.mxu0 %v20709_v31  ;;  %v20721_v50 = vld [vmem:[#allocation14_spill] sm:$0xff] }
 0x2f9   : > { %15333 = vmatpush3.bf16.msra.mxu0 %v16791_v58  ;;  %15640 = vmatprep.mubr.bf16.mxu1 %v20709_v31  ;;  %v16832_v58 = vld [vmem:[%s20614_s4 + $0x4e4] ss:$8 sps:$4 sm:$0xff]  }
 0x2fa   : > { %15653 = vmatpush3.bf16.msra.mxu1 %v16792_v26  ;;  %15334 = vmatprep.subr.bf16.mxu0 %v16793_v46  ;;  %v16834_v26 = vld [vmem:[%s20614_s4 + $0x4f4] ss:$8 sps:$4 sm:$0xff]   ;;  %v16843_v31 = vld [vmem:[%s20616_s6 + $0xa4] ss:$8 sps:$4 sm:$0xff]  }
 0x2fb   : > { %15654 = vmatprep.subr.bf16.mxu1 %v16794_v28 }
 0x2fd   : > { %15335 = vmatpush3.bf16.msra.mxu0 %v16793_v46  ;;  %v20722_v46 = vld [vmem:[#allocation19_spill] sm:$0xff] }
 0x2fe   : > { %15655 = vmatpush3.bf16.msra.mxu1 %v16794_v28  ;;  %15336 = vmatprep.subr.bf16.mxu0 %v16795_v37  ;;  %v16838_v28 = vld [vmem:[%s20616_s6 + $0x90] ss:$8 sps:$4 sm:$0xff]  }
 0x2ff   : > { %15321 = vmatmul.mubr.bf16.gmra.mrb[40].mxu0 %v20710_v23  ;;  %15656 = vmatprep.subr.bf16.mxu1 %v16796_v5 }
 0x300   : > { %15641 = vmatmul.mubr.bf16.gmra.mrb[40].mxu1 %v20710_v23  ;;  %15324 = vmatprep.mubr.bf16.mxu0 %v20711_v33  ;;  %v20724_v23 = vld [vmem:[#allocation25_spill] sm:$0xff] }
 0x301   : > { %15337 = vmatpush3.bf16.msra.mxu0 %v16795_v37  ;;  %15644 = vmatprep.mubr.bf16.mxu1 %v20711_v33  ;;  %v16841_v37 = vld [vmem:[%s20616_s6 + $0xa0] ss:$8 sps:$4 sm:$0xff]   ;;  %v16849_v33 = vld [vmem:[%s20616_s6 + $0xc4] ss:$8 sps:$4 sm:$0xff]  }
 0x302   : > { %15657 = vmatpush3.bf16.msra.mxu1 %v16796_v5  ;;  %15338 = vmatprep.subr.bf16.mxu0 %v16797_v4  ;;  %v16846_v5 = vld [vmem:[%s20616_s6 + $0xb4] ss:$8 sps:$4 sm:$0xff]  }
 0x303   : > { %15658 = vmatprep.subr.bf16.mxu1 %v16798_v24 }
 0x305   : > { %15339 = vmatpush3.bf16.msra.mxu0 %v16797_v4  ;;  %v20723_v4 = vld [vmem:[#allocation21_spill] sm:$0xff] }
 0x306   : > { %15659 = vmatpush3.bf16.msra.mxu1 %v16798_v24  ;;  %15340 = vmatprep.subr.bf16.mxu0 %v16799_v25  ;;  %v16844_v24 = vld [vmem:[%s20616_s6 + $0xb0] ss:$8 sps:$4 sm:$0xff]  }
 0x307   : > { %15325 = vmatmul.mubr.bf16.gmra.mrb[44].mxu0 %v18679_v12  ;;  %15660 = vmatprep.subr.bf16.mxu1 %v16800_v51 }
 0x308   : > { %15645 = vmatmul.mubr.bf16.gmra.mrb[44].mxu1 %v18679_v12  ;;  %15344 = vmatprep.mubr.bf16.mxu0 %v20712_v13  ;;  %v16805_v12 = vld [vmem:[%s20614_s4 + $0x410] ss:$8 sps:$4 sm:$0xff]  }
 0x309   : > { %15341 = vmatpush3.bf16.msra.mxu0 %v16799_v25  ;;  %15664 = vmatprep.mubr.bf16.mxu1 %v20712_v13  ;;  %v16847_v25 = vld [vmem:[%s20616_s6 + $0xc0] ss:$8 sps:$4 sm:$0xff]   ;;  %v6379_v13 = vpack.c.bf16 %v20690_v16, %v4557_v53  ;;  %v16861_v53 = vld [vmem:[%s20616_s6 + $0x4] ss:$8 sps:$4 sm:$0xff]  }
 0x30a   : > { %15661 = vmatpush3.bf16.msra.mxu1 %v16800_v51  ;;  %15342 = vmatprep.subr.bf16.mxu0 %v16801_v42  ;;  %v16852_v51 = vld [vmem:[%s20616_s6 + $0xd4] ss:$8 sps:$4 sm:$0xff]  }
 0x30b   : > { %15662 = vmatprep.subr.bf16.mxu1 %v16802_v15 }
 0x30d   : > { %15343 = vmatpush3.bf16.msra.mxu0 %v16801_v42  ;;  %v20725_v42 = vld [vmem:[#allocation29_spill] sm:$0xff] }
 0x30e   : > { %15663 = vmatpush3.bf16.msra.mxu1 %v16802_v15  ;;  %15360 = vmatprep.subr.bf16.mxu0 %v16803_v43  ;;  %v16850_v15 = vld [vmem:[%s20616_s6 + $0xd0] ss:$8 sps:$4 sm:$0xff]  }
 0x30f   : > { %15680 = vmatprep.subr.bf16.mxu1 %v16804_v38 }
 0x310   : > { %15345 = vmatmul.mubr.bf16.vlgmr.msra.gmra.mrb[32].mxu0 %v20713_v45 }
 0x311   : > { %15665 = vmatmul.mubr.bf16.vlgmr.msra.gmra.mrb[32].mxu1 %v20713_v45  ;;  %15348 = vmatprep.mubr.bf16.mxu0 %v20714_v7  ;;  %v19304_v45 = vld [vmem:[%s20615_s5] ss:$0 sm:$0xff] }
 0x312   : > { %15361 = vmatpush3.bf16.msra.mxu0 %v16803_v43  ;;  %15668 = vmatprep.mubr.bf16.mxu1 %v20714_v7  ;;  %v16855_v43 = vld [vmem:[%s20616_s6 + $0xe4] ss:$8 sps:$4 sm:$0xff]  }
 0x313   : > { %15681 = vmatpush3.bf16.msra.mxu1 %v16804_v38  ;;  %15362 = vmatprep.subr.bf16.mxu0 %v16805_v12  ;;  %v16858_v38 = vld [vmem:[%s20616_s6 + $0xf4] ss:$8 sps:$4 sm:$0xff]  }
 0x314   : > { %15682 = vmatprep.subr.bf16.mxu1 %v16806_v41 }
 0x316   : > { %15363 = vmatpush3.bf16.msra.mxu0 %v16805_v12  ;;  %v17326_v12 = vmov 0  }
 0x317   : > { %15683 = vmatpush3.bf16.msra.mxu1 %v16806_v41  ;;  %15364 = vmatprep.subr.bf16.mxu0 %v16807_v14  ;;  %v19309_v41 = vld [vmem:[%s20615_s5 + $0x1] ss:$0 sm:$0xff] }
 0x318   : > { %15349 = vmatmul.mubr.bf16.gmra.mrb[36].mxu0 %v5972_v54  ;;  %15684 = vmatprep.subr.bf16.mxu1 %v16808_v2 }
 0x319   : > { %15669 = vmatmul.mubr.bf16.gmra.mrb[36].mxu1 %v5972_v54  ;;  %15352 = vmatprep.mubr.bf16.mxu0 %v20717_v6 }
 0x31a   : > { %15365 = vmatpush3.bf16.msra.mxu0 %v16807_v14  ;;  %15672 = vmatprep.mubr.bf16.mxu1 %v20717_v6 }
 0x31b   : > { %15685 = vmatpush3.bf16.msra.mxu1 %v16808_v2  ;;  %15366 = vmatprep.subr.bf16.mxu0 %v16809_v60 }
 0x31c   : > { %15686 = vmatprep.subr.bf16.mxu1 %v16810_v61 }
 0x31e   : > { %15367 = vmatpush3.bf16.msra.mxu0 %v16809_v60 }
 0x31f   : > { %15687 = vmatpush3.bf16.msra.mxu1 %v16810_v61  ;;  %15368 = vmatprep.subr.bf16.mxu0 %v16811_v30 }
 0x320   : > { %15353 = vmatmul.mubr.bf16.gmra.mrb[40].mxu0 %v20718_v55  ;;  %15688 = vmatprep.subr.bf16.mxu1 %v16812_v40 }
 0x321   : > { %15673 = vmatmul.mubr.bf16.gmra.mrb[40].mxu1 %v20718_v55  ;;  %15356 = vmatprep.mubr.bf16.mxu0 %v20719_v17 }
 0x322   : > { %15369 = vmatpush3.bf16.msra.mxu0 %v16811_v30  ;;  %15676 = vmatprep.mubr.bf16.mxu1 %v20719_v17 }
 0x323   : > { %15689 = vmatpush3.bf16.msra.mxu1 %v16812_v40  ;;  %15370 = vmatprep.subr.bf16.mxu0 %v16813_v1 }
 0x324   : > { %15690 = vmatprep.subr.bf16.mxu1 %v16814_v44 }
 0x326   : > { %15371 = vmatpush3.bf16.msra.mxu0 %v16813_v1 }
 0x327   : > { %15691 = vmatpush3.bf16.msra.mxu1 %v16814_v44  ;;  %15372 = vmatprep.subr.bf16.mxu0 %v16815_v3 }
 0x328   : > { %15357 = vmatmul.mubr.bf16.gmra.mrb[44].mxu0 %v18683_v0  ;;  %15692 = vmatprep.subr.bf16.mxu1 %v16816_v27 }
 0x329   : > { %15677 = vmatmul.mubr.bf16.gmra.mrb[44].mxu1 %v18683_v0  ;;  %15376 = vmatprep.mubr.bf16.mxu0 %v18408_v63  ;;  %v16821_v0 = vld [vmem:[%s20614_s4 + $0x490] ss:$8 sps:$4 sm:$0xff]  }
 0x32a   : > { %15373 = vmatpush3.bf16.msra.mxu0 %v16815_v3  ;;  %15696 = vmatprep.mubr.bf16.mxu1 %v18408_v63  ;;  %v16822_v63 = vld [vmem:[%s20614_s4 + $0x494] ss:$8 sps:$4 sm:$0xff]  }
 0x32b   : > { %15693 = vmatpush3.bf16.msra.mxu1 %v16816_v27  ;;  %15374 = vmatprep.subr.bf16.mxu0 %v16817_v34 }
 0x32c   : > { %15694 = vmatprep.subr.bf16.mxu1 %v16818_v52 }
 0x32e   : > { %15375 = vmatpush3.bf16.msra.mxu0 %v16817_v34 }
 0x32f   : > { %15695 = vmatpush3.bf16.msra.mxu1 %v16818_v52  ;;  %15392 = vmatprep.subr.bf16.mxu0 %v16819_v20 }
 0x330   : > { %15712 = vmatprep.subr.bf16.mxu1 %v16820_v47 }
 0x331   : > { %15377 = vmatmul.mubr.bf16.vlgmr.msra.gmra.mrb[32].mxu0 %v18434_v8 }
 0x332   : > { %15697 = vmatmul.mubr.bf16.vlgmr.msra.gmra.mrb[32].mxu1 %v18434_v8  ;;  %15380 = vmatprep.mubr.bf16.mxu0 %v18476_v59  ;;  %v16825_v8 = vld [vmem:[%s20614_s4 + $0x4b0] ss:$8 sps:$4 sm:$0xff]  }
 0x333   : > { %15393 = vmatpush3.bf16.msra.mxu0 %v16819_v20  ;;  %15700 = vmatprep.mubr.bf16.mxu1 %v18476_v59  ;;  %v16826_v59 = vld [vmem:[%s20614_s4 + $0x4b4] ss:$8 sps:$4 sm:$0xff]  }
 0x334   : > { %15713 = vmatpush3.bf16.msra.mxu1 %v16820_v47  ;;  %15394 = vmatprep.subr.bf16.mxu0 %v16821_v0 }
 0x335   : > { %15714 = vmatprep.subr.bf16.mxu1 %v16822_v63 }
 0x337   : > { %15395 = vmatpush3.bf16.msra.mxu0 %v16821_v0 }
 0x338   : > { %15715 = vmatpush3.bf16.msra.mxu1 %v16822_v63  ;;  %15396 = vmatprep.subr.bf16.mxu0 %v16823_v35 }
 0x339   : > { %15381 = vmatmul.mubr.bf16.gmra.mrb[36].mxu0 %v18714_v56  ;;  %15716 = vmatprep.subr.bf16.mxu1 %v16824_v22 }
 0x33a   : > { %15701 = vmatmul.mubr.bf16.gmra.mrb[36].mxu1 %v18714_v56  ;;  %15384 = vmatprep.mubr.bf16.mxu0 %v18604_v11  ;;  %v16829_v56 = vld [vmem:[%s20614_s4 + $0x4d0] ss:$8 sps:$4 sm:$0xff]  }
 0x33b   : > { %15397 = vmatpush3.bf16.msra.mxu0 %v16823_v35  ;;  %15704 = vmatprep.mubr.bf16.mxu1 %v18604_v11  ;;  %v16830_v11 = vld [vmem:[%s20614_s4 + $0x4d4] ss:$8 sps:$4 sm:$0xff]  }
 0x33c   : > { %15717 = vmatpush3.bf16.msra.mxu1 %v16824_v22  ;;  %15398 = vmatprep.subr.bf16.mxu0 %v16825_v8  ;;  %v16859_v22 = vld [vmem:[%s20616_s6] ss:$8 sps:$4 sm:$0xff]  }
 0x33d   : > { %15718 = vmatprep.subr.bf16.mxu1 %v16826_v59 }
 0x33f   : > { %15399 = vmatpush3.bf16.msra.mxu0 %v16825_v8 }
 0x340   : > { %15719 = vmatpush3.bf16.msra.mxu1 %v16826_v59  ;;  %15400 = vmatprep.subr.bf16.mxu0 %v16827_v57 }
 0x341   : > { %15385 = vmatmul.mubr.bf16.gmra.mrb[40].mxu0 %v18630_v62  ;;  %15720 = vmatprep.subr.bf16.mxu1 %v16828_v36 }
 0x342   : > { %15705 = vmatmul.mubr.bf16.gmra.mrb[40].mxu1 %v18630_v62  ;;  %15388 = vmatprep.mubr.bf16.mxu0 %v18662_v9  ;;  %v6177_v62 = vpack.c.bf16 %v20690_v16, %v3529_v39  ;;  %v16835_v39 = vld [vmem:[%s20616_s6 + $0x80] ss:$8 sps:$4 sm:$0xff]  }
 0x343   : > { %15401 = vmatpush3.bf16.msra.mxu0 %v16827_v57  ;;  %15708 = vmatprep.mubr.bf16.mxu1 %v18662_v9  ;;  %v16833_v9 = vld [vmem:[%s20614_s4 + $0x4f0] ss:$8 sps:$4 sm:$0xff]  }
 0x344   : > { %15721 = vmatpush3.bf16.msra.mxu1 %v16828_v36  ;;  %15402 = vmatprep.subr.bf16.mxu0 %v16829_v56  ;;  %v16864_v36 = vld [vmem:[%s20616_s6 + $0x14] ss:$8 sps:$4 sm:$0xff]  }
 0x345   : > { %15722 = vmatprep.subr.bf16.mxu1 %v16830_v11 }
 0x347   : > { %15403 = vmatpush3.bf16.msra.mxu0 %v16829_v56 }
 0x348   : > { %15723 = vmatpush3.bf16.msra.mxu1 %v16830_v11  ;;  %15404 = vmatprep.subr.bf16.mxu0 %v16831_v19 }
 0x349   : > { %15389 = vmatmul.mubr.bf16.gmra.mrb[44].mxu0 %v6177_v62  ;;  %15724 = vmatprep.subr.bf16.mxu1 %v16832_v58 }
 0x34a   : > { %15709 = vmatmul.mubr.bf16.gmra.mrb[44].mxu1 %v6177_v62  ;;  %15408 = vmatprep.mubr.bf16.mxu0 %v20720_v10 }
 0x34b   : > { %15405 = vmatpush3.bf16.msra.mxu0 %v16831_v19  ;;  %15728 = vmatprep.mubr.bf16.mxu1 %v20720_v10 }
 0x34c   : > { %15725 = vmatpush3.bf16.msra.mxu1 %v16832_v58  ;;  %15406 = vmatprep.subr.bf16.mxu0 %v16833_v9 }
 0x34d   : > { %15726 = vmatprep.subr.bf16.mxu1 %v16834_v26 }
 0x34f   : > { %15407 = vmatpush3.bf16.msra.mxu0 %v16833_v9 }
 0x350   : > { %15727 = vmatpush3.bf16.msra.mxu1 %v16834_v26  ;;  %8781 = vmatprep.subr.bf16.mxu0 %v16837_v29 }
 0x352   : > { %15409 = vmatmul.mubr.bf16.vlgmr.msra.gmra.mrb[32].mxu0 %v20721_v50 }
 0x353   : > { %15729 = vmatmul.mubr.bf16.vlgmr.msra.gmra.mrb[32].mxu1 %v20721_v50  ;;  %15412 = vmatprep.mubr.bf16.mxu0 %v20722_v46 }
 0x354   : > { %15732 = vmatprep.mubr.bf16.mxu1 %v20722_v46  ;;  %8782 = vmatpush1.bf16.msra.mxu0 %v16835_v39 }
 0x355   : > { %8783 = vmatprep.subr.bf16.mxu0 %v16840_v18  ;;  %v16862_v18 = vld [vmem:[%s20616_s6 + $0x10] ss:$8 sps:$4 sm:$0xff]  }
 0x358   : > { %8784 = vmatpush1.bf16.msra.mxu0 %v16838_v28 }
 0x359   : > { %8785 = vmatprep.subr.bf16.mxu0 %v16843_v31 }
 0x35a   : > { %15413 = vmatmul.mubr.bf16.gmra.mrb[36].mxu0 %v20723_v4 }
 0x35b   : > { %15733 = vmatmul.mubr.bf16.gmra.mrb[36].mxu1 %v20723_v4  ;;  %15416 = vmatprep.mubr.bf16.mxu0 %v20724_v23 }
 0x35c   : > { %15736 = vmatprep.mubr.bf16.mxu1 %v20724_v23  ;;  %8786 = vmatpush1.bf16.msra.mxu0 %v16841_v37 }
 0x35d   : > { %8787 = vmatprep.subr.bf16.mxu0 %v16846_v5  ;;  %v16867_v5 = vld [vmem:[%s20616_s6 + $0x24] ss:$8 sps:$4 sm:$0xff]  }
 0x360   : > { %8788 = vmatpush1.bf16.msra.mxu0 %v16844_v24 }
 0x361   : > { %8789 = vmatprep.subr.bf16.mxu0 %v16849_v33 }
 0x362   : > { %15417 = vmatmul.mubr.bf16.gmra.mrb[40].mxu0 %v20725_v42 }
 0x363   : > { %15737 = vmatmul.mubr.bf16.gmra.mrb[40].mxu1 %v20725_v42  ;;  %15420 = vmatprep.mubr.bf16.mxu0 %v18668_v48 }
 0x364   : > { %15740 = vmatprep.mubr.bf16.mxu1 %v18668_v48  ;;  %8790 = vmatpush1.bf16.msra.mxu0 %v16847_v25  ;;  %v16853_v48 = vld [vmem:[%s20616_s6 + $0xe0] ss:$8 sps:$4 sm:$0xff]  }
 0x365   : > { %8791 = vmatprep.subr.bf16.mxu0 %v16852_v51 }
 0x368   : > { %8792 = vmatpush1.bf16.msra.mxu0 %v16850_v15 }
 0x369   : > { %8793 = vmatprep.subr.bf16.mxu0 %v16855_v43 }
 0x36a   : > { %15421 = vmatmul.mubr.bf16.gmra.mrb[44].mxu0 %v6379_v13 }
 0x36b   : > { %15741 = vmatmul.mubr.bf16.gmra.mrb[44].mxu1 %v6379_v13  ;;  %8813 = vmatprep.mubr.bf16.mxu0 %v17326_v12 }
 0x36c   : > { %8794 = vmatpush1.bf16.msra.mxu0 %v16853_v48  ;;  %10803 = vmatprep.mubr.bf16.mxu1 %v17326_v12 }
 0x36d   : > { %8795 = vmatprep.subr.bf16.mxu0 %v16858_v38 }
 0x370   : > { %8796 = vmatpush1.bf16.msra.mxu0 %v16856_v32  ;;  %v16865_v32 = vld [vmem:[%s20616_s6 + $0x20] ss:$8 sps:$4 sm:$0xff]  }
 0x371   : > { %8934 = vmatprep.subr.bf16.mxu0 %v16861_v53 }
 0x425   : > { %v15410_v7 = vpop.f32.mrb[32].mxu0 }
 0x426   : > { %v6566_v14 = vadd.f32 %v15410_v7, %v19304_v45  ;;  %v15730_v2 = vpop.f32.mrb[32].mxu1  ;;  %v6478_v21 = vpop.f32.mrb[33].mxu0 }
 0x427   : > { %v8599_v49 = vadd.f32 %v15730_v2, %v19309_v41  ;;  %v19314_v54 = vadd.f32 %v19304_v45, %v6478_v21  ;;  %v8511_v60 = vpop.f32.mrb[33].mxu1  ;;  %v15411_v61 = vpop.f32.mrb[34].mxu0  ;;  %v16870_v2 = vld [vmem:[%s20616_s6 + $0x34] ss:$8 sps:$4 sm:$0xff]  }
 0x428   : > { %v6582_v6 = vmax.f32 %v6566_v14, 0.0  ;;  %v8597_v30 = vadd.f32 %v19309_v41, %v8511_v60  ;;  %v6567_v40 = vadd.f32 %v15411_v61, %v19304_v45  ;;  %v15731_v1 = vpop.f32.mrb[34].mxu1  ;;  %v6481_v55 = vpop.f32.mrb[35].mxu0 }
 0x429   : > { %v8615_v44 = vmax.f32 %v8599_v49, 0.0  ;;  %v6580_v17 = vmax.f32 %v19314_v54, 0.0  ;;  %v8600_v3 = vadd.f32 %v15731_v1, %v19309_v41  ;;  %v19321_v27 = vadd.f32 %v19304_v45, %v6481_v55  ;;  %v8514_v34 = vpop.f32.mrb[35].mxu1  ;;  %v16889_v54 = vld [vmem:[%s20616_s6 + $0x120] ss:$8 sps:$4 sm:$0xff]  }
 0x42a   : > { %v8613_v52 = vmax.f32 %v8597_v30, 0.0  ;;  %v6583_v20 = vmax.f32 %v6567_v40, 0.0  ;;  %v19324_v47 = vadd.f32 %v19309_v41, %v8514_v34 }
 0x42b   : > { %v19328_v0 = vpack.c.bf16 %v6582_v6, %v6580_v17  ;;  %v8616_v63 = vmax.f32 %v8600_v3, 0.0  ;;  %v6581_v35 = vmax.f32 %v19321_v27, 0.0  ;;  %v16913_v27 = vld [vmem:[%s20616_s6 + $0x1a0] ss:$8 sps:$4 sm:$0xff]  }
 0x42c   : > { %v8681_v8 = vpack.c.bf16 %v8613_v52, %v20690_v16  ;;  %v19335_v59 = vpack.c.bf16 %v8615_v44, %v8613_v52  ;;  %v8614_v57 = vmax.f32 %v19324_v47, 0.0  ;;  %v16868_v52 = vld [vmem:[%s20616_s6 + $0x30] ss:$8 sps:$4 sm:$0xff]   ;;  %v16937_v47 = vld [vmem:[%s20616_s6 + $0x220] ss:$8 sps:$4 sm:$0xff]  }
 0x42d   : > { %v19343_v56 = vpack.c.bf16 %v6583_v20, %v6581_v35  ;;  %v15414_v11 = vpop.f32.mrb[36].mxu0 }
 0x42e   : > { %v19347_v19 = vpack.c.bf16 %v8616_v63, %v8614_v57  ;;  %v19350_v58 = vadd.f32 %v15414_v11, %v19304_v45  ;;  %v15734_v62 = vpop.f32.mrb[36].mxu1  ;;  %8814 = vmatmul.mubr.bf16.vlgmr.msra.gmra.mrb[48].mxu0 %v8681_v8  ;;  %v6494_v9 = vpop.f32.mrb[37].mxu0  ;;  %v16873_v11 = vld [vmem:[%s20616_s6 + $0x44] ss:$8 sps:$4 sm:$0xff]  }
 0x42f   : > { %v19353_v26 = vadd.f32 %v15734_v62, %v19309_v41  ;;  %v6568_v10 = vadd.f32 %v19304_v45, %v6494_v9  ;;  %v8527_v29 = vpop.f32.mrb[37].mxu1  ;;  %8935 = vmatpush1.bf16.msra.mxu0 %v16859_v22  ;;  %v15415_v39 = vpop.f32.mrb[38].mxu0  ;;  %8823 = vmatprep.mubr.bf16.mxu0 %v17326_v12 }
 0x430   : > { %v6586_v50 = vmax.f32 %v19350_v58, 0.0  ;;  %v8601_v46 = vadd.f32 %v19309_v41, %v8527_v29  ;;  %v19363_v28 = vadd.f32 %v15415_v39, %v19304_v45  ;;  %v15735_v31 = vpop.f32.mrb[38].mxu1  ;;  %v6497_v37 = vpop.f32.mrb[39].mxu0  ;;  %8936 = vmatprep.subr.bf16.mxu0 %v16864_v36 }
 0x431   : > { %v8619_v4 = vmax.f32 %v19353_v26, 0.0  ;;  %v6584_v23 = vmax.f32 %v6568_v10, 0.0  ;;  %v19370_v24 = vadd.f32 %v15735_v31, %v19309_v41  ;;  %v6569_v33 = vadd.f32 %v19304_v45, %v6497_v37  ;;  %v8530_v25 = vpop.f32.mrb[39].mxu1 }
 0x432   : > { %v8617_v51 = vmax.f32 %v8601_v46, 0.0  ;;  %v6587_v42 = vmax.f32 %v19363_v28, 0.0  ;;  %v8602_v15 = vadd.f32 %v19309_v41, %v8530_v25 }
 0x433   : > { %v19375_v13 = vpack.c.bf16 %v6584_v23, %v6582_v6  ;;  %v19377_v43 = vpack.c.bf16 %v6586_v50, %v6584_v23  ;;  %v8620_v48 = vmax.f32 %v19370_v24, 0.0  ;;  %v6585_v38 = vmax.f32 %v6569_v33, 0.0  ;;  %8937 = vmatpush1.bf16.msra.mxu0 %v16862_v18 }
 0x434   : > { %v19383_v53 = vpack.c.bf16 %v8617_v51, %v8615_v44  ;;  %v19385_v7 = vpack.c.bf16 %v8619_v4, %v8617_v51  ;;  %v8618_v14 = vmax.f32 %v8602_v15, 0.0  ;;  %8938 = vmatprep.subr.bf16.mxu0 %v16867_v5  ;;  %v16871_v5 = vld [vmem:[%s20616_s6 + $0x40] ss:$8 sps:$4 sm:$0xff]  }
 0x435   : > { %v19390_v21 = vpack.c.bf16 %v6585_v38, %v6583_v20  ;;  %v19392_v49 = vpack.c.bf16 %v6587_v42, %v6585_v38  ;;  %v15418_v60 = vpop.f32.mrb[40].mxu0 }
 0x436   : > { %v19394_v61 = vpack.c.bf16 %v8618_v14, %v8616_v63  ;;  %v19396_v6 = vpack.c.bf16 %v8620_v48, %v8618_v14  ;;  %v19399_v30 = vadd.f32 %v15418_v60, %v19304_v45  ;;  %v15738_v40 = vpop.f32.mrb[40].mxu1  ;;  %8824 = vmatmul.mubr.bf16.gmra.mrb[52].mxu0 %v19383_v53  ;;  %v6510_v1 = vpop.f32.mrb[41].mxu0 }
 0x437   : > { %v19403_v55 = vadd.f32 %v15738_v40, %v19309_v41  ;;  %v6572_v44 = vadd.f32 %v19304_v45, %v6510_v1  ;;  %v8543_v3 = vpop.f32.mrb[41].mxu1  ;;  %8939 = vmatpush1.bf16.msra.mxu0 %v16865_v32  ;;  %v15419_v34 = vpop.f32.mrb[42].mxu0  ;;  %8833 = vmatprep.mubr.bf16.mxu0 %v17326_v12 }
 0x438   : > { %v6590_v20 = vmax.f32 %v19399_v30, 0.0  ;;  %v8605_v63 = vadd.f32 %v19309_v41, %v8543_v3  ;;  %v19413_v22 = vadd.f32 %v15419_v34, %v19304_v45  ;;  %v15739_v8 = vpop.f32.mrb[42].mxu1  ;;  %v6513_v36 = vpop.f32.mrb[43].mxu0  ;;  %8940 = vmatprep.subr.bf16.mxu0 %v16870_v2 }
 0x439   : > { %v8623_v58 = vmax.f32 %v19403_v55, 0.0  ;;  %v6588_v62 = vmax.f32 %v6572_v44, 0.0  ;;  %v8608_v9 = vadd.f32 %v15739_v8, %v19309_v41  ;;  %v6573_v26 = vadd.f32 %v19304_v45, %v6513_v36  ;;  %v8546_v10 = vpop.f32.mrb[43].mxu1 }
 0x43a   : > { %v8621_v29 = vmax.f32 %v8605_v63, 0.0  ;;  %v6591_v39 = vmax.f32 %v19413_v22, 0.0  ;;  %v8606_v18 = vadd.f32 %v19309_v41, %v8546_v10 }
 0x43b   : > { %v19423_v46 = vpack.c.bf16 %v6588_v62, %v6586_v50  ;;  %v19425_v28 = vpack.c.bf16 %v6590_v20, %v6588_v62  ;;  %v8624_v31 = vmax.f32 %v8608_v9, 0.0  ;;  %v6589_v37 = vmax.f32 %v6573_v26, 0.0  ;;  %8941 = vmatpush1.bf16.msra.mxu0 %v16868_v52  ;;  %v16876_v50 = vld [vmem:[%s20616_s6 + $0x54] ss:$8 sps:$4 sm:$0xff]   ;;  %v16879_v52 = vld [vmem:[%s20616_s6 + $0x64] ss:$8 sps:$4 sm:$0xff]  }
 0x43c   : > { %v19430_v23 = vpack.c.bf16 %v8621_v29, %v8619_v4  ;;  %v19432_v24 = vpack.c.bf16 %v8623_v58, %v8621_v29  ;;  %v8622_v33 = vmax.f32 %v8606_v18, 0.0  ;;  %8942 = vmatprep.subr.bf16.mxu0 %v16873_v11 }
 0x43d   : > { %v19437_v25 = vpack.c.bf16 %v6589_v37, %v6587_v42  ;;  %v19439_v51 = vpack.c.bf16 %v6591_v39, %v6589_v37  ;;  %v15422_v15 = vpop.f32.mrb[44].mxu0  ;;  %v16877_v37 = vld [vmem:[%s20616_s6 + $0x60] ss:$8 sps:$4 sm:$0xff]  }
 0x43e   : > { %v19441_v38 = vpack.c.bf16 %v8622_v33, %v8620_v48  ;;  %v19443_v32 = vpack.c.bf16 %v8624_v31, %v8622_v33  ;;  %v19446_v4 = vadd.f32 %v15422_v15, %v19304_v45  ;;  %v15742_v14 = vpop.f32.mrb[44].mxu1  ;;  %8834 = vmatmul.mubr.bf16.gmra.mrb[56].mxu0 %v19430_v23  ;;  %v6526_v2 = vpop.f32.mrb[45].mxu0  ;;  %v16874_v48 = vld [vmem:[%s20616_s6 + $0x50] ss:$8 sps:$4 sm:$0xff]  }
 0x43f   : > { %v19450_v60 = vadd.f32 %v15742_v14, %v19309_v41  ;;  %v6576_v42 = vadd.f32 %v19304_v45, %v6526_v2  ;;  %v8559_v30 = vpop.f32.mrb[45].mxu1  ;;  %8943 = vmatpush1.bf16.msra.mxu0 %v16871_v5  ;;  %v15423_v40 = vpop.f32.mrb[46].mxu0  ;;  %8843 = vmatprep.mubr.bf16.mxu0 %v17326_v12 }
 0x440   : > { %v6594_v1 = vmax.f32 %v19446_v4, 0.0  ;;  %v8609_v55 = vadd.f32 %v19309_v41, %v8559_v30  ;;  %v6579_v44 = vadd.f32 %v15423_v40, %v19304_v45  ;;  %v15743_v3 = vpop.f32.mrb[46].mxu1  ;;  %v6529_v34 = vpop.f32.mrb[47].mxu0  ;;  %8944 = vmatprep.subr.bf16.mxu0 %v16876_v50  ;;  %v16888_v30 = vld [vmem:[%s20616_s6 + $0x114] ss:$8 sps:$4 sm:$0xff]  }
 0x441   : > { %v8627_v63 = vmax.f32 %v19450_v60, 0.0  ;;  %v6592_v22 = vmax.f32 %v6576_v42, 0.0  ;;  %v8612_v8 = vadd.f32 %v15743_v3, %v19309_v41  ;;  %v6577_v36 = vadd.f32 %v19304_v45, %v6529_v34  ;;  %v8562_v11 = vpop.f32.mrb[47].mxu1  ;;  %v16886_v40 = vld [vmem:[%s20616_s6 + $0x110] ss:$8 sps:$4 sm:$0xff]  }
 0x442   : > { %v8625_v62 = vmax.f32 %v8609_v55, 0.0  ;;  %v6595_v9 = vmax.f32 %v6579_v44, 0.0  ;;  %v8610_v26 = vadd.f32 %v19309_v41, %v8562_v11  ;;  %v8653_v42 = vpack.c.bf16 %v6580_v17, %v20690_v16  ;;  %v16894_v17 = vld [vmem:[%s20616_s6 + $0x134] ss:$8 sps:$4 sm:$0xff]   ;;  %v16892_v55 = vld [vmem:[%s20616_s6 + $0x130] ss:$8 sps:$4 sm:$0xff]  }
 0x443   : > { %v19467_v10 = vpack.c.bf16 %v6592_v22, %v6590_v20  ;;  %v19471_v29 = vpack.c.bf16 %v6594_v1, %v6592_v22  ;;  %v8628_v18 = vmax.f32 %v8612_v8, 0.0  ;;  %8945 = vmatpush1.bf16.msra.mxu0 %v16874_v48  ;;  %v6593_v33 = vmax.f32 %v6577_v36, 0.0  ;;  %v16882_v20 = vld [vmem:[%s20616_s6 + $0x74] ss:$8 sps:$4 sm:$0xff]   ;;  %v16891_v48 = vld [vmem:[%s20616_s6 + $0x124] ss:$8 sps:$4 sm:$0xff]  }
 0x444   : > { %v19476_v5 = vpack.c.bf16 %v8625_v62, %v8623_v58  ;;  %v19480_v45 = vpack.c.bf16 %v8627_v63, %v8625_v62  ;;  %v8626_v41 = vmax.f32 %v8610_v26, 0.0  ;;  %8946 = vmatprep.subr.bf16.mxu0 %v16879_v52  ;;  %v16880_v58 = vld [vmem:[%s20616_s6 + $0x70] ss:$8 sps:$4 sm:$0xff]   ;;  %v16897_v44 = vld [vmem:[%s20616_s6 + $0x144] ss:$8 sps:$4 sm:$0xff]   ;;  %v9015_v26 = vpack.c.bf16 %v6581_v35, %v20690_v16 }
 0x445   : > { %v19485_v50 = vpack.c.bf16 %v6593_v33, %v6591_v39  ;;  %v19487_v15 = vpack.c.bf16 %v6595_v9, %v6593_v33  ;;  %v16885_v39 = vld [vmem:[%s20616_s6 + $0x104] ss:$8 sps:$4 sm:$0xff]   ;;  %v16895_v3 = vld [vmem:[%s20616_s6 + $0x140] ss:$8 sps:$4 sm:$0xff]   ;;  %v16900_v34 = vld [vmem:[%s20616_s6 + $0x154] ss:$8 sps:$4 sm:$0xff]   ;;  %v10401_v4 = vpack.c.bf16 %v20690_v16, %v8627_v63 }
 0x446   : > { %v19489_v14 = vpack.c.bf16 %v8626_v41, %v8624_v31  ;;  %v19491_v2 = vpack.c.bf16 %v8628_v18, %v8626_v41  ;;  %8844 = vmatmul.mubr.bf16.gmra.mrb[60].mxu0 %v19476_v5  ;;  %v16883_v31 = vld [vmem:[%s20616_s6 + $0x100] ss:$8 sps:$4 sm:$0xff]   ;;  %v16898_v52 = vld [vmem:[%s20616_s6 + $0x150] ss:$8 sps:$4 sm:$0xff]   ;;  %v16903_v22 = vld [vmem:[%s20616_s6 + $0x164] ss:$8 sps:$4 sm:$0xff]  }
 0x447   : > { %8947 = vmatpush1.bf16.msra.mxu0 %v16877_v37  ;;  %8966 = vmatprep.mubr.bf16.mxu0 %v17326_v12  ;;  %v16901_v8 = vld [vmem:[%s20616_s6 + $0x160] ss:$8 sps:$4 sm:$0xff]   ;;  %v16906_v36 = vld [vmem:[%s20616_s6 + $0x174] ss:$8 sps:$4 sm:$0xff]   ;;  %v16904_v11 = vld [vmem:[%s20616_s6 + $0x170] ss:$8 sps:$4 sm:$0xff]  }
 0x448   : > { %8948 = vmatprep.subr.bf16.mxu0 %v16882_v20  ;;  %v16909_v62 = vld [vmem:[%s20616_s6 + $0x184] ss:$8 sps:$4 sm:$0xff]   ;;  %v16907_v9 = vld [vmem:[%s20616_s6 + $0x180] ss:$8 sps:$4 sm:$0xff]   ;;  %v16912_v18 = vld [vmem:[%s20616_s6 + $0x194] ss:$8 sps:$4 sm:$0xff]  }
 0x449   : > { %v16910_v37 = vld [vmem:[%s20616_s6 + $0x190] ss:$8 sps:$4 sm:$0xff]   ;;  %v16915_v33 = vld [vmem:[%s20616_s6 + $0x1a4] ss:$8 sps:$4 sm:$0xff]   ;;  %v16918_v35 = vld [vmem:[%s20616_s6 + $0x1b4] ss:$8 sps:$4 sm:$0xff]  }
 0x44a   : > { %v16916_v41 = vld [vmem:[%s20616_s6 + $0x1b0] ss:$8 sps:$4 sm:$0xff]   ;;  %v16921_v20 = vld [vmem:[%s20616_s6 + $0x1c4] ss:$8 sps:$4 sm:$0xff]  }
 0x44b   : > { %8949 = vmatpush1.bf16.msra.mxu0 %v16880_v58  ;;  %v16919_v58 = vld [vmem:[%s20616_s6 + $0x1c0] ss:$8 sps:$4 sm:$0xff]  }
 0x44c   : > { %9116 = vmatprep.subr.bf16.mxu0 %v16885_v39  ;;  %v16922_v39 = vld [vmem:[%s20616_s6 + $0x1d0] ss:$8 sps:$4 sm:$0xff]  }
 0x44e   : > { %8967 = vmatmul.mubr.bf16.vlgmr.msra.gmra.mrb[48].mxu0 %v8653_v42  ;;  %v16925_v42 = vld [vmem:[%s20616_s6 + $0x1e0] ss:$8 sps:$4 sm:$0xff]  }
 0x44f   : > { %9117 = vmatpush1.bf16.msra.mxu0 %v16883_v31  ;;  %8976 = vmatprep.mubr.bf16.mxu0 %v17326_v12  ;;  %v16927_v31 = vld [vmem:[%s20616_s6 + $0x1e4] ss:$8 sps:$4 sm:$0xff]  }
 0x450   : > { %9118 = vmatprep.subr.bf16.mxu0 %v16888_v30  ;;  %v16928_v30 = vld [vmem:[%s20616_s6 + $0x1f0] ss:$8 sps:$4 sm:$0xff]  }
 0x453   : > { %9119 = vmatpush1.bf16.msra.mxu0 %v16886_v40  ;;  %v16933_v40 = vld [vmem:[%s20616_s6 + $0x204] ss:$8 sps:$4 sm:$0xff]  }
 0x454   : > { %9120 = vmatprep.subr.bf16.mxu0 %v16891_v48  ;;  %v16931_v48 = vld [vmem:[%s20616_s6 + $0x200] ss:$8 sps:$4 sm:$0xff]  }
 0x456   : > { %8977 = vmatmul.mubr.bf16.gmra.mrb[52].mxu0 %v19375_v13 }
 0x457   : > { %9121 = vmatpush1.bf16.msra.mxu0 %v16889_v54  ;;  %8986 = vmatprep.mubr.bf16.mxu0 %v17326_v12  ;;  %v16936_v54 = vld [vmem:[%s20616_s6 + $0x214] ss:$8 sps:$4 sm:$0xff]  }
 0x458   : > { %9122 = vmatprep.subr.bf16.mxu0 %v16894_v17  ;;  %v16934_v17 = vld [vmem:[%s20616_s6 + $0x210] ss:$8 sps:$4 sm:$0xff]  }
 0x45b   : > { %9123 = vmatpush1.bf16.msra.mxu0 %v16892_v55  ;;  %v16939_v55 = vld [vmem:[%s20616_s6 + $0x224] ss:$8 sps:$4 sm:$0xff]  }
 0x45c   : > { %9124 = vmatprep.subr.bf16.mxu0 %v16897_v44  ;;  %v16940_v44 = vld [vmem:[%s20616_s6 + $0x230] ss:$8 sps:$4 sm:$0xff]  }
 0x45e   : > { %8987 = vmatmul.mubr.bf16.gmra.mrb[56].mxu0 %v19423_v46 }
 0x45f   : > { %9125 = vmatpush1.bf16.msra.mxu0 %v16895_v3  ;;  %8996 = vmatprep.mubr.bf16.mxu0 %v17326_v12  ;;  %v16945_v3 = vld [vmem:[%s20616_s6 + $0x244] ss:$8 sps:$4 sm:$0xff]  }
 0x460   : > { %9126 = vmatprep.subr.bf16.mxu0 %v16900_v34  ;;  %v16943_v34 = vld [vmem:[%s20616_s6 + $0x240] ss:$8 sps:$4 sm:$0xff]  }
 0x463   : > { %9127 = vmatpush1.bf16.msra.mxu0 %v16898_v52  ;;  %v16946_v52 = vld [vmem:[%s20616_s6 + $0x250] ss:$8 sps:$4 sm:$0xff]  }
 0x464   : > { %9128 = vmatprep.subr.bf16.mxu0 %v16903_v22  ;;  %v16951_v22 = vld [vmem:[%s20616_s6 + $0x264] ss:$8 sps:$4 sm:$0xff]  }
 0x466   : > { %8997 = vmatmul.mubr.bf16.gmra.mrb[60].mxu0 %v19467_v10 }
 0x467   : > { %9129 = vmatpush1.bf16.msra.mxu0 %v16901_v8  ;;  %9148 = vmatprep.mubr.bf16.mxu0 %v17326_v12  ;;  %v16949_v8 = vld [vmem:[%s20616_s6 + $0x260] ss:$8 sps:$4 sm:$0xff]  }
 0x468   : > { %9130 = vmatprep.subr.bf16.mxu0 %v16906_v36  ;;  %v16952_v36 = vld [vmem:[%s20616_s6 + $0x270] ss:$8 sps:$4 sm:$0xff]  }
 0x46b   : > { %9131 = vmatpush1.bf16.msra.mxu0 %v16904_v11  ;;  %v16957_v11 = vld [vmem:[%s20616_s6 + $0x284] ss:$8 sps:$4 sm:$0xff]  }
 0x46c   : > { %9313 = vmatprep.subr.bf16.mxu0 %v16909_v62  ;;  %v16955_v62 = vld [vmem:[%s20616_s6 + $0x280] ss:$8 sps:$4 sm:$0xff]  }
 0x46e   : > { %9149 = vmatmul.mubr.bf16.vlgmr.msra.gmra.mrb[48].mxu0 %v9015_v26  ;;  %v16963_v26 = vld [vmem:[%s20616_s6 + $0x2a4] ss:$8 sps:$4 sm:$0xff]  }
 0x46f   : > { %9314 = vmatpush1.bf16.msra.mxu0 %v16907_v9  ;;  %9158 = vmatprep.mubr.bf16.mxu0 %v17326_v12  ;;  %v16958_v9 = vld [vmem:[%s20616_s6 + $0x290] ss:$8 sps:$4 sm:$0xff]  }
 0x470   : > { %9315 = vmatprep.subr.bf16.mxu0 %v16912_v18  ;;  %v16961_v18 = vld [vmem:[%s20616_s6 + $0x2a0] ss:$8 sps:$4 sm:$0xff]  }
 0x473   : > { %9316 = vmatpush1.bf16.msra.mxu0 %v16910_v37  ;;  %v16964_v37 = vld [vmem:[%s20616_s6 + $0x2b0] ss:$8 sps:$4 sm:$0xff]  }
 0x474   : > { %9317 = vmatprep.subr.bf16.mxu0 %v16915_v33  ;;  %v16969_v33 = vld [vmem:[%s20616_s6 + $0x2c4] ss:$8 sps:$4 sm:$0xff]  }
 0x476   : > { %9159 = vmatmul.mubr.bf16.gmra.mrb[52].mxu0 %v19390_v21  ;;  %v16924_v21 = vld [vmem:[%s20616_s6 + $0x1d4] ss:$8 sps:$4 sm:$0xff]  }
 0x477   : > { %9318 = vmatpush1.bf16.msra.mxu0 %v16913_v27  ;;  %9168 = vmatprep.mubr.bf16.mxu0 %v17326_v12  ;;  %v16967_v27 = vld [vmem:[%s20616_s6 + $0x2c0] ss:$8 sps:$4 sm:$0xff]  }
 0x478   : > { %9319 = vmatprep.subr.bf16.mxu0 %v16918_v35  ;;  %v16970_v35 = vld [vmem:[%s20616_s6 + $0x2d0] ss:$8 sps:$4 sm:$0xff]  }
 0x47b   : > { %9320 = vmatpush1.bf16.msra.mxu0 %v16916_v41  ;;  %v16975_v41 = vld [vmem:[%s20616_s6 + $0x2e4] ss:$8 sps:$4 sm:$0xff]  }
 0x47c   : > { %9321 = vmatprep.subr.bf16.mxu0 %v16921_v20  ;;  %v16973_v20 = vld [vmem:[%s20616_s6 + $0x2e0] ss:$8 sps:$4 sm:$0xff]  }
 0x47e   : > { %9169 = vmatmul.mubr.bf16.gmra.mrb[56].mxu0 %v19437_v25  ;;  %v16930_v25 = vld [vmem:[%s20616_s6 + $0x1f4] ss:$8 sps:$4 sm:$0xff]  }
 0x47f   : > { %9322 = vmatpush1.bf16.msra.mxu0 %v16919_v58  ;;  %9178 = vmatprep.mubr.bf16.mxu0 %v17326_v12  ;;  %v16976_v58 = vld [vmem:[%s20616_s6 + $0x2f0] ss:$8 sps:$4 sm:$0xff]  }
 0x480   : > { %9323 = vmatprep.subr.bf16.mxu0 %v16924_v21  ;;  %v16981_v21 = vld [vmem:[%s20616_s6 + $0x304] ss:$8 sps:$4 sm:$0xff]  }
 0x483   : > { %9324 = vmatpush1.bf16.msra.mxu0 %v16922_v39  ;;  %v16979_v39 = vld [vmem:[%s20616_s6 + $0x300] ss:$8 sps:$4 sm:$0xff]  }
 0x484   : > { %9325 = vmatprep.subr.bf16.mxu0 %v16927_v31  ;;  %v16982_v31 = vld [vmem:[%s20616_s6 + $0x310] ss:$8 sps:$4 sm:$0xff]  }
 0x486   : > { %9179 = vmatmul.mubr.bf16.gmra.mrb[60].mxu0 %v19485_v50  ;;  %v9213_v50 = vpack.c.bf16 %v8614_v57, %v20690_v16  ;;  %v16942_v57 = vld [vmem:[%s20616_s6 + $0x234] ss:$8 sps:$4 sm:$0xff]  }
 0x487   : > { %9326 = vmatpush1.bf16.msra.mxu0 %v16925_v42  ;;  %9345 = vmatprep.mubr.bf16.mxu0 %v17326_v12  ;;  %v16987_v42 = vld [vmem:[%s20616_s6 + $0x324] ss:$8 sps:$4 sm:$0xff]  }
 0x488   : > { %9327 = vmatprep.subr.bf16.mxu0 %v16930_v25  ;;  %v16985_v25 = vld [vmem:[%s20616_s6 + $0x320] ss:$8 sps:$4 sm:$0xff]  }
 0x48b   : > { %9328 = vmatpush1.bf16.msra.mxu0 %v16928_v30  ;;  %v16988_v30 = vld [vmem:[%s20616_s6 + $0x330] ss:$8 sps:$4 sm:$0xff]  }
 0x48c   : > { %9511 = vmatprep.subr.bf16.mxu0 %v16933_v40  ;;  %v16993_v40 = vld [vmem:[%s20616_s6 + $0x344] ss:$8 sps:$4 sm:$0xff]  }
 0x48e   : > { %9346 = vmatmul.mubr.bf16.vlgmr.msra.gmra.mrb[48].mxu0 %v9213_v50  ;;  %v16994_v50 = vld [vmem:[%s20616_s6 + $0x350] ss:$8 sps:$4 sm:$0xff]  }
 0x48f   : > { %9512 = vmatpush1.bf16.msra.mxu0 %v16931_v48  ;;  %9355 = vmatprep.mubr.bf16.mxu0 %v17326_v12  ;;  %v16991_v48 = vld [vmem:[%s20616_s6 + $0x340] ss:$8 sps:$4 sm:$0xff]  }
 0x490   : > { %9513 = vmatprep.subr.bf16.mxu0 %v16936_v54  ;;  %v16999_v54 = vld [vmem:[%s20616_s6 + $0x364] ss:$8 sps:$4 sm:$0xff]  }
 0x493   : > { %9514 = vmatpush1.bf16.msra.mxu0 %v16934_v17  ;;  %v16997_v17 = vld [vmem:[%s20616_s6 + $0x360] ss:$8 sps:$4 sm:$0xff]  }
 0x494   : > { %9515 = vmatprep.subr.bf16.mxu0 %v16939_v55  ;;  %v17075_v55 = vld [vmem:[%s20618_s8 + $0x80] ss:$8 sps:$4 sm:$0xff]  }
 0x496   : > { %9356 = vmatmul.mubr.bf16.gmra.mrb[52].mxu0 %v19394_v61  ;;  %v16948_v61 = vld [vmem:[%s20616_s6 + $0x254] ss:$8 sps:$4 sm:$0xff]  }
 0x497   : > { %9516 = vmatpush1.bf16.msra.mxu0 %v16937_v47  ;;  %9365 = vmatprep.mubr.bf16.mxu0 %v17326_v12  ;;  %v17077_v47 = vld [vmem:[%s20618_s8 + $0x84] ss:$8 sps:$4 sm:$0xff]  }
 0x498   : > { %9517 = vmatprep.subr.bf16.mxu0 %v16942_v57  ;;  %v17000_v57 = vld [vmem:[%s20616_s6 + $0x370] ss:$8 sps:$4 sm:$0xff]   ;;  %10771 = vmatprep.subr.bf16.mxu1 %v17077_v47 }
 0x499   : > { %10772 = vmatpush1.bf16.msra.mxu1 %v17075_v55  ;;  %v17057_v55 = vld [vmem:[%s20616_s6 + $0x4a0] ss:$8 sps:$4 sm:$0xff]   ;;  %v17060_v47 = vld [vmem:[%s20616_s6 + $0x4b0] ss:$8 sps:$4 sm:$0xff]  }
 0x49b   : > { %9518 = vmatpush1.bf16.msra.mxu0 %v16940_v44  ;;  %v17080_v44 = vld [vmem:[%s20618_s8 + $0x94] ss:$8 sps:$4 sm:$0xff]  }
 0x49c   : > { %9519 = vmatprep.subr.bf16.mxu0 %v16945_v3  ;;  %v17078_v3 = vld [vmem:[%s20618_s8 + $0x90] ss:$8 sps:$4 sm:$0xff]   ;;  %10773 = vmatprep.subr.bf16.mxu1 %v17080_v44  ;;  %v17063_v44 = vld [vmem:[%s20616_s6 + $0x4c0] ss:$8 sps:$4 sm:$0xff]  }
 0x49d   : > { %10774 = vmatpush1.bf16.msra.mxu1 %v17078_v3  ;;  %v17071_v3 = vld [vmem:[%s20616_s6 + $0x4e4] ss:$8 sps:$4 sm:$0xff]  }
 0x49e   : > { %9366 = vmatmul.mubr.bf16.gmra.mrb[56].mxu0 %v19441_v38  ;;  %v16954_v38 = vld [vmem:[%s20616_s6 + $0x274] ss:$8 sps:$4 sm:$0xff]  }
 0x49f   : > { %9520 = vmatpush1.bf16.msra.mxu0 %v16943_v34  ;;  %9375 = vmatprep.mubr.bf16.mxu0 %v17326_v12  ;;  %v17083_v34 = vld [vmem:[%s20618_s8 + $0xa4] ss:$8 sps:$4 sm:$0xff]  }
 0x4a0   : > { %9521 = vmatprep.subr.bf16.mxu0 %v16948_v61  ;;  %v17003_v61 = vld [vmem:[%s20616_s6 + $0x380] ss:$8 sps:$4 sm:$0xff]   ;;  %10775 = vmatprep.subr.bf16.mxu1 %v17083_v34 }
 0x4a1   : > { %v17069_v34 = vld [vmem:[%s20616_s6 + $0x4e0] ss:$8 sps:$4 sm:$0xff]  }
 0x4a3   : > { %9522 = vmatpush1.bf16.msra.mxu0 %v16946_v52  ;;  %v17008_v52 = vld [vmem:[%s20616_s6 + $0x394] ss:$8 sps:$4 sm:$0xff]  }
 0x4a4   : > { %9523 = vmatprep.subr.bf16.mxu0 %v16951_v22  ;;  %v17081_v22 = vld [vmem:[%s20618_s8 + $0xa0] ss:$8 sps:$4 sm:$0xff]  }
 0x4a5   : > { %10776 = vmatpush1.bf16.msra.mxu1 %v17081_v22  ;;  %v10587_v22 = vld [vmem:[%s20617_s7] sm:$0x3] }
 0x4a6   : > { %9376 = vmatmul.mubr.bf16.gmra.mrb[60].mxu0 %v19489_v14  ;;  %v16960_v14 = vld [vmem:[%s20616_s6 + $0x294] ss:$8 sps:$4 sm:$0xff]  }
 0x4a7   : > { %9524 = vmatpush1.bf16.msra.mxu0 %v16949_v8  ;;  %9543 = vmatprep.mubr.bf16.mxu0 %v17326_v12  ;;  %v17086_v8 = vld [vmem:[%s20618_s8 + $0xb4] ss:$8 sps:$4 sm:$0xff]  }
 0x4a8   : > { %9525 = vmatprep.subr.bf16.mxu0 %v16954_v38  ;;  %v17006_v38 = vld [vmem:[%s20616_s6 + $0x390] ss:$8 sps:$4 sm:$0xff]   ;;  %10777 = vmatprep.subr.bf16.mxu1 %v17086_v8 }
 0x4ab   : > { %9526 = vmatpush1.bf16.msra.mxu0 %v16952_v36  ;;  %v17011_v36 = vld [vmem:[%s20616_s6 + $0x3a4] ss:$8 sps:$4 sm:$0xff]  }
 0x4ac   : > { %9708 = vmatprep.subr.bf16.mxu0 %v16957_v11  ;;  %v17089_v11 = vld [vmem:[%s20618_s8 + $0xc4] ss:$8 sps:$4 sm:$0xff]  }
 0x4ae   : > { %9544 = vmatmul.mubr.bf16.vlgmr.msra.gmra.mrb[48].mxu0 %v19328_v0  ;;  %v16966_v0 = vld [vmem:[%s20616_s6 + $0x2b4] ss:$8 sps:$4 sm:$0xff]  }
 0x4af   : > { %9709 = vmatpush1.bf16.msra.mxu0 %v16955_v62  ;;  %9553 = vmatprep.mubr.bf16.mxu0 %v17326_v12  ;;  %v17009_v62 = vld [vmem:[%s20616_s6 + $0x3a0] ss:$8 sps:$4 sm:$0xff]  }
 0x4b0   : > { %9710 = vmatprep.subr.bf16.mxu0 %v16960_v14  ;;  %v17014_v14 = vld [vmem:[%s20616_s6 + $0x3b4] ss:$8 sps:$4 sm:$0xff]  }
 0x4b3   : > { %9711 = vmatpush1.bf16.msra.mxu0 %v16958_v9  ;;  %v17087_v9 = vld [vmem:[%s20618_s8 + $0xc0] ss:$8 sps:$4 sm:$0xff]  }
 0x4b4   : > { %9712 = vmatprep.subr.bf16.mxu0 %v16963_v26  ;;  %v17092_v26 = vld [vmem:[%s20618_s8 + $0xd4] ss:$8 sps:$4 sm:$0xff]  }
 0x4b6   : > { %9554 = vmatmul.mubr.bf16.gmra.mrb[52].mxu0 %v19377_v43  ;;  %v16972_v43 = vld [vmem:[%s20616_s6 + $0x2d4] ss:$8 sps:$4 sm:$0xff]  }
 0x4b7   : > { %9713 = vmatpush1.bf16.msra.mxu0 %v16961_v18  ;;  %9563 = vmatprep.mubr.bf16.mxu0 %v17326_v12  ;;  %v17012_v18 = vld [vmem:[%s20616_s6 + $0x3b0] ss:$8 sps:$4 sm:$0xff]  }
 0x4b8   : > { %9714 = vmatprep.subr.bf16.mxu0 %v16966_v0  ;;  %v17017_v0 = vld [vmem:[%s20616_s6 + $0x3c4] ss:$8 sps:$4 sm:$0xff]  }
 0x4bb   : > { %9715 = vmatpush1.bf16.msra.mxu0 %v16964_v37  ;;  %v17095_v37 = vld [vmem:[%s20618_s8 + $0xe4] ss:$8 sps:$4 sm:$0xff]  }
 0x4bc   : > { %9716 = vmatprep.subr.bf16.mxu0 %v16969_v33  ;;  %v17015_v33 = vld [vmem:[%s20616_s6 + $0x3c0] ss:$8 sps:$4 sm:$0xff]  }
 0x4be   : > { %9564 = vmatmul.mubr.bf16.gmra.mrb[56].mxu0 %v19425_v28  ;;  %v16978_v28 = vld [vmem:[%s20616_s6 + $0x2f4] ss:$8 sps:$4 sm:$0xff]  }
 0x4bf   : > { %9717 = vmatpush1.bf16.msra.mxu0 %v16967_v27  ;;  %9573 = vmatprep.mubr.bf16.mxu0 %v17326_v12  ;;  %v17020_v27 = vld [vmem:[%s20616_s6 + $0x3d4] ss:$8 sps:$4 sm:$0xff]  }
 0x4c0   : > { %9718 = vmatprep.subr.bf16.mxu0 %v16972_v43  ;;  %v17093_v43 = vld [vmem:[%s20618_s8 + $0xe0] ss:$8 sps:$4 sm:$0xff]  }
 0x4c3   : > { %9719 = vmatpush1.bf16.msra.mxu0 %v16970_v35  ;;  %v17018_v35 = vld [vmem:[%s20616_s6 + $0x3d0] ss:$8 sps:$4 sm:$0xff]  }
 0x4c4   : > { %9720 = vmatprep.subr.bf16.mxu0 %v16975_v41  ;;  %v17023_v41 = vld [vmem:[%s20616_s6 + $0x3e4] ss:$8 sps:$4 sm:$0xff]  }
 0x4c6   : > { %9574 = vmatmul.mubr.bf16.gmra.mrb[60].mxu0 %v19471_v29  ;;  %v16984_v29 = vld [vmem:[%s20616_s6 + $0x314] ss:$8 sps:$4 sm:$0xff]  }
 0x4c7   : > { %9721 = vmatpush1.bf16.msra.mxu0 %v16973_v20  ;;  %9740 = vmatprep.mubr.bf16.mxu0 %v17326_v12  ;;  %v17021_v20 = vld [vmem:[%s20616_s6 + $0x3e0] ss:$8 sps:$4 sm:$0xff]  }
 0x4c8   : > { %9722 = vmatprep.subr.bf16.mxu0 %v16978_v28  ;;  %v17024_v28 = vld [vmem:[%s20616_s6 + $0x3f0] ss:$8 sps:$4 sm:$0xff]  }
 0x4cb   : > { %9723 = vmatpush1.bf16.msra.mxu0 %v16976_v58  ;;  %v17029_v58 = vld [vmem:[%s20616_s6 + $0x404] ss:$8 sps:$4 sm:$0xff]  }
 0x4cc   : > { %9906 = vmatprep.subr.bf16.mxu0 %v16981_v21  ;;  %v17027_v21 = vld [vmem:[%s20616_s6 + $0x400] ss:$8 sps:$4 sm:$0xff]  }
 0x4ce   : > { %9741 = vmatmul.mubr.bf16.vlgmr.msra.gmra.mrb[48].mxu0 %v19335_v59  ;;  %v16990_v59 = vld [vmem:[%s20616_s6 + $0x334] ss:$8 sps:$4 sm:$0xff]  }
 0x4cf   : > { %9907 = vmatpush1.bf16.msra.mxu0 %v16979_v39  ;;  %9750 = vmatprep.mubr.bf16.mxu0 %v17326_v12  ;;  %v17030_v39 = vld [vmem:[%s20616_s6 + $0x410] ss:$8 sps:$4 sm:$0xff]  }
 0x4d0   : > { %9908 = vmatprep.subr.bf16.mxu0 %v16984_v29  ;;  %v17035_v29 = vld [vmem:[%s20616_s6 + $0x424] ss:$8 sps:$4 sm:$0xff]  }
 0x4d3   : > { %9909 = vmatpush1.bf16.msra.mxu0 %v16982_v31  ;;  %v17033_v31 = vld [vmem:[%s20616_s6 + $0x420] ss:$8 sps:$4 sm:$0xff]  }
 0x4d4   : > { %9910 = vmatprep.subr.bf16.mxu0 %v16987_v42  ;;  %v17036_v42 = vld [vmem:[%s20616_s6 + $0x430] ss:$8 sps:$4 sm:$0xff]  }
 0x4d6   : > { %9751 = vmatmul.mubr.bf16.gmra.mrb[52].mxu0 %v19385_v7  ;;  %v16996_v7 = vld [vmem:[%s20616_s6 + $0x354] ss:$8 sps:$4 sm:$0xff]  }
 0x4d7   : > { %9911 = vmatpush1.bf16.msra.mxu0 %v16985_v25  ;;  %9760 = vmatprep.mubr.bf16.mxu0 %v17326_v12  ;;  %v17041_v25 = vld [vmem:[%s20616_s6 + $0x444] ss:$8 sps:$4 sm:$0xff]  }
 0x4d8   : > { %9912 = vmatprep.subr.bf16.mxu0 %v16990_v59  ;;  %v17039_v59 = vld [vmem:[%s20616_s6 + $0x440] ss:$8 sps:$4 sm:$0xff]  }
 0x4db   : > { %9913 = vmatpush1.bf16.msra.mxu0 %v16988_v30  ;;  %v17042_v30 = vld [vmem:[%s20616_s6 + $0x450] ss:$8 sps:$4 sm:$0xff]  }
 0x4dc   : > { %9914 = vmatprep.subr.bf16.mxu0 %v16993_v40  ;;  %v17047_v40 = vld [vmem:[%s20616_s6 + $0x464] ss:$8 sps:$4 sm:$0xff]  }
 0x4de   : > { %9761 = vmatmul.mubr.bf16.gmra.mrb[56].mxu0 %v19432_v24  ;;  %v17002_v24 = vld [vmem:[%s20616_s6 + $0x374] ss:$8 sps:$4 sm:$0xff]  }
 0x4df   : > { %9915 = vmatpush1.bf16.msra.mxu0 %v16991_v48  ;;  %9770 = vmatprep.mubr.bf16.mxu0 %v17326_v12  ;;  %v17045_v48 = vld [vmem:[%s20616_s6 + $0x460] ss:$8 sps:$4 sm:$0xff]  }
 0x4e0   : > { %9916 = vmatprep.subr.bf16.mxu0 %v16996_v7  ;;  %v17048_v7 = vld [vmem:[%s20616_s6 + $0x470] ss:$8 sps:$4 sm:$0xff]  }
 0x4e3   : > { %9917 = vmatpush1.bf16.msra.mxu0 %v16994_v50  ;;  %v17053_v50 = vld [vmem:[%s20616_s6 + $0x484] ss:$8 sps:$4 sm:$0xff]  }
 0x4e4   : > { %9918 = vmatprep.subr.bf16.mxu0 %v16999_v54  ;;  %v17051_v54 = vld [vmem:[%s20616_s6 + $0x480] ss:$8 sps:$4 sm:$0xff]  }
 0x4e6   : > { %9771 = vmatmul.mubr.bf16.gmra.mrb[60].mxu0 %v19480_v45  ;;  %v17005_v45 = vld [vmem:[%s20616_s6 + $0x384] ss:$8 sps:$4 sm:$0xff]  }
 0x4e7   : > { %9919 = vmatpush1.bf16.msra.mxu0 %v16997_v17  ;;  %9938 = vmatprep.mubr.bf16.mxu0 %v17326_v12  ;;  %v17054_v17 = vld [vmem:[%s20616_s6 + $0x490] ss:$8 sps:$4 sm:$0xff]  }
 0x4e8   : > { %9920 = vmatprep.subr.bf16.mxu0 %v17002_v24  ;;  %v17059_v24 = vld [vmem:[%s20616_s6 + $0x4a4] ss:$8 sps:$4 sm:$0xff]  }
 0x4eb   : > { %9921 = vmatpush1.bf16.msra.mxu0 %v17000_v57  ;;  %v17065_v57 = vld [vmem:[%s20616_s6 + $0x4c4] ss:$8 sps:$4 sm:$0xff]  }
 0x4ec   : > { %10103 = vmatprep.subr.bf16.mxu0 %v17005_v45  ;;  %v17066_v45 = vld [vmem:[%s20616_s6 + $0x4d0] ss:$8 sps:$4 sm:$0xff]  }
 0x4ee   : > { %9939 = vmatmul.mubr.bf16.vlgmr.msra.gmra.mrb[48].mxu0 %v19343_v56  ;;  %v17084_v56 = vld [vmem:[%s20618_s8 + $0xb0] ss:$8 sps:$4 sm:$0xff]  }
 0x4ef   : > { %10104 = vmatpush1.bf16.msra.mxu0 %v17003_v61  ;;  %9948 = vmatprep.mubr.bf16.mxu0 %v17326_v12  ;;  %v17074_v61 = vld [vmem:[%s20616_s6 + $0x4f4] ss:$8 sps:$4 sm:$0xff]  }
 0x4f0   : > { %10105 = vmatprep.subr.bf16.mxu0 %v17008_v52  ;;  %10778 = vmatpush1.bf16.msra.mxu1 %v17084_v56  ;;  %v17072_v52 = vld [vmem:[%s20616_s6 + $0x4f0] ss:$8 sps:$4 sm:$0xff]  }
 0x4f1   : > { %10779 = vmatprep.subr.bf16.mxu1 %v17089_v11 }
 0x4f3   : > { %10106 = vmatpush1.bf16.msra.mxu0 %v17006_v38 }
 0x4f4   : > { %10107 = vmatprep.subr.bf16.mxu0 %v17011_v36  ;;  %10780 = vmatpush1.bf16.msra.mxu1 %v17087_v9 }
 0x4f5   : > { %10781 = vmatprep.subr.bf16.mxu1 %v17092_v26 }
 0x4f6   : > { %9949 = vmatmul.mubr.bf16.gmra.mrb[52].mxu0 %v19392_v49  ;;  %v17090_v49 = vld [vmem:[%s20618_s8 + $0xd0] ss:$8 sps:$4 sm:$0xff]  }
 0x4f7   : > { %10108 = vmatpush1.bf16.msra.mxu0 %v17009_v62  ;;  %9958 = vmatprep.mubr.bf16.mxu0 %v17326_v12 }
 0x4f8   : > { %10109 = vmatprep.subr.bf16.mxu0 %v17014_v14  ;;  %10782 = vmatpush1.bf16.msra.mxu1 %v17090_v49 }
 0x4f9   : > { %10783 = vmatprep.subr.bf16.mxu1 %v17095_v37  ;;  %v17104_v37 = vld [vmem:[%s20618_s8 + $0x14] ss:$8 sps:$4 sm:$0xff]  }
 0x4fb   : > { %10110 = vmatpush1.bf16.msra.mxu0 %v17012_v18 }
 0x4fc   : > { %10111 = vmatprep.subr.bf16.mxu0 %v17017_v0  ;;  %10784 = vmatpush1.bf16.msra.mxu1 %v17093_v43  ;;  %v17099_v0 = vld [vmem:[%s20618_s8] ss:$8 sps:$4 sm:$0xff]  }
 0x4fe   : > { %9959 = vmatmul.mubr.bf16.gmra.mrb[56].mxu0 %v19439_v51  ;;  %v17026_v51 = vld [vmem:[%s20616_s6 + $0x3f4] ss:$8 sps:$4 sm:$0xff]  }
 0x4ff   : > { %10112 = vmatpush1.bf16.msra.mxu0 %v17015_v33  ;;  %9968 = vmatprep.mubr.bf16.mxu0 %v17326_v12 }
 0x500   : > { %10113 = vmatprep.subr.bf16.mxu0 %v17020_v27 }
 0x503   : > { %10114 = vmatpush1.bf16.msra.mxu0 %v17018_v35 }
 0x504   : > { %10115 = vmatprep.subr.bf16.mxu0 %v17023_v41 }
 0x506   : > { %9969 = vmatmul.mubr.bf16.gmra.mrb[60].mxu0 %v19487_v15  ;;  %v17032_v15 = vld [vmem:[%s20616_s6 + $0x414] ss:$8 sps:$4 sm:$0xff]  }
 0x507   : > { %10116 = vmatpush1.bf16.msra.mxu0 %v17021_v20  ;;  %10135 = vmatprep.mubr.bf16.mxu0 %v17326_v12  ;;  %v17102_v20 = vld [vmem:[%s20618_s8 + $0x10] ss:$8 sps:$4 sm:$0xff]  }
 0x508   : > { %10117 = vmatprep.subr.bf16.mxu0 %v17026_v51 }
 0x50b   : > { %10118 = vmatpush1.bf16.msra.mxu0 %v17024_v28 }
 0x50c   : > { %10301 = vmatprep.subr.bf16.mxu0 %v17029_v58  ;;  %v17107_v58 = vld [vmem:[%s20618_s8 + $0x24] ss:$8 sps:$4 sm:$0xff]  }
 0x50e   : > { %10136 = vmatmul.mubr.bf16.vlgmr.msra.gmra.mrb[48].mxu0 %v19347_v19  ;;  %v17038_v19 = vld [vmem:[%s20616_s6 + $0x434] ss:$8 sps:$4 sm:$0xff]  }
 0x50f   : > { %10302 = vmatpush1.bf16.msra.mxu0 %v17027_v21  ;;  %10145 = vmatprep.mubr.bf16.mxu0 %v17326_v12 }
 0x510   : > { %10303 = vmatprep.subr.bf16.mxu0 %v17032_v15 }
 0x513   : > { %10304 = vmatpush1.bf16.msra.mxu0 %v17030_v39 }
 0x514   : > { %10305 = vmatprep.subr.bf16.mxu0 %v17035_v29 }
 0x516   : > { %10146 = vmatmul.mubr.bf16.gmra.mrb[52].mxu0 %v19396_v6  ;;  %v17044_v6 = vld [vmem:[%s20616_s6 + $0x454] ss:$8 sps:$4 sm:$0xff]  }
 0x517   : > { %10306 = vmatpush1.bf16.msra.mxu0 %v17033_v31  ;;  %10155 = vmatprep.mubr.bf16.mxu0 %v17326_v12 }
 0x518   : > { %10307 = vmatprep.subr.bf16.mxu0 %v17038_v19 }
 0x51b   : > { %10308 = vmatpush1.bf16.msra.mxu0 %v17036_v42 }
 0x51c   : > { %10309 = vmatprep.subr.bf16.mxu0 %v17041_v25 }
 0x51e   : > { %10156 = vmatmul.mubr.bf16.gmra.mrb[56].mxu0 %v19443_v32  ;;  %v17050_v32 = vld [vmem:[%s20616_s6 + $0x474] ss:$8 sps:$4 sm:$0xff]  }
 0x51f   : > { %10310 = vmatpush1.bf16.msra.mxu0 %v17039_v59  ;;  %10165 = vmatprep.mubr.bf16.mxu0 %v17326_v12 }
 0x520   : > { %10311 = vmatprep.subr.bf16.mxu0 %v17044_v6  ;;  %v17105_v6 = vld [vmem:[%s20618_s8 + $0x20] ss:$8 sps:$4 sm:$0xff]  }
 0x523   : > { %10312 = vmatpush1.bf16.msra.mxu0 %v17042_v30 }
 0x524   : > { %10313 = vmatprep.subr.bf16.mxu0 %v17047_v40 }
 0x526   : > { %10166 = vmatmul.mubr.bf16.gmra.mrb[60].mxu0 %v19491_v2  ;;  %v17056_v2 = vld [vmem:[%s20616_s6 + $0x494] ss:$8 sps:$4 sm:$0xff]  }
 0x527   : > { %10314 = vmatpush1.bf16.msra.mxu0 %v17045_v48  ;;  %10333 = vmatprep.mubr.bf16.mxu0 %v17326_v12 }
 0x528   : > { %10315 = vmatprep.subr.bf16.mxu0 %v17050_v32  ;;  %v17110_v32 = vld [vmem:[%s20618_s8 + $0x34] ss:$8 sps:$4 sm:$0xff]  }
 0x52b   : > { %10316 = vmatpush1.bf16.msra.mxu0 %v17048_v7 }
 0x52c   : > { %10498 = vmatprep.subr.bf16.mxu0 %v17053_v50 }
 0x52e   : > { %10334 = vmatmul.mubr.bf16.vlgmr.msra.gmra.mrb[48].mxu0 %v19375_v13  ;;  %v17062_v13 = vld [vmem:[%s20616_s6 + $0x4b4] ss:$8 sps:$4 sm:$0xff]  }
 0x52f   : > { %10499 = vmatpush1.bf16.msra.mxu0 %v17051_v54  ;;  %10343 = vmatprep.mubr.bf16.mxu0 %v17326_v12 }
 0x530   : > { %10500 = vmatprep.subr.bf16.mxu0 %v17056_v2 }
 0x533   : > { %10501 = vmatpush1.bf16.msra.mxu0 %v17054_v17 }
 0x534   : > { %10502 = vmatprep.subr.bf16.mxu0 %v17059_v24  ;;  %v17108_v24 = vld [vmem:[%s20618_s8 + $0x30] ss:$8 sps:$4 sm:$0xff]  }
 0x536   : > { %10344 = vmatmul.mubr.bf16.gmra.mrb[52].mxu0 %v19423_v46  ;;  %v17068_v46 = vld [vmem:[%s20616_s6 + $0x4d4] ss:$8 sps:$4 sm:$0xff]  }
 0x537   : > { %10503 = vmatpush1.bf16.msra.mxu0 %v17057_v55  ;;  %10353 = vmatprep.mubr.bf16.mxu0 %v17326_v12 }
 0x538   : > { %10504 = vmatprep.subr.bf16.mxu0 %v17062_v13 }
 0x53b   : > { %10505 = vmatpush1.bf16.msra.mxu0 %v17060_v47  ;;  %v17113_v47 = vld [vmem:[%s20618_s8 + $0x44] ss:$8 sps:$4 sm:$0xff]  }
 0x53c   : > { %10506 = vmatprep.subr.bf16.mxu0 %v17065_v57 }
 0x53e   : > { %10354 = vmatmul.mubr.bf16.gmra.mrb[56].mxu0 %v19467_v10  ;;  %v10203_v10 = vpack.c.bf16 %v20690_v16, %v6594_v1  ;;  %v17098_v1 = vld [vmem:[%s20618_s8 + $0xf4] ss:$8 sps:$4 sm:$0xff]  }
 0x53f   : > { %10507 = vmatpush1.bf16.msra.mxu0 %v17063_v44  ;;  %10363 = vmatprep.mubr.bf16.mxu0 %v17326_v12 }
 0x540   : > { %10508 = vmatprep.subr.bf16.mxu0 %v17068_v46  ;;  %10785 = vmatprep.subr.bf16.mxu1 %v17098_v1  ;;  %v17116_v1 = vld [vmem:[%s20618_s8 + $0x54] ss:$8 sps:$4 sm:$0xff]  }
 0x543   : > { %10509 = vmatpush1.bf16.msra.mxu0 %v17066_v45 }
 0x544   : > { %10510 = vmatprep.subr.bf16.mxu0 %v17071_v3 }
 0x546   : > { %10364 = vmatmul.mubr.bf16.gmra.mrb[60].mxu0 %v10203_v10 }
 0x547   : > { %10511 = vmatpush1.bf16.msra.mxu0 %v17069_v34  ;;  %10530 = vmatprep.mubr.bf16.mxu0 %v17326_v12 }
 0x548   : > { %10512 = vmatprep.subr.bf16.mxu0 %v17074_v61  ;;  %v17111_v61 = vld [vmem:[%s20618_s8 + $0x40] ss:$8 sps:$4 sm:$0xff]  }
 0x54b   : > { %10513 = vmatpush1.bf16.msra.mxu0 %v17072_v52 }
 0x54e   : > { %10531 = vmatmul.mubr.bf16.vlgmr.msra.gmra.mrb[48].mxu0 %v19383_v53  ;;  %v17096_v53 = vld [vmem:[%s20618_s8 + $0xf0] ss:$8 sps:$4 sm:$0xff]  }
 0x54f   : > { %10540 = vmatprep.mubr.bf16.mxu0 %v17326_v12  ;;  %10786 = vmatpush1.bf16.msra.mxu1 %v17096_v53 }
 0x556   : > { %10541 = vmatmul.mubr.bf16.gmra.mrb[52].mxu0 %v19430_v23  ;;  %v17101_v23 = vld [vmem:[%s20618_s8 + $0x4] ss:$8 sps:$4 sm:$0xff]  }
 0x557   : > { %10550 = vmatprep.mubr.bf16.mxu0 %v17326_v12  ;;  %10904 = vmatprep.subr.bf16.mxu1 %v17101_v23 }
 0x55e   : > { %10551 = vmatmul.mubr.bf16.gmra.mrb[56].mxu0 %v19476_v5  ;;  %v10589_v5 = vlaneseq }
 0x55f   : > { %10560 = vmatprep.mubr.bf16.mxu0 %v17326_v12 }
 0x560   : > { %v20014_v60 = vshrl.u32 %v10589_v5, 7 }
 0x562   : > { %v10595_v63 = vsub.s32 1, %v20014_v60  ;;  %v10591_v38 = vsub.s32 0, %v20014_v60  ;;  %v12295_v60 = vld [vmem:[%s20620_s10 + $0x10] sm:$0xff] }
 0x564   : > { %v20022_v8 = vrot.slane %v10587_v22, %v10595_v63  ;;  %v20028_v14 = vrot.slane %v10587_v22, %v10591_v38 }
 0x566   : > { %10561 = vmatmul.mubr.bf16.gmra.mrb[60].mxu0 %v10401_v4 }
 0x621   : > { %v10532_v36 = vpop.f32.mrb[48].mxu0 }
 0x622   : > { %v10534_v56 = vpop.f32.mrb[49].mxu0  ;;  %v20041_v33 = vadd.f32 %v20028_v14, %v10532_v36 }
 0x623   : > { %v10600_v11 = vadd.f32 %v20022_v8, %v10534_v56  ;;  %v10536_v62 = vpop.f32.mrb[50].mxu0  ;;  %v17114_v56 = vld [vmem:[%s20618_s8 + $0x50] ss:$8 sps:$4 sm:$0xff]  }
 0x624   : > { %v10538_v9 = vpop.f32.mrb[51].mxu0  ;;  %v20044_v43 = vadd.f32 %v20028_v14, %v10536_v62  ;;  %v10615_v21 = vmax.f32 %v20041_v33, 0.0  ;;  %v17129_v33 = vld [vmem:[%s20618_s8 + $0x120] ss:$8 sps:$4 sm:$0xff]  }
 0x625   : > { %v10616_v26 = vmax.f32 %v10600_v11, 0.0  ;;  %v20031_v18 = vadd.f32 %v20022_v8, %v10538_v9  ;;  %v17119_v9 = vld [vmem:[%s20618_s8 + $0x64] ss:$8 sps:$4 sm:$0xff]  }
 0x626   : > { %v10617_v42 = vmax.f32 %v20044_v43, 0.0  ;;  %v17153_v43 = vld [vmem:[%s20618_s8 + $0x1a0] ss:$8 sps:$4 sm:$0xff]  }
 0x627   : > { %v10673_v49 = vpack.c.bf16 %v10616_v26, %v20690_v16  ;;  %v10618_v30 = vmax.f32 %v20031_v18, 0.0  ;;  %v17177_v18 = vld [vmem:[%s20618_s8 + $0x220] ss:$8 sps:$4 sm:$0xff]  }
 0x629   : > { %v10542_v27 = vpop.f32.mrb[52].mxu0  ;;  %10804 = vmatmul.mubr.bf16.vlgmr.msra.gmra.mrb[48].mxu1 %v10673_v49 }
 0x62a   : > { %v10603_v35 = vadd.f32 %v20028_v14, %v10542_v27  ;;  %10905 = vmatpush1.bf16.msra.mxu1 %v17099_v0  ;;  %v10544_v41 = vpop.f32.mrb[53].mxu0  ;;  %10813 = vmatprep.mubr.bf16.mxu1 %v17326_v12 }
 0x62b   : > { %v10604_v51 = vadd.f32 %v20022_v8, %v10544_v41  ;;  %v10546_v28 = vpop.f32.mrb[54].mxu0  ;;  %10906 = vmatprep.subr.bf16.mxu1 %v17104_v37 }
 0x62c   : > { %v10619_v15 = vmax.f32 %v10603_v35, 0.0  ;;  %v10605_v39 = vadd.f32 %v20028_v14, %v10546_v28  ;;  %v10548_v29 = vpop.f32.mrb[55].mxu0 }
 0x62d   : > { %v10620_v31 = vmax.f32 %v10604_v51, 0.0  ;;  %v10606_v19 = vadd.f32 %v20022_v8, %v10548_v29  ;;  %v17123_v29 = vld [vmem:[%s20618_s8 + $0x100] ss:$8 sps:$4 sm:$0xff]  }
 0x62e   : > { %v20061_v25 = vpack.c.bf16 %v10619_v15, %v10615_v21  ;;  %v10621_v59 = vmax.f32 %v10605_v39, 0.0  ;;  %10907 = vmatpush1.bf16.msra.mxu1 %v17102_v20  ;;  %v17117_v20 = vld [vmem:[%s20618_s8 + $0x60] ss:$8 sps:$4 sm:$0xff]   ;;  %v17125_v39 = vld [vmem:[%s20618_s8 + $0x104] ss:$8 sps:$4 sm:$0xff]  }
 0x62f   : > { %v20067_v40 = vpack.c.bf16 %v10620_v31, %v10616_v26  ;;  %v10622_v48 = vmax.f32 %v10606_v19, 0.0  ;;  %10908 = vmatprep.subr.bf16.mxu1 %v17107_v58  ;;  %v17128_v19 = vld [vmem:[%s20618_s8 + $0x114] ss:$8 sps:$4 sm:$0xff]  }
 0x630   : > { %v20074_v7 = vpack.c.bf16 %v10621_v59, %v10617_v42 }
 0x631   : > { %v20078_v50 = vpack.c.bf16 %v10622_v48, %v10618_v30  ;;  %v10552_v54 = vpop.f32.mrb[56].mxu0 }
 0x632   : > { %v10607_v2 = vadd.f32 %v20028_v14, %v10552_v54  ;;  %10909 = vmatpush1.bf16.msra.mxu1 %v17105_v6  ;;  %v10554_v17 = vpop.f32.mrb[57].mxu0  ;;  %v17131_v6 = vld [vmem:[%s20618_s8 + $0x124] ss:$8 sps:$4 sm:$0xff]   ;;  %v17135_v54 = vld [vmem:[%s20618_s8 + $0x140] ss:$8 sps:$4 sm:$0xff]  }
 0x633   : > { %v10608_v55 = vadd.f32 %v20022_v8, %v10554_v17  ;;  %v10556_v13 = vpop.f32.mrb[58].mxu0  ;;  %10910 = vmatprep.subr.bf16.mxu1 %v17110_v32  ;;  %v17137_v32 = vld [vmem:[%s20618_s8 + $0x144] ss:$8 sps:$4 sm:$0xff]   ;;  %v17138_v17 = vld [vmem:[%s20618_s8 + $0x150] ss:$8 sps:$4 sm:$0xff]  }
 0x634   : > { %v10623_v57 = vmax.f32 %v10607_v2, 0.0  ;;  %v10609_v44 = vadd.f32 %v20028_v14, %v10556_v13  ;;  %v10558_v46 = vpop.f32.mrb[59].mxu0  ;;  %v17140_v2 = vld [vmem:[%s20618_s8 + $0x154] ss:$8 sps:$4 sm:$0xff]  }
 0x635   : > { %v10624_v45 = vmax.f32 %v10608_v55, 0.0  ;;  %v10610_v3 = vadd.f32 %v20022_v8, %v10558_v46  ;;  %v17141_v55 = vld [vmem:[%s20618_s8 + $0x160] ss:$8 sps:$4 sm:$0xff]   ;;  %v17146_v13 = vld [vmem:[%s20618_s8 + $0x174] ss:$8 sps:$4 sm:$0xff]   ;;  %v10961_v46 = vpack.c.bf16 %v10617_v42, %v20690_v16 }
 0x636   : > { %v20090_v34 = vpack.c.bf16 %v10623_v57, %v10619_v15  ;;  %v10625_v10 = vmax.f32 %v10609_v44, 0.0  ;;  %10911 = vmatpush1.bf16.msra.mxu1 %v17108_v24  ;;  %v17120_v15 = vld [vmem:[%s20618_s8 + $0x70] ss:$8 sps:$4 sm:$0xff]   ;;  %v17143_v24 = vld [vmem:[%s20618_s8 + $0x164] ss:$8 sps:$4 sm:$0xff]  }
 0x637   : > { %v20095_v52 = vpack.c.bf16 %v10624_v45, %v10620_v31  ;;  %v10626_v4 = vmax.f32 %v10610_v3, 0.0  ;;  %10912 = vmatprep.subr.bf16.mxu1 %v17113_v47  ;;  %v10651_v31 = vpack.c.bf16 %v10615_v21, %v20690_v16  ;;  %v17134_v21 = vld [vmem:[%s20618_s8 + $0x134] ss:$8 sps:$4 sm:$0xff]   ;;  %v17144_v47 = vld [vmem:[%s20618_s8 + $0x170] ss:$8 sps:$4 sm:$0xff]  }
 0x638   : > { %v20100_v53 = vpack.c.bf16 %v10625_v10, %v10621_v59  ;;  %v17126_v59 = vld [vmem:[%s20618_s8 + $0x110] ss:$8 sps:$4 sm:$0xff]   ;;  %v17147_v44 = vld [vmem:[%s20618_s8 + $0x180] ss:$8 sps:$4 sm:$0xff]   ;;  %v17158_v42 = vld [vmem:[%s20618_s8 + $0x1b4] ss:$8 sps:$4 sm:$0xff]  }
 0x639   : > { %v20102_v23 = vpack.c.bf16 %v10626_v4, %v10622_v48  ;;  %v10562_v5 = vpop.f32.mrb[60].mxu0  ;;  %10814 = vmatmul.mubr.bf16.gmra.mrb[52].mxu1 %v20095_v52  ;;  %v17132_v48 = vld [vmem:[%s20618_s8 + $0x130] ss:$8 sps:$4 sm:$0xff]  }
 0x63a   : > { %v20106_v22 = vadd.f32 %v20028_v14, %v10562_v5  ;;  %10913 = vmatpush1.bf16.msra.mxu1 %v17111_v61  ;;  %v10564_v36 = vpop.f32.mrb[61].mxu0  ;;  %10936 = vmatprep.mubr.bf16.mxu1 %v17326_v12  ;;  %v17150_v3 = vld [vmem:[%s20618_s8 + $0x190] ss:$8 sps:$4 sm:$0xff]  }
 0x63b   : > { %v20113_v11 = vadd.f32 %v20022_v8, %v10564_v36  ;;  %v10566_v62 = vpop.f32.mrb[62].mxu0  ;;  %10914 = vmatprep.subr.bf16.mxu1 %v17116_v1  ;;  %v17156_v61 = vld [vmem:[%s20618_s8 + $0x1b0] ss:$8 sps:$4 sm:$0xff]   ;;  %v17159_v1 = vld [vmem:[%s20618_s8 + $0x1c0] ss:$8 sps:$4 sm:$0xff]  }
 0x63c   : > { %v10627_v26 = vmax.f32 %v20106_v22, 0.0  ;;  %v10613_v0 = vadd.f32 %v20028_v14, %v10566_v62  ;;  %v10568_v49 = vpop.f32.mrb[63].mxu0  ;;  %v17162_v5 = vld [vmem:[%s20618_s8 + $0x1d0] ss:$8 sps:$4 sm:$0xff]   ;;  %v17167_v36 = vld [vmem:[%s20618_s8 + $0x1e4] ss:$8 sps:$4 sm:$0xff]  }
 0x63d   : > { %v10628_v37 = vmax.f32 %v20113_v11, 0.0  ;;  %v10614_v27 = vadd.f32 %v20022_v8, %v10568_v49  ;;  %v17122_v8 = vld [vmem:[%s20618_s8 + $0x74] ss:$8 sps:$4 sm:$0xff]   ;;  %v17171_v49 = vld [vmem:[%s20618_s8 + $0x200] ss:$8 sps:$4 sm:$0xff]  }
 0x63e   : > { %v20124_v35 = vpack.c.bf16 %v10627_v26, %v10623_v57  ;;  %v10629_v41 = vmax.f32 %v10613_v0, 0.0  ;;  %10915 = vmatpush1.bf16.msra.mxu1 %v17114_v56  ;;  %v17149_v57 = vld [vmem:[%s20618_s8 + $0x184] ss:$8 sps:$4 sm:$0xff]   ;;  %v17165_v56 = vld [vmem:[%s20618_s8 + $0x1e0] ss:$8 sps:$4 sm:$0xff]  }
 0x63f   : > { %v20131_v51 = vpack.c.bf16 %v10628_v37, %v10624_v45  ;;  %v10630_v14 = vmax.f32 %v10614_v27, 0.0  ;;  %10916 = vmatprep.subr.bf16.mxu1 %v17119_v9  ;;  %v17152_v45 = vld [vmem:[%s20618_s8 + $0x194] ss:$8 sps:$4 sm:$0xff]   ;;  %v17168_v9 = vld [vmem:[%s20618_s8 + $0x1f0] ss:$8 sps:$4 sm:$0xff]   ;;  %v11125_v27 = vpack.c.bf16 %v10618_v30, %v20690_v16 }
 0x640   : > { %v20136_v28 = vpack.c.bf16 %v10629_v41, %v10625_v10  ;;  %v17155_v10 = vld [vmem:[%s20618_s8 + $0x1a4] ss:$8 sps:$4 sm:$0xff]   ;;  %v17170_v62 = vld [vmem:[%s20618_s8 + $0x1f4] ss:$8 sps:$4 sm:$0xff]  }
 0x641   : > { %v20138_v58 = vpack.c.bf16 %v10630_v14, %v10626_v4  ;;  %v17161_v4 = vld [vmem:[%s20618_s8 + $0x1c4] ss:$8 sps:$4 sm:$0xff]   ;;  %v17176_v41 = vld [vmem:[%s20618_s8 + $0x214] ss:$8 sps:$4 sm:$0xff]  }
 0x642   : > { %10917 = vmatpush1.bf16.msra.mxu1 %v17117_v20  ;;  %v17173_v0 = vld [vmem:[%s20618_s8 + $0x204] ss:$8 sps:$4 sm:$0xff]   ;;  %v17174_v20 = vld [vmem:[%s20618_s8 + $0x210] ss:$8 sps:$4 sm:$0xff]   ;;  %v17182_v30 = vld [vmem:[%s20618_s8 + $0x234] ss:$8 sps:$4 sm:$0xff]  }
 0x643   : > { %10918 = vmatprep.subr.bf16.mxu1 %v17122_v8  ;;  %v17179_v14 = vld [vmem:[%s20618_s8 + $0x224] ss:$8 sps:$4 sm:$0xff]   ;;  %v17180_v8 = vld [vmem:[%s20618_s8 + $0x230] ss:$8 sps:$4 sm:$0xff]  }
 0x644   : > { %v17305_v22 = vld [vmem:[%s20618_s8 + $0x4c4] ss:$8 sps:$4 sm:$0xff]  }
 0x646   : > { %10919 = vmatpush1.bf16.msra.mxu1 %v17120_v15  ;;  %v17185_v15 = vld [vmem:[%s20618_s8 + $0x244] ss:$8 sps:$4 sm:$0xff]  }
 0x647   : > { %11060 = vmatprep.subr.bf16.mxu1 %v17125_v39  ;;  %v17183_v39 = vld [vmem:[%s20618_s8 + $0x240] ss:$8 sps:$4 sm:$0xff]  }
 0x649   : > { %10937 = vmatmul.mubr.bf16.vlgmr.msra.gmra.mrb[48].mxu1 %v10651_v31  ;;  %v17191_v31 = vld [vmem:[%s20618_s8 + $0x264] ss:$8 sps:$4 sm:$0xff]  }
 0x64a   : > { %11061 = vmatpush1.bf16.msra.mxu1 %v17123_v29  ;;  %10946 = vmatprep.mubr.bf16.mxu1 %v17326_v12  ;;  %v17186_v29 = vld [vmem:[%s20618_s8 + $0x250] ss:$8 sps:$4 sm:$0xff]  }
 0x64b   : > { %11062 = vmatprep.subr.bf16.mxu1 %v17128_v19  ;;  %v17189_v19 = vld [vmem:[%s20618_s8 + $0x260] ss:$8 sps:$4 sm:$0xff]  }
 0x64e   : > { %11063 = vmatpush1.bf16.msra.mxu1 %v17126_v59  ;;  %v17194_v59 = vld [vmem:[%s20618_s8 + $0x274] ss:$8 sps:$4 sm:$0xff]  }
 0x64f   : > { %11064 = vmatprep.subr.bf16.mxu1 %v17131_v6  ;;  %v17192_v6 = vld [vmem:[%s20618_s8 + $0x270] ss:$8 sps:$4 sm:$0xff]  }
 0x651   : > { %10947 = vmatmul.mubr.bf16.gmra.mrb[52].mxu1 %v20090_v34 }
 0x652   : > { %11065 = vmatpush1.bf16.msra.mxu1 %v17129_v33  ;;  %11092 = vmatprep.mubr.bf16.mxu1 %v17326_v12  ;;  %v17197_v33 = vld [vmem:[%s20618_s8 + $0x284] ss:$8 sps:$4 sm:$0xff]  }
 0x653   : > { %11066 = vmatprep.subr.bf16.mxu1 %v17134_v21  ;;  %v17195_v21 = vld [vmem:[%s20618_s8 + $0x280] ss:$8 sps:$4 sm:$0xff]  }
 0x656   : > { %11067 = vmatpush1.bf16.msra.mxu1 %v17132_v48  ;;  %v17200_v48 = vld [vmem:[%s20618_s8 + $0x294] ss:$8 sps:$4 sm:$0xff]  }
 0x657   : > { %11068 = vmatprep.subr.bf16.mxu1 %v17137_v32  ;;  %v17198_v32 = vld [vmem:[%s20618_s8 + $0x290] ss:$8 sps:$4 sm:$0xff]  }
 0x65a   : > { %11069 = vmatpush1.bf16.msra.mxu1 %v17135_v54  ;;  %v17203_v54 = vld [vmem:[%s20618_s8 + $0x2a4] ss:$8 sps:$4 sm:$0xff]  }
 0x65b   : > { %11070 = vmatprep.subr.bf16.mxu1 %v17140_v2  ;;  %v17201_v2 = vld [vmem:[%s20618_s8 + $0x2a0] ss:$8 sps:$4 sm:$0xff]  }
 0x65e   : > { %11071 = vmatpush1.bf16.msra.mxu1 %v17138_v17  ;;  %v17204_v17 = vld [vmem:[%s20618_s8 + $0x2b0] ss:$8 sps:$4 sm:$0xff]  }
 0x65f   : > { %11072 = vmatprep.subr.bf16.mxu1 %v17143_v24  ;;  %v17209_v24 = vld [vmem:[%s20618_s8 + $0x2c4] ss:$8 sps:$4 sm:$0xff]  }
 0x662   : > { %11073 = vmatpush1.bf16.msra.mxu1 %v17141_v55  ;;  %v17207_v55 = vld [vmem:[%s20618_s8 + $0x2c0] ss:$8 sps:$4 sm:$0xff]  }
 0x663   : > { %11074 = vmatprep.subr.bf16.mxu1 %v17146_v13  ;;  %v17210_v13 = vld [vmem:[%s20618_s8 + $0x2d0] ss:$8 sps:$4 sm:$0xff]  }
 0x666   : > { %11075 = vmatpush1.bf16.msra.mxu1 %v17144_v47  ;;  %v17215_v47 = vld [vmem:[%s20618_s8 + $0x2e4] ss:$8 sps:$4 sm:$0xff]  }
 0x667   : > { %11223 = vmatprep.subr.bf16.mxu1 %v17149_v57  ;;  %v17213_v57 = vld [vmem:[%s20618_s8 + $0x2e0] ss:$8 sps:$4 sm:$0xff]  }
 0x669   : > { %11093 = vmatmul.mubr.bf16.vlgmr.msra.gmra.mrb[48].mxu1 %v10961_v46  ;;  %v17216_v46 = vld [vmem:[%s20618_s8 + $0x2f0] ss:$8 sps:$4 sm:$0xff]  }
 0x66a   : > { %11224 = vmatpush1.bf16.msra.mxu1 %v17147_v44  ;;  %11102 = vmatprep.mubr.bf16.mxu1 %v17326_v12  ;;  %v17218_v44 = vld [vmem:[%s20618_s8 + $0x2f4] ss:$8 sps:$4 sm:$0xff]  }
 0x66b   : > { %11225 = vmatprep.subr.bf16.mxu1 %v17152_v45  ;;  %v17221_v45 = vld [vmem:[%s20618_s8 + $0x304] ss:$8 sps:$4 sm:$0xff]  }
 0x66e   : > { %11226 = vmatpush1.bf16.msra.mxu1 %v17150_v3  ;;  %v17219_v3 = vld [vmem:[%s20618_s8 + $0x300] ss:$8 sps:$4 sm:$0xff]  }
 0x66f   : > { %11227 = vmatprep.subr.bf16.mxu1 %v17155_v10  ;;  %v17224_v10 = vld [vmem:[%s20618_s8 + $0x314] ss:$8 sps:$4 sm:$0xff]  }
 0x671   : > { %11103 = vmatmul.mubr.bf16.gmra.mrb[52].mxu1 %v20100_v53  ;;  %v17164_v53 = vld [vmem:[%s20618_s8 + $0x1d4] ss:$8 sps:$4 sm:$0xff]  }
 0x672   : > { %11228 = vmatpush1.bf16.msra.mxu1 %v17153_v43  ;;  %11255 = vmatprep.mubr.bf16.mxu1 %v17326_v12  ;;  %v17222_v43 = vld [vmem:[%s20618_s8 + $0x310] ss:$8 sps:$4 sm:$0xff]  }
 0x673   : > { %11229 = vmatprep.subr.bf16.mxu1 %v17158_v42  ;;  %v17227_v42 = vld [vmem:[%s20618_s8 + $0x324] ss:$8 sps:$4 sm:$0xff]  }
 0x676   : > { %11230 = vmatpush1.bf16.msra.mxu1 %v17156_v61  ;;  %v17225_v61 = vld [vmem:[%s20618_s8 + $0x320] ss:$8 sps:$4 sm:$0xff]  }
 0x677   : > { %11231 = vmatprep.subr.bf16.mxu1 %v17161_v4  ;;  %v17228_v4 = vld [vmem:[%s20618_s8 + $0x330] ss:$8 sps:$4 sm:$0xff]  }
 0x67a   : > { %11232 = vmatpush1.bf16.msra.mxu1 %v17159_v1  ;;  %v17233_v1 = vld [vmem:[%s20618_s8 + $0x344] ss:$8 sps:$4 sm:$0xff]  }
 0x67b   : > { %11233 = vmatprep.subr.bf16.mxu1 %v17164_v53  ;;  %v17231_v53 = vld [vmem:[%s20618_s8 + $0x340] ss:$8 sps:$4 sm:$0xff]  }
 0x67e   : > { %11234 = vmatpush1.bf16.msra.mxu1 %v17162_v5  ;;  %v17234_v5 = vld [vmem:[%s20618_s8 + $0x350] ss:$8 sps:$4 sm:$0xff]  }
 0x67f   : > { %11235 = vmatprep.subr.bf16.mxu1 %v17167_v36  ;;  %v17239_v36 = vld [vmem:[%s20618_s8 + $0x364] ss:$8 sps:$4 sm:$0xff]  }
 0x682   : > { %11236 = vmatpush1.bf16.msra.mxu1 %v17165_v56  ;;  %v17237_v56 = vld [vmem:[%s20618_s8 + $0x360] ss:$8 sps:$4 sm:$0xff]  }
 0x683   : > { %11237 = vmatprep.subr.bf16.mxu1 %v17170_v62  ;;  %v17242_v62 = vld [vmem:[%s20618_s8 + $0x374] ss:$8 sps:$4 sm:$0xff]  }
 0x686   : > { %11238 = vmatpush1.bf16.msra.mxu1 %v17168_v9  ;;  %v17240_v9 = vld [vmem:[%s20618_s8 + $0x370] ss:$8 sps:$4 sm:$0xff]  }
 0x687   : > { %11387 = vmatprep.subr.bf16.mxu1 %v17173_v0  ;;  %v17245_v0 = vld [vmem:[%s20618_s8 + $0x384] ss:$8 sps:$4 sm:$0xff]  }
 0x689   : > { %11256 = vmatmul.mubr.bf16.vlgmr.msra.gmra.mrb[48].mxu1 %v11125_v27  ;;  %v17248_v27 = vld [vmem:[%s20618_s8 + $0x394] ss:$8 sps:$4 sm:$0xff]  }
 0x68a   : > { %11388 = vmatpush1.bf16.msra.mxu1 %v17171_v49  ;;  %11265 = vmatprep.mubr.bf16.mxu1 %v17326_v12  ;;  %v17243_v49 = vld [vmem:[%s20618_s8 + $0x380] ss:$8 sps:$4 sm:$0xff]  }
 0x68b   : > { %11389 = vmatprep.subr.bf16.mxu1 %v17176_v41  ;;  %v17246_v41 = vld [vmem:[%s20618_s8 + $0x390] ss:$8 sps:$4 sm:$0xff]  }
 0x68e   : > { %11390 = vmatpush1.bf16.msra.mxu1 %v17174_v20  ;;  %v17251_v20 = vld [vmem:[%s20618_s8 + $0x3a4] ss:$8 sps:$4 sm:$0xff]  }
 0x68f   : > { %11391 = vmatprep.subr.bf16.mxu1 %v17179_v14  ;;  %v17249_v14 = vld [vmem:[%s20618_s8 + $0x3a0] ss:$8 sps:$4 sm:$0xff]  }
 0x691   : > { %11266 = vmatmul.mubr.bf16.gmra.mrb[52].mxu1 %v20102_v23  ;;  %v17188_v23 = vld [vmem:[%s20618_s8 + $0x254] ss:$8 sps:$4 sm:$0xff]  }
 0x692   : > { %11392 = vmatpush1.bf16.msra.mxu1 %v17177_v18  ;;  %11419 = vmatprep.mubr.bf16.mxu1 %v17326_v12  ;;  %v17252_v18 = vld [vmem:[%s20618_s8 + $0x3b0] ss:$8 sps:$4 sm:$0xff]  }
 0x693   : > { %11393 = vmatprep.subr.bf16.mxu1 %v17182_v30  ;;  %v17257_v30 = vld [vmem:[%s20618_s8 + $0x3c4] ss:$8 sps:$4 sm:$0xff]  }
 0x696   : > { %11394 = vmatpush1.bf16.msra.mxu1 %v17180_v8  ;;  %v17255_v8 = vld [vmem:[%s20618_s8 + $0x3c0] ss:$8 sps:$4 sm:$0xff]  }
 0x697   : > { %11395 = vmatprep.subr.bf16.mxu1 %v17185_v15  ;;  %v17258_v15 = vld [vmem:[%s20618_s8 + $0x3d0] ss:$8 sps:$4 sm:$0xff]  }
 0x69a   : > { %11396 = vmatpush1.bf16.msra.mxu1 %v17183_v39  ;;  %v17263_v39 = vld [vmem:[%s20618_s8 + $0x3e4] ss:$8 sps:$4 sm:$0xff]  }
 0x69b   : > { %11397 = vmatprep.subr.bf16.mxu1 %v17188_v23  ;;  %v17261_v23 = vld [vmem:[%s20618_s8 + $0x3e0] ss:$8 sps:$4 sm:$0xff]  }
 0x69e   : > { %11398 = vmatpush1.bf16.msra.mxu1 %v17186_v29  ;;  %v17266_v29 = vld [vmem:[%s20618_s8 + $0x3f4] ss:$8 sps:$4 sm:$0xff]  }
 0x69f   : > { %11399 = vmatprep.subr.bf16.mxu1 %v17191_v31  ;;  %v17264_v31 = vld [vmem:[%s20618_s8 + $0x3f0] ss:$8 sps:$4 sm:$0xff]  }
 0x6a2   : > { %11400 = vmatpush1.bf16.msra.mxu1 %v17189_v19  ;;  %v17269_v19 = vld [vmem:[%s20618_s8 + $0x404] ss:$8 sps:$4 sm:$0xff]  }
 0x6a3   : > { %11401 = vmatprep.subr.bf16.mxu1 %v17194_v59  ;;  %v17267_v59 = vld [vmem:[%s20618_s8 + $0x400] ss:$8 sps:$4 sm:$0xff]  }
 0x6a6   : > { %11402 = vmatpush1.bf16.msra.mxu1 %v17192_v6  ;;  %v17272_v6 = vld [vmem:[%s20618_s8 + $0x414] ss:$8 sps:$4 sm:$0xff]  }
 0x6a7   : > { %11550 = vmatprep.subr.bf16.mxu1 %v17197_v33  ;;  %v17270_v33 = vld [vmem:[%s20618_s8 + $0x410] ss:$8 sps:$4 sm:$0xff]  }
 0x6a9   : > { %11420 = vmatmul.mubr.bf16.vlgmr.msra.gmra.mrb[48].mxu1 %v20061_v25  ;;  %v17206_v25 = vld [vmem:[%s20618_s8 + $0x2b4] ss:$8 sps:$4 sm:$0xff]  }
 0x6aa   : > { %11551 = vmatpush1.bf16.msra.mxu1 %v17195_v21  ;;  %11429 = vmatprep.mubr.bf16.mxu1 %v17326_v12  ;;  %v17275_v21 = vld [vmem:[%s20618_s8 + $0x424] ss:$8 sps:$4 sm:$0xff]  }
 0x6ab   : > { %11552 = vmatprep.subr.bf16.mxu1 %v17200_v48  ;;  %v17273_v48 = vld [vmem:[%s20618_s8 + $0x420] ss:$8 sps:$4 sm:$0xff]  }
 0x6ae   : > { %11553 = vmatpush1.bf16.msra.mxu1 %v17198_v32  ;;  %v17276_v32 = vld [vmem:[%s20618_s8 + $0x430] ss:$8 sps:$4 sm:$0xff]  }
 0x6af   : > { %11554 = vmatprep.subr.bf16.mxu1 %v17203_v54  ;;  %v17281_v54 = vld [vmem:[%s20618_s8 + $0x444] ss:$8 sps:$4 sm:$0xff]  }
 0x6b1   : > { %11430 = vmatmul.mubr.bf16.gmra.mrb[52].mxu1 %v20124_v35  ;;  %v17212_v35 = vld [vmem:[%s20618_s8 + $0x2d4] ss:$8 sps:$4 sm:$0xff]  }
 0x6b2   : > { %11555 = vmatpush1.bf16.msra.mxu1 %v17201_v2  ;;  %11582 = vmatprep.mubr.bf16.mxu1 %v17326_v12  ;;  %v17279_v2 = vld [vmem:[%s20618_s8 + $0x440] ss:$8 sps:$4 sm:$0xff]  }
 0x6b3   : > { %11556 = vmatprep.subr.bf16.mxu1 %v17206_v25  ;;  %v17282_v25 = vld [vmem:[%s20618_s8 + $0x450] ss:$8 sps:$4 sm:$0xff]  }
 0x6b6   : > { %11557 = vmatpush1.bf16.msra.mxu1 %v17204_v17  ;;  %v17287_v17 = vld [vmem:[%s20618_s8 + $0x464] ss:$8 sps:$4 sm:$0xff]  }
 0x6b7   : > { %11558 = vmatprep.subr.bf16.mxu1 %v17209_v24  ;;  %v17285_v24 = vld [vmem:[%s20618_s8 + $0x460] ss:$8 sps:$4 sm:$0xff]  }
 0x6ba   : > { %11559 = vmatpush1.bf16.msra.mxu1 %v17207_v55  ;;  %v17290_v55 = vld [vmem:[%s20618_s8 + $0x474] ss:$8 sps:$4 sm:$0xff]  }
 0x6bb   : > { %11560 = vmatprep.subr.bf16.mxu1 %v17212_v35  ;;  %v17288_v35 = vld [vmem:[%s20618_s8 + $0x470] ss:$8 sps:$4 sm:$0xff]  }
 0x6be   : > { %11561 = vmatpush1.bf16.msra.mxu1 %v17210_v13  ;;  %v17293_v13 = vld [vmem:[%s20618_s8 + $0x484] ss:$8 sps:$4 sm:$0xff]  }
 0x6bf   : > { %11562 = vmatprep.subr.bf16.mxu1 %v17215_v47  ;;  %v17291_v47 = vld [vmem:[%s20618_s8 + $0x480] ss:$8 sps:$4 sm:$0xff]  }
 0x6c2   : > { %11563 = vmatpush1.bf16.msra.mxu1 %v17213_v57  ;;  %v17296_v57 = vld [vmem:[%s20618_s8 + $0x494] ss:$8 sps:$4 sm:$0xff]  }
 0x6c3   : > { %11564 = vmatprep.subr.bf16.mxu1 %v17218_v44  ;;  %v17294_v44 = vld [vmem:[%s20618_s8 + $0x490] ss:$8 sps:$4 sm:$0xff]  }
 0x6c6   : > { %11565 = vmatpush1.bf16.msra.mxu1 %v17216_v46  ;;  %v17299_v46 = vld [vmem:[%s20618_s8 + $0x4a4] ss:$8 sps:$4 sm:$0xff]  }
 0x6c7   : > { %11714 = vmatprep.subr.bf16.mxu1 %v17221_v45  ;;  %v17297_v45 = vld [vmem:[%s20618_s8 + $0x4a0] ss:$8 sps:$4 sm:$0xff]  }
 0x6c9   : > { %11583 = vmatmul.mubr.bf16.vlgmr.msra.gmra.mrb[48].mxu1 %v20067_v40  ;;  %v17230_v40 = vld [vmem:[%s20618_s8 + $0x334] ss:$8 sps:$4 sm:$0xff]  }
 0x6ca   : > { %11715 = vmatpush1.bf16.msra.mxu1 %v17219_v3  ;;  %11592 = vmatprep.mubr.bf16.mxu1 %v17326_v12  ;;  %v17302_v3 = vld [vmem:[%s20618_s8 + $0x4b4] ss:$8 sps:$4 sm:$0xff]  }
 0x6cb   : > { %11716 = vmatprep.subr.bf16.mxu1 %v17224_v10  ;;  %v17300_v10 = vld [vmem:[%s20618_s8 + $0x4b0] ss:$8 sps:$4 sm:$0xff]  }
 0x6ce   : > { %11717 = vmatpush1.bf16.msra.mxu1 %v17222_v43  ;;  %v17308_v43 = vld [vmem:[%s20618_s8 + $0x4d4] ss:$8 sps:$4 sm:$0xff]  }
 0x6cf   : > { %11718 = vmatprep.subr.bf16.mxu1 %v17227_v42  ;;  %v17306_v42 = vld [vmem:[%s20618_s8 + $0x4d0] ss:$8 sps:$4 sm:$0xff]  }
 0x6d1   : > { %11593 = vmatmul.mubr.bf16.gmra.mrb[52].mxu1 %v20131_v51  ;;  %v17236_v51 = vld [vmem:[%s20618_s8 + $0x354] ss:$8 sps:$4 sm:$0xff]  }
 0x6d2   : > { %11719 = vmatpush1.bf16.msra.mxu1 %v17225_v61  ;;  %11746 = vmatprep.mubr.bf16.mxu1 %v17326_v12  ;;  %v17311_v61 = vld [vmem:[%s20618_s8 + $0x4e4] ss:$8 sps:$4 sm:$0xff]  }
 0x6d3   : > { %11720 = vmatprep.subr.bf16.mxu1 %v17230_v40  ;;  %v17309_v40 = vld [vmem:[%s20618_s8 + $0x4e0] ss:$8 sps:$4 sm:$0xff]  }
 0x6d6   : > { %11721 = vmatpush1.bf16.msra.mxu1 %v17228_v4  ;;  %v17314_v4 = vld [vmem:[%s20618_s8 + $0x4f4] ss:$8 sps:$4 sm:$0xff]  }
 0x6d7   : > { %11722 = vmatprep.subr.bf16.mxu1 %v17233_v1  ;;  %v17312_v1 = vld [vmem:[%s20618_s8 + $0x4f0] ss:$8 sps:$4 sm:$0xff]  }
 0x6da   : > { %11723 = vmatpush1.bf16.msra.mxu1 %v17231_v53  ;;  %v12107_v53 = vpack.c.bf16 %v20690_v16, %v10628_v37 }
 0x6db   : > { %11724 = vmatprep.subr.bf16.mxu1 %v17236_v51  ;;  %v12265_v51 = vld [vmem:[%s20619_s9] sm:$0x3] }
 0x6de   : > { %11725 = vmatpush1.bf16.msra.mxu1 %v17234_v5  ;;  %v12270_v5 = vrot.slane %v12265_v51, %v10591_v38 }
 0x6df   : > { %11726 = vmatprep.subr.bf16.mxu1 %v17239_v36  ;;  %v12274_v36 = vrot.slane %v12265_v51, %v10595_v63 }
 0x6e2   : > { %11727 = vmatpush1.bf16.msra.mxu1 %v17237_v56 }
 0x6e3   : > { %11728 = vmatprep.subr.bf16.mxu1 %v17242_v62 }
 0x6e6   : > { %11729 = vmatpush1.bf16.msra.mxu1 %v17240_v9 }
 0x6e7   : > { %11877 = vmatprep.subr.bf16.mxu1 %v17245_v0 }
 0x6e9   : > { %11747 = vmatmul.mubr.bf16.vlgmr.msra.gmra.mrb[48].mxu1 %v20074_v7  ;;  %v17254_v7 = vld [vmem:[%s20618_s8 + $0x3b4] ss:$8 sps:$4 sm:$0xff]  }
 0x6ea   : > { %11878 = vmatpush1.bf16.msra.mxu1 %v17243_v49  ;;  %11756 = vmatprep.mubr.bf16.mxu1 %v17326_v12  ;;  %v12294_v49 = vld [vmem:[%s20620_s10 + $0x8] sm:$0xff] }
 0x6eb   : > { %11879 = vmatprep.subr.bf16.mxu1 %v17248_v27 }
 0x6ee   : > { %11880 = vmatpush1.bf16.msra.mxu1 %v17246_v41  ;;  %v12296_v41 = vld [vmem:[%s20620_s10 + $0x18] sm:$0xff] }
 0x6ef   : > { %11881 = vmatprep.subr.bf16.mxu1 %v17251_v20 }
 0x6f1   : > { %11757 = vmatmul.mubr.bf16.gmra.mrb[52].mxu1 %v20136_v28  ;;  %v17260_v28 = vld [vmem:[%s20618_s8 + $0x3d4] ss:$8 sps:$4 sm:$0xff]  }
 0x6f2   : > { %11882 = vmatpush1.bf16.msra.mxu1 %v17249_v14  ;;  %11909 = vmatprep.mubr.bf16.mxu1 %v17326_v12 }
 0x6f3   : > { %11883 = vmatprep.subr.bf16.mxu1 %v17254_v7 }
 0x6f6   : > { %11884 = vmatpush1.bf16.msra.mxu1 %v17252_v18 }
 0x6f7   : > { %11885 = vmatprep.subr.bf16.mxu1 %v17257_v30 }
 0x6fa   : > { %11886 = vmatpush1.bf16.msra.mxu1 %v17255_v8 }
 0x6fb   : > { %11887 = vmatprep.subr.bf16.mxu1 %v17260_v28 }
 0x6fe   : > { %11888 = vmatpush1.bf16.msra.mxu1 %v17258_v15 }
 0x6ff   : > { %11889 = vmatprep.subr.bf16.mxu1 %v17263_v39 }
 0x702   : > { %11890 = vmatpush1.bf16.msra.mxu1 %v17261_v23 }
 0x703   : > { %11891 = vmatprep.subr.bf16.mxu1 %v17266_v29 }
 0x706   : > { %11892 = vmatpush1.bf16.msra.mxu1 %v17264_v31 }
 0x707   : > { %12041 = vmatprep.subr.bf16.mxu1 %v17269_v19  ;;  %v12297_v19 = vld [vmem:[%s20620_s10 + $0x20] sm:$0xff] }
 0x709   : > { %11910 = vmatmul.mubr.bf16.vlgmr.msra.gmra.mrb[48].mxu1 %v20078_v50  ;;  %v17278_v50 = vld [vmem:[%s20618_s8 + $0x434] ss:$8 sps:$4 sm:$0xff]  }
 0x70a   : > { %12042 = vmatpush1.bf16.msra.mxu1 %v17267_v59  ;;  %11919 = vmatprep.mubr.bf16.mxu1 %v17326_v12 }
 0x70b   : > { %12043 = vmatprep.subr.bf16.mxu1 %v17272_v6 }
 0x70e   : > { %12044 = vmatpush1.bf16.msra.mxu1 %v17270_v33 }
 0x70f   : > { %12045 = vmatprep.subr.bf16.mxu1 %v17275_v21  ;;  %v12298_v21 = vld [vmem:[%s20620_s10 + $0x28] sm:$0xff] }
 0x711   : > { %11920 = vmatmul.mubr.bf16.gmra.mrb[52].mxu1 %v20138_v58  ;;  %v17284_v58 = vld [vmem:[%s20618_s8 + $0x454] ss:$8 sps:$4 sm:$0xff]  }
 0x712   : > { %12046 = vmatpush1.bf16.msra.mxu1 %v17273_v48  ;;  %12073 = vmatprep.mubr.bf16.mxu1 %v17326_v12 }
 0x713   : > { %12047 = vmatprep.subr.bf16.mxu1 %v17278_v50  ;;  %v12299_v50 = vld [vmem:[%s20620_s10 + $0x30] sm:$0xff] }
 0x716   : > { %12048 = vmatpush1.bf16.msra.mxu1 %v17276_v32 }
 0x717   : > { %12049 = vmatprep.subr.bf16.mxu1 %v17281_v54 }
 0x71a   : > { %12050 = vmatpush1.bf16.msra.mxu1 %v17279_v2  ;;  %v12300_v2 = vld [vmem:[%s20620_s10 + $0x38] sm:$0xff] }
 0x71b   : > { %12051 = vmatprep.subr.bf16.mxu1 %v17284_v58 }
 0x71e   : > { %12052 = vmatpush1.bf16.msra.mxu1 %v17282_v25 }
 0x71f   : > { %12053 = vmatprep.subr.bf16.mxu1 %v17287_v17 }
 0x722   : > { %12054 = vmatpush1.bf16.msra.mxu1 %v17285_v24 }
 0x723   : > { %12055 = vmatprep.subr.bf16.mxu1 %v17290_v55 }
 0x726   : > { %12056 = vmatpush1.bf16.msra.mxu1 %v17288_v35 }
 0x727   : > { %12204 = vmatprep.subr.bf16.mxu1 %v17293_v13 }
 0x729   : > { %12074 = vmatmul.mubr.bf16.vlgmr.msra.gmra.mrb[48].mxu1 %v20090_v34  ;;  %v11943_v34 = vpack.c.bf16 %v20690_v16, %v10627_v26  ;;  %v17303_v26 = vld [vmem:[%s20618_s8 + $0x4c0] ss:$8 sps:$4 sm:$0xff]  }
 0x72a   : > { %12205 = vmatpush1.bf16.msra.mxu1 %v17291_v47  ;;  %12083 = vmatprep.mubr.bf16.mxu1 %v17326_v12  ;;  %v12293_v16 = vld [vmem:[%s20620_s10] sm:$0xff] }
 0x72b   : > { %12206 = vmatprep.subr.bf16.mxu1 %v17296_v57 }
 0x72e   : > { %12207 = vmatpush1.bf16.msra.mxu1 %v17294_v44 }
 0x72f   : > { %12208 = vmatprep.subr.bf16.mxu1 %v17299_v46 }
 0x731   : > { %12084 = vmatmul.mubr.bf16.gmra.mrb[52].mxu1 %v11943_v34  ;;  %v13821_v34 = vld [vmem:[#allocation8] ss:$0 sm:$0xff] }
 0x732   : > { %12209 = vmatpush1.bf16.msra.mxu1 %v17297_v45  ;;  %12236 = vmatprep.mubr.bf16.mxu1 %v17326_v12 }
 0x733   : > { %12210 = vmatprep.subr.bf16.mxu1 %v17302_v3 }
 0x736   : > { %12211 = vmatpush1.bf16.msra.mxu1 %v17300_v10 }
 0x737   : > { %12212 = vmatprep.subr.bf16.mxu1 %v17305_v22 }
 0x73a   : > { %12213 = vmatpush1.bf16.msra.mxu1 %v17303_v26 }
 0x73b   : > { %12214 = vmatprep.subr.bf16.mxu1 %v17308_v43 }
 0x73e   : > { %12215 = vmatpush1.bf16.msra.mxu1 %v17306_v42 }
 0x73f   : > { %12216 = vmatprep.subr.bf16.mxu1 %v17311_v61 }
 0x742   : > { %12217 = vmatpush1.bf16.msra.mxu1 %v17309_v40 }
 0x743   : > { %12218 = vmatprep.subr.bf16.mxu1 %v17314_v4 }
 0x746   : > { %12219 = vmatpush1.bf16.msra.mxu1 %v17312_v1 }
 0x749   : > { %12237 = vmatmul.mubr.bf16.vlgmr.msra.gmra.mrb[48].mxu1 %v20095_v52 }
 0x74a   : > { %12246 = vmatprep.mubr.bf16.mxu1 %v17326_v12 }
 0x751   : > { %12247 = vmatmul.mubr.bf16.gmra.mrb[52].mxu1 %v12107_v53 }
 0x81c   : > { %v12238_v56 = vpop.f32.mrb[48].mxu1 }
 0x81d   : > { %v12277_v62 = vadd.f32 %v12270_v5, %v12238_v56  ;;  %v12240_v52 = vpop.f32.mrb[49].mxu1 }
 0x81e   : > { %v12278_v9 = vadd.f32 %v12274_v36, %v12240_v52  ;;  %v12242_v12 = vpop.f32.mrb[50].mxu1 }
 0x81f   : > { %v12285_v11 = vmax.f32 %v12277_v62, 0.0  ;;  %v12279_v37 = vadd.f32 %v12270_v5, %v12242_v12  ;;  %v12244_v0 = vpop.f32.mrb[51].mxu1 }
 0x820   : > { %v12286_v38 = vmax.f32 %v12278_v9, 0.0  ;;  %v12280_v63 = vadd.f32 %v12274_v36, %v12244_v0 }
 0x821   : > { %v12287_v27 = vmax.f32 %v12279_v37, 0.0  ;;  %v12301_v20 = vmul.f32 %v12293_v16, %v12285_v11 }
 0x822   : > { %v12288_v14 = vmax.f32 %v12280_v63, 0.0  ;;  %v12302_v7 = vmul.f32 %v12294_v49, %v12286_v38 }
 0x823   : > { %v12303_v18 = vmul.f32 %v12295_v60, %v12287_v27 }
 0x824   : > { %v12304_v30 = vmul.f32 %v12296_v41, %v12288_v14  ;;  %v12248_v8 = vpop.f32.mrb[52].mxu1  ;;  %v12309_v28 = vadd.f32 %v12302_v7, %v12301_v20 }
 0x825   : > { %v12281_v15 = vadd.f32 %v12270_v5, %v12248_v8  ;;  %v12250_v39 = vpop.f32.mrb[53].mxu1 }
 0x826   : > { %v12282_v23 = vadd.f32 %v12274_v36, %v12250_v39  ;;  %12310 = vadd.xlane.f32.xlu0 %v12309_v28  ;;  %v12252_v29 = vpop.f32.mrb[54].mxu1  ;;  %v12312_v31 = vadd.f32 %v12304_v30, %v12303_v18 }
 0x827   : > { %v12289_v59 = vmax.f32 %v12281_v15, 0.0  ;;  %v12283_v6 = vadd.f32 %v12270_v5, %v12252_v29  ;;  %v12254_v33 = vpop.f32.mrb[55].mxu1 }
 0x828   : > { %v12290_v48 = vmax.f32 %v12282_v23, 0.0  ;;  %v12284_v32 = vadd.f32 %v12274_v36, %v12254_v33 }
 0x829   : > { %v12291_v54 = vmax.f32 %v12283_v6, 0.0  ;;  %v12305_v58 = vmul.f32 %v12297_v19, %v12289_v59 }
 0x82a   : > { %v12292_v25 = vmax.f32 %v12284_v32, 0.0  ;;  %12313 = vadd.xlane.f32.xlu0 %v12312_v31  ;;  %v12306_v17 = vmul.f32 %v12298_v21, %v12290_v48 }
 0x82b   : > { %v12307_v24 = vmul.f32 %v12299_v50, %v12291_v54 }
 0x82c   : > { %v12308_v55 = vmul.f32 %v12300_v2, %v12292_v25  ;;  %v12315_v35 = vadd.f32 %v12306_v17, %v12305_v58 }
 0x82e   : > { %12316 = vadd.xlane.f32.xlu1 %v12315_v35  ;;  %v12318_v13 = vadd.f32 %v12308_v55, %v12307_v24 }
 0x832   : > { %12319 = vadd.xlane.f32.xlu1 %v12318_v13 }
 0x8b3   : > { %v12311_v47 = vpop.xlane.xlu0 %12310 }
 0x8b7   : > { %v12314_v57 = vpop.xlane.xlu0 %12313 }
 0x8b8   : > { %v12321_v46 = vadd.f32 %v12314_v57, %v12311_v47 }
 0x8bb   : > { %v12317_v44 = vpop.xlane.xlu1 %12316 }
 0x8bc   : > { %v12322_v45 = vadd.f32 %v12321_v46, %v12317_v44 }
 0x8bf   : > { %v12320_v3 = vpop.xlane.xlu1 %12319 }
 0x8c0   : > { %v12323_v10 = vadd.f32 %v12322_v45, %v12320_v3 }
 0x8c2   : > { %v12331_v22 = vadd.f32 %v13821_v34, %v12323_v10 }
 0x8c4   : > { %12333 = vst.msk [vmem:[%s433_s25] sm:$0xff] %vm12332_vm0, %v12331_v22 }
 0x8c5 PF: > { %s24_s23 = sadd.s32 1, %s17323_s23  }
 0x8c6   : > { %p21_p4 = scmp.ge.s32.totalorder %s24_s23, 4  }
 0x8c8   :  { %23 = sbr.rel (!%p21_p4) target bundleno = 3 (0x3), region = 117 }

</bundles_post_ra>
